<compile_context>
chip_gen: v7x
topology: tpu7x:2x2x1
jax: 0.10.0
libtpu: 0.0.40
codegen_flags: <defaults>
</compile_context>

<pallas_src>
import jax
import jax.numpy as jnp
from jax import lax
from jax.experimental import pallas as pl
from jax.experimental.pallas import tpu as pltpu

# ---- model hyper-parameters (module defaults, small vocab / seq for test) ----
VOCAB = 64
VOCAB_PAD = 128           # lane-dense logits tile (pad 64 -> 128)
BLOCK_SIZE = 256          # size of the position-embedding table
N_EMBD = 384
N_HEAD = 6
N_LAYER = 6
HEAD_SIZE = N_EMBD // N_HEAD
FFN = 4 * N_EMBD
LN_EPS = 1e-5

# weight-argument order for the fused kernel
_W_NAMES = ["ln1w", "ln1b", "wqkv", "bqkv", "wp", "bp", "ln2w", "ln2b",
            "w1", "b1", "w2", "b2", "lnfw", "lnfb", "wlm", "blm"]
_PER_LAYER = set(_W_NAMES[:12])   # stacked on a leading N_LAYER axis


def _layer_norm(x, w, b):
    mu = jnp.mean(x, axis=-1, keepdims=True)
    var = jnp.mean(x * x, axis=-1, keepdims=True) - mu * mu
    return (x - mu) * lax.rsqrt(var + LN_EPS) * w + b


# ------------------------------ fused Pallas kernel ---------------------------
def _gpt_kernel(x_ref, ln1w_ref, ln1b_ref, wqkv_ref, bqkv_ref, wp_ref, bp_ref,
                ln2w_ref, ln2b_ref, w1_ref, b1_ref, w2_ref, b2_ref,
                lnfw_ref, lnfb_ref, wlm_ref, blm_ref, o_ref, x_carry):
    layer = pl.program_id(1)

    # layer 0: load the residual stream into the resident VMEM carry
    @pl.when(layer == 0)
    def _():
        x_carry[...] = x_ref[0]

    x = x_carry[...]                                   # (T, C) float32
    T = x.shape[0]

    # ------------------ multi-head masked self-attention ---------------------
    h1 = _layer_norm(x, ln1w_ref[0], ln1b_ref[0]).astype(jnp.bfloat16)
    # fused QKV projection: one lane-dense (C, 3C) bf16 matmul
    qkv = (jnp.dot(h1, wqkv_ref[0], preferred_element_type=jnp.float32)
           + bqkv_ref[0])                              # (T, 3C) float32

    row = lax.broadcasted_iota(jnp.int32, (T, T), 0)   # query index
    col = lax.broadcasted_iota(jnp.int32, (T, T), 1)   # key index
    mask_bias = jnp.where(row >= col, 0.0, -1e30)      # additive causal mask

    sa = jnp.zeros((T, N_EMBD), jnp.float32)
    for h in range(N_HEAD):                            # static unroll over heads
        q = qkv[:, h * HEAD_SIZE:(h + 1) * HEAD_SIZE].astype(jnp.bfloat16)
        k = qkv[:, N_EMBD + h * HEAD_SIZE:
                   N_EMBD + (h + 1) * HEAD_SIZE].astype(jnp.bfloat16)
        v = qkv[:, 2 * N_EMBD + h * HEAD_SIZE:
                   2 * N_EMBD + (h + 1) * HEAD_SIZE].astype(jnp.bfloat16)
        # scores q @ k.T  (NO 1/sqrt(d) scaling, as in the reference module)
        wei = lax.dot_general(q, k, (((1,), (1,)), ((), ())),
                              preferred_element_type=jnp.float32) + mask_bias
        # softmax over the *query* axis (torch dim=1), as in the reference
        m = jnp.max(wei, axis=0, keepdims=True)
        e = jnp.exp(wei - m)
        attn = e / jnp.sum(e, axis=0, keepdims=True)
        av = jnp.dot(attn.astype(jnp.bfloat16), v,
                     preferred_element_type=jnp.float32)          # (T, D)
        # concat-free output projection: accumulate av @ Wp[h]  (K=64, N=384)
        sa = sa + jnp.dot(av.astype(jnp.bfloat16), wp_ref[0, h],
                          preferred_element_type=jnp.float32)
    x = x + sa + bp_ref[0]

    # ------------------------------ feed-forward ------------------------------
    h2 = _layer_norm(x, ln2w_ref[0], ln2b_ref[0]).astype(jnp.bfloat16)
    ff = jnp.dot(h2, w1_ref[0], preferred_element_type=jnp.float32) + b1_ref[0]
    ff = jnp.maximum(ff, 0.0).astype(jnp.bfloat16)
    ff = jnp.dot(ff, w2_ref[0], preferred_element_type=jnp.float32) + b2_ref[0]
    x = x + ff

    x_carry[...] = x

    # ---------------- final LayerNorm + lm_head on the last layer -------------
    @pl.when(layer == pl.num_programs(1) - 1)
    def _():
        hf = _layer_norm(x, lnfw_ref[...], lnfb_ref[...]).astype(jnp.bfloat16)
        o_ref[0] = (jnp.dot(hf, wlm_ref[...], preferred_element_type=jnp.float32)
                    + blm_ref[...])                    # (T, VOCAB_PAD)


# ----------------------------- pallas_call wrapper ----------------------------
def _layer_spec(shape):
    nz = len(shape) - 1
    return pl.BlockSpec((1,) + tuple(shape[1:]),
                        lambda b, l, _nz=nz: (l,) + (0,) * _nz)


def _const_spec(shape):
    nz = len(shape)
    return pl.BlockSpec(tuple(shape), lambda b, l, _nz=nz: (0,) * _nz)


def gpt_forward(idx, params):
    # Embedding gathers stay in plain JAX (data-dependent gather glue, tiny).
    # NOTE: position table is indexed by TOKEN ids, matching the PyTorch module.
    # TODO(synk): move the embedding gather in-kernel via scalar-prefetch row gather.
    x = params["tok"][idx] + params["pos"][idx]            # (B, T, C) f32
    B, T, C = x.shape

    weights = [params[n] for n in _W_NAMES]
    in_specs = [pl.BlockSpec((1, T, C), lambda b, l: (b, 0, 0))]
    for name, w in zip(_W_NAMES, weights):
        in_specs.append(_layer_spec(w.shape) if name in _PER_LAYER
                        else _const_spec(w.shape))

    out = pl.pallas_call(
        _gpt_kernel,
        out_shape=jax.ShapeDtypeStruct((B, T, VOCAB_PAD), jnp.float32),
        grid=(B, N_LAYER),
        in_specs=in_specs,
        out_specs=pl.BlockSpec((1, T, VOCAB_PAD), lambda b, l: (b, 0, 0)),
        scratch_shapes=[pltpu.VMEM((T, C), jnp.float32)],   # resident residual stream
        compiler_params=pltpu.CompilerParams(
            dimension_semantics=("parallel", "arbitrary"),
            vmem_limit_bytes=32 * 1024 * 1024,
        ),
    )(x, *weights)
    return out[:, :, :VOCAB]                                # loss is None (target=None)


# ---------------------------------- parameters --------------------------------
def init_params(key):
    def normal(k, shape):
        return 0.02 * jax.random.normal(k, shape, dtype=jnp.float32)

    L, C, H, D, F = N_LAYER, N_EMBD, N_HEAD, HEAD_SIZE, FFN
    keys = jax.random.split(key, 7)

    wlm = jnp.zeros((C, VOCAB_PAD), jnp.float32)
    wlm = wlm.at[:, :VOCAB].set(normal(keys[2], (C, VOCAB)))

    return {
        "tok": normal(keys[0], (VOCAB, C)),
        "pos": normal(keys[1], (BLOCK_SIZE, C)),
        # per-layer stacked weights (bf16 for matmul weights, f32 elsewhere)
        "ln1w": jnp.ones((L, 1, C), jnp.float32),
        "ln1b": jnp.zeros((L, 1, C), jnp.float32),
        "wqkv": normal(keys[3], (L, C, 3 * C)).astype(jnp.bfloat16),
        "bqkv": jnp.zeros((L, 1, 3 * C), jnp.float32),
        "wp": normal(keys[4], (L, H, D, C)).astype(jnp.bfloat16),
        "bp": jnp.zeros((L, 1, C), jnp.float32),
        "ln2w": jnp.ones((L, 1, C), jnp.float32),
        "ln2b": jnp.zeros((L, 1, C), jnp.float32),
        "w1": normal(keys[5], (L, C, F)).astype(jnp.bfloat16),
        "b1": jnp.zeros((L, 1, F), jnp.float32),
        "w2": normal(keys[6], (L, F, C)).astype(jnp.bfloat16),
        "b2": jnp.zeros((L, 1, C), jnp.float32),
        # final head (lane-padded to 128)
        "lnfw": jnp.ones((1, C), jnp.float32),
        "lnfb": jnp.zeros((1, C), jnp.float32),
        "wlm": wlm.astype(jnp.bfloat16),
        "blm": jnp.zeros((1, VOCAB_PAD), jnp.float32),
    }


# ------------------------------ pure-JAX reference ----------------------------
def ref_forward(idx, params):
    x = params["tok"][idx] + params["pos"][idx]
    B, T, C = x.shape
    tril = jnp.tril(jnp.ones((T, T), dtype=bool))
    for l in range(N_LAYER):
        h = _layer_norm(x, params["ln1w"][l], params["ln1b"][l])
        qkv = h @ params["wqkv"][l].astype(jnp.float32) + params["bqkv"][l]
        sa = jnp.zeros_like(x)
        for hd in range(N_HEAD):
            q = qkv[..., hd * HEAD_SIZE:(hd + 1) * HEAD_SIZE]
            k = qkv[..., N_EMBD + hd * HEAD_SIZE:N_EMBD + (hd + 1) * HEAD_SIZE]
            v = qkv[..., 2 * N_EMBD + hd * HEAD_SIZE:
                        2 * N_EMBD + (hd + 1) * HEAD_SIZE]
            wei = jnp.einsum("btd,bsd->bts", q, k)
            wei = jnp.where(tril[None], wei, -jnp.inf)
            wei = jax.nn.softmax(wei, axis=1)            # dim=1, as in reference
            av = jnp.einsum("bts,bsd->btd", wei, v)
            sa = sa + av @ params["wp"][l, hd].astype(jnp.float32)
        x = x + sa + params["bp"][l]
        h2 = _layer_norm(x, params["ln2w"][l], params["ln2b"][l])
        ff = jax.nn.relu(h2 @ params["w1"][l].astype(jnp.float32) + params["b1"][l])
        ff = ff @ params["w2"][l].astype(jnp.float32) + params["b2"][l]
        x = x + ff
    x = _layer_norm(x, params["lnfw"], params["lnfb"])
    logits = x @ params["wlm"].astype(jnp.float32) + params["blm"]
    return logits[:, :, :VOCAB]


# -------------------------------------- main -----------------------------------
if __name__ == "__main__":
    key = jax.random.PRNGKey(0)
    pkey, ikey = jax.random.split(key)
    params = init_params(pkey)

    B, T = 2, 8
    idx = jax.random.randint(ikey, (B, T), 0, VOCAB, dtype=jnp.int32)

    logits = gpt_forward(idx, params)
    jax.block_until_ready(logits)

    ref = ref_forward(idx, params)
    assert logits.shape == (B, T, VOCAB)
    err = float(jnp.max(jnp.abs(logits - ref)))
    assert jnp.allclose(logits, ref, atol=3e-2, rtol=3e-2), f"max abs err {err}"

    print("KERNEL_OK")
</pallas_src>

<mosaic_0001>
module attributes {stable_mosaic.version = 11 : i64} {
  func.func @_gpt_kernel(%arg0: i32, %arg1: i32, %arg2: memref<1x8x384xf32, #tpu.memory_space<vmem>>, %arg3: memref<1x1x384xf32, #tpu.memory_space<vmem>>, %arg4: memref<1x1x384xf32, #tpu.memory_space<vmem>>, %arg5: memref<1x384x1152xbf16, #tpu.memory_space<vmem>>, %arg6: memref<1x1x1152xf32, #tpu.memory_space<vmem>>, %arg7: memref<1x6x64x384xbf16, #tpu.memory_space<vmem>>, %arg8: memref<1x1x384xf32, #tpu.memory_space<vmem>>, %arg9: memref<1x1x384xf32, #tpu.memory_space<vmem>>, %arg10: memref<1x1x384xf32, #tpu.memory_space<vmem>>, %arg11: memref<1x384x1536xbf16, #tpu.memory_space<vmem>>, %arg12: memref<1x1x1536xf32, #tpu.memory_space<vmem>>, %arg13: memref<1x1536x384xbf16, #tpu.memory_space<vmem>>, %arg14: memref<1x1x384xf32, #tpu.memory_space<vmem>>, %arg15: memref<1x384xf32, #tpu.memory_space<vmem>>, %arg16: memref<1x384xf32, #tpu.memory_space<vmem>>, %arg17: memref<384x128xbf16, #tpu.memory_space<vmem>>, %arg18: memref<1x128xf32, #tpu.memory_space<vmem>>, %arg19: memref<1x8x128xf32, #tpu.memory_space<vmem>>, %arg20: memref<8x384xf32, #tpu.memory_space<vmem>>) attributes {dimension_semantics = [#tpu.dimension_semantics<parallel>, #tpu.dimension_semantics<arbitrary>], iteration_bounds = array<i64: 2, 6>, scalar_prefetch = 0 : i64, scratch_operands = 1 : i64, tpu.core_type = #tpu.core_type<tc>, window_params = [{transform_indices = @transform_0, window_bounds = array<i64: 1, 8, 384>}, {transform_indices = @transform_1, window_bounds = array<i64: 1, 1, 384>}, {transform_indices = @transform_2, window_bounds = array<i64: 1, 1, 384>}, {transform_indices = @transform_3, window_bounds = array<i64: 1, 384, 1152>}, {transform_indices = @transform_4, window_bounds = array<i64: 1, 1, 1152>}, {transform_indices = @transform_5, window_bounds = array<i64: 1, 6, 64, 384>}, {transform_indices = @transform_6, window_bounds = array<i64: 1, 1, 384>}, {transform_indices = @transform_7, window_bounds = array<i64: 1, 1, 384>}, {transform_indices = @transform_8, window_bounds = array<i64: 1, 1, 384>}, {transform_indices = @transform_9, window_bounds = array<i64: 1, 384, 1536>}, {transform_indices = @transform_10, window_bounds = array<i64: 1, 1, 1536>}, {transform_indices = @transform_11, window_bounds = array<i64: 1, 1536, 384>}, {transform_indices = @transform_12, window_bounds = array<i64: 1, 1, 384>}, {pipeline_mode = #tpu.pipeline_mode<synchronous>, transform_indices = @transform_13, window_bounds = array<i64: 1, 384>}, {pipeline_mode = #tpu.pipeline_mode<synchronous>, transform_indices = @transform_14, window_bounds = array<i64: 1, 384>}, {pipeline_mode = #tpu.pipeline_mode<synchronous>, transform_indices = @transform_15, window_bounds = array<i64: 384, 128>}, {pipeline_mode = #tpu.pipeline_mode<synchronous>, transform_indices = @transform_16, window_bounds = array<i64: 1, 128>}, {transform_indices = @transform_17, window_bounds = array<i64: 1, 8, 128>}]} {
    %c0_i32 = arith.constant 0 : i32
    %0 = arith.cmpi eq, %arg1, %c0_i32 : i32
    %1 = arith.extui %0 : i1 to i32
    %c0_i32_0 = arith.constant 0 : i32
    %2 = arith.cmpi ne, %1, %c0_i32_0 : i32
    scf.if %2 {
      %c0_103 = arith.constant 0 : index
      %c0_104 = arith.constant 0 : index
      %c0_105 = arith.constant 0 : index
      %243 = vector.load %arg2[%c0_103, %c0_104, %c0_105] : memref<1x8x384xf32, #tpu.memory_space<vmem>>, vector<1x8x384xf32>
      %244 = vector.shape_cast %243 : vector<1x8x384xf32> to vector<8x384xf32>
      %c0_106 = arith.constant 0 : index
      %c0_107 = arith.constant 0 : index
      %245 = vector.load %arg20[%c0_106, %c0_107] : memref<8x384xf32, #tpu.memory_space<vmem>>, vector<8x384xf32>
      tpu.vector_store %arg20[%c0_106, %c0_107], %244 {strides = array<i32>} : memref<8x384xf32, #tpu.memory_space<vmem>>, vector<8x384xf32>,
    } else {
    }
    %c0 = arith.constant 0 : index
    %c0_1 = arith.constant 0 : index
    %3 = vector.load %arg20[%c0, %c0_1] : memref<8x384xf32, #tpu.memory_space<vmem>>, vector<8x384xf32>
    %c0_2 = arith.constant 0 : index
    %c0_3 = arith.constant 0 : index
    %c0_4 = arith.constant 0 : index
    %4 = vector.load %arg3[%c0_2, %c0_3, %c0_4] : memref<1x1x384xf32, #tpu.memory_space<vmem>>, vector<1x1x384xf32>
    %5 = vector.shape_cast %4 : vector<1x1x384xf32> to vector<1x384xf32>
    %c0_5 = arith.constant 0 : index
    %c0_6 = arith.constant 0 : index
    %c0_7 = arith.constant 0 : index
    %6 = vector.load %arg4[%c0_5, %c0_6, %c0_7] : memref<1x1x384xf32, #tpu.memory_space<vmem>>, vector<1x1x384xf32>
    %7 = vector.shape_cast %6 : vector<1x1x384xf32> to vector<1x384xf32>
    %cst = arith.constant dense<0.000000e+00> : vector<8xf32>
    %8 = vector.multi_reduction <add>, %3, %cst [1] : vector<8x384xf32> to vector<8xf32>
    %9 = vector.shape_cast %8 : vector<8xf32> to vector<8x1xf32>
    %cst_8 = arith.constant 3.840000e+02 : f32
    %10 = vector.broadcast %cst_8 : f32 to vector<8x1xf32>
    %11 = arith.divf %9, %10 : vector<8x1xf32>
    %12 = arith.mulf %3, %3 : vector<8x384xf32>
    %cst_9 = arith.constant dense<0.000000e+00> : vector<8xf32>
    %13 = vector.multi_reduction <add>, %12, %cst_9 [1] : vector<8x384xf32> to vector<8xf32>
    %14 = vector.shape_cast %13 : vector<8xf32> to vector<8x1xf32>
    %cst_10 = arith.constant 3.840000e+02 : f32
    %15 = vector.broadcast %cst_10 : f32 to vector<8x1xf32>
    %16 = arith.divf %14, %15 : vector<8x1xf32>
    %17 = arith.mulf %11, %11 : vector<8x1xf32>
    %18 = arith.subf %16, %17 : vector<8x1xf32>
    %19 = vector.broadcast %11 : vector<8x1xf32> to vector<8x384xf32>
    %20 = arith.subf %3, %19 : vector<8x384xf32>
    %cst_11 = arith.constant 9.99999974E-6 : f32
    %21 = vector.broadcast %cst_11 : f32 to vector<8x1xf32>
    %22 = arith.addf %18, %21 : vector<8x1xf32>
    %23 = math.rsqrt %22 : vector<8x1xf32>
    %24 = vector.broadcast %23 : vector<8x1xf32> to vector<8x384xf32>
    %25 = arith.mulf %20, %24 : vector<8x384xf32>
    %26 = vector.broadcast %5 : vector<1x384xf32> to vector<8x384xf32>
    %27 = arith.mulf %25, %26 : vector<8x384xf32>
    %28 = vector.broadcast %7 : vector<1x384xf32> to vector<8x384xf32>
    %29 = arith.addf %27, %28 : vector<8x384xf32>
    %30 = arith.truncf %29 : vector<8x384xf32> to vector<8x384xbf16>
    %c0_12 = arith.constant 0 : index
    %c0_13 = arith.constant 0 : index
    %c0_14 = arith.constant 0 : index
    %31 = vector.load %arg5[%c0_12, %c0_13, %c0_14] : memref<1x384x1152xbf16, #tpu.memory_space<vmem>>, vector<1x384x1152xbf16>
    %32 = vector.shape_cast %31 : vector<1x384x1152xbf16> to vector<384x1152xbf16>
    %cst_15 = arith.constant dense<0.000000e+00> : vector<8x1152xf32>
    %33 = tpu.matmul %30, %32, %cst_15 {dimension_numbers = #tpu.dot_dimension_numbers<[1], [0], [0], [1], [0, 0, 1, 1], [], []>} : vector<8x384xbf16>, vector<384x1152xbf16>, vector<8x1152xf32> -> vector<8x1152xf32>
    %c0_16 = arith.constant 0 : index
    %c0_17 = arith.constant 0 : index
    %c0_18 = arith.constant 0 : index
    %34 = vector.load %arg6[%c0_16, %c0_17, %c0_18] : memref<1x1x1152xf32, #tpu.memory_space<vmem>>, vector<1x1x1152xf32>
    %35 = vector.shape_cast %34 : vector<1x1x1152xf32> to vector<1x1152xf32>
    %36 = vector.broadcast %35 : vector<1x1152xf32> to vector<8x1152xf32>
    %37 = arith.addf %33, %36 : vector<8x1152xf32>
    %38 = tpu.iota {dimensions = array<i32: 0>} : vector<8x8xi32>
    %39 = tpu.iota {dimensions = array<i32: 1>} : vector<8x8xi32>
    %40 = arith.cmpi sge, %38, %39 : vector<8x8xi32>
    %cst_19 = arith.constant 0.000000e+00 : f32
    %cst_20 = arith.constant -1.000000e+30 : f32
    %41 = vector.broadcast %cst_19 : f32 to vector<8x8xf32>
    %42 = vector.broadcast %cst_20 : f32 to vector<8x8xf32>
    %43 = arith.select %40, %41, %42 : vector<8x8xi1>, vector<8x8xf32>
    %cst_21 = arith.constant 0.000000e+00 : f32
    %44 = vector.broadcast %cst_21 : f32 to vector<8x384xf32>
    %45 = vector.extract_strided_slice %37 {offsets = [0, 0], sizes = [8, 64], strides = [1, 1]} : vector<8x1152xf32> to vector<8x64xf32>
    %46 = arith.truncf %45 : vector<8x64xf32> to vector<8x64xbf16>
    %47 = vector.extract_strided_slice %37 {offsets = [0, 384], sizes = [8, 64], strides = [1, 1]} : vector<8x1152xf32> to vector<8x64xf32>
    %48 = arith.truncf %47 : vector<8x64xf32> to vector<8x64xbf16>
    %49 = vector.extract_strided_slice %37 {offsets = [0, 768], sizes = [8, 64], strides = [1, 1]} : vector<8x1152xf32> to vector<8x64xf32>
    %50 = arith.truncf %49 : vector<8x64xf32> to vector<8x64xbf16>
    %cst_22 = arith.constant dense<0.000000e+00> : vector<8x8xf32>
    %51 = tpu.matmul %46, %48, %cst_22 {dimension_numbers = #tpu.dot_dimension_numbers<[1], [1], [0], [0], [0, 0, 1, 0], [], []>} : vector<8x64xbf16>, vector<8x64xbf16>, vector<8x8xf32> -> vector<8x8xf32>
    %52 = arith.addf %51, %43 : vector<8x8xf32>
    %cst_23 = arith.constant dense<0xFF800000> : vector<8xf32>
    %53 = vector.multi_reduction <maximumf>, %52, %cst_23 [0] : vector<8x8xf32> to vector<8xf32>
    %54 = vector.shape_cast %53 : vector<8xf32> to vector<1x8xf32>
    %55 = vector.broadcast %54 : vector<1x8xf32> to vector<8x8xf32>
    %56 = arith.subf %52, %55 : vector<8x8xf32>
    %57 = math.exp %56 : vector<8x8xf32>
    %cst_24 = arith.constant dense<0.000000e+00> : vector<8xf32>
    %58 = vector.multi_reduction <add>, %57, %cst_24 [0] : vector<8x8xf32> to vector<8xf32>
    %59 = vector.shape_cast %58 : vector<8xf32> to vector<1x8xf32>
    %60 = vector.broadcast %59 : vector<1x8xf32> to vector<8x8xf32>
    %61 = arith.divf %57, %60 : vector<8x8xf32>
    %62 = arith.truncf %61 : vector<8x8xf32> to vector<8x8xbf16>
    %cst_25 = arith.constant dense<0.000000e+00> : vector<8x64xf32>
    %63 = tpu.matmul %62, %50, %cst_25 {dimension_numbers = #tpu.dot_dimension_numbers<[1], [0], [0], [1], [0, 0, 1, 1], [], []>} : vector<8x8xbf16>, vector<8x64xbf16>, vector<8x64xf32> -> vector<8x64xf32>
    %64 = arith.truncf %63 : vector<8x64xf32> to vector<8x64xbf16>
    %c0_26 = arith.constant 0 : index
    %c0_27 = arith.constant 0 : index
    %c0_28 = arith.constant 0 : index
    %c0_29 = arith.constant 0 : index
    %65 = vector.load %arg7[%c0_26, %c0_27, %c0_28, %c0_29] : memref<1x6x64x384xbf16, #tpu.memory_space<vmem>>, vector<1x1x64x384xbf16>
    %66 = vector.shape_cast %65 : vector<1x1x64x384xbf16> to vector<64x384xbf16>
    %cst_30 = arith.constant dense<0.000000e+00> : vector<8x384xf32>
    %67 = tpu.matmul %64, %66, %cst_30 {dimension_numbers = #tpu.dot_dimension_numbers<[1], [0], [0], [1], [0, 0, 1, 1], [], []>} : vector<8x64xbf16>, vector<64x384xbf16>, vector<8x384xf32> -> vector<8x384xf32>
    %68 = arith.addf %44, %67 : vector<8x384xf32>
    %69 = vector.extract_strided_slice %37 {offsets = [0, 64], sizes = [8, 64], strides = [1, 1]} : vector<8x1152xf32> to vector<8x64xf32>
    %70 = arith.truncf %69 : vector<8x64xf32> to vector<8x64xbf16>
    %71 = vector.extract_strided_slice %37 {offsets = [0, 448], sizes = [8, 64], strides = [1, 1]} : vector<8x1152xf32> to vector<8x64xf32>
    %72 = arith.truncf %71 : vector<8x64xf32> to vector<8x64xbf16>
    %73 = vector.extract_strided_slice %37 {offsets = [0, 832], sizes = [8, 64], strides = [1, 1]} : vector<8x1152xf32> to vector<8x64xf32>
    %74 = arith.truncf %73 : vector<8x64xf32> to vector<8x64xbf16>
    %cst_31 = arith.constant dense<0.000000e+00> : vector<8x8xf32>
    %75 = tpu.matmul %70, %72, %cst_31 {dimension_numbers = #tpu.dot_dimension_numbers<[1], [1], [0], [0], [0, 0, 1, 0], [], []>} : vector<8x64xbf16>, vector<8x64xbf16>, vector<8x8xf32> -> vector<8x8xf32>
    %76 = arith.addf %75, %43 : vector<8x8xf32>
    %cst_32 = arith.constant dense<0xFF800000> : vector<8xf32>
    %77 = vector.multi_reduction <maximumf>, %76, %cst_32 [0] : vector<8x8xf32> to vector<8xf32>
    %78 = vector.shape_cast %77 : vector<8xf32> to vector<1x8xf32>
    %79 = vector.broadcast %78 : vector<1x8xf32> to vector<8x8xf32>
    %80 = arith.subf %76, %79 : vector<8x8xf32>
    %81 = math.exp %80 : vector<8x8xf32>
    %cst_33 = arith.constant dense<0.000000e+00> : vector<8xf32>
    %82 = vector.multi_reduction <add>, %81, %cst_33 [0] : vector<8x8xf32> to vector<8xf32>
    %83 = vector.shape_cast %82 : vector<8xf32> to vector<1x8xf32>
    %84 = vector.broadcast %83 : vector<1x8xf32> to vector<8x8xf32>
    %85 = arith.divf %81, %84 : vector<8x8xf32>
    %86 = arith.truncf %85 : vector<8x8xf32> to vector<8x8xbf16>
    %cst_34 = arith.constant dense<0.000000e+00> : vector<8x64xf32>
    %87 = tpu.matmul %86, %74, %cst_34 {dimension_numbers = #tpu.dot_dimension_numbers<[1], [0], [0], [1], [0, 0, 1, 1], [], []>} : vector<8x8xbf16>, vector<8x64xbf16>, vector<8x64xf32> -> vector<8x64xf32>
    %88 = arith.truncf %87 : vector<8x64xf32> to vector<8x64xbf16>
    %c0_35 = arith.constant 0 : index
    %c1 = arith.constant 1 : index
    %c0_36 = arith.constant 0 : index
    %c0_37 = arith.constant 0 : index
    %89 = vector.load %arg7[%c0_35, %c1, %c0_36, %c0_37] : memref<1x6x64x384xbf16, #tpu.memory_space<vmem>>, vector<1x1x64x384xbf16>
    %90 = vector.shape_cast %89 : vector<1x1x64x384xbf16> to vector<64x384xbf16>
    %cst_38 = arith.constant dense<0.000000e+00> : vector<8x384xf32>
    %91 = tpu.matmul %88, %90, %cst_38 {dimension_numbers = #tpu.dot_dimension_numbers<[1], [0], [0], [1], [0, 0, 1, 1], [], []>} : vector<8x64xbf16>, vector<64x384xbf16>, vector<8x384xf32> -> vector<8x384xf32>
    %92 = arith.addf %68, %91 : vector<8x384xf32>
    %93 = vector.extract_strided_slice %37 {offsets = [0, 128], sizes = [8, 64], strides = [1, 1]} : vector<8x1152xf32> to vector<8x64xf32>
    %94 = arith.truncf %93 : vector<8x64xf32> to vector<8x64xbf16>
    %95 = vector.extract_strided_slice %37 {offsets = [0, 512], sizes = [8, 64], strides = [1, 1]} : vector<8x1152xf32> to vector<8x64xf32>
    %96 = arith.truncf %95 : vector<8x64xf32> to vector<8x64xbf16>
    %97 = vector.extract_strided_slice %37 {offsets = [0, 896], sizes = [8, 64], strides = [1, 1]} : vector<8x1152xf32> to vector<8x64xf32>
    %98 = arith.truncf %97 : vector<8x64xf32> to vector<8x64xbf16>
    %cst_39 = arith.constant dense<0.000000e+00> : vector<8x8xf32>
    %99 = tpu.matmul %94, %96, %cst_39 {dimension_numbers = #tpu.dot_dimension_numbers<[1], [1], [0], [0], [0, 0, 1, 0], [], []>} : vector<8x64xbf16>, vector<8x64xbf16>, vector<8x8xf32> -> vector<8x8xf32>
    %100 = arith.addf %99, %43 : vector<8x8xf32>
    %cst_40 = arith.constant dense<0xFF800000> : vector<8xf32>
    %101 = vector.multi_reduction <maximumf>, %100, %cst_40 [0] : vector<8x8xf32> to vector<8xf32>
    %102 = vector.shape_cast %101 : vector<8xf32> to vector<1x8xf32>
    %103 = vector.broadcast %102 : vector<1x8xf32> to vector<8x8xf32>
    %104 = arith.subf %100, %103 : vector<8x8xf32>
    %105 = math.exp %104 : vector<8x8xf32>
    %cst_41 = arith.constant dense<0.000000e+00> : vector<8xf32>
    %106 = vector.multi_reduction <add>, %105, %cst_41 [0] : vector<8x8xf32> to vector<8xf32>
    %107 = vector.shape_cast %106 : vector<8xf32> to vector<1x8xf32>
    %108 = vector.broadcast %107 : vector<1x8xf32> to vector<8x8xf32>
    %109 = arith.divf %105, %108 : vector<8x8xf32>
    %110 = arith.truncf %109 : vector<8x8xf32> to vector<8x8xbf16>
    %cst_42 = arith.constant dense<0.000000e+00> : vector<8x64xf32>
    %111 = tpu.matmul %110, %98, %cst_42 {dimension_numbers = #tpu.dot_dimension_numbers<[1], [0], [0], [1], [0, 0, 1, 1], [], []>} : vector<8x8xbf16>, vector<8x64xbf16>, vector<8x64xf32> -> vector<8x64xf32>
    %112 = arith.truncf %111 : vector<8x64xf32> to vector<8x64xbf16>
    %c0_43 = arith.constant 0 : index
    %c2 = arith.constant 2 : index
    %c0_44 = arith.constant 0 : index
    %c0_45 = arith.constant 0 : index
    %113 = vector.load %arg7[%c0_43, %c2, %c0_44, %c0_45] : memref<1x6x64x384xbf16, #tpu.memory_space<vmem>>, vector<1x1x64x384xbf16>
    %114 = vector.shape_cast %113 : vector<1x1x64x384xbf16> to vector<64x384xbf16>
    %cst_46 = arith.constant dense<0.000000e+00> : vector<8x384xf32>
    %115 = tpu.matmul %112, %114, %cst_46 {dimension_numbers = #tpu.dot_dimension_numbers<[1], [0], [0], [1], [0, 0, 1, 1], [], []>} : vector<8x64xbf16>, vector<64x384xbf16>, vector<8x384xf32> -> vector<8x384xf32>
    %116 = arith.addf %92, %115 : vector<8x384xf32>
    %117 = vector.extract_strided_slice %37 {offsets = [0, 192], sizes = [8, 64], strides = [1, 1]} : vector<8x1152xf32> to vector<8x64xf32>
    %118 = arith.truncf %117 : vector<8x64xf32> to vector<8x64xbf16>
    %119 = vector.extract_strided_slice %37 {offsets = [0, 576], sizes = [8, 64], strides = [1, 1]} : vector<8x1152xf32> to vector<8x64xf32>
    %120 = arith.truncf %119 : vector<8x64xf32> to vector<8x64xbf16>
    %121 = vector.extract_strided_slice %37 {offsets = [0, 960], sizes = [8, 64], strides = [1, 1]} : vector<8x1152xf32> to vector<8x64xf32>
    %122 = arith.truncf %121 : vector<8x64xf32> to vector<8x64xbf16>
    %cst_47 = arith.constant dense<0.000000e+00> : vector<8x8xf32>
    %123 = tpu.matmul %118, %120, %cst_47 {dimension_numbers = #tpu.dot_dimension_numbers<[1], [1], [0], [0], [0, 0, 1, 0], [], []>} : vector<8x64xbf16>, vector<8x64xbf16>, vector<8x8xf32> -> vector<8x8xf32>
    %124 = arith.addf %123, %43 : vector<8x8xf32>
    %cst_48 = arith.constant dense<0xFF800000> : vector<8xf32>
    %125 = vector.multi_reduction <maximumf>, %124, %cst_48 [0] : vector<8x8xf32> to vector<8xf32>
    %126 = vector.shape_cast %125 : vector<8xf32> to vector<1x8xf32>
    %127 = vector.broadcast %126 : vector<1x8xf32> to vector<8x8xf32>
    %128 = arith.subf %124, %127 : vector<8x8xf32>
    %129 = math.exp %128 : vector<8x8xf32>
    %cst_49 = arith.constant dense<0.000000e+00> : vector<8xf32>
    %130 = vector.multi_reduction <add>, %129, %cst_49 [0] : vector<8x8xf32> to vector<8xf32>
    %131 = vector.shape_cast %130 : vector<8xf32> to vector<1x8xf32>
    %132 = vector.broadcast %131 : vector<1x8xf32> to vector<8x8xf32>
    %133 = arith.divf %129, %132 : vector<8x8xf32>
    %134 = arith.truncf %133 : vector<8x8xf32> to vector<8x8xbf16>
    %cst_50 = arith.constant dense<0.000000e+00> : vector<8x64xf32>
    %135 = tpu.matmul %134, %122, %cst_50 {dimension_numbers = #tpu.dot_dimension_numbers<[1], [0], [0], [1], [0, 0, 1, 1], [], []>} : vector<8x8xbf16>, vector<8x64xbf16>, vector<8x64xf32> -> vector<8x64xf32>
    %136 = arith.truncf %135 : vector<8x64xf32> to vector<8x64xbf16>
    %c0_51 = arith.constant 0 : index
    %c3 = arith.constant 3 : index
    %c0_52 = arith.constant 0 : index
    %c0_53 = arith.constant 0 : index
    %137 = vector.load %arg7[%c0_51, %c3, %c0_52, %c0_53] : memref<1x6x64x384xbf16, #tpu.memory_space<vmem>>, vector<1x1x64x384xbf16>
    %138 = vector.shape_cast %137 : vector<1x1x64x384xbf16> to vector<64x384xbf16>
    %cst_54 = arith.constant dense<0.000000e+00> : vector<8x384xf32>
    %139 = tpu.matmul %136, %138, %cst_54 {dimension_numbers = #tpu.dot_dimension_numbers<[1], [0], [0], [1], [0, 0, 1, 1], [], []>} : vector<8x64xbf16>, vector<64x384xbf16>, vector<8x384xf32> -> vector<8x384xf32>
    %140 = arith.addf %116, %139 : vector<8x384xf32>
    %141 = vector.extract_strided_slice %37 {offsets = [0, 256], sizes = [8, 64], strides = [1, 1]} : vector<8x1152xf32> to vector<8x64xf32>
    %142 = arith.truncf %141 : vector<8x64xf32> to vector<8x64xbf16>
    %143 = vector.extract_strided_slice %37 {offsets = [0, 640], sizes = [8, 64], strides = [1, 1]} : vector<8x1152xf32> to vector<8x64xf32>
    %144 = arith.truncf %143 : vector<8x64xf32> to vector<8x64xbf16>
    %145 = vector.extract_strided_slice %37 {offsets = [0, 1024], sizes = [8, 64], strides = [1, 1]} : vector<8x1152xf32> to vector<8x64xf32>
    %146 = arith.truncf %145 : vector<8x64xf32> to vector<8x64xbf16>
    %cst_55 = arith.constant dense<0.000000e+00> : vector<8x8xf32>
    %147 = tpu.matmul %142, %144, %cst_55 {dimension_numbers = #tpu.dot_dimension_numbers<[1], [1], [0], [0], [0, 0, 1, 0], [], []>} : vector<8x64xbf16>, vector<8x64xbf16>, vector<8x8xf32> -> vector<8x8xf32>
    %148 = arith.addf %147, %43 : vector<8x8xf32>
    %cst_56 = arith.constant dense<0xFF800000> : vector<8xf32>
    %149 = vector.multi_reduction <maximumf>, %148, %cst_56 [0] : vector<8x8xf32> to vector<8xf32>
    %150 = vector.shape_cast %149 : vector<8xf32> to vector<1x8xf32>
    %151 = vector.broadcast %150 : vector<1x8xf32> to vector<8x8xf32>
    %152 = arith.subf %148, %151 : vector<8x8xf32>
    %153 = math.exp %152 : vector<8x8xf32>
    %cst_57 = arith.constant dense<0.000000e+00> : vector<8xf32>
    %154 = vector.multi_reduction <add>, %153, %cst_57 [0] : vector<8x8xf32> to vector<8xf32>
    %155 = vector.shape_cast %154 : vector<8xf32> to vector<1x8xf32>
    %156 = vector.broadcast %155 : vector<1x8xf32> to vector<8x8xf32>
    %157 = arith.divf %153, %156 : vector<8x8xf32>
    %158 = arith.truncf %157 : vector<8x8xf32> to vector<8x8xbf16>
    %cst_58 = arith.constant dense<0.000000e+00> : vector<8x64xf32>
    %159 = tpu.matmul %158, %146, %cst_58 {dimension_numbers = #tpu.dot_dimension_numbers<[1], [0], [0], [1], [0, 0, 1, 1], [], []>} : vector<8x8xbf16>, vector<8x64xbf16>, vector<8x64xf32> -> vector<8x64xf32>
    %160 = arith.truncf %159 : vector<8x64xf32> to vector<8x64xbf16>
    %c0_59 = arith.constant 0 : index
    %c4 = arith.constant 4 : index
    %c0_60 = arith.constant 0 : index
    %c0_61 = arith.constant 0 : index
    %161 = vector.load %arg7[%c0_59, %c4, %c0_60, %c0_61] : memref<1x6x64x384xbf16, #tpu.memory_space<vmem>>, vector<1x1x64x384xbf16>
    %162 = vector.shape_cast %161 : vector<1x1x64x384xbf16> to vector<64x384xbf16>
    %cst_62 = arith.constant dense<0.000000e+00> : vector<8x384xf32>
    %163 = tpu.matmul %160, %162, %cst_62 {dimension_numbers = #tpu.dot_dimension_numbers<[1], [0], [0], [1], [0, 0, 1, 1], [], []>} : vector<8x64xbf16>, vector<64x384xbf16>, vector<8x384xf32> -> vector<8x384xf32>
    %164 = arith.addf %140, %163 : vector<8x384xf32>
    %165 = vector.extract_strided_slice %37 {offsets = [0, 320], sizes = [8, 64], strides = [1, 1]} : vector<8x1152xf32> to vector<8x64xf32>
    %166 = arith.truncf %165 : vector<8x64xf32> to vector<8x64xbf16>
    %167 = vector.extract_strided_slice %37 {offsets = [0, 704], sizes = [8, 64], strides = [1, 1]} : vector<8x1152xf32> to vector<8x64xf32>
    %168 = arith.truncf %167 : vector<8x64xf32> to vector<8x64xbf16>
    %169 = vector.extract_strided_slice %37 {offsets = [0, 1088], sizes = [8, 64], strides = [1, 1]} : vector<8x1152xf32> to vector<8x64xf32>
    %170 = arith.truncf %169 : vector<8x64xf32> to vector<8x64xbf16>
    %cst_63 = arith.constant dense<0.000000e+00> : vector<8x8xf32>
    %171 = tpu.matmul %166, %168, %cst_63 {dimension_numbers = #tpu.dot_dimension_numbers<[1], [1], [0], [0], [0, 0, 1, 0], [], []>} : vector<8x64xbf16>, vector<8x64xbf16>, vector<8x8xf32> -> vector<8x8xf32>
    %172 = arith.addf %171, %43 : vector<8x8xf32>
    %cst_64 = arith.constant dense<0xFF800000> : vector<8xf32>
    %173 = vector.multi_reduction <maximumf>, %172, %cst_64 [0] : vector<8x8xf32> to vector<8xf32>
    %174 = vector.shape_cast %173 : vector<8xf32> to vector<1x8xf32>
    %175 = vector.broadcast %174 : vector<1x8xf32> to vector<8x8xf32>
    %176 = arith.subf %172, %175 : vector<8x8xf32>
    %177 = math.exp %176 : vector<8x8xf32>
    %cst_65 = arith.constant dense<0.000000e+00> : vector<8xf32>
    %178 = vector.multi_reduction <add>, %177, %cst_65 [0] : vector<8x8xf32> to vector<8xf32>
    %179 = vector.shape_cast %178 : vector<8xf32> to vector<1x8xf32>
    %180 = vector.broadcast %179 : vector<1x8xf32> to vector<8x8xf32>
    %181 = arith.divf %177, %180 : vector<8x8xf32>
    %182 = arith.truncf %181 : vector<8x8xf32> to vector<8x8xbf16>
    %cst_66 = arith.constant dense<0.000000e+00> : vector<8x64xf32>
    %183 = tpu.matmul %182, %170, %cst_66 {dimension_numbers = #tpu.dot_dimension_numbers<[1], [0], [0], [1], [0, 0, 1, 1], [], []>} : vector<8x8xbf16>, vector<8x64xbf16>, vector<8x64xf32> -> vector<8x64xf32>
    %184 = arith.truncf %183 : vector<8x64xf32> to vector<8x64xbf16>
    %c0_67 = arith.constant 0 : index
    %c5 = arith.constant 5 : index
    %c0_68 = arith.constant 0 : index
    %c0_69 = arith.constant 0 : index
    %185 = vector.load %arg7[%c0_67, %c5, %c0_68, %c0_69] : memref<1x6x64x384xbf16, #tpu.memory_space<vmem>>, vector<1x1x64x384xbf16>
    %186 = vector.shape_cast %185 : vector<1x1x64x384xbf16> to vector<64x384xbf16>
    %cst_70 = arith.constant dense<0.000000e+00> : vector<8x384xf32>
    %187 = tpu.matmul %184, %186, %cst_70 {dimension_numbers = #tpu.dot_dimension_numbers<[1], [0], [0], [1], [0, 0, 1, 1], [], []>} : vector<8x64xbf16>, vector<64x384xbf16>, vector<8x384xf32> -> vector<8x384xf32>
    %188 = arith.addf %164, %187 : vector<8x384xf32>
    %189 = arith.addf %3, %188 : vector<8x384xf32>
    %c0_71 = arith.constant 0 : index
    %c0_72 = arith.constant 0 : index
    %c0_73 = arith.constant 0 : index
    %190 = vector.load %arg8[%c0_71, %c0_72, %c0_73] : memref<1x1x384xf32, #tpu.memory_space<vmem>>, vector<1x1x384xf32>
    %191 = vector.shape_cast %190 : vector<1x1x384xf32> to vector<1x384xf32>
    %192 = vector.broadcast %191 : vector<1x384xf32> to vector<8x384xf32>
    %193 = arith.addf %189, %192 : vector<8x384xf32>
    %c0_74 = arith.constant 0 : index
    %c0_75 = arith.constant 0 : index
    %c0_76 = arith.constant 0 : index
    %194 = vector.load %arg9[%c0_74, %c0_75, %c0_76] : memref<1x1x384xf32, #tpu.memory_space<vmem>>, vector<1x1x384xf32>
    %195 = vector.shape_cast %194 : vector<1x1x384xf32> to vector<1x384xf32>
    %c0_77 = arith.constant 0 : index
    %c0_78 = arith.constant 0 : index
    %c0_79 = arith.constant 0 : index
    %196 = vector.load %arg10[%c0_77, %c0_78, %c0_79] : memref<1x1x384xf32, #tpu.memory_space<vmem>>, vector<1x1x384xf32>
    %197 = vector.shape_cast %196 : vector<1x1x384xf32> to vector<1x384xf32>
    %cst_80 = arith.constant dense<0.000000e+00> : vector<8xf32>
    %198 = vector.multi_reduction <add>, %193, %cst_80 [1] : vector<8x384xf32> to vector<8xf32>
    %199 = vector.shape_cast %198 : vector<8xf32> to vector<8x1xf32>
    %cst_81 = arith.constant 3.840000e+02 : f32
    %200 = vector.broadcast %cst_81 : f32 to vector<8x1xf32>
    %201 = arith.divf %199, %200 : vector<8x1xf32>
    %202 = arith.mulf %193, %193 : vector<8x384xf32>
    %cst_82 = arith.constant dense<0.000000e+00> : vector<8xf32>
    %203 = vector.multi_reduction <add>, %202, %cst_82 [1] : vector<8x384xf32> to vector<8xf32>
    %204 = vector.shape_cast %203 : vector<8xf32> to vector<8x1xf32>
    %cst_83 = arith.constant 3.840000e+02 : f32
    %205 = vector.broadcast %cst_83 : f32 to vector<8x1xf32>
    %206 = arith.divf %204, %205 : vector<8x1xf32>
    %207 = arith.mulf %201, %201 : vector<8x1xf32>
    %208 = arith.subf %206, %207 : vector<8x1xf32>
    %209 = vector.broadcast %201 : vector<8x1xf32> to vector<8x384xf32>
    %210 = arith.subf %193, %209 : vector<8x384xf32>
    %cst_84 = arith.constant 9.99999974E-6 : f32
    %211 = vector.broadcast %cst_84 : f32 to vector<8x1xf32>
    %212 = arith.addf %208, %211 : vector<8x1xf32>
    %213 = math.rsqrt %212 : vector<8x1xf32>
    %214 = vector.broadcast %213 : vector<8x1xf32> to vector<8x384xf32>
    %215 = arith.mulf %210, %214 : vector<8x384xf32>
    %216 = vector.broadcast %195 : vector<1x384xf32> to vector<8x384xf32>
    %217 = arith.mulf %215, %216 : vector<8x384xf32>
    %218 = vector.broadcast %197 : vector<1x384xf32> to vector<8x384xf32>
    %219 = arith.addf %217, %218 : vector<8x384xf32>
    %220 = arith.truncf %219 : vector<8x384xf32> to vector<8x384xbf16>
    %c0_85 = arith.constant 0 : index
    %c0_86 = arith.constant 0 : index
    %c0_87 = arith.constant 0 : index
    %221 = vector.load %arg11[%c0_85, %c0_86, %c0_87] : memref<1x384x1536xbf16, #tpu.memory_space<vmem>>, vector<1x384x1536xbf16>
    %222 = vector.shape_cast %221 : vector<1x384x1536xbf16> to vector<384x1536xbf16>
    %cst_88 = arith.constant dense<0.000000e+00> : vector<8x1536xf32>
    %223 = tpu.matmul %220, %222, %cst_88 {dimension_numbers = #tpu.dot_dimension_numbers<[1], [0], [0], [1], [0, 0, 1, 1], [], []>} : vector<8x384xbf16>, vector<384x1536xbf16>, vector<8x1536xf32> -> vector<8x1536xf32>
    %c0_89 = arith.constant 0 : index
    %c0_90 = arith.constant 0 : index
    %c0_91 = arith.constant 0 : index
    %224 = vector.load %arg12[%c0_89, %c0_90, %c0_91] : memref<1x1x1536xf32, #tpu.memory_space<vmem>>, vector<1x1x1536xf32>
    %225 = vector.shape_cast %224 : vector<1x1x1536xf32> to vector<1x1536xf32>
    %226 = vector.broadcast %225 : vector<1x1536xf32> to vector<8x1536xf32>
    %227 = arith.addf %223, %226 : vector<8x1536xf32>
    %cst_92 = arith.constant 0.000000e+00 : f32
    %228 = vector.broadcast %cst_92 : f32 to vector<8x1536xf32>
    %229 = arith.maximumf %227, %228 : vector<8x1536xf32>
    %230 = arith.truncf %229 : vector<8x1536xf32> to vector<8x1536xbf16>
    %c0_93 = arith.constant 0 : index
    %c0_94 = arith.constant 0 : index
    %c0_95 = arith.constant 0 : index
    %231 = vector.load %arg13[%c0_93, %c0_94, %c0_95] : memref<1x1536x384xbf16, #tpu.memory_space<vmem>>, vector<1x1536x384xbf16>
    %232 = vector.shape_cast %231 : vector<1x1536x384xbf16> to vector<1536x384xbf16>
    %cst_96 = arith.constant dense<0.000000e+00> : vector<8x384xf32>
    %233 = tpu.matmul %230, %232, %cst_96 {dimension_numbers = #tpu.dot_dimension_numbers<[1], [0], [0], [1], [0, 0, 1, 1], [], []>} : vector<8x1536xbf16>, vector<1536x384xbf16>, vector<8x384xf32> -> vector<8x384xf32>
    %c0_97 = arith.constant 0 : index
    %c0_98 = arith.constant 0 : index
    %c0_99 = arith.constant 0 : index
    %234 = vector.load %arg14[%c0_97, %c0_98, %c0_99] : memref<1x1x384xf32, #tpu.memory_space<vmem>>, vector<1x1x384xf32>
    %235 = vector.shape_cast %234 : vector<1x1x384xf32> to vector<1x384xf32>
    %236 = vector.broadcast %235 : vector<1x384xf32> to vector<8x384xf32>
    %237 = arith.addf %233, %236 : vector<8x384xf32>
    %238 = arith.addf %193, %237 : vector<8x384xf32>
    %c0_100 = arith.constant 0 : index
    %c0_101 = arith.constant 0 : index
    %239 = vector.load %arg20[%c0_100, %c0_101] : memref<8x384xf32, #tpu.memory_space<vmem>>, vector<8x384xf32>
    tpu.vector_store %arg20[%c0_100, %c0_101], %238 {strides = array<i32>} : memref<8x384xf32, #tpu.memory_space<vmem>>, vector<8x384xf32>,
    %c5_i32 = arith.constant 5 : i32
    %240 = arith.cmpi eq, %arg1, %c5_i32 : i32
    %241 = arith.extui %240 : i1 to i32
    %c0_i32_102 = arith.constant 0 : i32
    %242 = arith.cmpi ne, %241, %c0_i32_102 : i32
    scf.if %242 {
      %c0_103 = arith.constant 0 : index
      %c0_104 = arith.constant 0 : index
      %243 = vector.load %arg15[%c0_103, %c0_104] : memref<1x384xf32, #tpu.memory_space<vmem>>, vector<1x384xf32>
      %c0_105 = arith.constant 0 : index
      %c0_106 = arith.constant 0 : index
      %244 = vector.load %arg16[%c0_105, %c0_106] : memref<1x384xf32, #tpu.memory_space<vmem>>, vector<1x384xf32>
      %cst_107 = arith.constant dense<0.000000e+00> : vector<8xf32>
      %245 = vector.multi_reduction <add>, %238, %cst_107 [1] : vector<8x384xf32> to vector<8xf32>
      %246 = vector.shape_cast %245 : vector<8xf32> to vector<8x1xf32>
      %cst_108 = arith.constant 3.840000e+02 : f32
      %247 = vector.broadcast %cst_108 : f32 to vector<8x1xf32>
      %248 = arith.divf %246, %247 : vector<8x1xf32>
      %249 = arith.mulf %238, %238 : vector<8x384xf32>
      %cst_109 = arith.constant dense<0.000000e+00> : vector<8xf32>
      %250 = vector.multi_reduction <add>, %249, %cst_109 [1] : vector<8x384xf32> to vector<8xf32>
      %251 = vector.shape_cast %250 : vector<8xf32> to vector<8x1xf32>
      %cst_110 = arith.constant 3.840000e+02 : f32
      %252 = vector.broadcast %cst_110 : f32 to vector<8x1xf32>
      %253 = arith.divf %251, %252 : vector<8x1xf32>
      %254 = arith.mulf %248, %248 : vector<8x1xf32>
      %255 = arith.subf %253, %254 : vector<8x1xf32>
      %256 = vector.broadcast %248 : vector<8x1xf32> to vector<8x384xf32>
      %257 = arith.subf %238, %256 : vector<8x384xf32>
      %cst_111 = arith.constant 9.99999974E-6 : f32
      %258 = vector.broadcast %cst_111 : f32 to vector<8x1xf32>
      %259 = arith.addf %255, %258 : vector<8x1xf32>
      %260 = math.rsqrt %259 : vector<8x1xf32>
      %261 = vector.broadcast %260 : vector<8x1xf32> to vector<8x384xf32>
      %262 = arith.mulf %257, %261 : vector<8x384xf32>
      %263 = vector.broadcast %243 : vector<1x384xf32> to vector<8x384xf32>
      %264 = arith.mulf %262, %263 : vector<8x384xf32>
      %265 = vector.broadcast %244 : vector<1x384xf32> to vector<8x384xf32>
      %266 = arith.addf %264, %265 : vector<8x384xf32>
      %267 = arith.truncf %266 : vector<8x384xf32> to vector<8x384xbf16>
      %c0_112 = arith.constant 0 : index
      %c0_113 = arith.constant 0 : index
      %268 = vector.load %arg17[%c0_112, %c0_113] : memref<384x128xbf16, #tpu.memory_space<vmem>>, vector<384x128xbf16>
      %cst_114 = arith.constant dense<0.000000e+00> : vector<8x128xf32>
      %269 = tpu.matmul %267, %268, %cst_114 {dimension_numbers = #tpu.dot_dimension_numbers<[1], [0], [0], [1], [0, 0, 1, 1], [], []>} : vector<8x384xbf16>, vector<384x128xbf16>, vector<8x128xf32> -> vector<8x128xf32>
      %c0_115 = arith.constant 0 : index
      %c0_116 = arith.constant 0 : index
      %270 = vector.load %arg18[%c0_115, %c0_116] : memref<1x128xf32, #tpu.memory_space<vmem>>, vector<1x128xf32>
      %271 = vector.broadcast %270 : vector<1x128xf32> to vector<8x128xf32>
      %272 = arith.addf %269, %271 : vector<8x128xf32>
      %c0_117 = arith.constant 0 : index
      %c0_118 = arith.constant 0 : index
      %c0_119 = arith.constant 0 : index
      %273 = vector.load %arg19[%c0_117, %c0_118, %c0_119] : memref<1x8x128xf32, #tpu.memory_space<vmem>>, vector<1x8x128xf32>
      %274 = vector.shape_cast %273 : vector<1x8x128xf32> to vector<8x128xf32>
      %275 = vector.shape_cast %272 : vector<8x128xf32> to vector<1x8x128xf32>
      tpu.vector_store %arg19[%c0_117, %c0_118, %c0_119], %275 {strides = array<i32>} : memref<1x8x128xf32, #tpu.memory_space<vmem>>, vector<1x8x128xf32>,
    } else {
    }
    return
  }
  func.func @transform_0(%arg0: i32, %arg1: i32) -> (i32, i32, i32) {
    %c0_i32 = arith.constant 0 : i32
    %c0_i32_0 = arith.constant 0 : i32
    %c0_i32_1 = arith.constant 0 : i32
    return %arg0, %c0_i32, %c0_i32_0 : i32, i32, i32
  }
  func.func @transform_1(%arg0: i32, %arg1: i32) -> (i32, i32, i32) {
    %c0_i32 = arith.constant 0 : i32
    %c0_i32_0 = arith.constant 0 : i32
    %c0_i32_1 = arith.constant 0 : i32
    return %arg1, %c0_i32, %c0_i32_0 : i32, i32, i32
  }
  func.func @transform_2(%arg0: i32, %arg1: i32) -> (i32, i32, i32) {
    %c0_i32 = arith.constant 0 : i32
    %c0_i32_0 = arith.constant 0 : i32
    %c0_i32_1 = arith.constant 0 : i32
    return %arg1, %c0_i32, %c0_i32_0 : i32, i32, i32
  }
  func.func @transform_3(%arg0: i32, %arg1: i32) -> (i32, i32, i32) {
    %c0_i32 = arith.constant 0 : i32
    %c0_i32_0 = arith.constant 0 : i32
    %c0_i32_1 = arith.constant 0 : i32
    return %arg1, %c0_i32, %c0_i32_0 : i32, i32, i32
  }
  func.func @transform_4(%arg0: i32, %arg1: i32) -> (i32, i32, i32) {
    %c0_i32 = arith.constant 0 : i32
    %c0_i32_0 = arith.constant 0 : i32
    %c0_i32_1 = arith.constant 0 : i32
    return %arg1, %c0_i32, %c0_i32_0 : i32, i32, i32
  }
  func.func @transform_5(%arg0: i32, %arg1: i32) -> (i32, i32, i32, i32) {
    %c0_i32 = arith.constant 0 : i32
    %c0_i32_0 = arith.constant 0 : i32
    %c0_i32_1 = arith.constant 0 : i32
    %c0_i32_2 = arith.constant 0 : i32
    return %arg1, %c0_i32, %c0_i32_0, %c0_i32_1 : i32, i32, i32, i32
  }
  func.func @transform_6(%arg0: i32, %arg1: i32) -> (i32, i32, i32) {
    %c0_i32 = arith.constant 0 : i32
    %c0_i32_0 = arith.constant 0 : i32
    %c0_i32_1 = arith.constant 0 : i32
    return %arg1, %c0_i32, %c0_i32_0 : i32, i32, i32
  }
  func.func @transform_7(%arg0: i32, %arg1: i32) -> (i32, i32, i32) {
    %c0_i32 = arith.constant 0 : i32
    %c0_i32_0 = arith.constant 0 : i32
    %c0_i32_1 = arith.constant 0 : i32
    return %arg1, %c0_i32, %c0_i32_0 : i32, i32, i32
  }
  func.func @transform_8(%arg0: i32, %arg1: i32) -> (i32, i32, i32) {
    %c0_i32 = arith.constant 0 : i32
    %c0_i32_0 = arith.constant 0 : i32
    %c0_i32_1 = arith.constant 0 : i32
    return %arg1, %c0_i32, %c0_i32_0 : i32, i32, i32
  }
  func.func @transform_9(%arg0: i32, %arg1: i32) -> (i32, i32, i32) {
    %c0_i32 = arith.constant 0 : i32
    %c0_i32_0 = arith.constant 0 : i32
    %c0_i32_1 = arith.constant 0 : i32
    return %arg1, %c0_i32, %c0_i32_0 : i32, i32, i32
  }
  func.func @transform_10(%arg0: i32, %arg1: i32) -> (i32, i32, i32) {
    %c0_i32 = arith.constant 0 : i32
    %c0_i32_0 = arith.constant 0 : i32
    %c0_i32_1 = arith.constant 0 : i32
    return %arg1, %c0_i32, %c0_i32_0 : i32, i32, i32
  }
  func.func @transform_11(%arg0: i32, %arg1: i32) -> (i32, i32, i32) {
    %c0_i32 = arith.constant 0 : i32
    %c0_i32_0 = arith.constant 0 : i32
    %c0_i32_1 = arith.constant 0 : i32
    return %arg1, %c0_i32, %c0_i32_0 : i32, i32, i32
  }
  func.func @transform_12(%arg0: i32, %arg1: i32) -> (i32, i32, i32) {
    %c0_i32 = arith.constant 0 : i32
    %c0_i32_0 = arith.constant 0 : i32
    %c0_i32_1 = arith.constant 0 : i32
    return %arg1, %c0_i32, %c0_i32_0 : i32, i32, i32
  }
  func.func @transform_13(%arg0: i32, %arg1: i32) -> (i32, i32) {
    %c0_i32 = arith.constant 0 : i32
    %c0_i32_0 = arith.constant 0 : i32
    %c0_i32_1 = arith.constant 0 : i32
    return %c0_i32, %c0_i32_0 : i32, i32
  }
  func.func @transform_14(%arg0: i32, %arg1: i32) -> (i32, i32) {
    %c0_i32 = arith.constant 0 : i32
    %c0_i32_0 = arith.constant 0 : i32
    %c0_i32_1 = arith.constant 0 : i32
    return %c0_i32, %c0_i32_0 : i32, i32
  }
  func.func @transform_15(%arg0: i32, %arg1: i32) -> (i32, i32) {
    %c0_i32 = arith.constant 0 : i32
    %c0_i32_0 = arith.constant 0 : i32
    %c0_i32_1 = arith.constant 0 : i32
    return %c0_i32, %c0_i32_0 : i32, i32
  }
  func.func @transform_16(%arg0: i32, %arg1: i32) -> (i32, i32) {
    %c0_i32 = arith.constant 0 : i32
    %c0_i32_0 = arith.constant 0 : i32
    %c0_i32_1 = arith.constant 0 : i32
    return %c0_i32, %c0_i32_0 : i32, i32
  }
  func.func @transform_17(%arg0: i32, %arg1: i32) -> (i32, i32, i32) {
    %c0_i32 = arith.constant 0 : i32
    %c0_i32_0 = arith.constant 0 : i32
    %c0_i32_1 = arith.constant 0 : i32
    return %arg0, %c0_i32, %c0_i32_0 : i32, i32, i32
  }
}

</mosaic_0001>

<bundles_post_ra>
// kernel: tpu_custom_call.1
= control target key start
LH: loop header
LB: loop body
LE: loop exit
PB: predicated region body
PF: predicated region fallthrough
CT: control target
= control target key end

     0   :  { %s16212_s0 = inlined_call_operand.hbm [shape: f32[2,8,384], index: 0, kind: input, shape index: {}]   ;;  %s16213_s1 = inlined_call_operand.hbm [shape: f32[6,1,384], index: 1, kind: input, shape index: {}]   ;;  %s16214_s2 = inlined_call_operand.hbm [shape: f32[6,1,384], index: 2, kind: input, shape index: {}]   ;;  %s16215_s3 = inlined_call_operand.hbm [shape: bf16[6,384,1152], index: 3, kind: input, shape index: {}]   ;;  %s16216_s4 = inlined_call_operand.hbm [shape: f32[6,1,1152], index: 4, kind: input, shape index: {}]   ;;  %s16217_s5 = inlined_call_operand.hbm [shape: bf16[6,6,64,384], index: 5, kind: input, shape index: {}]   ;;  %s16218_s6 = inlined_call_operand.hbm [shape: f32[6,1,384], index: 6, kind: input, shape index: {}]   ;;  %s16219_s7 = inlined_call_operand.hbm [shape: f32[6,1,384], index: 7, kind: input, shape index: {}]   ;;  %s16220_s8 = inlined_call_operand.hbm [shape: f32[6,1,384], index: 8, kind: input, shape index: {}]   ;;  %s16221_s9 = inlined_call_operand.hbm [shape: bf16[6,384,1536], index: 9, kind: input, shape index: {}]   ;;  %s16222_s10 = inlined_call_operand.hbm [shape: f32[6,1,1536], index: 10, kind: input, shape index: {}]   ;;  %s16223_s11 = inlined_call_operand.hbm [shape: bf16[6,1536,384], index: 11, kind: input, shape index: {}]   ;;  %s16224_s12 = inlined_call_operand.hbm [shape: f32[6,1,384], index: 12, kind: input, shape index: {}]   ;;  %s16225_s13 = inlined_call_operand.hbm [shape: f32[1,384], index: 13, kind: input, shape index: {}]   ;;  %s16226_s14 = inlined_call_operand.hbm [shape: f32[1,384], index: 14, kind: input, shape index: {}]   ;;  %s16227_s15 = inlined_call_operand.hbm [shape: bf16[384,128], index: 15, kind: input, shape index: {}]   ;;  %s16228_s16 = inlined_call_operand.hbm [shape: f32[1,128], index: 16, kind: input, shape index: {}]   ;;  %s16229_s17 = inlined_call_operand.hbm [shape: f32[2,8,128], index: 17, kind: output, shape index: {}]  }
   0x1   :  { %16277 = sst [smem:[#allocation58_spill]] %s16212_s0 }
   0x2   :  { %16278 = sst [smem:[#allocation59_spill]] %s16213_s1 }
   0x3   :  { %16279 = sst [smem:[#allocation60_spill]] %s16214_s2 }
   0x4   :  { %16280 = sst [smem:[#allocation61_spill]] %s16215_s3 }
   0x5   :  { %16281 = sst [smem:[#allocation62_spill]] %s16216_s4 }
   0x6   :  { %16282 = sst [smem:[#allocation63_spill]] %s16217_s5 }
   0x7   :  { %16283 = sst [smem:[#allocation64_spill]] %s16218_s6 }
   0x8   :  { %16284 = sst [smem:[#allocation65_spill]] %s16219_s7 }
   0x9   :  { %16285 = sst [smem:[#allocation66_spill]] %s16220_s8 }
   0xa   :  { %16286 = sst [smem:[#allocation67_spill]] %s16221_s9 }
   0xb   :  { %16287 = sst [smem:[#allocation68_spill]] %s16222_s10 }
   0xc   :  { %16288 = sst [smem:[#allocation69_spill]] %s16223_s11 }
   0xd   :  { %16289 = sst [smem:[#allocation70_spill]] %s16224_s12 }
   0xe   :  { %16290 = sst [smem:[#allocation71_spill]] %s16225_s13 }
   0xf   :  { %16291 = sst [smem:[#allocation72_spill]] %s16226_s14 }
  0x10   :  { %16292 = sst [smem:[#allocation73_spill]] %s16229_s17 }
  0x11   :  { %22 = vsyncpa [#allocation4], 0 }
  0x12   :  { %24 = vsyncpa [#allocation4 + $0x1], 0 }
  0x13   :  { %25 = vsyncpa [#allocation7], 0 }
  0x14   :  { %27 = vsyncpa [#allocation7 + $0x1], 0 }
  0x15   :  { %28 = vsyncpa [#allocation10], 0 }
  0x16   :  { %30 = vsyncpa [#allocation10 + $0x1], 0 }
  0x17   :  { %31 = vsyncpa [#allocation13], 0 }
  0x18   :  { %33 = vsyncpa [#allocation13 + $0x1], 0 }
  0x19   :  { %34 = vsyncpa [#allocation16], 0 }
  0x1a   :  { %36 = vsyncpa [#allocation16 + $0x1], 0 }
  0x1b   :  { %37 = vsyncpa [#allocation19], 0 }
  0x1c   :  { %39 = vsyncpa [#allocation19 + $0x1], 0 }
  0x1d   :  { %40 = vsyncpa [#allocation22], 0 }
  0x1e   :  { %42 = vsyncpa [#allocation22 + $0x1], 0 }
  0x1f   :  { %43 = vsyncpa [#allocation25], 0 }
  0x20   :  { %44 = vsyncpa [#allocation28], 0 }
  0x21   :  { %45 = vsyncpa [#allocation5], 0 }
  0x22   :  { %47 = vsyncpa [#allocation5 + $0x1], 0  ;;  %s14014_s24 = smov 0   ;;  %s14016_s25 = smov 0  }
  0x23   :  { %s14018_s26 = smov 0   ;;  %s14020_s27 = smov 0  }
  0x24   :  { %16293 = sst [smem:[#allocation41_spill]] %s14020_s27  ;;  %s14022_s28 = smov 0  }
  0x25   :  { %s14024_s29 = smov 0   ;;  %s14026_s0 = smov 0  }
  0x26   :  { %s14028_s30 = smov 0   ;;  %s14030_s18 = smov 0  }
  0x27   :  { %s14032_s19 = smov 0   ;;  %s14034_s1 = smov 0  }
  0x28 LB: > { %s16295_s27 = sld [smem:[#allocation41_spill]]  ;;  %16298 = sst [smem:[#allocation43_spill]] %s13865_s28  ;;  %s13889_s1 = sphi %s14034_s1, %s53_s1   ;;  %s13885_s19 = sphi %s14032_s19, %s16391_s19   ;;  %s13881_s18 = sphi %s14030_s18, %s16390_s18   ;;  %s13877_s30 = sphi %s14028_s30, %s16381_s30   ;;  %s13873_s0 = sphi %s14026_s0, %s16389_s0   ;;  %s13869_s29 = sphi %s14024_s29, %s16388_s29   ;;  %s13865_s28 = sphi %s14022_s28, %s16387_s28   ;;  %s13857_s26 = sphi %s14018_s26, %s16385_s26   ;;  %s13853_s25 = sphi %s14016_s25, %s16384_s25   ;;  %s13849_s24 = sphi %s14014_s24, %s16377_s24  }
  0x29   : > { %16296 = sst [smem:[#allocation41_spill]] %s13853_s25  ;;  %s14070_s20 = sadd.s32 4294967295, %s13889_s1  }
  0x2a   : > { %16299 = sst [smem:[#allocation44_spill]] %s13873_s0  ;;  %s10249_s21 = sadd.s32 4294967294, %s13889_s1  }
  0x2b   : > { %16300 = sst [smem:[#allocation45_spill]] %s13877_s30  ;;  %s62_s22 = sadd.s32 1, %s13881_s18 }
  0x2c   : > { %16301 = sst [smem:[#allocation46_spill]] %s13885_s19  ;;  %s65_s23 = sadd.s32 1, %s13885_s19 }
  0x2d   : > { %16302 = sst [smem:[#allocation47_spill]] %s14070_s20  ;;  %p63_p0 = scmp.ge.s32.totalorder %s62_s22, 6 }
  0x2e   : > { %16297 = sst [smem:[#allocation42_spill]] %s16295_s27  ;;  %s72_s17 = sadd.s32 1, %s13869_s29 }
  0x2f   : > { %p16241_p1 = scmp.ne.s32.totalorder %s13869_s29, %s13865_s28  ;;  %p80_p2 = scmp.eq.s32.totalorder %s13889_s1, 0 }
  0x30   : > { %s16393_s22 = smov (%p63_p0, %s62_s22), 0  ;;  %s16395_s23 = smov (!%p63_p0, %s65_s23), %s13885_s19 }
  0x31   : > { %16303 = sst [smem:[#allocation48_spill]] %s16393_s22  ;;  %p14087_p3 = por %p80_p2, %p16241_p1 }
  0x32   : > { %p16240_p4 = scmp.ne.s32.totalorder %s13865_s28, %s16295_s27  ;;  %p67_p5 = scmp.ge.s32.totalorder %s16395_s23, 2 }
  0x33   : > { %s16304_s30 = scalar_select %p14087_p3, 1, 0 }
  0x34   : > { %p16252_p6 = scmp.eq.s32.totalorder %s14070_s20, 0  ;;  %s95_s0 = ssub.s32 %s13881_s18, %s16393_s22 }
  0x35   : > { %16305 = sst [smem:[#allocation49_spill]] %s16304_s30  ;;  %s98_s12 = sadd.s32 1, %s13857_s26 }
  0x36   : > { %s16397_s23 = smov (%p67_p5, %s16395_s23), 0  ;;  %p14104_p7 = por %p16252_p6, %p16240_p4 }
  0x37   : > { %16306 = sst [smem:[#allocation50_spill]] %s16397_s23  ;;  %p96_p8 = scmp.eq.s32.totalorder %s95_s0, 0 }
  0x38   : > { %s16307_s10 = scalar_select %p14104_p7, 1, 0 }
  0x39   : > { %s69_s8 = ssub.s32 %s13885_s19, %s16397_s23  ;;  %p105_p9 = scmp.ne.s32.totalorder %s13857_s26, %s13853_s25 }
  0x3a   : > { %16308 = sst [smem:[#allocation51_spill]] %s16307_s10  ;;  %p70_p10 = scmp.eq.s32.totalorder %s69_s8, 0 }
  0x3b   : > { %p111_p11 = scmp.ne.s32.totalorder %s13853_s25, %s13849_s24  ;;  %p14122_p12 = por %p105_p9, %p80_p2 }
  0x3c   : > { %s14115_s22 = scalar_select %p96_p8, %s13857_s26, %s98_s12  }
  0x3d   : > { %s14118_s4 = scalar_select %p70_p10, %s13869_s29, %s72_s17  }
  0x3e   : > { %16309 = sst [smem:[#allocation52_spill]] %s14115_s22  ;;  %p14128_p13 = por %p111_p11, %p16252_p6 }
  0x3f   : > { %16310 = sst [smem:[#allocation53_spill]] %s14118_s4  ;;  %p505_p0 = scmp.eq.s32.totalorder %s14070_s20, 11 }
  0x40   : > { %s16311_s6 = scalar_select %p14122_p12, 1, 0 }
  0x41   : > { %s16312_s2 = scalar_select %p14128_p13, 1, 0 }
  0x42   : > { %p511_p5 = scmp.eq.s32.totalorder %s10249_s21, 11  ;;  %p10250_p4 = scmp.ge.s32.totalorder %s13889_s1, 1 }
  0x43   : > { %16313 = sst [smem:[#allocation54_spill]] %s16312_s2  ;;  %p518_p1 = scmp.lt.s32.totalorder %s13889_s1, 13 }
  0x44   : > { %p16314_p7 = scmp.ne.s32.totalorder %s13869_s29, %s13865_s28  ;;  %p16317_p10 = scmp.ne.s32.totalorder %s13865_s28, %s16295_s27 }
  0x45   : > { %p14149_p2 = pnand %p10250_p4, %p518_p1  ;;  %s13891_s24 = smov [#allocation24]  }
  0x46   : > { %p14138_p8 = por %p505_p0, %p16314_p7  ;;  %p14145_p3 = por %p511_p5, %p16317_p10 }
  0x47   : > { %s16320_s17 = scalar_select %p14149_p2, 1, 0 }
  0x48   : > { %s16315_s8 = scalar_select %p14138_p8, 1, 0 }
  0x49   : > { %s16318_s12 = scalar_select %p14145_p3, 1, 0 }
  0x4a   : > { %16316 = sst [smem:[#allocation55_spill]] %s16315_s8  ;;  %p11844_p9 = pneg %p14149_p2 }
  0x4b   : > { %16319 = sst [smem:[#allocation56_spill]] %s16318_s12  ;;  %s531_s0 = sshll.u32 %s13891_s24, 4  ;;  %s532_s0 = int_to_ptr.vmem [resolvable:$true] %s531_s0 }
  0x4c   : > { %16321 = sst [smem:[#allocation57_spill]] %s16320_s17  ;;  %s13892_s21 = smov [#allocation27]  }
  0x4d   : > { %s552_s23 = sshll.u32 %s13892_s21, 4  ;;  %p14157_p7 = pnand %p11844_p9, %p16252_p6  ;;  %s14161_s23 = int_to_ptr.vmem [resolvable:$true] %s552_s23 }
  0x4e   : > { %s16323_s13 = sld [smem:[#allocation71_spill]] }
  0x4f   : > { %p14171_p4 = pneg %p14157_p7 }
  0x54   : > { %s13259_s27 = scalar_lea.hbm %s16323_s13, 48 }
  0x55   : > { %p13260_p1 = scmp.ne.s32.totalorder %s16323_s13, %s13259_s27  ;;  %p13266_p5 = scmp.lt.u32.totalorder %s13259_s27, %s16323_s13 }
  0x57   : > { %p13262_p11 = pnand %p14171_p4, %p13260_p1 }
  0x59   : > { %p13263_p0 = pneg %p13262_p11 }
  0x5b   : > { %p13268_p10 = pnand %p13266_p5, %p13263_p0 }
  0x5d   : > { %13271 = shalt.err (!%p13268_p10)
}
  0x5e   : > { %s13272_s22 = scalar_lea.vmem %s532_s0, 48  ;;  %s13279_s2 = scalar_lea.vmem %s532_s0, 64 }
  0x5f   : > { %p13273_p9 = scmp.ne.s32.totalorder %s532_s0, %s13272_s22  ;;  %p13280_p8 = scmp.lt.s32.totalorder %s532_s0, %s532_s0 }
  0x60   : > { %p13281_p13 = scmp.lt.s32.totalorder %s13279_s2, %s13272_s22 }
  0x61   : > { %p13275_p6 = pnand %p13273_p9, %p14171_p4 }
  0x62   : > { %p13282_p2 = por %p13281_p13, %p13280_p8 }
  0x63   : > { %p13276_p3 = pneg %p13275_p6 }
  0x65   : > { %p13283_p12 = pnand %p13282_p2, %p13276_p3 }
  0x67   : > { %13286 = shalt.err (!%p13283_p12)
}
  0x68   : > { %11847 = dma.hbm_to_vmem [thread:$0]  (!%p14157_p7), %s16323_s13, 48, %s532_s0, [#allocation25]  }
  0x69   : > { %s13287_s21 = scalar_lea.hbm %s16227_s15, 3072 }
  0x6a   : > { %p13288_p6 = scmp.ne.s32.totalorder %s16227_s15, %s13287_s21  ;;  %p13294_p3 = scmp.lt.u32.totalorder %s13287_s21, %s16227_s15 }
  0x6c   : > { %p13290_p1 = pnand %p13288_p6, %p14171_p4 }
  0x6e   : > { %p13291_p13 = pneg %p13290_p1 }
  0x70   : > { %p13296_p12 = pnand %p13294_p3, %p13291_p13 }
  0x72   : > { %13299 = shalt.err (!%p13296_p12)
}
  0x73   : > { %s13300_s0 = scalar_lea.vmem %s14161_s23, 3072  ;;  %p13308_p0 = scmp.lt.s32.totalorder %s14161_s23, %s14161_s23 }
  0x74   : > { %p13301_p8 = scmp.ne.s32.totalorder %s14161_s23, %s13300_s0  ;;  %p13309_p5 = scmp.lt.s32.totalorder %s13300_s0, %s13300_s0 }
  0x76   : > { %p13303_p2 = pnand %p13301_p8, %p14171_p4  ;;  %p13310_p10 = por %p13309_p5, %p13308_p0 }
  0x78   : > { %p13304_p11 = pneg %p13303_p2 }
  0x7a   : > { %p13311_p9 = pnand %p13310_p10, %p13304_p11 }
  0x7c   : > { %13314 = shalt.err (!%p13311_p9)
}
  0x7d   : > { %s13893_s10 = smov 64   ;;  %s13894_s20 = smov 4  }
  0x7e   : > { %11853 = dma.hbm_to_vmem [thread:$0]  (!%p14157_p7), %s16227_s15, 3072, %s14161_s23, [#allocation28], %s13893_s10, %s13893_s10, %s13894_s20  }
  0x7f   : > { %s13895_s25 = smov [#allocation26]   ;;  %s13896_s21 = smov [#allocation29]  }
  0x80   : > { %s542_s27 = sshll.u32 %s13895_s25, 4  ;;  %s566_s22 = sshll.u32 %s13896_s21, 4  ;;  %s543_s27 = int_to_ptr.vmem [resolvable:$true] %s542_s27  ;;  %s567_s22 = int_to_ptr.vmem [resolvable:$true] %s566_s22 }
  0x81   : > { %s16325_s14 = sld [smem:[#allocation72_spill]] }
  0x87   : > { %s13315_s13 = scalar_lea.hbm %s16325_s14, 48 }
  0x88   : > { %p13316_p6 = scmp.ne.s32.totalorder %s16325_s14, %s13315_s13  ;;  %p13322_p3 = scmp.lt.u32.totalorder %s13315_s13, %s16325_s14 }
  0x8a   : > { %p13318_p1 = pnand %p13316_p6, %p14171_p4 }
  0x8c   : > { %p13319_p13 = pneg %p13318_p1 }
  0x8e   : > { %p13324_p12 = pnand %p13322_p3, %p13319_p13 }
  0x90   : > { %13327 = shalt.err (!%p13324_p12)
}
  0x91   : > { %s13328_s23 = scalar_lea.vmem %s543_s27, 48  ;;  %s13335_s10 = scalar_lea.vmem %s543_s27, 64 }
  0x92   : > { %p13329_p8 = scmp.ne.s32.totalorder %s543_s27, %s13328_s23  ;;  %p13336_p0 = scmp.lt.s32.totalorder %s543_s27, %s543_s27 }
  0x93   : > { %p13337_p5 = scmp.lt.s32.totalorder %s13335_s10, %s13328_s23 }
  0x94   : > { %p13331_p2 = pnand %p13329_p8, %p14171_p4 }
  0x95   : > { %p13338_p10 = por %p13337_p5, %p13336_p0 }
  0x96   : > { %p13332_p11 = pneg %p13331_p2 }
  0x98   : > { %p13339_p9 = pnand %p13338_p10, %p13332_p11 }
  0x9a   : > { %13342 = shalt.err (!%p13339_p9)
}
  0x9b   : > { %11850 = dma.hbm_to_vmem [thread:$0]  (!%p14157_p7), %s16325_s14, 48, %s543_s27, [#allocation25]  }
  0x9c   : > { %s13343_s19 = scalar_lea.hbm %s16228_s16, 16 }
  0x9d   : > { %p13344_p6 = scmp.ne.s32.totalorder %s16228_s16, %s13343_s19  ;;  %p13350_p3 = scmp.lt.u32.totalorder %s13343_s19, %s16228_s16 }
  0x9f   : > { %p13346_p1 = pnand %p13344_p6, %p14171_p4 }
  0xa1   : > { %p13347_p13 = pneg %p13346_p1 }
  0xa3   : > { %p13352_p12 = pnand %p13350_p3, %p13347_p13 }
  0xa5   : > { %13355 = shalt.err (!%p13352_p12)
}
  0xa6   : > { %s13356_s21 = scalar_lea.vmem %s567_s22, 16  ;;  %s13363_s27 = scalar_lea.vmem %s567_s22, 32 }
  0xa7   : > { %p13357_p8 = scmp.ne.s32.totalorder %s567_s22, %s13356_s21  ;;  %p13364_p0 = scmp.lt.s32.totalorder %s567_s22, %s567_s22 }
  0xa8   : > { %p13365_p5 = scmp.lt.s32.totalorder %s13363_s27, %s13356_s21 }
  0xa9   : > { %p13359_p2 = pnand %p13357_p8, %p14171_p4 }
  0xaa   : > { %p13366_p10 = por %p13365_p5, %p13364_p0 }
  0xab   : > { %p13360_p11 = pneg %p13359_p2 }
  0xad   : > { %p13367_p9 = pnand %p13366_p10, %p13360_p11 }
  0xaf   : > { %13370 = shalt.err (!%p13367_p9)
}
  0xb0   : > { %11856 = dma.hbm_to_vmem [thread:$0]  (!%p14157_p7), %s16228_s16, 16, %s567_s22, [#allocation28]  }
  0xb1   : > { %p10255_p6 = scmp.ge.s32.totalorder %s13889_s1, 12 }
  0xb2   : > { %s14248_s24 = sand.u32 (!%p10255_p6), 1, %s13889_s1   ;;  %s14251_s23 = sand.u32 (!%p10255_p6), 1, %s13857_s26  }
  0xb3   : > { %573 = sbr.rel (%p10255_p6) target bundleno = 536 (0x218), region = 32  ;;  %s16326_s13 = sld [smem:[#allocation59_spill]] (!%p10255_p6) }
  0xb4   : > { %s14254_s10 = smul.u32 (!%p10255_p6), 3, %s14251_s23  ;;  %s16266_s8 = scalar_lea.sflag (!%p10255_p6), [#allocation7], %s14248_s24 }
  0xb5   : > { %s14257_s4 = smul.u32 (!%p10255_p6), 48, %s13881_s18  ;;  %p16327_p4 = scmp.ne.s32.totalorder (!%p10255_p6), %s16311_s6, 0 }
  0xb6   : > { %s11773_s22 = smul.u32 (!%p10255_p6), 1728, %s14251_s23  ;;  %s600_s19 = scalar_lea.vmem (!%p10255_p6), [#allocation6], %s14254_s10 }
  0xb7   : > { %s608_s20 = sshll.u32 (!%p10255_p6), %s600_s19, 4  ;;  %s609_s20 = int_to_ptr.vmem [resolvable:$true] %s608_s20 }
  0xb9   : > { %s14264_s30 = scalar_lea.hbm (!%p10255_p6), %s16326_s13, %s14257_s4  ;;  %s13375_s27 = scalar_lea.hbm (!%p10255_p6), %s16326_s13, 288 }
  0xba   : > { %s13371_s12 = scalar_lea.hbm %s14264_s30, 48  ;;  %p13376_p3 = scmp.lt.u32.totalorder %s14264_s30, %s16326_s13 }
  0xbb   : > { %p13372_p7 = scmp.ne.s32.totalorder %s14264_s30, %s13371_s12  ;;  %p13377_p12 = scmp.lt.u32.totalorder %s13375_s27, %s13371_s12 }
  0xbc   : > { %p13379_p2 = scmp.lt.u32.totalorder %s13371_s12, %s14264_s30 }
  0xbd   : > { %p13373_p1 = pnand %p13372_p7, %p16327_p4  ;;  %p13378_p8 = por %p13377_p12, %p13376_p3 }
  0xbf   : > { %p13374_p13 = pneg %p13373_p1  ;;  %p13380_p11 = por %p13379_p2, %p13378_p8 }
  0xc1   : > { %p13381_p0 = pnand %p13380_p11, %p13374_p13 }
  0xc3   : > { %13384 = shalt.err (!%p13381_p0)
}
  0xc4   : > { %s13385_s28 = scalar_lea.vmem %s609_s20, 48  ;;  %s13897_s17 = smov [#allocation6]  }
  0xc5   : > { %p13386_p5 = scmp.ne.s32.totalorder %s609_s20, %s13385_s28  ;;  %s13389_s19 = sshll.u32 %s13897_s17, 4  ;;  %s13390_s19 = int_to_ptr.vmem [resolvable:$false] %s13389_s19 }
  0xc6   : > { %s13391_s25 = scalar_lea.vmem %s13390_s19, 96  ;;  %p13392_p6 = scmp.lt.s32.totalorder %s609_s20, %s13390_s19 }
  0xc7   : > { %p13387_p10 = pnand %p13386_p5, %p16327_p4  ;;  %p13393_p7 = scmp.lt.s32.totalorder %s13391_s25, %s13385_s28 }
  0xc9   : > { %p13388_p9 = pneg %p13387_p10  ;;  %p13394_p1 = por %p13393_p7, %p13392_p6 }
  0xcb   : > { %p13395_p3 = pnand %p13394_p1, %p13388_p9 }
  0xcd   : > { %13398 = shalt.err (!%p13395_p3)
}
  0xce   : > { %11809 = dma.hbm_to_vmem [thread:$0]  (%p16327_p4), %s14264_s30, 48, %s609_s20, %s16266_s8  }
  0xcf   : > { %s11774_s12 = smul.u32 27648, %s13881_s18  ;;  %s638_s21 = scalar_lea.vmem [#allocation9], %s11773_s22 }
  0xd0   : > { %s645_s27 = sshll.u32 %s638_s21, 4  ;;  %s16328_s3 = sld [smem:[#allocation61_spill]]  ;;  %s14290_s27 = int_to_ptr.vmem [resolvable:$true] %s645_s27 }
  0xd1   : > { %s16268_s17 = scalar_lea.sflag [#allocation10], %s14248_s24 }
  0xd6   : > { %s14295_s28 = scalar_lea.hbm %s16328_s3, %s11774_s12  ;;  %s13403_s20 = scalar_lea.hbm %s16328_s3, 165888 }
  0xd7   : > { %s13399_s19 = scalar_lea.hbm %s14295_s28, 27648  ;;  %p13404_p2 = scmp.lt.u32.totalorder %s14295_s28, %s16328_s3 }
  0xd8   : > { %p13400_p13 = scmp.ne.s32.totalorder %s14295_s28, %s13399_s19  ;;  %p13405_p11 = scmp.lt.u32.totalorder %s13403_s20, %s13399_s19 }
  0xd9   : > { %p13407_p5 = scmp.lt.u32.totalorder %s13399_s19, %s14295_s28 }
  0xda   : > { %p13401_p12 = pnand %p13400_p13, %p16327_p4  ;;  %p13406_p0 = por %p13405_p11, %p13404_p2 }
  0xdc   : > { %p13402_p8 = pneg %p13401_p12  ;;  %p13408_p10 = por %p13407_p5, %p13406_p0 }
  0xde   : > { %p13409_p9 = pnand %p13408_p10, %p13402_p8 }
  0xe0   : > { %13412 = shalt.err (!%p13409_p9)
}
  0xe1   : > { %s13413_s12 = scalar_lea.vmem %s14290_s27, 27648  ;;  %s13898_s2 = smov [#allocation9]  }
  0xe2   : > { %p13414_p6 = scmp.ne.s32.totalorder %s14290_s27, %s13413_s12  ;;  %s13417_s0 = sshll.u32 %s13898_s2, 4  ;;  %s13418_s0 = int_to_ptr.vmem [resolvable:$false] %s13417_s0 }
  0xe3   : > { %s13419_s30 = scalar_lea.vmem %s13418_s0, 55296  ;;  %p13420_p3 = scmp.lt.s32.totalorder %s14290_s27, %s13418_s0 }
  0xe4   : > { %p13415_p7 = pnand %p13414_p6, %p16327_p4  ;;  %p13421_p13 = scmp.lt.s32.totalorder %s13419_s30, %s13413_s12 }
  0xe6   : > { %p13416_p1 = pneg %p13415_p7  ;;  %p13422_p12 = por %p13421_p13, %p13420_p3 }
  0xe8   : > { %p13423_p2 = pnand %p13422_p12, %p13416_p1 }
  0xea   : > { %13426 = shalt.err (!%p13423_p2)
}
  0xeb   : > { %s13899_s19 = smov 576   ;;  %s13900_s22 = smov 36  }
  0xec   : > { %11811 = dma.hbm_to_vmem [thread:$0]  (%p16327_p4), %s14295_s28, 27648, %s14290_s27, %s16268_s17, %s13899_s19, %s13899_s19, %s13900_s22  }
  0xed   : > { %s11777_s20 = smul.u32 576, %s14251_s23  ;;  %s16329_s5 = sld [smem:[#allocation63_spill]] }
  0xee   : > { %s11778_s25 = smul.u32 9216, %s13881_s18  ;;  %s16267_s8 = scalar_lea.sflag [#allocation13], %s14248_s24 }
  0xef   : > { %s678_s0 = scalar_lea.vmem [#allocation12], %s11777_s20 }
  0xf0   : > { %s685_s30 = sshll.u32 %s678_s0, 4  ;;  %s14328_s30 = int_to_ptr.vmem [resolvable:$true] %s685_s30 }
  0xf3   : > { %s14326_s2 = scalar_lea.hbm %s16329_s5, %s11778_s25  ;;  %s13431_s19 = scalar_lea.hbm %s16329_s5, 55296 }
  0xf4   : > { %s13427_s3 = scalar_lea.hbm %s14326_s2, 9216  ;;  %p13432_p5 = scmp.lt.u32.totalorder %s14326_s2, %s16329_s5 }
  0xf5   : > { %p13428_p8 = scmp.ne.s32.totalorder %s14326_s2, %s13427_s3  ;;  %p13433_p10 = scmp.lt.u32.totalorder %s13431_s19, %s13427_s3 }
  0xf6   : > { %p13435_p6 = scmp.lt.u32.totalorder %s13427_s3, %s14326_s2 }
  0xf7   : > { %p13429_p11 = pnand %p13428_p8, %p16327_p4  ;;  %p13434_p9 = por %p13433_p10, %p13432_p5 }
  0xf9   : > { %p13430_p0 = pneg %p13429_p11  ;;  %p13436_p7 = por %p13435_p6, %p13434_p9 }
  0xfb   : > { %p13437_p1 = pnand %p13436_p7, %p13430_p0 }
  0xfd   : > { %13440 = shalt.err (!%p13437_p1)
}
  0xfe   : > { %s13441_s20 = scalar_lea.vmem %s14328_s30, 9216  ;;  %s13901_s21 = smov [#allocation12]  }
  0xff   : > { %p13442_p3 = scmp.ne.s32.totalorder %s14328_s30, %s13441_s20  ;;  %s13445_s12 = sshll.u32 %s13901_s21, 4  ;;  %s13446_s12 = int_to_ptr.vmem [resolvable:$false] %s13445_s12 }
 0x100   : > { %s13447_s0 = scalar_lea.vmem %s13446_s12, 18432  ;;  %p13448_p2 = scmp.lt.s32.totalorder %s14328_s30, %s13446_s12 }
 0x101   : > { %p13443_p13 = pnand %p13442_p3, %p16327_p4  ;;  %p13449_p8 = scmp.lt.s32.totalorder %s13447_s0, %s13441_s20 }
 0x103   : > { %p13444_p12 = pneg %p13443_p13  ;;  %p13450_p11 = por %p13449_p8, %p13448_p2 }
 0x105   : > { %p13451_p5 = pnand %p13450_p11, %p13444_p12 }
 0x107   : > { %13454 = shalt.err (!%p13451_p5)
}
 0x108   : > { %s16270_s3 = smov 192   ;;  %s16271_s27 = smov 12  }
 0x109   : > { %11813 = dma.hbm_to_vmem [thread:$0]  (%p16327_p4), %s14326_s2, 9216, %s14328_s30, %s16267_s8, %s16270_s3, %s16270_s3, %s16271_s27  }
 0x10a   : > { %s16330_s7 = sld [smem:[#allocation65_spill]]  ;;  %s718_s25 = scalar_lea.vmem [#allocation15], %s14254_s10 }
 0x10b   : > { %s726_s20 = sshll.u32 %s718_s25, 4  ;;  %s11785_s21 = smul.u32 2304, %s14251_s23  ;;  %s14364_s20 = int_to_ptr.vmem [resolvable:$true] %s726_s20 }
 0x10c   : > { %s16269_s12 = scalar_lea.sflag [#allocation16], %s14248_s24 }
 0x110   : > { %s14361_s22 = scalar_lea.hbm %s16330_s7, %s14257_s4  ;;  %s13459_s28 = scalar_lea.hbm %s16330_s7, 288 }
 0x111   : > { %s13455_s0 = scalar_lea.hbm %s14361_s22, 48  ;;  %p13460_p6 = scmp.lt.u32.totalorder %s14361_s22, %s16330_s7 }
 0x112   : > { %p13456_p0 = scmp.ne.s32.totalorder %s14361_s22, %s13455_s0  ;;  %p13461_p7 = scmp.lt.u32.totalorder %s13459_s28, %s13455_s0 }
 0x113   : > { %p13463_p3 = scmp.lt.u32.totalorder %s13455_s0, %s14361_s22 }
 0x114   : > { %p13457_p10 = pnand %p13456_p0, %p16327_p4  ;;  %p13462_p1 = por %p13461_p7, %p13460_p6 }
 0x116   : > { %p13458_p9 = pneg %p13457_p10  ;;  %p13464_p13 = por %p13463_p3, %p13462_p1 }
 0x118   : > { %p13465_p12 = pnand %p13464_p13, %p13458_p9 }
 0x11a   : > { %13468 = shalt.err (!%p13465_p12)
}
 0x11b   : > { %s13469_s25 = scalar_lea.vmem %s14364_s20, 48  ;;  %s13904_s2 = smov [#allocation15]  }
 0x11c   : > { %p13470_p2 = scmp.ne.s32.totalorder %s14364_s20, %s13469_s25  ;;  %s13473_s30 = sshll.u32 %s13904_s2, 4  ;;  %s13474_s30 = int_to_ptr.vmem [resolvable:$false] %s13473_s30 }
 0x11d   : > { %s13475_s8 = scalar_lea.vmem %s13474_s30, 96  ;;  %p13476_p5 = scmp.lt.s32.totalorder %s14364_s20, %s13474_s30 }
 0x11e   : > { %p13471_p8 = pnand %p13470_p2, %p16327_p4  ;;  %p13477_p0 = scmp.lt.s32.totalorder %s13475_s8, %s13469_s25 }
 0x120   : > { %p13472_p11 = pneg %p13471_p8  ;;  %p13478_p10 = por %p13477_p0, %p13476_p5 }
 0x122   : > { %p13479_p6 = pnand %p13478_p10, %p13472_p11 }
 0x124   : > { %13482 = shalt.err (!%p13479_p6)
}
 0x125   : > { %11815 = dma.hbm_to_vmem [thread:$0]  (%p16327_p4), %s14361_s22, 48, %s14364_s20, %s16269_s12  }
 0x126   : > { %s11786_s0 = smul.u32 36864, %s13881_s18  ;;  %s756_s28 = scalar_lea.vmem [#allocation18], %s11785_s21 }
 0x127   : > { %s763_s19 = sshll.u32 %s756_s28, 4  ;;  %s16331_s9 = sld [smem:[#allocation67_spill]]  ;;  %s14401_s19 = int_to_ptr.vmem [resolvable:$true] %s763_s19 }
 0x128   : > { %s16272_s8 = scalar_lea.sflag [#allocation19], %s14248_s24 }
 0x12d   : > { %s14399_s30 = scalar_lea.hbm %s16331_s9, %s11786_s0  ;;  %s13487_s28 = scalar_lea.hbm %s16331_s9, 221184 }
 0x12e   : > { %s13483_s17 = scalar_lea.hbm %s14399_s30, 36864  ;;  %p13488_p3 = scmp.lt.u32.totalorder %s14399_s30, %s16331_s9 }
 0x12f   : > { %p13484_p9 = scmp.ne.s32.totalorder %s14399_s30, %s13483_s17  ;;  %p13489_p13 = scmp.lt.u32.totalorder %s13487_s28, %s13483_s17 }
 0x130   : > { %p13491_p2 = scmp.lt.u32.totalorder %s13483_s17, %s14399_s30 }
 0x131   : > { %p13485_p7 = pnand %p13484_p9, %p16327_p4  ;;  %p13490_p12 = por %p13489_p13, %p13488_p3 }
 0x133   : > { %p13486_p1 = pneg %p13485_p7  ;;  %p13492_p8 = por %p13491_p2, %p13490_p12 }
 0x135   : > { %p13493_p11 = pnand %p13492_p8, %p13486_p1 }
 0x137   : > { %13496 = shalt.err (!%p13493_p11)
}
 0x138   : > { %s13497_s2 = scalar_lea.vmem %s14401_s19, 36864  ;;  %s13905_s22 = smov [#allocation18]  }
 0x139   : > { %p13498_p5 = scmp.ne.s32.totalorder %s14401_s19, %s13497_s2  ;;  %s13501_s20 = sshll.u32 %s13905_s22, 4  ;;  %s13502_s20 = int_to_ptr.vmem [resolvable:$false] %s13501_s20 }
 0x13a   : > { %s13503_s12 = scalar_lea.vmem %s13502_s20, 73728  ;;  %p13504_p6 = scmp.lt.s32.totalorder %s14401_s19, %s13502_s20 }
 0x13b   : > { %p13499_p0 = pnand %p13498_p5, %p16327_p4  ;;  %p13505_p9 = scmp.lt.s32.totalorder %s13503_s12, %s13497_s2 }
 0x13d   : > { %p13500_p10 = pneg %p13499_p0  ;;  %p13506_p7 = por %p13505_p9, %p13504_p6 }
 0x13f   : > { %p13507_p3 = pnand %p13506_p7, %p13500_p10 }
 0x141   : > { %13510 = shalt.err (!%p13507_p3)
}
 0x142   : > { %s13906_s17 = smov 768   ;;  %s13907_s28 = smov 48  }
 0x143   : > { %11817 = dma.hbm_to_vmem [thread:$0]  (%p16327_p4), %s14399_s30, 36864, %s14401_s19, %s16272_s8, %s13906_s17, %s13906_s17, %s13907_s28  }
 0x144   : > { %s16332_s11 = sld [smem:[#allocation69_spill]]  ;;  %s796_s20 = scalar_lea.vmem [#allocation21], %s11785_s21 }
 0x145   : > { %s803_s12 = sshll.u32 %s796_s20, 4  ;;  %s577_s3 = sand.u32 1, %s13869_s29   ;;  %s14437_s12 = int_to_ptr.vmem [resolvable:$true] %s803_s12 }
 0x146   : > { %s16274_s27 = scalar_lea.sflag [#allocation22], %s14248_s24 }
 0x14a   : > { %s14432_s22 = scalar_lea.hbm %s16332_s11, %s11786_s0  ;;  %s13515_s0 = scalar_lea.hbm %s16332_s11, 221184 }
 0x14b   : > { %s13511_s5 = scalar_lea.hbm %s14432_s22, 36864  ;;  %p13516_p2 = scmp.lt.u32.totalorder %s14432_s22, %s16332_s11 }
 0x14c   : > { %p13512_p1 = scmp.ne.s32.totalorder %s14432_s22, %s13511_s5  ;;  %p13517_p8 = scmp.lt.u32.totalorder %s13515_s0, %s13511_s5 }
 0x14d   : > { %p13519_p5 = scmp.lt.u32.totalorder %s13511_s5, %s14432_s22 }
 0x14e   : > { %p13513_p13 = pnand %p13512_p1, %p16327_p4  ;;  %p13518_p11 = por %p13517_p8, %p13516_p2 }
 0x150   : > { %p13514_p12 = pneg %p13513_p13  ;;  %p13520_p0 = por %p13519_p5, %p13518_p11 }
 0x152   : > { %p13521_p10 = pnand %p13520_p0, %p13514_p12 }
 0x154   : > { %13524 = shalt.err (!%p13521_p10)
}
 0x155   : > { %s13525_s21 = scalar_lea.vmem %s14437_s12, 36864  ;;  %s13908_s25 = smov [#allocation21]  }
 0x156   : > { %p13526_p6 = scmp.ne.s32.totalorder %s14437_s12, %s13525_s21  ;;  %s13529_s2 = sshll.u32 %s13908_s25, 4  ;;  %s13530_s2 = int_to_ptr.vmem [resolvable:$false] %s13529_s2 }
 0x157   : > { %s13531_s20 = scalar_lea.vmem %s13530_s2, 73728  ;;  %p13532_p3 = scmp.lt.s32.totalorder %s14437_s12, %s13530_s2 }
 0x158   : > { %p13527_p9 = pnand %p13526_p6, %p16327_p4  ;;  %p13533_p1 = scmp.lt.s32.totalorder %s13531_s20, %s13525_s21 }
 0x15a   : > { %p13528_p7 = pneg %p13527_p9  ;;  %p13534_p13 = por %p13533_p1, %p13532_p3 }
 0x15c   : > { %p13535_p2 = pnand %p13534_p13, %p13528_p7 }
 0x15e   : > { %13538 = shalt.err (!%p13535_p2)
}
 0x15f   : > { %s16333_s5 = smov 12   ;;  %s16334_s19 = smov 192  }
 0x160   : > { %s16335_s30 = sld [smem:[#allocation46_spill]]  ;;  %s16336_s0 = sld [smem:[#allocation49_spill]] }
 0x161   : > { %11819 = dma.hbm_to_vmem [thread:$0]  (%p16327_p4), %s14432_s22, 36864, %s14437_s12, %s16274_s27, %s16334_s19, %s16334_s19, %s16333_s5  }
 0x162   : > { %s11767_s17 = smul.u32 24, %s577_s3  ;;  %s16337_s2 = sld [smem:[#allocation60_spill]] }
 0x163   : > { %s619_s8 = scalar_lea.vmem [#allocation8], %s14254_s10  ;;  %s16338_s13 = sld [smem:[#allocation58_spill]] }
 0x164   : > { %s627_s7 = sshll.u32 %s619_s8, 4  ;;  %s581_s22 = scalar_lea.vmem [#allocation3], %s11767_s17  ;;  %s14483_s7 = int_to_ptr.vmem [resolvable:$true] %s627_s7 }
 0x165   : > { %s589_s12 = sshll.u32 %s581_s22, 4  ;;  %s578_s5 = scalar_lea.sflag [#allocation4], %s577_s3  ;;  %s14481_s12 = int_to_ptr.vmem [resolvable:$true] %s589_s12 }
 0x166   : > { %s11768_s28 = smul.u32 384, %s16335_s30  ;;  %p16339_p8 = scmp.ne.s32.totalorder %s16336_s0, 0 }
 0x168   : > { %s14473_s20 = scalar_lea.hbm %s16337_s2, %s14257_s4 }
 0x169   : > { %s14479_s14 = scalar_lea.hbm %s16338_s13, %s11768_s28  ;;  %s13543_s8 = scalar_lea.hbm %s16338_s13, 768 }
 0x16a   : > { %s13539_s19 = scalar_lea.hbm %s14479_s14, 384  ;;  %p13544_p0 = scmp.lt.u32.totalorder %s14479_s14, %s16338_s13 }
 0x16b   : > { %p13540_p12 = scmp.ne.s32.totalorder %s14479_s14, %s13539_s19  ;;  %p13545_p10 = scmp.lt.u32.totalorder %s13543_s8, %s13539_s19 }
 0x16c   : > { %p13547_p9 = scmp.lt.u32.totalorder %s13539_s19, %s14479_s14 }
 0x16d   : > { %p13541_p11 = pnand %p13540_p12, %p16339_p8  ;;  %p13546_p6 = por %p13545_p10, %p13544_p0 }
 0x16f   : > { %p13542_p5 = pneg %p13541_p11  ;;  %p13548_p7 = por %p13547_p9, %p13546_p6 }
 0x171   : > { %p13549_p3 = pnand %p13548_p7, %p13542_p5 }
 0x173   : > { %13552 = shalt.err (!%p13549_p3)
}
 0x174   : > { %s13553_s3 = scalar_lea.vmem %s14481_s12, 384  ;;  %s13909_s17 = smov [#allocation3]  }
 0x175   : > { %p13554_p1 = scmp.ne.s32.totalorder %s14481_s12, %s13553_s3  ;;  %s13557_s21 = sshll.u32 %s13909_s17, 4  ;;  %s13558_s21 = int_to_ptr.vmem [resolvable:$false] %s13557_s21 }
 0x176   : > { %s13559_s25 = scalar_lea.vmem %s13558_s21, 768  ;;  %p13560_p12 = scmp.lt.s32.totalorder %s14481_s12, %s13558_s21 }
 0x177   : > { %p13555_p13 = pnand %p13554_p1, %p16339_p8  ;;  %p13561_p11 = scmp.lt.s32.totalorder %s13559_s25, %s13553_s3 }
 0x179   : > { %p13556_p2 = pneg %p13555_p13  ;;  %p13562_p0 = por %p13561_p11, %p13560_p12 }
 0x17b   : > { %p13563_p10 = pnand %p13562_p0, %p13556_p2 }
 0x17d   : > { %13566 = shalt.err (!%p13563_p10)
}
 0x17e   : > { %11808 = dma.hbm_to_vmem [thread:$0]  (%p16339_p8), %s14479_s14, 384, %s14481_s12, %s578_s5  }
 0x17f   : > { %s13567_s22 = scalar_lea.hbm %s14473_s20, 48  ;;  %s13571_s11 = scalar_lea.hbm %s16337_s2, 288 }
 0x180   : > { %p13568_p5 = scmp.ne.s32.totalorder %s14473_s20, %s13567_s22  ;;  %p13572_p7 = scmp.lt.u32.totalorder %s14473_s20, %s16337_s2 }
 0x181   : > { %p13573_p3 = scmp.lt.u32.totalorder %s13571_s11, %s13567_s22  ;;  %p13575_p13 = scmp.lt.u32.totalorder %s13567_s22, %s14473_s20 }
 0x182   : > { %p13569_p6 = pnand %p13568_p5, %p16327_p4 }
 0x183   : > { %p13574_p1 = por %p13573_p3, %p13572_p7 }
 0x184   : > { %p13570_p9 = pneg %p13569_p6 }
 0x185   : > { %p13576_p2 = por %p13575_p13, %p13574_p1 }
 0x187   : > { %p13577_p12 = pnand %p13576_p2, %p13570_p9 }
 0x189   : > { %13580 = shalt.err (!%p13577_p12)
}
 0x18a   : > { %s13581_s14 = scalar_lea.vmem %s14483_s7, 48  ;;  %s13910_s0 = smov [#allocation8]  }
 0x18b   : > { %p13582_p8 = scmp.ne.s32.totalorder %s14483_s7, %s13581_s14  ;;  %s13585_s12 = sshll.u32 %s13910_s0, 4  ;;  %s13586_s12 = int_to_ptr.vmem [resolvable:$false] %s13585_s12 }
 0x18c   : > { %s13587_s5 = scalar_lea.vmem %s13586_s12, 96  ;;  %p13588_p10 = scmp.lt.s32.totalorder %s14483_s7, %s13586_s12 }
 0x18d   : > { %p13583_p11 = pnand %p13582_p8, %p16327_p4  ;;  %p13589_p5 = scmp.lt.s32.totalorder %s13587_s5, %s13581_s14 }
 0x18f   : > { %p13584_p0 = pneg %p13583_p11  ;;  %p13590_p6 = por %p13589_p5, %p13588_p10 }
 0x191   : > { %p13591_p7 = pnand %p13590_p6, %p13584_p0 }
 0x193   : > { %13594 = shalt.err (!%p13591_p7)
}
 0x194   : > { %s16340_s28 = scalar_lea.sflag [#allocation7], %s14248_s24  ;;  %s11775_s3 = smul.u32 9, %s14251_s23 }
 0x195   : > { %11810 = dma.hbm_to_vmem [thread:$0]  (%p16327_p4), %s14473_s20, 48, %s14483_s7, %s16340_s28  }
 0x196   : > { %s11776_s17 = smul.u32 144, %s13881_s18  ;;  %s16341_s22 = sld [smem:[#allocation64_spill]] }
 0x197   : > { %s699_s9 = scalar_lea.vmem [#allocation14], %s14254_s10  ;;  %s16342_s14 = sld [smem:[#allocation62_spill]] }
 0x198   : > { %s707_s11 = sshll.u32 %s699_s9, 4  ;;  %s659_s12 = scalar_lea.vmem [#allocation11], %s11775_s3  ;;  %s14545_s11 = int_to_ptr.vmem [resolvable:$true] %s707_s11 }
 0x199   : > { %s667_s7 = sshll.u32 %s659_s12, 4  ;;  %s668_s7 = int_to_ptr.vmem [resolvable:$true] %s667_s7 }
 0x19c   : > { %s14537_s19 = scalar_lea.hbm %s16341_s22, %s14257_s4 }
 0x19d   : > { %s14543_s0 = scalar_lea.hbm %s16342_s14, %s11776_s17  ;;  %s13599_s21 = scalar_lea.hbm %s16342_s14, 864 }
 0x19e   : > { %s13595_s20 = scalar_lea.hbm %s14543_s0, 144  ;;  %p13600_p13 = scmp.lt.u32.totalorder %s14543_s0, %s16342_s14 }
 0x19f   : > { %p13596_p9 = scmp.ne.s32.totalorder %s14543_s0, %s13595_s20  ;;  %p13601_p2 = scmp.lt.u32.totalorder %s13599_s21, %s13595_s20 }
 0x1a0   : > { %p13603_p8 = scmp.lt.u32.totalorder %s13595_s20, %s14543_s0 }
 0x1a1   : > { %p13597_p3 = pnand %p13596_p9, %p16327_p4  ;;  %p13602_p12 = por %p13601_p2, %p13600_p13 }
 0x1a3   : > { %p13598_p1 = pneg %p13597_p3  ;;  %p13604_p11 = por %p13603_p8, %p13602_p12 }
 0x1a5   : > { %p13605_p0 = pnand %p13604_p11, %p13598_p1 }
 0x1a7   : > { %13608 = shalt.err (!%p13605_p0)
}
 0x1a8   : > { %s13609_s3 = scalar_lea.vmem %s668_s7, 144  ;;  %s13911_s9 = smov [#allocation11]  }
 0x1a9   : > { %p13610_p10 = scmp.ne.s32.totalorder %s668_s7, %s13609_s3  ;;  %s13613_s8 = sshll.u32 %s13911_s9, 4  ;;  %s13614_s8 = int_to_ptr.vmem [resolvable:$false] %s13613_s8 }
 0x1aa   : > { %s13615_s30 = scalar_lea.vmem %s13614_s8, 288  ;;  %p13616_p7 = scmp.lt.s32.totalorder %s668_s7, %s13614_s8 }
 0x1ab   : > { %p13611_p5 = pnand %p13610_p10, %p16327_p4  ;;  %p13617_p9 = scmp.lt.s32.totalorder %s13615_s30, %s13609_s3 }
 0x1ad   : > { %p13612_p6 = pneg %p13611_p5  ;;  %p13618_p3 = por %p13617_p9, %p13616_p7 }
 0x1af   : > { %p13619_p2 = pnand %p13618_p3, %p13612_p6 }
 0x1b1   : > { %13622 = shalt.err (!%p13619_p2)
}
 0x1b2   : > { %s16343_s12 = scalar_lea.sflag [#allocation10], %s14248_s24  ;;  %s13623_s20 = scalar_lea.hbm %s14537_s19, 48 }
 0x1b3   : > { %11812 = dma.hbm_to_vmem [thread:$0]  (%p16327_p4), %s14543_s0, 144, %s668_s7, %s16343_s12  }
 0x1b4   : > { %p13624_p1 = scmp.ne.s32.totalorder %s14537_s19, %s13623_s20  ;;  %s13627_s21 = scalar_lea.hbm %s16341_s22, 288 }
 0x1b5   : > { %p13628_p8 = scmp.lt.u32.totalorder %s14537_s19, %s16341_s22  ;;  %p13629_p11 = scmp.lt.u32.totalorder %s13627_s21, %s13623_s20 }
 0x1b6   : > { %p13625_p13 = pnand %p13624_p1, %p16327_p4  ;;  %p13631_p10 = scmp.lt.u32.totalorder %s13623_s20, %s14537_s19 }
 0x1b7   : > { %p13630_p0 = por %p13629_p11, %p13628_p8 }
 0x1b8   : > { %p13626_p12 = pneg %p13625_p13 }
 0x1b9   : > { %p13632_p5 = por %p13631_p10, %p13630_p0 }
 0x1bb   : > { %p13633_p6 = pnand %p13632_p5, %p13626_p12 }
 0x1bd   : > { %13636 = shalt.err (!%p13633_p6)
}
 0x1be   : > { %s13637_s0 = scalar_lea.vmem %s14545_s11, 48  ;;  %s13912_s7 = smov [#allocation14]  }
 0x1bf   : > { %p13638_p7 = scmp.ne.s32.totalorder %s14545_s11, %s13637_s0  ;;  %s13641_s3 = sshll.u32 %s13912_s7, 4  ;;  %s13642_s3 = int_to_ptr.vmem [resolvable:$false] %s13641_s3 }
 0x1c0   : > { %s13643_s9 = scalar_lea.vmem %s13642_s3, 96  ;;  %p13644_p2 = scmp.lt.s32.totalorder %s14545_s11, %s13642_s3 }
 0x1c1   : > { %p13639_p9 = pnand %p13638_p7, %p16327_p4  ;;  %p13645_p1 = scmp.lt.s32.totalorder %s13643_s9, %s13637_s0 }
 0x1c3   : > { %p13640_p3 = pneg %p13639_p9  ;;  %p13646_p13 = por %p13645_p1, %p13644_p2 }
 0x1c5   : > { %p13647_p8 = pnand %p13646_p13, %p13640_p3 }
 0x1c7   : > { %13650 = shalt.err (!%p13647_p8)
}
 0x1c8   : > { %s16344_s8 = scalar_lea.sflag [#allocation13], %s14248_s24  ;;  %s16345_s20 = sld [smem:[#allocation66_spill]] }
 0x1c9   : > { %11814 = dma.hbm_to_vmem [thread:$0]  (%p16327_p4), %s14537_s19, 48, %s14545_s11, %s16344_s8  }
 0x1ca   : > { %s737_s28 = scalar_lea.vmem [#allocation17], %s14254_s10  ;;  %s11787_s17 = smul.u32 12, %s14251_s23 }
 0x1cb   : > { %s745_s21 = sshll.u32 %s737_s28, 4  ;;  %s11788_s25 = smul.u32 192, %s13881_s18  ;;  %s746_s21 = int_to_ptr.vmem [resolvable:$true] %s745_s21 }
 0x1ce   : > { %s14593_s5 = scalar_lea.hbm %s16345_s20, %s14257_s4  ;;  %s13655_s7 = scalar_lea.hbm %s16345_s20, 288 }
 0x1cf   : > { %s13651_s0 = scalar_lea.hbm %s14593_s5, 48  ;;  %p13656_p10 = scmp.lt.u32.totalorder %s14593_s5, %s16345_s20 }
 0x1d0   : > { %p13652_p12 = scmp.ne.s32.totalorder %s14593_s5, %s13651_s0  ;;  %p13657_p5 = scmp.lt.u32.totalorder %s13655_s7, %s13651_s0 }
 0x1d1   : > { %p13659_p7 = scmp.lt.u32.totalorder %s13651_s0, %s14593_s5 }
 0x1d2   : > { %p13653_p11 = pnand %p13652_p12, %p16327_p4  ;;  %p13658_p6 = por %p13657_p5, %p13656_p10 }
 0x1d4   : > { %p13654_p0 = pneg %p13653_p11  ;;  %p13660_p9 = por %p13659_p7, %p13658_p6 }
 0x1d6   : > { %p13661_p3 = pnand %p13660_p9, %p13654_p0 }
 0x1d8   : > { %13664 = shalt.err (!%p13661_p3)
}
 0x1d9   : > { %s13665_s8 = scalar_lea.vmem %s746_s21, 48  ;;  %s13913_s30 = smov [#allocation17]  }
 0x1da   : > { %p13666_p2 = scmp.ne.s32.totalorder %s746_s21, %s13665_s8  ;;  %s13669_s12 = sshll.u32 %s13913_s30, 4  ;;  %s13670_s12 = int_to_ptr.vmem [resolvable:$false] %s13669_s12 }
 0x1db   : > { %s13671_s28 = scalar_lea.vmem %s13670_s12, 96  ;;  %p13672_p8 = scmp.lt.s32.totalorder %s746_s21, %s13670_s12 }
 0x1dc   : > { %p13667_p1 = pnand %p13666_p2, %p16327_p4  ;;  %p13673_p12 = scmp.lt.s32.totalorder %s13671_s28, %s13665_s8 }
 0x1de   : > { %p13668_p13 = pneg %p13667_p1  ;;  %p13674_p11 = por %p13673_p12, %p13672_p8 }
 0x1e0   : > { %p13675_p5 = pnand %p13674_p11, %p13668_p13 }
 0x1e2   : > { %13678 = shalt.err (!%p13675_p5)
}
 0x1e3   : > { %s16346_s0 = scalar_lea.sflag [#allocation16], %s14248_s24  ;;  %s16347_s7 = sld [smem:[#allocation68_spill]] }
 0x1e4   : > { %11816 = dma.hbm_to_vmem [thread:$0]  (%p16327_p4), %s14593_s5, 48, %s746_s21, %s16346_s0  }
 0x1e5   : > { %s777_s9 = scalar_lea.vmem [#allocation20], %s11787_s17  ;;  %s16348_s28 = sld [smem:[#allocation70_spill]] }
 0x1e6   : > { %s785_s8 = sshll.u32 %s777_s9, 4  ;;  %s786_s8 = int_to_ptr.vmem [resolvable:$true] %s785_s8 }
 0x1e9   : > { %s14620_s3 = scalar_lea.hbm %s16347_s7, %s11788_s25  ;;  %s13683_s23 = scalar_lea.hbm %s16347_s7, 1152 }
 0x1ea   : > { %s13679_s13 = scalar_lea.hbm %s14620_s3, 192  ;;  %p13684_p7 = scmp.lt.u32.totalorder %s14620_s3, %s16347_s7 }
 0x1eb   : > { %s16349_s27 = smov %s16348_s28  ;;  %s14628_s2 = scalar_lea.hbm %s16348_s28, %s14257_s4 }
 0x1ec   : > { %p13680_p0 = scmp.ne.s32.totalorder %s14620_s3, %s13679_s13  ;;  %p13685_p9 = scmp.lt.u32.totalorder %s13683_s23, %s13679_s13 }
 0x1ed   : > { %p13687_p2 = scmp.lt.u32.totalorder %s13679_s13, %s14620_s3 }
 0x1ee   : > { %p13681_p10 = pnand %p13680_p0, %p16327_p4  ;;  %p13686_p3 = por %p13685_p9, %p13684_p7 }
 0x1f0   : > { %p13682_p6 = pneg %p13681_p10  ;;  %p13688_p1 = por %p13687_p2, %p13686_p3 }
 0x1f2   : > { %p13689_p13 = pnand %p13688_p1, %p13682_p6 }
 0x1f4   : > { %13692 = shalt.err (!%p13689_p13)
}
 0x1f5   : > { %s13693_s4 = scalar_lea.vmem %s786_s8, 192  ;;  %s13914_s17 = smov [#allocation20]  }
 0x1f6   : > { %p13694_p8 = scmp.ne.s32.totalorder %s786_s8, %s13693_s4  ;;  %s13697_s19 = sshll.u32 %s13914_s17, 4  ;;  %s13698_s19 = int_to_ptr.vmem [resolvable:$false] %s13697_s19 }
 0x1f7   : > { %s13699_s11 = scalar_lea.vmem %s13698_s19, 384  ;;  %p13700_p5 = scmp.lt.s32.totalorder %s786_s8, %s13698_s19 }
 0x1f8   : > { %p13695_p12 = pnand %p13694_p8, %p16327_p4  ;;  %p13701_p0 = scmp.lt.s32.totalorder %s13699_s11, %s13693_s4 }
 0x1fa   : > { %p13696_p11 = pneg %p13695_p12  ;;  %p13702_p10 = por %p13701_p0, %p13700_p5 }
 0x1fc   : > { %p13703_p7 = pnand %p13702_p10, %p13696_p11 }
 0x1fe   : > { %13706 = shalt.err (!%p13703_p7)
}
 0x1ff   : > { %s16350_s13 = scalar_lea.sflag [#allocation19], %s14248_s24  ;;  %s817_s9 = scalar_lea.vmem [#allocation23], %s14254_s10 }
 0x200   : > { %11818 = dma.hbm_to_vmem [thread:$0]  (%p16327_p4), %s14620_s3, 192, %s786_s8, %s16350_s13  }
 0x201   : > { %s825_s30 = sshll.u32 %s817_s9, 4  ;;  %s13707_s12 = scalar_lea.hbm %s14628_s2, 48  ;;  %s826_s30 = int_to_ptr.vmem [resolvable:$true] %s825_s30 }
 0x202   : > { %p13708_p6 = scmp.ne.s32.totalorder %s14628_s2, %s13707_s12  ;;  %s13711_s21 = scalar_lea.hbm %s16349_s27, 288 }
 0x203   : > { %p13712_p2 = scmp.lt.u32.totalorder %s14628_s2, %s16349_s27  ;;  %p13713_p1 = scmp.lt.u32.totalorder %s13711_s21, %s13707_s12 }
 0x204   : > { %p13709_p9 = pnand %p13708_p6, %p16327_p4  ;;  %p13715_p8 = scmp.lt.u32.totalorder %s13707_s12, %s14628_s2 }
 0x205   : > { %p13714_p13 = por %p13713_p1, %p13712_p2 }
 0x206   : > { %p13710_p3 = pneg %p13709_p9 }
 0x207   : > { %p13716_p12 = por %p13715_p8, %p13714_p13 }
 0x209   : > { %p13717_p11 = pnand %p13716_p12, %p13710_p3 }
 0x20b   : > { %13720 = shalt.err (!%p13717_p11)
}
 0x20c   : > { %s13721_s10 = scalar_lea.vmem %s826_s30, 48  ;;  %s13915_s3 = smov [#allocation23]  }
 0x20d   : > { %p13722_p5 = scmp.ne.s32.totalorder %s826_s30, %s13721_s10  ;;  %s13725_s8 = sshll.u32 %s13915_s3, 4  ;;  %s13726_s8 = int_to_ptr.vmem [resolvable:$false] %s13725_s8 }
 0x20e   : > { %s13727_s0 = scalar_lea.vmem %s13726_s8, 96  ;;  %p13728_p7 = scmp.lt.s32.totalorder %s826_s30, %s13726_s8 }
 0x20f   : > { %p13723_p0 = pnand %p13722_p5, %p16327_p4  ;;  %p13729_p6 = scmp.lt.s32.totalorder %s13727_s0, %s13721_s10 }
 0x211   : > { %p13724_p10 = pneg %p13723_p0  ;;  %p13730_p9 = por %p13729_p6, %p13728_p7 }
 0x213   : > { %p13731_p1 = pnand %p13730_p9, %p13724_p10 }
 0x215   : > { %13734 = shalt.err (!%p13731_p1)
}
 0x216   : > { %s16351_s4 = scalar_lea.sflag [#allocation22], %s14248_s24 }
 0x217   : > { %11820 = dma.hbm_to_vmem [thread:$0]  (%p16327_p4), %s14628_s2, 48, %s826_s30, %s16351_s4  }
 0x218 PF: > { %s16352_s17 = sld [smem:[#allocation57_spill]] }
 0x21e   : > { %p16353_p3 = scmp.ne.s32.totalorder %s16352_s17, 0 }
 0x21f   : > { %s16354_s19 = sld [smem:[#allocation43_spill]] (!%p16353_p3)  ;;  %s16355_s11 = sld [smem:[#allocation51_spill]] (!%p16353_p3) }
 0x220   : > { %834 = sbr.rel (%p16353_p3) target bundleno = 5203 (0x1453), region = 88 }
 0x225   : > { %s14672_s13 = sand.u32 (!%p16353_p3), 1, %s16354_s19   ;;  %p16356_p2 = scmp.ne.s32.totalorder (!%p16353_p3), %s16355_s11, 0 }
 0x226   : > { %s11793_s9 = smul.u32 (!%p16353_p3), 24, %s14672_s13  ;;  %s837_s12 = scalar_lea.sflag (!%p16353_p3), [#allocation4], %s14672_s13 }
 0x228   : > { %s14676_s28 = scalar_lea.vmem [#allocation3], %s11793_s9 }
 0x229   : > { %13808 = dma.done.wait (%p16356_p2), %s837_s12, 384  }
 0x22a   : > { %13810 = vsyncadd (%p16356_p2), %s837_s12, 4294966912  ;;  %s16357_s6 = sld [smem:[#allocation47_spill]]  ;;  %s16358_s24 = sld [smem:[#allocation41_spill]] }
 0x22b   : > { %s16359_s2 = sld [smem:[#allocation54_spill]] }
 0x230   : > { %s14683_s30 = sand.u32 1, %s16357_s6   ;;  %s14686_s5 = sand.u32 1, %s16358_s24  }
 0x231   : > { %s14689_s21 = smul.u32 3, %s14686_s5  ;;  %s846_s23 = scalar_lea.sflag [#allocation7], %s14683_s30 }
 0x232   : > { %p16360_p4 = scmp.ne.s32.totalorder %s16359_s2, 0 }
 0x233   : > { %s849_s25 = scalar_lea.vmem [#allocation6], %s14689_s21 }
 0x234   : > { %13812 = dma.done.wait (%p16360_p4), %s846_s23, 96  }
 0x235   : > { %13814 = vsyncadd (%p16360_p4), %s846_s23, 4294967200  ;;  %s11795_s10 = smul.u32 1728, %s14686_s5  ;;  %s858_s3 = scalar_lea.vmem [#allocation8], %s14689_s21 }
 0x236   : > { %s864_s8 = scalar_lea.sflag [#allocation10], %s14683_s30 }
 0x237   : > { %s14700_s0 = scalar_lea.vmem [#allocation9], %s11795_s10 }
 0x238   : > { %13816 = dma.done.wait (%p16360_p4), %s864_s8, 27792  }
 0x239   : > { %13818 = vsyncadd (%p16360_p4), %s864_s8, 4294939504  ;;  %s11796_s4 = smul.u32 9, %s14686_s5  ;;  %s882_s11 = scalar_lea.sflag [#allocation13], %s14683_s30 }
 0x23a   : > { %s11797_s17 = smul.u32 576, %s14686_s5 }
 0x23b   : > { %s14708_s19 = scalar_lea.vmem [#allocation11], %s11796_s4 }
 0x23c   : > { %s14711_s9 = scalar_lea.vmem [#allocation12], %s11797_s17 }
 0x23d   : > { %13820 = dma.done.wait (%p16360_p4), %s882_s11, 9264  }
 0x23e   : > { %13822 = vsyncadd (%p16360_p4), %s882_s11, 4294958032  ;;  %s900_s24 = scalar_lea.sflag [#allocation16], %s14683_s30 }
 0x23f   : > { %13824 = dma.done.wait (%p16360_p4), %s900_s24, 96  }
 0x240   : > { %13826 = vsyncadd (%p16360_p4), %s900_s24, 4294967200  ;;  %s11798_s10 = smul.u32 2304, %s14686_s5  ;;  %s918_s4 = scalar_lea.sflag [#allocation19], %s14683_s30 }
 0x242   : > { %s14727_s17 = scalar_lea.vmem [#allocation18], %s11798_s10 }
 0x243   : > { %13828 = dma.done.wait (%p16360_p4), %s918_s4, 37056  }
 0x244   : > { %13830 = vsyncadd (%p16360_p4), %s918_s4, 4294930240  ;;  %s11799_s11 = smul.u32 12, %s14686_s5  ;;  %s936_s24 = scalar_lea.sflag [#allocation22], %s14683_s30 }
 0x245   : > { %s14737_s12 = scalar_lea.vmem [#allocation21], %s11798_s10 }
 0x246   : > { %s14734_s23 = scalar_lea.vmem [#allocation20], %s11799_s11 }
 0x247   : > { %13832 = dma.done.wait (%p16360_p4), %s936_s24, 36912  }
 0x248   : > { %13834 = vsyncadd (%p16360_p4), %s936_s24, 4294930384  ;;  %s948_s8 = scalar_lea.vmem [#allocation23], %s14689_s21  ;;  %p16361_p13 = scmp.eq.s32.totalorder %s16357_s6, 0 }
 0x24a   : > { %13836 = dma.done.wait (%p16361_p13), [#allocation25], 96   ;;  %p16362_p8 = pmov %p16361_p13 }
 0x24c   : > { %13838 = vsyncadd (%p16362_p8), [#allocation25], 4294967200  ;;  %p16363_p12 = pmov %p16362_p8 }
 0x24d   : > { %p16364_p11 = pmov %p16362_p8 }
 0x24e   : > { %13840 = dma.done.wait (%p16363_p12), [#allocation28], 3088  }
 0x24f   : > { %13842 = vsyncadd (%p16364_p11), [#allocation28], 4294964208  ;;  %s10274_s30 = sshll.u32 %s14672_s13, 3  ;;  %s16365_s2 = sld [smem:[#allocation44_spill]] }
 0x250   : > { %s14753_s5 = scalar_lea.vmem [#allocation30], %s10274_s30 }
 0x255   : > { %p10275_p5 = scmp.ne.s32.totalorder %s16365_s2, 0 }
 0x256   : > { %v1080_v0 = vld [vmem:[%s14676_s28] sm:$0xff] (!%p10275_p5)  ;;  %v1081_v1 = vld [vmem:[%s14676_s28 + $0x8] sm:$0xff] (!%p10275_p5)  ;;  %v1082_v2 = vld [vmem:[%s14676_s28 + $0x10] sm:$0xff] (!%p10275_p5) }
 0x257   : > { %1079 = sbr.rel (%p10275_p5) target bundleno = 606 (0x25e), region = 160  ;;  %1083 = vst [vmem:[#allocation2] sm:$0xff] (!%p10275_p5), %v1080_v0  ;;  %1084 = vst [vmem:[#allocation2 + $0x8] sm:$0xff] (!%p10275_p5), %v1081_v1 }
 0x258   : > { %1085 = vst [vmem:[#allocation2 + $0x10] sm:$0xff] (!%p10275_p5), %v1082_v2 }
 0x25e PF: > { %v14759_v3 = vld [vmem:[#allocation2] sm:$0xff]  ;;  %v14761_v4 = vld [vmem:[#allocation2 + $0x8] sm:$0xff]  ;;  %v11977_v10 = vld [vmem:[%s14700_s0 + $0x4] ss:$36 sps:$4 sm:$0xff]   ;;  %vm13918_vm0 = vmmov 0   ;;  %vm2966_vm1 = vcmask 523264  }
 0x25f   : > { %v1088_v5 = vld [vmem:[#allocation2 + $0x10] sm:$0xff]  ;;  %v1091_v6 = vadd.f32 %v14761_v4, %v14759_v3  ;;  %v1097_v7 = vmul.f32 %v14759_v3, %v14759_v3  ;;  %v1098_v8 = vmul.f32 %v14761_v4, %v14761_v4  ;;  %v11979_v11 = vld [vmem:[%s14700_s0 + $0xc] ss:$36 sps:$4 sm:$0xff]   ;;  %2549 = vmatprep.subr.bf16.mxu0 %v11977_v10  ;;  %v11985_v18 = vld [vmem:[%s14700_s0 + $0x54] ss:$36 sps:$4 sm:$0xff]   ;;  %s13919_s28 = smov 64  }
 0x260   : > { %v1099_v9 = vmul.f32 %v1088_v5, %v1088_v5  ;;  %v11981_v14 = vld [vmem:[%s14700_s0] ss:$36 sps:$4 sm:$0xff]   ;;  %v11982_v15 = vld [vmem:[%s14700_s0 + $0x8] ss:$36 sps:$4 sm:$0xff]   ;;  %2631 = vmatprep.subr.bf16.mxu1 %v11979_v11  ;;  %v11988_v20 = vld [vmem:[%s14700_s0 + $0x50] ss:$36 sps:$4 sm:$0xff]  }
 0x261   : > { %v1092_v12 = vadd.f32 %v1091_v6, %v1088_v5  ;;  %v1100_v13 = vadd.f32 %v1098_v8, %v1097_v7  ;;  %v11983_v16 = vld [vmem:[%s14700_s0 + $0x4c] ss:$36 sps:$4 sm:$0xff]   ;;  %2550 = vmatpush1.bf16.msra.mxu0 %v11981_v14  ;;  %2632 = vmatpush1.bf16.msra.mxu1 %v11982_v15  ;;  %v11989_v21 = vld [vmem:[%s14700_s0 + $0x94] ss:$36 sps:$4 sm:$0xff]   ;;  %v11991_v22 = vld [vmem:[%s14700_s0 + $0x9c] ss:$36 sps:$4 sm:$0xff]  }
 0x262   : > { %v11987_v19 = vld [vmem:[%s14700_s0 + $0x48] ss:$36 sps:$4 sm:$0xff]   ;;  %2551 = vmatprep.subr.bf16.mxu0 %v11983_v16  ;;  %2633 = vmatprep.subr.bf16.mxu1 %v11985_v18  ;;  %v11993_v23 = vld [vmem:[%s14700_s0 + $0x90] ss:$36 sps:$4 sm:$0xff]   ;;  %v11994_v24 = vld [vmem:[%s14700_s0 + $0x98] ss:$36 sps:$4 sm:$0xff]  }
 0x263   : > { %1093 = vadd.xlane.f32.xlu0 %v1092_v12  ;;  %v1101_v17 = vadd.f32 %v1100_v13, %v1099_v9  ;;  %v11995_v25 = vld [vmem:[%s14700_s0 + $0xdc] ss:$36 sps:$4 sm:$0xff]   ;;  %v11997_v26 = vld [vmem:[%s14700_s0 + $0xe4] ss:$36 sps:$4 sm:$0xff]   ;;  %v12003_v30 = vld [vmem:[%s14700_s0 + $0x12c] ss:$36 sps:$4 sm:$0xff]  }
 0x264   : > { %v11999_v27 = vld [vmem:[%s14700_s0 + $0xd8] ss:$36 sps:$4 sm:$0xff]   ;;  %v12000_v28 = vld [vmem:[%s14700_s0 + $0xe0] ss:$36 sps:$4 sm:$0xff]   ;;  %v12006_v32 = vld [vmem:[%s14700_s0 + $0x128] ss:$36 sps:$4 sm:$0xff]  }
 0x265   : > { %2552 = vmatpush1.bf16.msra.mxu0 %v11987_v19  ;;  %2634 = vmatpush1.bf16.msra.mxu1 %v11988_v20  ;;  %v12001_v29 = vld [vmem:[%s14700_s0 + $0x124] ss:$36 sps:$4 sm:$0xff]   ;;  %v12007_v33 = vld [vmem:[%s14700_s0 + $0x16c] ss:$36 sps:$4 sm:$0xff]   ;;  %v12009_v34 = vld [vmem:[%s14700_s0 + $0x174] ss:$36 sps:$4 sm:$0xff]  }
 0x266   : > { %2553 = vmatprep.subr.bf16.mxu0 %v11989_v21  ;;  %2635 = vmatprep.subr.bf16.mxu1 %v11991_v22  ;;  %v12005_v31 = vld [vmem:[%s14700_s0 + $0x120] ss:$36 sps:$4 sm:$0xff]   ;;  %v12011_v35 = vld [vmem:[%s14700_s0 + $0x168] ss:$36 sps:$4 sm:$0xff]   ;;  %v12012_v36 = vld [vmem:[%s14700_s0 + $0x170] ss:$36 sps:$4 sm:$0xff]  }
 0x267   : > { %1102 = vadd.xlane.f32.xlu0 %v1101_v17  ;;  %v12013_v37 = vld [vmem:[%s14700_s0 + $0x1b4] ss:$36 sps:$4 sm:$0xff]   ;;  %v12015_v38 = vld [vmem:[%s14700_s0 + $0x1bc] ss:$36 sps:$4 sm:$0xff]   ;;  %v12021_v42 = vld [vmem:[%s14700_s0 + $0x204] ss:$36 sps:$4 sm:$0xff]  }
 0x268   : > { %v12017_v39 = vld [vmem:[%s14700_s0 + $0x1b0] ss:$36 sps:$4 sm:$0xff]   ;;  %v12018_v40 = vld [vmem:[%s14700_s0 + $0x1b8] ss:$36 sps:$4 sm:$0xff]   ;;  %v12024_v44 = vld [vmem:[%s14700_s0 + $0x200] ss:$36 sps:$4 sm:$0xff]  }
 0x269   : > { %2554 = vmatpush1.bf16.msra.mxu0 %v11993_v23  ;;  %2636 = vmatpush1.bf16.msra.mxu1 %v11994_v24  ;;  %v12019_v41 = vld [vmem:[%s14700_s0 + $0x1fc] ss:$36 sps:$4 sm:$0xff]   ;;  %v12025_v45 = vld [vmem:[%s14700_s0 + $0x244] ss:$36 sps:$4 sm:$0xff]   ;;  %v12027_v46 = vld [vmem:[%s14700_s0 + $0x24c] ss:$36 sps:$4 sm:$0xff]   ;;  %v1116_v23 = vlaneseq }
 0x26a   : > { %2555 = vmatprep.subr.bf16.mxu0 %v11995_v25  ;;  %2637 = vmatprep.subr.bf16.mxu1 %v11997_v26  ;;  %v12023_v43 = vld [vmem:[%s14700_s0 + $0x1f8] ss:$36 sps:$4 sm:$0xff]   ;;  %v12029_v47 = vld [vmem:[%s14700_s0 + $0x240] ss:$36 sps:$4 sm:$0xff]   ;;  %v12030_v48 = vld [vmem:[%s14700_s0 + $0x248] ss:$36 sps:$4 sm:$0xff]  }
 0x26b   : > { %v12031_v49 = vld [vmem:[%s14700_s0 + $0x28c] ss:$36 sps:$4 sm:$0xff]   ;;  %v12033_v50 = vld [vmem:[%s14700_s0 + $0x294] ss:$36 sps:$4 sm:$0xff]   ;;  %v12039_v54 = vld [vmem:[%s14700_s0 + $0x2dc] ss:$36 sps:$4 sm:$0xff]  }
 0x26c   : > { %v12035_v51 = vld [vmem:[%s14700_s0 + $0x288] ss:$36 sps:$4 sm:$0xff]   ;;  %v12036_v52 = vld [vmem:[%s14700_s0 + $0x290] ss:$36 sps:$4 sm:$0xff]   ;;  %v12042_v56 = vld [vmem:[%s14700_s0 + $0x2d8] ss:$36 sps:$4 sm:$0xff]  }
 0x26d   : > { %2556 = vmatpush1.bf16.msra.mxu0 %v11999_v27  ;;  %2638 = vmatpush1.bf16.msra.mxu1 %v12000_v28  ;;  %v12037_v53 = vld [vmem:[%s14700_s0 + $0x2d4] ss:$36 sps:$4 sm:$0xff]   ;;  %v12043_v57 = vld [vmem:[%s14700_s0 + $0x31c] ss:$36 sps:$4 sm:$0xff]   ;;  %v12045_v58 = vld [vmem:[%s14700_s0 + $0x324] ss:$36 sps:$4 sm:$0xff]  }
 0x26e   : > { %2557 = vmatprep.subr.bf16.mxu0 %v12001_v29  ;;  %2639 = vmatprep.subr.bf16.mxu1 %v12003_v30  ;;  %v12041_v55 = vld [vmem:[%s14700_s0 + $0x2d0] ss:$36 sps:$4 sm:$0xff]   ;;  %v12047_v59 = vld [vmem:[%s14700_s0 + $0x318] ss:$36 sps:$4 sm:$0xff]   ;;  %v12048_v60 = vld [vmem:[%s14700_s0 + $0x320] ss:$36 sps:$4 sm:$0xff]  }
 0x26f   : > { %v12049_v61 = vld [vmem:[%s14700_s0 + $0x364] ss:$36 sps:$4 sm:$0xff]   ;;  %v12051_v62 = vld [vmem:[%s14700_s0 + $0x36c] ss:$36 sps:$4 sm:$0xff]   ;;  %v12057_v2 = vld [vmem:[%s14700_s0 + $0x3b4] ss:$36 sps:$4 sm:$0xff]  }
 0x270   : > { %v12053_v63 = vld [vmem:[%s14700_s0 + $0x360] ss:$36 sps:$4 sm:$0xff]   ;;  %v12054_v0 = vld [vmem:[%s14700_s0 + $0x368] ss:$36 sps:$4 sm:$0xff]   ;;  %v12060_v6 = vld [vmem:[%s14700_s0 + $0x3b0] ss:$36 sps:$4 sm:$0xff]  }
 0x271   : > { %2558 = vmatpush1.bf16.msra.mxu0 %v12005_v31  ;;  %2640 = vmatpush1.bf16.msra.mxu1 %v12006_v32  ;;  %v12055_v1 = vld [vmem:[%s14700_s0 + $0x3ac] ss:$36 sps:$4 sm:$0xff]   ;;  %v12061_v7 = vld [vmem:[%s14700_s0 + $0x3f4] ss:$36 sps:$4 sm:$0xff]   ;;  %v12063_v8 = vld [vmem:[%s14700_s0 + $0x3fc] ss:$36 sps:$4 sm:$0xff]  }
 0x272   : > { %2559 = vmatprep.subr.bf16.mxu0 %v12007_v33  ;;  %2641 = vmatprep.subr.bf16.mxu1 %v12009_v34  ;;  %v12059_v5 = vld [vmem:[%s14700_s0 + $0x3a8] ss:$36 sps:$4 sm:$0xff]   ;;  %v12065_v9 = vld [vmem:[%s14700_s0 + $0x3f0] ss:$36 sps:$4 sm:$0xff]   ;;  %v12066_v10 = vld [vmem:[%s14700_s0 + $0x3f8] ss:$36 sps:$4 sm:$0xff]  }
 0x273   : > { %v12067_v11 = vld [vmem:[%s14700_s0 + $0x43c] ss:$36 sps:$4 sm:$0xff]   ;;  %v12069_v12 = vld [vmem:[%s14700_s0 + $0x444] ss:$36 sps:$4 sm:$0xff]   ;;  %v12078_v16 = vld [vmem:[%s14700_s0 + $0x48c] ss:$36 sps:$4 sm:$0xff]  }
 0x274   : > { %v12071_v13 = vld [vmem:[%s14700_s0 + $0x438] ss:$36 sps:$4 sm:$0xff]   ;;  %v12072_v14 = vld [vmem:[%s14700_s0 + $0x440] ss:$36 sps:$4 sm:$0xff]   ;;  %v14840_v25 = vshrl.u32 %v1116_v23, 7  ;;  %vm3037_vm2 = vcmask 1043456  }
 0x275   : > { %2560 = vmatpush1.bf16.msra.mxu0 %v12011_v35  ;;  %2642 = vmatpush1.bf16.msra.mxu1 %v12012_v36  ;;  %v12075_v15 = vld [vmem:[%s14700_s0 + $0x484] ss:$36 sps:$4 sm:$0xff]   ;;  %v14850_v28 = vld [vmem:[%s849_s25] sm:$0x7]  ;;  %v14854_v29 = vld [vmem:[%s858_s3] sm:$0x7] }
 0x276   : > { %2561 = vmatprep.subr.bf16.mxu0 %v12013_v37  ;;  %2643 = vmatprep.subr.bf16.mxu1 %v12015_v38  ;;  %v14843_v26 = vsub.s32 1, %v14840_v25  ;;  %v14846_v27 = vsub.s32 0, %v14840_v25  ;;  %vm3013_vm4 = vcmask 64512   ;;  %s16366_s6 = scalar_lea.vmem [#allocation14], %s14689_s21  ;;  %s16367_s25 = scalar_lea.vmem [#allocation15], %s14689_s21 }
 0x277   : > { %s16368_s3 = scalar_lea.vmem [#allocation17], %s14689_s21  ;;  %s16369_s21 = sld [smem:[#allocation44_spill]] }
 0x278   : > { %v1123_v32 = vrot.slane %v14850_v28, %v14843_v26  ;;  %v1119_v33 = vrot.slane %v14850_v28, %v14846_v27  ;;  %v1142_v36 = vrot.slane %v14854_v29, %v14843_v26  ;;  %v1138_v37 = vrot.slane %v14854_v29, %v14846_v27 }
 0x279   : > { %2562 = vmatpush1.bf16.msra.mxu0 %v12017_v39  ;;  %2644 = vmatpush1.bf16.msra.mxu1 %v12018_v40  ;;  %v12073_v40 = vld [vmem:[%s14700_s0 + $0x480] ss:$36 sps:$4 sm:$0xff]  }
 0x27a   : > { %2563 = vmatprep.subr.bf16.mxu0 %v12019_v41  ;;  %2645 = vmatprep.subr.bf16.mxu1 %v12021_v42  ;;  %v12076_v41 = vld [vmem:[%s14700_s0 + $0x488] ss:$36 sps:$4 sm:$0xff]  }
 0x27d   : > { %2564 = vmatpush1.bf16.msra.mxu0 %v12023_v43  ;;  %2646 = vmatpush1.bf16.msra.mxu1 %v12024_v44  ;;  %v12081_v43 = vld [vmem:[%s14700_s0 + $0x4cc] ss:$36 sps:$4 sm:$0xff]   ;;  %v12084_v44 = vld [vmem:[%s14700_s0 + $0x4d4] ss:$36 sps:$4 sm:$0xff]   ;;  %p11245_p0 = scmp.ne.s32.totalorder %s16369_s21, 5 }
 0x27e   : > { %2565 = vmatprep.subr.bf16.mxu0 %v12025_v45  ;;  %2647 = vmatprep.subr.bf16.mxu1 %v12027_v46  ;;  %vm13922_vm5 = vmmov (!%p11245_p0), 0  }
 0x281   : > { %2566 = vmatpush1.bf16.msra.mxu0 %v12029_v47  ;;  %2648 = vmatpush1.bf16.msra.mxu1 %v12030_v48  ;;  %v12079_v47 = vld [vmem:[%s14700_s0 + $0x4c8] ss:$36 sps:$4 sm:$0xff]   ;;  %v12082_v48 = vld [vmem:[%s14700_s0 + $0x4d0] ss:$36 sps:$4 sm:$0xff]  }
 0x282   : > { %2567 = vmatprep.subr.bf16.mxu0 %v12031_v49  ;;  %2649 = vmatprep.subr.bf16.mxu1 %v12033_v50  ;;  %v12087_v49 = vld [vmem:[%s14700_s0 + $0x514] ss:$36 sps:$4 sm:$0xff]   ;;  %v12090_v50 = vld [vmem:[%s14700_s0 + $0x51c] ss:$36 sps:$4 sm:$0xff]  }
 0x285   : > { %2568 = vmatpush1.bf16.msra.mxu0 %v12035_v51  ;;  %2650 = vmatpush1.bf16.msra.mxu1 %v12036_v52  ;;  %v12085_v51 = vld [vmem:[%s14700_s0 + $0x510] ss:$36 sps:$4 sm:$0xff]   ;;  %v12088_v52 = vld [vmem:[%s14700_s0 + $0x518] ss:$36 sps:$4 sm:$0xff]  }
 0x286   : > { %2569 = vmatprep.subr.bf16.mxu0 %v12037_v53  ;;  %2651 = vmatprep.subr.bf16.mxu1 %v12039_v54  ;;  %v13916_v53 = vmov 0   ;;  %v12093_v54 = vld [vmem:[%s14700_s0 + $0x55c] ss:$36 sps:$4 sm:$0xff]  }
 0x289   : > { %2570 = vmatpush1.bf16.msra.mxu0 %v12041_v55  ;;  %2652 = vmatpush1.bf16.msra.mxu1 %v12042_v56  ;;  %v12096_v55 = vld [vmem:[%s14700_s0 + $0x564] ss:$36 sps:$4 sm:$0xff]   ;;  %v12091_v56 = vld [vmem:[%s14700_s0 + $0x558] ss:$36 sps:$4 sm:$0xff]  }
 0x28a   : > { %2571 = vmatprep.subr.bf16.mxu0 %v12043_v57  ;;  %2653 = vmatprep.subr.bf16.mxu1 %v12045_v58  ;;  %v12094_v57 = vld [vmem:[%s14700_s0 + $0x560] ss:$36 sps:$4 sm:$0xff]  }
 0x28b   : > { %v12099_v58 = vld [vmem:[%s14700_s0 + $0x5a4] ss:$36 sps:$4 sm:$0xff]  }
 0x28d   : > { %2572 = vmatpush1.bf16.msra.mxu0 %v12047_v59  ;;  %2654 = vmatpush1.bf16.msra.mxu1 %v12048_v60  ;;  %v12102_v59 = vld [vmem:[%s14700_s0 + $0x5ac] ss:$36 sps:$4 sm:$0xff]   ;;  %v12097_v60 = vld [vmem:[%s14700_s0 + $0x5a0] ss:$36 sps:$4 sm:$0xff]  }
 0x28e   : > { %2573 = vmatprep.subr.bf16.mxu0 %v12049_v61  ;;  %2655 = vmatprep.subr.bf16.mxu1 %v12051_v62  ;;  %v12100_v61 = vld [vmem:[%s14700_s0 + $0x5a8] ss:$36 sps:$4 sm:$0xff]  }
 0x28f   : > { %v12105_v62 = vld [vmem:[%s14700_s0 + $0x5ec] ss:$36 sps:$4 sm:$0xff]  }
 0x291   : > { %2574 = vmatpush1.bf16.msra.mxu0 %v12053_v63  ;;  %2656 = vmatpush1.bf16.msra.mxu1 %v12054_v0  ;;  %v12108_v63 = vld [vmem:[%s14700_s0 + $0x5f4] ss:$36 sps:$4 sm:$0xff]   ;;  %v14903_v0 = vsub.s32 2, %v14840_v25 }
 0x292   : > { %2575 = vmatprep.subr.bf16.mxu0 %v12055_v1  ;;  %2657 = vmatprep.subr.bf16.mxu1 %v12057_v2  ;;  %v12103_v1 = vld [vmem:[%s14700_s0 + $0x5e8] ss:$36 sps:$4 sm:$0xff]   ;;  %v12106_v2 = vld [vmem:[%s14700_s0 + $0x5f0] ss:$36 sps:$4 sm:$0xff]  }
 0x295   : > { %2576 = vmatpush1.bf16.msra.mxu0 %v12059_v5  ;;  %2658 = vmatpush1.bf16.msra.mxu1 %v12060_v6  ;;  %v13229_v5 = vld [vmem:[#allocation2 + $0x10] sm:$0xff] }
 0x296   : > { %2577 = vmatprep.subr.bf16.mxu0 %v12061_v7  ;;  %2659 = vmatprep.subr.bf16.mxu1 %v12063_v8  ;;  %v12111_v7 = vld [vmem:[%s14700_s0 + $0x634] ss:$36 sps:$4 sm:$0xff]   ;;  %v12114_v8 = vld [vmem:[%s14700_s0 + $0x63c] ss:$36 sps:$4 sm:$0xff]  }
 0x299   : > { %2578 = vmatpush1.bf16.msra.mxu0 %v12065_v9  ;;  %2660 = vmatpush1.bf16.msra.mxu1 %v12066_v10  ;;  %v1127_v10 = vrot.slane %v14850_v28, %v14903_v0  ;;  %v12129_v28 = vld [vmem:[%s14700_s0 + $0x5c] ss:$36 sps:$4 sm:$0xff]  }
 0x29a   : > { %2579 = vmatprep.subr.bf16.mxu0 %v12067_v11  ;;  %2661 = vmatprep.subr.bf16.mxu1 %v12069_v12  ;;  %v12109_v11 = vld [vmem:[%s14700_s0 + $0x630] ss:$36 sps:$4 sm:$0xff]   ;;  %v12112_v12 = vld [vmem:[%s14700_s0 + $0x638] ss:$36 sps:$4 sm:$0xff]  }
 0x29d   : > { %2580 = vmatpush1.bf16.msra.mxu0 %v12071_v13  ;;  %2662 = vmatpush1.bf16.msra.mxu1 %v12072_v14  ;;  %v12117_v13 = vld [vmem:[%s14700_s0 + $0x67c] ss:$36 sps:$4 sm:$0xff]   ;;  %v12120_v14 = vld [vmem:[%s14700_s0 + $0x684] ss:$36 sps:$4 sm:$0xff]  }
 0x29e   : > { %2590 = vmatprep.subr.bf16.mxu0 %v12075_v15  ;;  %2672 = vmatprep.subr.bf16.mxu1 %v12078_v16  ;;  %v1146_v16 = vrot.slane %v14854_v29, %v14903_v0 }
 0x2f0   : > { %v1094_v17 = vpop.xlane.xlu0 %1093 }
 0x2f1   : > { %v14835_v18 = vmul.f32 0.0026041667, %v1094_v17  ;;  %v12115_v17 = vld [vmem:[%s14700_s0 + $0x678] ss:$36 sps:$4 sm:$0xff]  }
 0x2f3   : > { %v1105_v20 = vmul.f32 %v14835_v18, %v14835_v18  ;;  %v1107_v30 = vsub.f32 %v14759_v3, %v14835_v18  ;;  %v1108_v31 = vsub.f32 %v14761_v4, %v14835_v18  ;;  %v1109_v6 = vsub.f32 %v13229_v5, %v14835_v18  ;;  %v12118_v18 = vld [vmem:[%s14700_s0 + $0x680] ss:$36 sps:$4 sm:$0xff]  }
 0x2f4   : > { %v1103_v19 = vpop.xlane.xlu0 %1102  ;;  %v12183_v5 = vld [vmem:[%s14700_s0 + $0x2e4] ss:$36 sps:$4 sm:$0xff]  }
 0x2f5   : > { %v1104_v21 = vmul.f32 0.0026041667, %v1103_v19  ;;  %v12123_v19 = vld [vmem:[%s14700_s0 + $0x14] ss:$36 sps:$4 sm:$0xff]  }
 0x2f7   : > { %v1106_v22 = vsub.f32 %v1104_v21, %v1105_v20  ;;  %v12126_v21 = vld [vmem:[%s14700_s0 + $0x1c] ss:$36 sps:$4 sm:$0xff]  }
 0x2f9   : > { %v1110_v24 = vadd.f32 1e-05, %v1106_v22  ;;  %v12121_v22 = vld [vmem:[%s14700_s0 + $0x10] ss:$36 sps:$4 sm:$0xff]  }
 0x2fb   : > { %13201 = vrsqrt.f32 %v1110_v24  ;;  %v12124_v24 = vld [vmem:[%s14700_s0 + $0x18] ss:$36 sps:$4 sm:$0xff]  }
 0x305   : > { %v14864_v34 = vpop.eup %13201 }
 0x306   : > { %v1113_v35 = vmul.f32 %v14864_v34, %v1108_v31  ;;  %v1112_v3 = vmul.f32 %v14864_v34, %v1107_v30  ;;  %v1114_v9 = vmul.f32 %v14864_v34, %v1109_v6  ;;  %v12132_v30 = vld [vmem:[%s14700_s0 + $0x64] ss:$36 sps:$4 sm:$0xff]   ;;  %v12127_v31 = vld [vmem:[%s14700_s0 + $0x58] ss:$36 sps:$4 sm:$0xff]   ;;  %v12138_v34 = vld [vmem:[%s14700_s0 + $0xac] ss:$36 sps:$4 sm:$0xff]  }
 0x307   : > { %v12186_v6 = vld [vmem:[%s14700_s0 + $0x2ec] ss:$36 sps:$4 sm:$0xff]  }
 0x308   : > { %v1132_v4 = vmul.f32 %v1123_v32, %v1113_v35  ;;  %v1131_v38 = vmul.f32 %v1119_v33, %v1112_v3  ;;  %v1133_v15 = vmul.f32 %v1127_v10, %v1114_v9  ;;  %v12130_v32 = vld [vmem:[%s14700_s0 + $0x60] ss:$36 sps:$4 sm:$0xff]   ;;  %v12141_v3 = vld [vmem:[%s14700_s0 + $0xec] ss:$36 sps:$4 sm:$0xff]   ;;  %v12192_v10 = vld [vmem:[%s14700_s0 + $0x334] ss:$36 sps:$4 sm:$0xff]  }
 0x309   : > { %v12135_v33 = vld [vmem:[%s14700_s0 + $0xa4] ss:$36 sps:$4 sm:$0xff]   ;;  %v12189_v9 = vld [vmem:[%s14700_s0 + $0x32c] ss:$36 sps:$4 sm:$0xff]  }
 0x30a   : > { %v1151_v39 = vadd.f32 %v1142_v36, %v1132_v4  ;;  %v1150_v42 = vadd.f32 %v1138_v37, %v1131_v38  ;;  %v1152_v20 = vadd.f32 %v1146_v16, %v1133_v15  ;;  %v12133_v35 = vld [vmem:[%s14700_s0 + $0xa0] ss:$36 sps:$4 sm:$0xff]   ;;  %v12136_v36 = vld [vmem:[%s14700_s0 + $0xa8] ss:$36 sps:$4 sm:$0xff]   ;;  %v12144_v37 = vld [vmem:[%s14700_s0 + $0xf4] ss:$36 sps:$4 sm:$0xff]  }
 0x30b   : > { %v12139_v4 = vld [vmem:[%s14700_s0 + $0xe8] ss:$36 sps:$4 sm:$0xff]   ;;  %v12142_v38 = vld [vmem:[%s14700_s0 + $0xf0] ss:$36 sps:$4 sm:$0xff]   ;;  %v12196_v16 = vld [vmem:[%s14700_s0 + $0x378] ss:$36 sps:$4 sm:$0xff]  }
 0x30c   : > { %v14876_v45 = vpack.c.bf16 %v1151_v39, %v1151_v39  ;;  %v14878_v46 = vpack.c.bf16 %v1150_v42, %v1150_v42  ;;  %v14927_v29 = vpack.c.bf16 %v1152_v20, %v1152_v20  ;;  %v12147_v39 = vld [vmem:[%s14700_s0 + $0x134] ss:$36 sps:$4 sm:$0xff]   ;;  %v12202_v20 = vld [vmem:[%s14700_s0 + $0x3c0] ss:$36 sps:$4 sm:$0xff]  }
 0x30d   : > { %v12148_v42 = vld [vmem:[%s14700_s0 + $0x138] ss:$36 sps:$4 sm:$0xff]   ;;  %v12193_v15 = vld [vmem:[%s14700_s0 + $0x370] ss:$36 sps:$4 sm:$0xff]  }
 0x30e   : > { %2581 = vmatprep.mubr.bf16.mxu0 %v14876_v45  ;;  %2663 = vmatprep.mubr.bf16.mxu1 %v14876_v45 }
 0x30f   : > { %2582 = vmatmul.mubr.bf16.vlgmr.msra.gmra.mrb[0].mxu0 %v14878_v46  ;;  %2664 = vmatmul.mubr.bf16.vlgmr.msra.gmra.mrb[0].mxu1 %v14878_v46 }
 0x310   : > { %2591 = vmatpush1.bf16.msra.mxu0 %v12073_v40  ;;  %2673 = vmatpush1.bf16.msra.mxu1 %v12076_v41  ;;  %v12150_v40 = vld [vmem:[%s14700_s0 + $0x13c] ss:$36 sps:$4 sm:$0xff]   ;;  %v12145_v41 = vld [vmem:[%s14700_s0 + $0x130] ss:$36 sps:$4 sm:$0xff]  }
 0x311   : > { %2592 = vmatprep.subr.bf16.mxu0 %v12081_v43  ;;  %2674 = vmatprep.subr.bf16.mxu1 %v12084_v44  ;;  %v12153_v43 = vld [vmem:[%s14700_s0 + $0x17c] ss:$36 sps:$4 sm:$0xff]   ;;  %v12156_v44 = vld [vmem:[%s14700_s0 + $0x184] ss:$36 sps:$4 sm:$0xff]  }
 0x312   : > { %2622 = vmatprep.mubr.bf16.mxu0 %v13916_v53  ;;  %2704 = vmatprep.mubr.bf16.mxu1 %v13916_v53 }
 0x314   : > { %2593 = vmatpush1.bf16.msra.mxu0 %v12079_v47  ;;  %2675 = vmatpush1.bf16.msra.mxu1 %v12082_v48  ;;  %v12151_v47 = vld [vmem:[%s14700_s0 + $0x178] ss:$36 sps:$4 sm:$0xff]   ;;  %v12154_v48 = vld [vmem:[%s14700_s0 + $0x180] ss:$36 sps:$4 sm:$0xff]  }
 0x315   : > { %2594 = vmatprep.subr.bf16.mxu0 %v12087_v49  ;;  %2676 = vmatprep.subr.bf16.mxu1 %v12090_v50  ;;  %v12159_v49 = vld [vmem:[%s14700_s0 + $0x1c4] ss:$36 sps:$4 sm:$0xff]   ;;  %v12162_v50 = vld [vmem:[%s14700_s0 + $0x1cc] ss:$36 sps:$4 sm:$0xff]  }
 0x318   : > { %2595 = vmatpush1.bf16.msra.mxu0 %v12085_v51  ;;  %2677 = vmatpush1.bf16.msra.mxu1 %v12088_v52  ;;  %v12157_v51 = vld [vmem:[%s14700_s0 + $0x1c0] ss:$36 sps:$4 sm:$0xff]   ;;  %v12160_v52 = vld [vmem:[%s14700_s0 + $0x1c8] ss:$36 sps:$4 sm:$0xff]  }
 0x319   : > { %2596 = vmatprep.subr.bf16.mxu0 %v12093_v54  ;;  %2678 = vmatprep.subr.bf16.mxu1 %v12096_v55  ;;  %v12165_v54 = vld [vmem:[%s14700_s0 + $0x20c] ss:$36 sps:$4 sm:$0xff]   ;;  %v12168_v55 = vld [vmem:[%s14700_s0 + $0x214] ss:$36 sps:$4 sm:$0xff]  }
 0x31c   : > { %2597 = vmatpush1.bf16.msra.mxu0 %v12091_v56  ;;  %2679 = vmatpush1.bf16.msra.mxu1 %v12094_v57  ;;  %v12163_v56 = vld [vmem:[%s14700_s0 + $0x208] ss:$36 sps:$4 sm:$0xff]   ;;  %v12166_v57 = vld [vmem:[%s14700_s0 + $0x210] ss:$36 sps:$4 sm:$0xff]  }
 0x31d   : > { %2598 = vmatprep.subr.bf16.mxu0 %v12099_v58  ;;  %2680 = vmatprep.subr.bf16.mxu1 %v12102_v59  ;;  %v12171_v58 = vld [vmem:[%s14700_s0 + $0x254] ss:$36 sps:$4 sm:$0xff]   ;;  %v12174_v59 = vld [vmem:[%s14700_s0 + $0x25c] ss:$36 sps:$4 sm:$0xff]  }
 0x320   : > { %2599 = vmatpush1.bf16.msra.mxu0 %v12097_v60  ;;  %2681 = vmatpush1.bf16.msra.mxu1 %v12100_v61  ;;  %v12169_v60 = vld [vmem:[%s14700_s0 + $0x250] ss:$36 sps:$4 sm:$0xff]   ;;  %v12172_v61 = vld [vmem:[%s14700_s0 + $0x258] ss:$36 sps:$4 sm:$0xff]  }
 0x321   : > { %2600 = vmatprep.subr.bf16.mxu0 %v12105_v62  ;;  %2682 = vmatprep.subr.bf16.mxu1 %v12108_v63  ;;  %v12177_v62 = vld [vmem:[%s14700_s0 + $0x29c] ss:$36 sps:$4 sm:$0xff]   ;;  %v12180_v63 = vld [vmem:[%s14700_s0 + $0x2a4] ss:$36 sps:$4 sm:$0xff]  }
 0x324   : > { %2601 = vmatpush1.bf16.msra.mxu0 %v12103_v1  ;;  %2683 = vmatpush1.bf16.msra.mxu1 %v12106_v2  ;;  %v12175_v1 = vld [vmem:[%s14700_s0 + $0x298] ss:$36 sps:$4 sm:$0xff]   ;;  %v12178_v2 = vld [vmem:[%s14700_s0 + $0x2a0] ss:$36 sps:$4 sm:$0xff]  }
 0x325   : > { %2602 = vmatprep.subr.bf16.mxu0 %v12111_v7  ;;  %2684 = vmatprep.subr.bf16.mxu1 %v12114_v8  ;;  %v12181_v7 = vld [vmem:[%s14700_s0 + $0x2e0] ss:$36 sps:$4 sm:$0xff]   ;;  %v12184_v8 = vld [vmem:[%s14700_s0 + $0x2e8] ss:$36 sps:$4 sm:$0xff]  }
 0x328   : > { %2603 = vmatpush1.bf16.msra.mxu0 %v12109_v11  ;;  %2685 = vmatpush1.bf16.msra.mxu1 %v12112_v12  ;;  %v12187_v11 = vld [vmem:[%s14700_s0 + $0x328] ss:$36 sps:$4 sm:$0xff]   ;;  %v12190_v12 = vld [vmem:[%s14700_s0 + $0x330] ss:$36 sps:$4 sm:$0xff]  }
 0x329   : > { %2604 = vmatprep.subr.bf16.mxu0 %v12117_v13  ;;  %2686 = vmatprep.subr.bf16.mxu1 %v12120_v14  ;;  %v12195_v13 = vld [vmem:[%s14700_s0 + $0x374] ss:$36 sps:$4 sm:$0xff]   ;;  %v12198_v14 = vld [vmem:[%s14700_s0 + $0x37c] ss:$36 sps:$4 sm:$0xff]  }
 0x32c   : > { %2605 = vmatpush1.bf16.msra.mxu0 %v12115_v17  ;;  %2687 = vmatpush1.bf16.msra.mxu1 %v12118_v18  ;;  %v12201_v17 = vld [vmem:[%s14700_s0 + $0x3bc] ss:$36 sps:$4 sm:$0xff]   ;;  %v12204_v18 = vld [vmem:[%s14700_s0 + $0x3c4] ss:$36 sps:$4 sm:$0xff]  }
 0x32d   : > { %2713 = vmatprep.subr.bf16.mxu0 %v12123_v19  ;;  %2795 = vmatprep.subr.bf16.mxu1 %v12126_v21  ;;  %v12199_v19 = vld [vmem:[%s14700_s0 + $0x3b8] ss:$36 sps:$4 sm:$0xff]   ;;  %v12207_v21 = vld [vmem:[%s14700_s0 + $0x404] ss:$36 sps:$4 sm:$0xff]  }
 0x32f   : > { %2623 = vmatmul.mubr.bf16.vlgmr.msra.gmra.mrb[0].mxu0 %v14927_v29  ;;  %2705 = vmatmul.mubr.bf16.vlgmr.msra.gmra.mrb[0].mxu1 %v14927_v29 }
 0x330   : > { %2714 = vmatpush1.bf16.msra.mxu0 %v12121_v22  ;;  %2745 = vmatprep.mubr.bf16.mxu0 %v14876_v45  ;;  %v12210_v22 = vld [vmem:[%s14700_s0 + $0x40c] ss:$36 sps:$4 sm:$0xff]  }
 0x331   : > { %2796 = vmatpush1.bf16.msra.mxu1 %v12124_v24  ;;  %2827 = vmatprep.mubr.bf16.mxu1 %v14876_v45  ;;  %v12205_v24 = vld [vmem:[%s14700_s0 + $0x400] ss:$36 sps:$4 sm:$0xff]  }
 0x332   : > { %2715 = vmatprep.subr.bf16.mxu0 %v12129_v28  ;;  %2797 = vmatprep.subr.bf16.mxu1 %v12132_v30  ;;  %v12208_v28 = vld [vmem:[%s14700_s0 + $0x408] ss:$36 sps:$4 sm:$0xff]  }
 0x333   : > { %v12213_v30 = vld [vmem:[%s14700_s0 + $0x44c] ss:$36 sps:$4 sm:$0xff]  }
 0x334   : > { %2716 = vmatpush1.bf16.msra.mxu0 %v12127_v31  ;;  %v12216_v31 = vld [vmem:[%s14700_s0 + $0x454] ss:$36 sps:$4 sm:$0xff]  }
 0x335   : > { %2798 = vmatpush1.bf16.msra.mxu1 %v12130_v32  ;;  %2717 = vmatprep.subr.bf16.mxu0 %v12135_v33  ;;  %v12211_v32 = vld [vmem:[%s14700_s0 + $0x448] ss:$36 sps:$4 sm:$0xff]   ;;  %v12214_v33 = vld [vmem:[%s14700_s0 + $0x450] ss:$36 sps:$4 sm:$0xff]  }
 0x336   : > { %2799 = vmatprep.subr.bf16.mxu1 %v12138_v34  ;;  %v12219_v34 = vld [vmem:[%s14700_s0 + $0x494] ss:$36 sps:$4 sm:$0xff]  }
 0x338   : > { %2718 = vmatpush1.bf16.msra.mxu0 %v12133_v35  ;;  %v12222_v35 = vld [vmem:[%s14700_s0 + $0x49c] ss:$36 sps:$4 sm:$0xff]  }
 0x339   : > { %2800 = vmatpush1.bf16.msra.mxu1 %v12136_v36  ;;  %2719 = vmatprep.subr.bf16.mxu0 %v12141_v3  ;;  %v12217_v36 = vld [vmem:[%s14700_s0 + $0x490] ss:$36 sps:$4 sm:$0xff]   ;;  %v12220_v3 = vld [vmem:[%s14700_s0 + $0x498] ss:$36 sps:$4 sm:$0xff]  }
 0x33a   : > { %2801 = vmatprep.subr.bf16.mxu1 %v12144_v37  ;;  %v12225_v37 = vld [vmem:[%s14700_s0 + $0x4dc] ss:$36 sps:$4 sm:$0xff]  }
 0x33c   : > { %2720 = vmatpush1.bf16.msra.mxu0 %v12139_v4  ;;  %v12228_v4 = vld [vmem:[%s14700_s0 + $0x4e4] ss:$36 sps:$4 sm:$0xff]  }
 0x33d   : > { %2802 = vmatpush1.bf16.msra.mxu1 %v12142_v38  ;;  %2721 = vmatprep.subr.bf16.mxu0 %v12147_v39  ;;  %v12223_v38 = vld [vmem:[%s14700_s0 + $0x4d8] ss:$36 sps:$4 sm:$0xff]   ;;  %v12226_v39 = vld [vmem:[%s14700_s0 + $0x4e0] ss:$36 sps:$4 sm:$0xff]  }
 0x33e   : > { %2803 = vmatprep.subr.bf16.mxu1 %v12150_v40  ;;  %v12231_v40 = vld [vmem:[%s14700_s0 + $0x524] ss:$36 sps:$4 sm:$0xff]  }
 0x340   : > { %2722 = vmatpush1.bf16.msra.mxu0 %v12145_v41  ;;  %v12234_v41 = vld [vmem:[%s14700_s0 + $0x52c] ss:$36 sps:$4 sm:$0xff]  }
 0x341   : > { %2804 = vmatpush1.bf16.msra.mxu1 %v12148_v42  ;;  %2723 = vmatprep.subr.bf16.mxu0 %v12153_v43  ;;  %v12229_v42 = vld [vmem:[%s14700_s0 + $0x520] ss:$36 sps:$4 sm:$0xff]   ;;  %v12232_v43 = vld [vmem:[%s14700_s0 + $0x528] ss:$36 sps:$4 sm:$0xff]  }
 0x342   : > { %2805 = vmatprep.subr.bf16.mxu1 %v12156_v44  ;;  %v12237_v44 = vld [vmem:[%s14700_s0 + $0x56c] ss:$36 sps:$4 sm:$0xff]  }
 0x344   : > { %2724 = vmatpush1.bf16.msra.mxu0 %v12151_v47  ;;  %v12240_v47 = vld [vmem:[%s14700_s0 + $0x574] ss:$36 sps:$4 sm:$0xff]  }
 0x345   : > { %2806 = vmatpush1.bf16.msra.mxu1 %v12154_v48  ;;  %2725 = vmatprep.subr.bf16.mxu0 %v12159_v49  ;;  %v12235_v48 = vld [vmem:[%s14700_s0 + $0x568] ss:$36 sps:$4 sm:$0xff]   ;;  %v12238_v49 = vld [vmem:[%s14700_s0 + $0x570] ss:$36 sps:$4 sm:$0xff]  }
 0x346   : > { %2807 = vmatprep.subr.bf16.mxu1 %v12162_v50  ;;  %v12243_v50 = vld [vmem:[%s14700_s0 + $0x5b4] ss:$36 sps:$4 sm:$0xff]  }
 0x348   : > { %2726 = vmatpush1.bf16.msra.mxu0 %v12157_v51  ;;  %v12246_v51 = vld [vmem:[%s14700_s0 + $0x5bc] ss:$36 sps:$4 sm:$0xff]  }
 0x349   : > { %2808 = vmatpush1.bf16.msra.mxu1 %v12160_v52  ;;  %2727 = vmatprep.subr.bf16.mxu0 %v12165_v54  ;;  %v12241_v52 = vld [vmem:[%s14700_s0 + $0x5b0] ss:$36 sps:$4 sm:$0xff]   ;;  %v12244_v54 = vld [vmem:[%s14700_s0 + $0x5b8] ss:$36 sps:$4 sm:$0xff]  }
 0x34a   : > { %2809 = vmatprep.subr.bf16.mxu1 %v12168_v55  ;;  %v12249_v55 = vld [vmem:[%s14700_s0 + $0x5fc] ss:$36 sps:$4 sm:$0xff]  }
 0x34c   : > { %2728 = vmatpush1.bf16.msra.mxu0 %v12163_v56  ;;  %v12252_v56 = vld [vmem:[%s14700_s0 + $0x604] ss:$36 sps:$4 sm:$0xff]  }
 0x34d   : > { %2810 = vmatpush1.bf16.msra.mxu1 %v12166_v57  ;;  %2729 = vmatprep.subr.bf16.mxu0 %v12171_v58  ;;  %v12247_v57 = vld [vmem:[%s14700_s0 + $0x5f8] ss:$36 sps:$4 sm:$0xff]   ;;  %v12250_v58 = vld [vmem:[%s14700_s0 + $0x600] ss:$36 sps:$4 sm:$0xff]  }
 0x34e   : > { %2811 = vmatprep.subr.bf16.mxu1 %v12174_v59  ;;  %v12255_v59 = vld [vmem:[%s14700_s0 + $0x644] ss:$36 sps:$4 sm:$0xff]  }
 0x350   : > { %2730 = vmatpush1.bf16.msra.mxu0 %v12169_v60  ;;  %v12258_v60 = vld [vmem:[%s14700_s0 + $0x64c] ss:$36 sps:$4 sm:$0xff]  }
 0x351   : > { %2812 = vmatpush1.bf16.msra.mxu1 %v12172_v61  ;;  %2731 = vmatprep.subr.bf16.mxu0 %v12177_v62  ;;  %v12253_v61 = vld [vmem:[%s14700_s0 + $0x640] ss:$36 sps:$4 sm:$0xff]   ;;  %v12256_v62 = vld [vmem:[%s14700_s0 + $0x648] ss:$36 sps:$4 sm:$0xff]  }
 0x352   : > { %2813 = vmatprep.subr.bf16.mxu1 %v12180_v63  ;;  %v12261_v63 = vld [vmem:[%s14700_s0 + $0x68c] ss:$36 sps:$4 sm:$0xff]  }
 0x354   : > { %2732 = vmatpush1.bf16.msra.mxu0 %v12175_v1  ;;  %v12264_v1 = vld [vmem:[%s14700_s0 + $0x694] ss:$36 sps:$4 sm:$0xff]  }
 0x355   : > { %2814 = vmatpush1.bf16.msra.mxu1 %v12178_v2  ;;  %2733 = vmatprep.subr.bf16.mxu0 %v12183_v5  ;;  %v12259_v2 = vld [vmem:[%s14700_s0 + $0x688] ss:$36 sps:$4 sm:$0xff]   ;;  %v12262_v5 = vld [vmem:[%s14700_s0 + $0x690] ss:$36 sps:$4 sm:$0xff]  }
 0x356   : > { %2815 = vmatprep.subr.bf16.mxu1 %v12186_v6  ;;  %v12265_v6 = vld [vmem:[%s14700_s0 + $0x260] ss:$36 sps:$4 sm:$0xff]  }
 0x358   : > { %2734 = vmatpush1.bf16.msra.mxu0 %v12181_v7  ;;  %v12266_v7 = vld [vmem:[%s14700_s0 + $0x20] ss:$36 sps:$4 sm:$0xff]  }
 0x359   : > { %2816 = vmatpush1.bf16.msra.mxu1 %v12184_v8  ;;  %2735 = vmatprep.subr.bf16.mxu0 %v12189_v9  ;;  %v12267_v8 = vld [vmem:[%s14700_s0 + $0x4a0] ss:$36 sps:$4 sm:$0xff]   ;;  %v12268_v9 = vld [vmem:[%s14700_s0 + $0x2a8] ss:$36 sps:$4 sm:$0xff]  }
 0x35a   : > { %2817 = vmatprep.subr.bf16.mxu1 %v12192_v10  ;;  %v13917_v10 = vmov 0.0  }
 0x35c   : > { %2736 = vmatpush1.bf16.msra.mxu0 %v12187_v11  ;;  %v12269_v11 = vld [vmem:[%s14700_s0 + $0x68] ss:$36 sps:$4 sm:$0xff]  }
 0x35d   : > { %2818 = vmatpush1.bf16.msra.mxu1 %v12190_v12  ;;  %2737 = vmatprep.subr.bf16.mxu0 %v12195_v13  ;;  %v12270_v12 = vld [vmem:[%s14700_s0 + $0x4e8] ss:$36 sps:$4 sm:$0xff]   ;;  %v12271_v13 = vld [vmem:[%s14700_s0 + $0x2f0] ss:$36 sps:$4 sm:$0xff]  }
 0x35e   : > { %2819 = vmatprep.subr.bf16.mxu1 %v12198_v14  ;;  %v12272_v14 = vld [vmem:[%s14700_s0 + $0xb0] ss:$36 sps:$4 sm:$0xff]  }
 0x360   : > { %2738 = vmatpush1.bf16.msra.mxu0 %v12193_v15  ;;  %v12273_v15 = vld [vmem:[%s14700_s0 + $0x530] ss:$36 sps:$4 sm:$0xff]  }
 0x361   : > { %2820 = vmatpush1.bf16.msra.mxu1 %v12196_v16  ;;  %2739 = vmatprep.subr.bf16.mxu0 %v12201_v17  ;;  %v12274_v16 = vld [vmem:[%s14700_s0 + $0x338] ss:$36 sps:$4 sm:$0xff]  }
 0x362   : > { %2821 = vmatprep.subr.bf16.mxu1 %v12204_v18  ;;  %v12276_v17 = vld [vmem:[%s14700_s0 + $0x578] ss:$36 sps:$4 sm:$0xff]   ;;  %v12277_v18 = vld [vmem:[%s14700_s0 + $0x380] ss:$36 sps:$4 sm:$0xff]  }
 0x364   : > { %2740 = vmatpush1.bf16.msra.mxu0 %v12199_v19  ;;  %v12278_v19 = vld [vmem:[%s14700_s0 + $0x140] ss:$36 sps:$4 sm:$0xff]  }
 0x365   : > { %2822 = vmatpush1.bf16.msra.mxu1 %v12202_v20  ;;  %2741 = vmatprep.subr.bf16.mxu0 %v12207_v21  ;;  %v12279_v20 = vld [vmem:[%s14700_s0 + $0x5c0] ss:$36 sps:$4 sm:$0xff]   ;;  %v12280_v21 = vld [vmem:[%s14700_s0 + $0x3c8] ss:$36 sps:$4 sm:$0xff]  }
 0x366   : > { %2823 = vmatprep.subr.bf16.mxu1 %v12210_v22  ;;  %v12281_v22 = vld [vmem:[%s14700_s0 + $0x188] ss:$36 sps:$4 sm:$0xff]  }
 0x368   : > { %2742 = vmatpush1.bf16.msra.mxu0 %v12205_v24  ;;  %v12282_v24 = vld [vmem:[%s14700_s0 + $0x608] ss:$36 sps:$4 sm:$0xff]  }
 0x369   : > { %2824 = vmatpush1.bf16.msra.mxu1 %v12208_v28  ;;  %2743 = vmatprep.subr.bf16.mxu0 %v12213_v30  ;;  %v12283_v28 = vld [vmem:[%s14700_s0 + $0x410] ss:$36 sps:$4 sm:$0xff]  }
 0x36a   : > { %2825 = vmatprep.subr.bf16.mxu1 %v12216_v31  ;;  %v12284_v30 = vld [vmem:[%s14700_s0 + $0x1d0] ss:$36 sps:$4 sm:$0xff]  }
 0x36b   : > { %v12285_v31 = vld [vmem:[%s14700_s0 + $0x650] ss:$36 sps:$4 sm:$0xff]  }
 0x36c   : > { %2744 = vmatpush1.bf16.msra.mxu0 %v12211_v32  ;;  %v12286_v32 = vld [vmem:[%s14700_s0 + $0x458] ss:$36 sps:$4 sm:$0xff]  }
 0x36d   : > { %2826 = vmatpush1.bf16.msra.mxu1 %v12214_v33  ;;  %2754 = vmatprep.subr.bf16.mxu0 %v12219_v34  ;;  %v12287_v33 = vld [vmem:[%s14700_s0 + $0x218] ss:$36 sps:$4 sm:$0xff]  }
 0x36e   : > { %2836 = vmatprep.subr.bf16.mxu1 %v12222_v35  ;;  %v12288_v34 = vld [vmem:[%s14700_s0 + $0x698] ss:$36 sps:$4 sm:$0xff]   ;;  %v15073_v35 = vsub.s32 3, %v14840_v25 }
 0x36f   : > { %2746 = vmatmul.mubr.bf16.vlgmr.msra.gmra.mrb[4].mxu0 %v14878_v46 }
 0x370   : > { %2828 = vmatmul.mubr.bf16.vlgmr.msra.gmra.mrb[4].mxu1 %v14878_v46  ;;  %2755 = vmatpush1.bf16.msra.mxu0 %v12217_v36  ;;  %v1396_v36 = vld [vmem:[%s14708_s19] sm:$0xff] }
 0x371   : > { %2837 = vmatpush1.bf16.msra.mxu1 %v12220_v3  ;;  %2756 = vmatprep.subr.bf16.mxu0 %v12225_v37  ;;  %v1415_v3 = vrot.slane %v1396_v36, %v15073_v35  ;;  %v1403_v37 = vrot.slane %v1396_v36, %v14846_v27 }
 0x372   : > { %2838 = vmatprep.subr.bf16.mxu1 %v12228_v4  ;;  %2786 = vmatprep.mubr.bf16.mxu0 %v13916_v53 }
 0x373   : > { %2868 = vmatprep.mubr.bf16.mxu1 %v13916_v53 }
 0x374   : > { %2757 = vmatpush1.bf16.msra.mxu0 %v12223_v38 }
 0x375   : > { %2839 = vmatpush1.bf16.msra.mxu1 %v12226_v39  ;;  %2758 = vmatprep.subr.bf16.mxu0 %v12231_v40 }
 0x376   : > { %2840 = vmatprep.subr.bf16.mxu1 %v12234_v41 }
 0x378   : > { %2759 = vmatpush1.bf16.msra.mxu0 %v12229_v42 }
 0x379   : > { %2841 = vmatpush1.bf16.msra.mxu1 %v12232_v43  ;;  %2760 = vmatprep.subr.bf16.mxu0 %v12237_v44 }
 0x37a   : > { %2842 = vmatprep.subr.bf16.mxu1 %v12240_v47 }
 0x37c   : > { %2761 = vmatpush1.bf16.msra.mxu0 %v12235_v48 }
 0x37d   : > { %2843 = vmatpush1.bf16.msra.mxu1 %v12238_v49  ;;  %2762 = vmatprep.subr.bf16.mxu0 %v12243_v50  ;;  %v1418_v50 = vsub.s32 4, %v14840_v25 }
 0x37e   : > { %2844 = vmatprep.subr.bf16.mxu1 %v12246_v51  ;;  %v1426_v51 = vsub.s32 6, %v14840_v25 }
 0x380   : > { %2763 = vmatpush1.bf16.msra.mxu0 %v12241_v52  ;;  %v1419_v52 = vrot.slane %v1396_v36, %v1418_v50 }
 0x381   : > { %2845 = vmatpush1.bf16.msra.mxu1 %v12244_v54  ;;  %2764 = vmatprep.subr.bf16.mxu0 %v12249_v55  ;;  %v1427_v54 = vrot.slane %v1396_v36, %v1426_v51  ;;  %v1407_v55 = vrot.slane %v1396_v36, %v14843_v26 }
 0x382   : > { %2846 = vmatprep.subr.bf16.mxu1 %v12252_v56  ;;  %v1430_v56 = vsub.s32 7, %v14840_v25 }
 0x384   : > { %2765 = vmatpush1.bf16.msra.mxu0 %v12247_v57 }
 0x385   : > { %2847 = vmatpush1.bf16.msra.mxu1 %v12250_v58  ;;  %2766 = vmatprep.subr.bf16.mxu0 %v12255_v59 }
 0x386   : > { %2848 = vmatprep.subr.bf16.mxu1 %v12258_v60 }
 0x388   : > { %2767 = vmatpush1.bf16.msra.mxu0 %v12253_v61 }
 0x389   : > { %2849 = vmatpush1.bf16.msra.mxu1 %v12256_v62  ;;  %2768 = vmatprep.subr.bf16.mxu0 %v12261_v63  ;;  %v1422_v62 = vsub.s32 5, %v14840_v25 }
 0x38a   : > { %2850 = vmatprep.subr.bf16.mxu1 %v12264_v1 }
 0x38c   : > { %2769 = vmatpush1.bf16.msra.mxu0 %v12259_v2 }
 0x38d   : > { %2851 = vmatpush1.bf16.msra.mxu1 %v12262_v5  ;;  %11275 = vmatprep.subr.bf16.mxu0 %v12265_v6  ;;  %v1431_v6 = vrot.slane %v1396_v36, %v1430_v56 }
 0x38e   : > { %11523 = vmatprep.subr.bf16.mxu1 %v13917_v10 }
 0x38f   : > { %2787 = vmatmul.mubr.bf16.vlgmr.msra.gmra.mrb[4].mxu0 %v14927_v29 }
 0x390   : > { %2869 = vmatmul.mubr.bf16.vlgmr.msra.gmra.mrb[4].mxu1 %v14927_v29  ;;  %11276 = vmatpush3.bf16.msra.mxu0 %v12266_v7 }
 0x391   : > { %2909 = vmatprep.mubr.bf16.mxu0 %v14876_v45  ;;  %11524 = vmatpush3.bf16.msra.mxu1 %v12267_v8  ;;  %v12275_v45 = vld [vmem:[%s14700_s0 + $0xf8] ss:$36 sps:$4 sm:$0xff]  }
 0x392   : > { %11277 = vmatprep.subr.bf16.mxu0 %v12268_v9  ;;  %11525 = vmatprep.subr.bf16.mxu1 %v13917_v10 }
 0x393   : > { %11539 = vmatprep.mubr.msk.bf16.mxu1 %vm13918_vm0, %v13917_v10 }
 0x394   : > { %11278 = vmatpush3.bf16.msra.mxu0 %v12269_v11 }
 0x395   : > { %11526 = vmatpush3.bf16.msra.mxu1 %v12270_v12  ;;  %11279 = vmatprep.subr.bf16.mxu0 %v12271_v13 }
 0x396   : > { %11527 = vmatprep.subr.bf16.mxu1 %v13917_v10 }
 0x398   : > { %11280 = vmatpush3.bf16.msra.mxu0 %v12272_v14  ;;  %v1423_v14 = vrot.slane %v1396_v36, %v1422_v62 }
 0x399   : > { %11528 = vmatpush3.bf16.msra.mxu1 %v12273_v15  ;;  %11281 = vmatprep.subr.bf16.mxu0 %v12274_v16  ;;  %v1411_v16 = vrot.slane %v1396_v36, %v14903_v0 }
 0x39a   : > { %11529 = vmatprep.subr.bf16.mxu1 %v13917_v10 }
 0x39c   : > { %11282 = vmatpush3.bf16.msra.mxu0 %v12275_v45 }
 0x39d   : > { %11530 = vmatpush3.bf16.msra.mxu1 %v12276_v17  ;;  %11283 = vmatprep.subr.bf16.mxu0 %v12277_v18 }
 0x39e   : > { %11531 = vmatprep.subr.bf16.mxu1 %v13917_v10 }
 0x3a0   : > { %11284 = vmatpush3.bf16.msra.mxu0 %v12278_v19 }
 0x3a1   : > { %11532 = vmatpush3.bf16.msra.mxu1 %v12279_v20  ;;  %11285 = vmatprep.subr.bf16.mxu0 %v12280_v21 }
 0x3a2   : > { %11533 = vmatprep.subr.bf16.mxu1 %v13917_v10 }
 0x3a4   : > { %11286 = vmatpush3.bf16.msra.mxu0 %v12281_v22 }
 0x3a5   : > { %11534 = vmatpush3.bf16.msra.mxu1 %v12282_v24  ;;  %11287 = vmatprep.subr.bf16.mxu0 %v12283_v28 }
 0x3a6   : > { %11535 = vmatprep.subr.bf16.mxu1 %v13917_v10 }
 0x3a8   : > { %11288 = vmatpush3.bf16.msra.mxu0 %v12284_v30 }
 0x3a9   : > { %11536 = vmatpush3.bf16.msra.mxu1 %v12285_v31  ;;  %11289 = vmatprep.subr.bf16.mxu0 %v12286_v32  ;;  %v10276_v31 = vld [vmem:[%s14708_s19 + $0x8] ss:$0 sm:$0xff] }
 0x3aa   : > { %11537 = vmatprep.subr.bf16.mxu1 %v13917_v10 }
 0x3ac   : > { %11290 = vmatpush3.bf16.msra.mxu0 %v12287_v33 }
 0x3ad   : > { %11538 = vmatpush3.bf16.msra.mxu1 %v12288_v34  ;;  %11543 = vmatprep.subr.bf16.mxu0 %v13917_v10 }
 0x3ae   : > { %11549 = vmatprep.subr.bf16.mxu1 %v13917_v10 }
 0x3af   : > { %2910 = vmatmul.mubr.bf16.vlgmr.msra.gmra.mrb[8].mxu0 %v14878_v46 }
 0x3b0   : > { %11540 = vmatmul.mubr.bf16.vlgmr.msra.gmra.mrb[8].mxu1 %v14927_v29  ;;  %11545 = vmatprep.mubr.msk.bf16.mxu0 %vm13918_vm0, %v13917_v10 }
 0x3b1   : > { %11551 = vmatprep.mubr.msk.bf16.mxu1 %vm13918_vm0, %v13917_v10 }
 0x402   : > { %v2624_v4 = vpop.f32.mrb[0].mxu0  ;;  %v2706_v38 = vpop.f32.mrb[0].mxu1 }
 0x403   : > { %v2626_v39 = vpop.f32.mrb[1].mxu0  ;;  %v2708_v46 = vpop.f32.mrb[1].mxu1  ;;  %v11707_v44 = vadd.f32 %v2624_v4, %v1403_v37  ;;  %v11709_v18 = vadd.f32 %v2706_v38, %v1411_v16 }
 0x404   : > { %v11710_v40 = vadd.f32 %v2708_v46, %v1415_v3  ;;  %v2628_v29 = vpop.f32.mrb[2].mxu0  ;;  %v2710_v41 = vpop.f32.mrb[2].mxu1  ;;  %v11708_v2 = vadd.f32 %v2626_v39, %v1407_v55 }
 0x405   : > { %v2629_v42 = vpop.f32.mrb[3].mxu0  ;;  %v2711_v43 = vpop.f32.mrb[3].mxu1  ;;  %v2963_v49 = vpack.c.bf16 %v11707_v44, %v11707_v44  ;;  %v15118_v20 = vpack.c.bf16 %v11709_v18, %v11709_v18  ;;  %v13920_v29 = vmov -1e+30  }
 0x406   : > { %v2964_v47 = vpack.c.bf16 %v11710_v40, %v11710_v40  ;;  %v15102_v13 = vpack.c.bf16 %v11708_v2, %v11708_v2  ;;  %v2960_v40 = vand.u32 127, %v1116_v23 }
 0x408   : > { %v2971_v48 = vsel %vm2966_vm1, %v2964_v47, 0  ;;  %3102 = vrot.lane.b32.xlu1 %v2964_v47, %s13919_s28  ;;  %vm2961_vm3 = vcmp.ge.s32.totalorder %v14840_v25, %v2960_v40 }
 0x409   : > { %11544 = vmatpush3.bf16.xpose.msra.mxu0 %v2971_v48  ;;  %v15132_v41 = vsel %vm2961_vm3, 0.0, %v13920_v29  ;;  %v12295_v29 = vld [vmem:[%s14711_s9 + $0x7c] ss:$12 sps:$4 sm:$0xff]  }
 0x40a   : > { %11555 = vmatprep.subr.bf16.mxu0 %v13917_v10 }
 0x40c   : > { %3099 = vrot.lane.b32.xlu1 %v2963_v49, %s13919_s28 }
 0x410   : > { %11546 = vmatmul.mubr.msk.bf16.vlgmr.msra.gmra.mrb[12].mxu0 %vm2966_vm1, %v2963_v49 }
 0x411   : > { %11557 = vmatprep.mubr.msk.bf16.mxu0 %vm13918_vm0, %v13917_v10 }
 0x462   : > { %v2788_v57 = vpop.f32.mrb[4].mxu0 }
 0x463   : > { %v11711_v58 = vadd.f32 %v2788_v57, %v1419_v52  ;;  %v2870_v59 = vpop.f32.mrb[4].mxu1  ;;  %v2790_v60 = vpop.f32.mrb[5].mxu0 }
 0x464   : > { %v11713_v61 = vadd.f32 %v2870_v59, %v1427_v54  ;;  %v2872_v63 = vpop.f32.mrb[5].mxu1  ;;  %v2792_v1 = vpop.f32.mrb[6].mxu0  ;;  %v11712_v45 = vadd.f32 %v2790_v60, %v1423_v14 }
 0x465   : > { %v15094_v5 = vpack.c.bf16 %v11711_v58, %v11711_v58  ;;  %v2874_v7 = vpop.f32.mrb[6].mxu1  ;;  %v2793_v8 = vpop.f32.mrb[7].mxu0  ;;  %v11714_v15 = vadd.f32 %v2872_v63, %v1431_v6 }
 0x466   : > { %v2965_v9 = vpack.c.bf16 %v11713_v61, %v11713_v61  ;;  %v2875_v11 = vpop.f32.mrb[7].mxu1  ;;  %v15114_v19 = vpack.c.bf16 %v11712_v45, %v11712_v45 }
 0x467   : > { %3821 = vrot.lane.b32.xlu1 %v15094_v5, %s13919_s28  ;;  %v15110_v17 = vpack.c.bf16 %v11714_v15, %v11714_v15 }
 0x468   : > { %v3039_v12 = vsel %vm3037_vm2, %v2965_v9, 0  ;;  %3171 = vrot.lane.b32.xlu0 %v2965_v9, %s13919_s28 }
 0x469   : > { %11550 = vmatpush3.bf16.msra.mxu1 %v3039_v12 }
 0x46a   : > { %11561 = vmatprep.subr.bf16.mxu1 %v13917_v10 }
 0x46b   : > { %3818 = vrot.lane.b32.xlu1 %v15102_v13, %s13919_s28 }
 0x46f   : > { %3890 = vrot.lane.b32.xlu1 %v15110_v17, %s13919_s28 }
 0x473   : > { %4395 = vrot.lane.b32.xlu1 %v15114_v19, %s13919_s28 }
 0x477   : > { %4392 = vrot.lane.b32.xlu1 %v15118_v20, %s13919_s28 }
 0x47a   : > { %v3103_v21 = vpop.permute.xlu1 %3102 }
 0x47b   : > { %v3108_v22 = vsel %vm2966_vm1, %v3103_v21, 0 }
 0x47c   : > { %11556 = vmatpush3.bf16.xpose.msra.mxu0 %v3108_v22 }
 0x47e   : > { %v3100_v24 = vpop.permute.xlu1 %3099 }
 0x482   : > { %v11291_v28 = vpop.f32.mrb[8].mxu0 }
 0x483   : > { %v2951_v30 = vpop.f32.mrb[8].mxu1  ;;  %v11292_v32 = vpop.f32.mrb[9].mxu0  ;;  %11558 = vmatmul.mubr.msk.bf16.vlgmr.msra.gmra.mrb[16].mxu0 %vm2966_vm1, %v3100_v24 }
 0x484   : > { %v11293_v33 = vadd.f32 %v11292_v32, %v11291_v28  ;;  %v11541_v34 = vpop.f32.mrb[9].mxu1  ;;  %v11294_v36 = vpop.f32.mrb[10].mxu0  ;;  %3336 = vmatprep.mubr.bf16.mxu0 %v13916_v53 }
 0x485   : > { %v2954_v3 = vpop.f32.mrb[10].mxu1  ;;  %v11295_v37 = vpop.f32.mrb[11].mxu0 }
 0x486   : > { %v2912_v4 = vadd.f32 %v11293_v33, %v10276_v31  ;;  %v11542_v38 = vpop.f32.mrb[11].mxu1 }
 0x487   : > { %v12289_v38 = vld [vmem:[%s14711_s9 + $0x60] ss:$12 sps:$4 sm:$0xff]  }
 0x488   : > { %v2952_v39 = vadd.f32 %v2951_v30, %v2912_v4 }
 0x48a   : > { %v15126_v46 = vpack.c.bf16 %v2952_v39, %v2952_v39  ;;  %v12291_v39 = vld [vmem:[%s14711_s9 + $0x64] ss:$12 sps:$4 sm:$0xff]  }
 0x48b   : > { %3304 = vmatprep.subr.bf16.mxu0 %v12291_v39  ;;  %v12326_v39 = vld [vmem:[%s14711_s9 + $0xdc] ss:$12 sps:$4 sm:$0xff]  }
 0x48c   : > { %4464 = vrot.lane.b32.xlu1 %v15126_v46, %s13919_s28  ;;  %3305 = vmatpush1.bf16.msra.mxu0 %v12289_v38  ;;  %v12323_v38 = vld [vmem:[%s14711_s9 + $0xc4] ss:$12 sps:$4 sm:$0xff]  }
 0x48d   : > { %3306 = vmatprep.subr.bf16.mxu0 %v12295_v29  ;;  %v12330_v29 = vld [vmem:[%s14711_s9 + $0xf4] ss:$12 sps:$4 sm:$0xff]  }
 0x4da   : > { %v3172_v14 = vpop.permute.xlu0 %3171 }
 0x4db   : > { %v3177_v16 = vsel %vm3037_vm2, %v3172_v14, 0  ;;  %v12305_v14 = vld [vmem:[%s14711_s9] ss:$12 sps:$4 sm:$0xff]  }
 0x4e3   : > { %v3007_v42 = vpop.f32.mrb[12].mxu0 }
 0x4e4   : > { %v3008_v43 = vadd.f32 %v3007_v42, %v15132_v41  ;;  %v11547_v44 = vpop.f32.mrb[13].mxu0 }
 0x4e5   : > { %v3010_v47 = vpop.f32.mrb[14].mxu0 }
 0x4e6   : > { %v3014_v48 = vsel %vm3013_vm4, %v3008_v43, -inf  ;;  %v11548_v49 = vpop.f32.mrb[15].mxu0  ;;  %v12299_v47 = vld [vmem:[%s14711_s9 + $0x94] ss:$12 sps:$4 sm:$0xff]  }
 0x4e7   : > { %v3015_v52 = vrot.slane %v3014_v48, 4  ;;  %v12297_v49 = vld [vmem:[%s14711_s9 + $0x90] ss:$12 sps:$4 sm:$0xff]  }
 0x4e9   : > { %v3016_v54 = vmax.f32 %v3014_v48, %v3015_v52 }
 0x4eb   : > { %v3017_v55 = vrot.slane %v3016_v54, 2 }
 0x4ed   : > { %v3018_v57 = vmax.f32 %v3016_v54, %v3017_v55  ;;  %v12303_v54 = vld [vmem:[%s14711_s9 + $0xac] ss:$12 sps:$4 sm:$0xff]  }
 0x4ef   : > { %v3019_v58 = vrot.slane %v3018_v57, 1 }
 0x4f1   : > { %v3020_v23 = vmax.f32 %v3018_v57, %v3019_v58  ;;  %v12301_v57 = vld [vmem:[%s14711_s9 + $0xa8] ss:$12 sps:$4 sm:$0xff]  }
 0x4f3   : > { %v3021_v59 = vsub.f32 %v3008_v43, %v3020_v23  ;;  %v12293_v43 = vld [vmem:[%s14711_s9 + $0x78] ss:$12 sps:$4 sm:$0xff]  }
 0x4f4   : > { %3307 = vmatpush1.bf16.msra.mxu0 %v12293_v43  ;;  %v12334_v43 = vld [vmem:[%s14711_s9 + $0x10c] ss:$12 sps:$4 sm:$0xff]  }
 0x4f5   : > { %v3022_v60 = vmul.f32 1.442695, %v3021_v59  ;;  %3308 = vmatprep.subr.bf16.mxu0 %v12299_v47 }
 0x4f7   : > { %13203 = vpow2.f32 %v3022_v60  ;;  %v12292_v60 = vld [vmem:[%s14711_s9 + $0x68] ss:$12 sps:$4 sm:$0xff]  }
 0x4f8   : > { %3309 = vmatpush1.bf16.msra.mxu0 %v12297_v49 }
 0x4f9   : > { %3310 = vmatprep.subr.bf16.mxu0 %v12303_v54 }
 0x4fc   : > { %3311 = vmatpush1.bf16.msra.mxu0 %v12301_v57 }
 0x501   : > { %v13204_v61 = vpop.eup %13203 }
 0x502   : > { %v3024_v63 = vsel %vm3013_vm4, %v13204_v61, 0.0 }
 0x503   : > { %v3025_v1 = vrot.slane %v3024_v63, 4 }
 0x505   : > { %v3026_v2 = vadd.f32 %v3025_v1, %v3024_v63  ;;  %v12296_v63 = vld [vmem:[%s14711_s9 + $0x80] ss:$12 sps:$4 sm:$0xff]   ;;  %v12300_v1 = vld [vmem:[%s14711_s9 + $0x98] ss:$12 sps:$4 sm:$0xff]  }
 0x507   : > { %v3027_v6 = vrot.slane %v3026_v2, 2 }
 0x509   : > { %v3028_v7 = vadd.f32 %v3027_v6, %v3026_v2  ;;  %v12304_v2 = vld [vmem:[%s14711_s9 + $0xb0] ss:$12 sps:$4 sm:$0xff]  }
 0x50a   : > { %v12307_v6 = vld [vmem:[%s14711_s9 + $0x4] ss:$12 sps:$4 sm:$0xff]  }
 0x50b   : > { %v3029_v8 = vrot.slane %v3028_v7, 1  ;;  %3452 = vmatprep.subr.bf16.mxu0 %v12307_v6 }
 0x50d   : > { %v3030_v9 = vadd.f32 %v3029_v8, %v3028_v7 }
 0x50f   : > { %13205 = vrcp.f32 %v3030_v9 }
 0x519   : > { %v13206_v11 = vpop.eup %13205 }
 0x51a   : > { %v3032_v12 = vmul.f32 %v13206_v11, %v13204_v61 }
 0x51c   : > { %v3033_v15 = vpack.c.bf16 %v3032_v12, %v3032_v12 }
 0x51e   : > { %11552 = vmatmul.mubr.msk.bf16.vlgmr.msra.gmra.mrb[12].mxu1 %vm3013_vm4, %v3033_v15  ;;  %v12308_v15 = vld [vmem:[%s14711_s9 + $0x8] ss:$12 sps:$4 sm:$0xff]  }
 0x51f   : > { %11562 = vmatpush3.bf16.msra.mxu1 %v3177_v16  ;;  %11563 = vmatprep.mubr.msk.bf16.mxu1 %vm13918_vm0, %v13917_v10 }
 0x520   : > { %11567 = vmatprep.subr.bf16.mxu1 %v13917_v10 }
 0x556   : > { %v3144_v45 = vpop.f32.mrb[16].mxu0 }
 0x557   : > { %v3145_v18 = vadd.f32 %v3144_v45, %v15132_v41  ;;  %v11559_v21 = vpop.f32.mrb[17].mxu0 }
 0x558   : > { %v3147_v22 = vpop.f32.mrb[18].mxu0 }
 0x559   : > { %v3150_v24 = vsel %vm3013_vm4, %v3145_v18, -inf  ;;  %v11560_v28 = vpop.f32.mrb[19].mxu0 }
 0x55a   : > { %v3151_v30 = vrot.slane %v3150_v24, 4  ;;  %v12312_v28 = vld [vmem:[%s14711_s9 + $0x20] ss:$12 sps:$4 sm:$0xff]  }
 0x55c   : > { %v3152_v31 = vmax.f32 %v3150_v24, %v3151_v30  ;;  %v12309_v24 = vld [vmem:[%s14711_s9 + $0x18] ss:$12 sps:$4 sm:$0xff]   ;;  %v12315_v30 = vld [vmem:[%s14711_s9 + $0x34] ss:$12 sps:$4 sm:$0xff]  }
 0x55e   : > { %v3153_v32 = vrot.slane %v3152_v31, 2 }
 0x560   : > { %v3154_v33 = vmax.f32 %v3152_v31, %v3153_v32  ;;  %v12313_v31 = vld [vmem:[%s14711_s9 + $0x30] ss:$12 sps:$4 sm:$0xff]   ;;  %v12316_v32 = vld [vmem:[%s14711_s9 + $0x38] ss:$12 sps:$4 sm:$0xff]  }
 0x562   : > { %v3155_v34 = vrot.slane %v3154_v33, 1 }
 0x564   : > { %v3156_v36 = vmax.f32 %v3154_v33, %v3155_v34  ;;  %v12319_v33 = vld [vmem:[%s14711_s9 + $0x4c] ss:$12 sps:$4 sm:$0xff]   ;;  %v12317_v34 = vld [vmem:[%s14711_s9 + $0x48] ss:$12 sps:$4 sm:$0xff]  }
 0x566   : > { %v3157_v3 = vsub.f32 %v3145_v18, %v3156_v36  ;;  %v12311_v18 = vld [vmem:[%s14711_s9 + $0x1c] ss:$12 sps:$4 sm:$0xff]  }
 0x567   : > { %v12320_v36 = vld [vmem:[%s14711_s9 + $0x50] ss:$12 sps:$4 sm:$0xff]  }
 0x568   : > { %v3158_v37 = vmul.f32 1.442695, %v3157_v3 }
 0x56a   : > { %13207 = vpow2.f32 %v3158_v37  ;;  %v3606_v37 = vsel %vm3037_vm2, %v15110_v17, 0  ;;  %v3540_v17 = vsel %vm2966_vm1, %v15094_v5, 0  ;;  %v12332_v5 = vld [vmem:[%s14711_s9 + $0x108] ss:$12 sps:$4 sm:$0xff]  }
 0x574   : > { %v13208_v4 = vpop.eup %13207 }
 0x575   : > { %v3160_v40 = vsel %vm3013_vm4, %v13208_v4, 0.0 }
 0x576   : > { %v3161_v42 = vrot.slane %v3160_v40, 4 }
 0x578   : > { %v3162_v44 = vadd.f32 %v3161_v42, %v3160_v40  ;;  %v12324_v40 = vld [vmem:[%s14711_s9 + $0xd8] ss:$12 sps:$4 sm:$0xff]   ;;  %v12328_v42 = vld [vmem:[%s14711_s9 + $0xf0] ss:$12 sps:$4 sm:$0xff]  }
 0x57a   : > { %v3163_v48 = vrot.slane %v3162_v44, 2 }
 0x57c   : > { %v3164_v52 = vadd.f32 %v3163_v48, %v3162_v44 }
 0x57e   : > { %v3165_v55 = vrot.slane %v3164_v52, 1 }
 0x580   : > { %v3166_v58 = vadd.f32 %v3165_v55, %v3164_v52 }
 0x582   : > { %13209 = vrcp.f32 %v3166_v58 }
 0x58c   : > { %v13210_v23 = vpop.eup %13209 }
 0x58d   : > { %v3168_v59 = vmul.f32 %v13210_v23, %v13208_v4  ;;  %v12321_v4 = vld [vmem:[%s14711_s9 + $0xc0] ss:$12 sps:$4 sm:$0xff]  }
 0x58f   : > { %v3169_v61 = vpack.c.bf16 %v3168_v59, %v3168_v59 }
 0x591   : > { %11564 = vmatmul.mubr.msk.bf16.vlgmr.msra.gmra.mrb[16].mxu1 %vm3013_vm4, %v3169_v61 }
 0x592   : > { %11568 = vmatpush3.bf16.msra.mxu1 %v12292_v60  ;;  %11575 = vmatprep.mubr.msk.bf16.mxu1 %vm13918_vm0, %v13917_v10 }
 0x593   : > { %11569 = vmatprep.subr.bf16.mxu1 %v13917_v10 }
 0x596   : > { %11570 = vmatpush3.bf16.msra.mxu1 %v12296_v63 }
 0x597   : > { %11571 = vmatprep.subr.bf16.mxu1 %v13917_v10 }
 0x59a   : > { %11572 = vmatpush3.bf16.msra.mxu1 %v12300_v1 }
 0x59b   : > { %11573 = vmatprep.subr.bf16.mxu1 %v13917_v10 }
 0x59e   : > { %11574 = vmatpush3.bf16.msra.mxu1 %v12304_v2 }
 0x59f   : > { %11579 = vmatprep.subr.bf16.mxu1 %v13917_v10 }
 0x5f1   : > { %v3075_v7 = vpop.f32.mrb[12].mxu1 }
 0x5f2   : > { %v11553_v8 = vpop.f32.mrb[13].mxu1  ;;  %v3081_v3 = vpack.c.bf16 %v3075_v7, %v3075_v7 }
 0x5f3   : > { %v3078_v9 = vpop.f32.mrb[14].mxu1 }
 0x5f4   : > { %v11554_v11 = vpop.f32.mrb[15].mxu1 }
 0x664   : > { %v3213_v12 = vpop.f32.mrb[16].mxu1 }
 0x665   : > { %v3219_v16 = vpack.c.bf16 %v3213_v12, %v3213_v12  ;;  %v11565_v45 = vpop.f32.mrb[17].mxu1 }
 0x666   : > { %v3216_v21 = vpop.f32.mrb[18].mxu1 }
 0x667   : > { %v11566_v22 = vpop.f32.mrb[19].mxu1  ;;  %10525 = vmatmul.mubr.msk.bf16.vlgmr.msra.gmra.mrb[20].mxu0 %vm2966_vm1, %v3219_v16  ;;  %11576 = vmatmul.mubr.msk.bf16.vlgmr.msra.gmra.mrb[20].mxu1 %vm2966_vm1, %v3219_v16 }
 0x668   : > { %3453 = vmatpush1.bf16.msra.mxu0 %v12305_v14  ;;  %11580 = vmatpush3.bf16.msra.mxu1 %v12308_v15 }
 0x669   : > { %3454 = vmatprep.subr.bf16.mxu0 %v12311_v18  ;;  %11581 = vmatprep.subr.bf16.mxu1 %v13917_v10 }
 0x66a   : > { %3484 = vmatprep.mubr.bf16.mxu0 %v13916_v53  ;;  %11587 = vmatprep.mubr.msk.bf16.mxu1 %vm13918_vm0, %v13917_v10 }
 0x66c   : > { %3455 = vmatpush1.bf16.msra.mxu0 %v12309_v24  ;;  %11582 = vmatpush3.bf16.msra.mxu1 %v12312_v28 }
 0x66d   : > { %3456 = vmatprep.subr.bf16.mxu0 %v12315_v30  ;;  %11583 = vmatprep.subr.bf16.mxu1 %v13917_v10 }
 0x670   : > { %3457 = vmatpush1.bf16.msra.mxu0 %v12313_v31  ;;  %11584 = vmatpush3.bf16.msra.mxu1 %v12316_v32 }
 0x671   : > { %3458 = vmatprep.subr.bf16.mxu0 %v12319_v33  ;;  %11585 = vmatprep.subr.bf16.mxu1 %v13917_v10 }
 0x674   : > { %3459 = vmatpush1.bf16.msra.mxu0 %v12317_v34  ;;  %11586 = vmatpush3.bf16.msra.mxu1 %v12320_v36 }
 0x675   : > { %11597 = vmatprep.subr.bf16.mxu1 %v13917_v10  ;;  %11591 = vmatprep.subr.bf16.mxu0 %v13917_v10 }
 0x677   : > { %10539 = vmatmul.mubr.msk.bf16.vlgmr.msra.gmra.mrb[24].mxu0 %vm2966_vm1, %v3081_v3  ;;  %11588 = vmatmul.mubr.msk.bf16.vlgmr.msra.gmra.mrb[24].mxu1 %vm2966_vm1, %v3081_v3 }
 0x678   : > { %11598 = vmatpush3.bf16.msra.mxu1 %v3606_v37  ;;  %11593 = vmatprep.mubr.msk.bf16.mxu0 %vm13918_vm0, %v13917_v10 }
 0x679   : > { %11599 = vmatprep.mubr.msk.bf16.mxu1 %vm13918_vm0, %v13917_v10  ;;  %11603 = vmatprep.subr.bf16.mxu1 %v13917_v10 }
 0x67d   : > { %11592 = vmatpush3.bf16.xpose.msra.mxu0 %v3540_v17 }
 0x67e   : > { %3733 = vmatprep.subr.bf16.mxu0 %v12323_v38 }
 0x684   : > { %11594 = vmatmul.mubr.msk.bf16.vlgmr.msra.gmra.mrb[28].mxu0 %vm2966_vm1, %v15102_v13 }
 0x685   : > { %3765 = vmatprep.mubr.bf16.mxu0 %v13916_v53  ;;  %3734 = vmatpush1.bf16.msra.mxu0 %v12321_v4 }
 0x686   : > { %3735 = vmatprep.subr.bf16.mxu0 %v12326_v39  ;;  %v12327_v39 = vld [vmem:[%s14711_s9 + $0xc8] ss:$12 sps:$4 sm:$0xff]  }
 0x689   : > { %3736 = vmatpush1.bf16.msra.mxu0 %v12324_v40 }
 0x68a   : > { %3737 = vmatprep.subr.bf16.mxu0 %v12330_v29  ;;  %v12331_v29 = vld [vmem:[%s14711_s9 + $0xe0] ss:$12 sps:$4 sm:$0xff]  }
 0x68d   : > { %3738 = vmatpush1.bf16.msra.mxu0 %v12328_v42  ;;  %v12335_v42 = vld [vmem:[%s14711_s9 + $0xf8] ss:$12 sps:$4 sm:$0xff]  }
 0x68e   : > { %3739 = vmatprep.subr.bf16.mxu0 %v12334_v43  ;;  %v12336_v43 = vld [vmem:[%s14711_s9 + $0x110] ss:$12 sps:$4 sm:$0xff]  }
 0x691   : > { %3740 = vmatpush1.bf16.msra.mxu0 %v12332_v5  ;;  %v3822_v5 = vpop.permute.xlu1 %3821 }
 0x692   : > { %11615 = vmatprep.subr.bf16.mxu0 %v13917_v10 }
 0x73a   : > { %v3338_v13 = vpop.f32.mrb[20].mxu0  ;;  %v3379_v44 = vpop.f32.mrb[20].mxu1 }
 0x73b   : > { %v3340_v47 = vpop.f32.mrb[21].mxu0  ;;  %v11577_v48 = vpop.f32.mrb[21].mxu1 }
 0x73c   : > { %v3342_v49 = vpop.f32.mrb[22].mxu0  ;;  %v3382_v52 = vpop.f32.mrb[22].mxu1 }
 0x73d   : > { %v3343_v54 = vpop.f32.mrb[23].mxu0  ;;  %v11578_v55 = vpop.f32.mrb[23].mxu1 }
 0x73e   : > { %v3827_v54 = vsel %vm2966_vm1, %v3822_v5, 0 }
 0x74a   : > { %v3486_v57 = vpop.f32.mrb[24].mxu0  ;;  %v3527_v58 = vpop.f32.mrb[24].mxu1 }
 0x74b   : > { %v15209_v23 = vadd.f32 %v3486_v57, %v3338_v13  ;;  %v15211_v59 = vadd.f32 %v3527_v58, %v3379_v44  ;;  %v3488_v60 = vpop.f32.mrb[25].mxu0  ;;  %v11589_v61 = vpop.f32.mrb[25].mxu1  ;;  %v12337_v58 = vld [vmem:[%s14711_s9 + $0x120] ss:$12 sps:$4 sm:$0xff]  }
 0x74c   : > { %v15213_v63 = vadd.f32 %v3488_v60, %v3340_v47  ;;  %v3490_v1 = vpop.f32.mrb[26].mxu0  ;;  %v3530_v2 = vpop.f32.mrb[26].mxu1  ;;  %v12339_v60 = vld [vmem:[%s14711_s9 + $0x124] ss:$12 sps:$4 sm:$0xff]   ;;  %v12342_v61 = vld [vmem:[%s14711_s9 + $0x13c] ss:$12 sps:$4 sm:$0xff]  }
 0x74d   : > { %v3491_v6 = vpop.f32.mrb[27].mxu0  ;;  %v11590_v7 = vpop.f32.mrb[27].mxu1  ;;  %v12340_v1 = vld [vmem:[%s14711_s9 + $0x138] ss:$12 sps:$4 sm:$0xff]   ;;  %v12346_v2 = vld [vmem:[%s14711_s9 + $0x154] ss:$12 sps:$4 sm:$0xff]  }
 0x74e   : > { %v3819_v13 = vpop.permute.xlu1 %3818  ;;  %v12344_v6 = vld [vmem:[%s14711_s9 + $0x150] ss:$12 sps:$4 sm:$0xff]   ;;  %v12350_v7 = vld [vmem:[%s14711_s9 + $0x16c] ss:$12 sps:$4 sm:$0xff]  }
 0x752   : > { %v3891_v44 = vpop.permute.xlu1 %3890 }
 0x753   : > { %v3896_v55 = vsel %vm3037_vm2, %v3891_v44, 0 }
 0x757   : > { %v3576_v8 = vpop.f32.mrb[28].mxu0 }
 0x758   : > { %v3577_v9 = vadd.f32 %v3576_v8, %v15132_v41  ;;  %v11595_v11 = vpop.f32.mrb[29].mxu0  ;;  %v12348_v8 = vld [vmem:[%s14711_s9 + $0x168] ss:$12 sps:$4 sm:$0xff]  }
 0x759   : > { %v3579_v12 = vpop.f32.mrb[30].mxu0 }
 0x75a   : > { %v3582_v14 = vsel %vm3013_vm4, %v3577_v9, -inf  ;;  %v11596_v15 = vpop.f32.mrb[31].mxu0 }
 0x75b   : > { %v3583_v16 = vrot.slane %v3582_v14, 4 }
 0x75d   : > { %v3584_v45 = vmax.f32 %v3582_v14, %v3583_v16 }
 0x75f   : > { %v3585_v18 = vrot.slane %v3584_v45, 2 }
 0x761   : > { %v3586_v21 = vmax.f32 %v3584_v45, %v3585_v18 }
 0x763   : > { %v3587_v22 = vrot.slane %v3586_v21, 1 }
 0x765   : > { %v3588_v24 = vmax.f32 %v3586_v21, %v3587_v22 }
 0x767   : > { %v3589_v28 = vsub.f32 %v3577_v9, %v3588_v24 }
 0x769   : > { %v3590_v30 = vmul.f32 1.442695, %v3589_v28 }
 0x76b   : > { %13211 = vpow2.f32 %v3590_v30 }
 0x775   : > { %v13212_v31 = vpop.eup %13211 }
 0x776   : > { %v3592_v32 = vsel %vm3013_vm4, %v13212_v31, 0.0 }
 0x777   : > { %v3593_v33 = vrot.slane %v3592_v32, 4 }
 0x779   : > { %v3594_v34 = vadd.f32 %v3593_v33, %v3592_v32 }
 0x77b   : > { %v3595_v36 = vrot.slane %v3594_v34, 2 }
 0x77d   : > { %v3596_v3 = vadd.f32 %v3595_v36, %v3594_v34 }
 0x77f   : > { %v3597_v37 = vrot.slane %v3596_v3, 1 }
 0x781   : > { %v3598_v17 = vadd.f32 %v3597_v37, %v3596_v3 }
 0x783   : > { %13213 = vrcp.f32 %v3598_v17 }
 0x78d   : > { %v13214_v4 = vpop.eup %13213 }
 0x78e   : > { %v3600_v38 = vmul.f32 %v13214_v4, %v13212_v31 }
 0x790   : > { %v3601_v40 = vpack.c.bf16 %v3600_v38, %v3600_v38 }
 0x792   : > { %11600 = vmatmul.mubr.msk.bf16.vlgmr.msra.gmra.mrb[28].mxu1 %vm3013_vm4, %v3601_v40 }
 0x793   : > { %11604 = vmatpush3.bf16.msra.mxu1 %v12327_v39  ;;  %11611 = vmatprep.mubr.msk.bf16.mxu1 %vm13918_vm0, %v13917_v10 }
 0x794   : > { %11605 = vmatprep.subr.bf16.mxu1 %v13917_v10 }
 0x797   : > { %11606 = vmatpush3.bf16.msra.mxu1 %v12331_v29 }
 0x798   : > { %11607 = vmatprep.subr.bf16.mxu1 %v13917_v10 }
 0x79b   : > { %11608 = vmatpush3.bf16.msra.mxu1 %v12335_v42 }
 0x79c   : > { %11609 = vmatprep.subr.bf16.mxu1 %v13917_v10 }
 0x79f   : > { %11610 = vmatpush3.bf16.msra.mxu1 %v12336_v43 }
 0x7a0   : > { %11621 = vmatprep.subr.bf16.mxu1 %v13917_v10 }
 0x865   : > { %v3642_v47 = vpop.f32.mrb[28].mxu1 }
 0x866   : > { %v3648_v48 = vpack.c.bf16 %v3642_v47, %v3642_v47  ;;  %v11601_v49 = vpop.f32.mrb[29].mxu1 }
 0x867   : > { %v3645_v52 = vpop.f32.mrb[30].mxu1 }
 0x868   : > { %v11602_v57 = vpop.f32.mrb[31].mxu1  ;;  %10571 = vmatmul.mubr.msk.bf16.vlgmr.msra.gmra.mrb[32].mxu0 %vm2966_vm1, %v3648_v48  ;;  %11612 = vmatmul.mubr.msk.bf16.vlgmr.msra.gmra.mrb[32].mxu1 %vm2966_vm1, %v3648_v48  ;;  %v12343_v48 = vld [vmem:[%s14711_s9 + $0x128] ss:$12 sps:$4 sm:$0xff]   ;;  %v12347_v52 = vld [vmem:[%s14711_s9 + $0x140] ss:$12 sps:$4 sm:$0xff]  }
 0x869   : > { %11616 = vmatpush3.bf16.xpose.msra.mxu0 %v3827_v54  ;;  %11622 = vmatpush3.bf16.msra.mxu1 %v3896_v55  ;;  %v12351_v54 = vld [vmem:[%s14711_s9 + $0x158] ss:$12 sps:$4 sm:$0xff]   ;;  %v12352_v55 = vld [vmem:[%s14711_s9 + $0x170] ss:$12 sps:$4 sm:$0xff]  }
 0x86a   : > { %11617 = vmatprep.mubr.msk.bf16.mxu0 %vm13918_vm0, %v13917_v10  ;;  %11623 = vmatprep.mubr.msk.bf16.mxu1 %vm13918_vm0, %v13917_v10 }
 0x86b   : > { %11627 = vmatprep.subr.bf16.mxu1 %v13917_v10  ;;  %4023 = vmatprep.subr.bf16.mxu0 %v12339_v60 }
 0x870   : > { %11618 = vmatmul.mubr.msk.bf16.vlgmr.msra.gmra.mrb[36].mxu0 %vm2966_vm1, %v3819_v13 }
 0x871   : > { %4055 = vmatprep.mubr.bf16.mxu0 %v13916_v53  ;;  %4024 = vmatpush1.bf16.msra.mxu0 %v12337_v58 }
 0x872   : > { %4025 = vmatprep.subr.bf16.mxu0 %v12342_v61 }
 0x875   : > { %4026 = vmatpush1.bf16.msra.mxu0 %v12340_v1  ;;  %v4114_v1 = vsel %vm2966_vm1, %v15114_v19, 0  ;;  %v12353_v19 = vld [vmem:[%s14711_s9 + $0x180] ss:$12 sps:$4 sm:$0xff]  }
 0x876   : > { %4027 = vmatprep.subr.bf16.mxu0 %v12346_v2 }
 0x879   : > { %4028 = vmatpush1.bf16.msra.mxu0 %v12344_v6  ;;  %v4180_v6 = vsel %vm3037_vm2, %v15126_v46, 0  ;;  %v12355_v46 = vld [vmem:[%s14711_s9 + $0x184] ss:$12 sps:$4 sm:$0xff]  }
 0x87a   : > { %4029 = vmatprep.subr.bf16.mxu0 %v12350_v7  ;;  %v12358_v7 = vld [vmem:[%s14711_s9 + $0x19c] ss:$12 sps:$4 sm:$0xff]  }
 0x87d   : > { %4030 = vmatpush1.bf16.msra.mxu0 %v12348_v8  ;;  %v12356_v8 = vld [vmem:[%s14711_s9 + $0x198] ss:$12 sps:$4 sm:$0xff]  }
 0x87e   : > { %11639 = vmatprep.subr.bf16.mxu0 %v13917_v10 }
 0x93b   : > { %v3767_v9 = vpop.f32.mrb[32].mxu0  ;;  %v3808_v11 = vpop.f32.mrb[32].mxu1 }
 0x93c   : > { %v15250_v12 = vadd.f32 %v3767_v9, %v15209_v23  ;;  %v15253_v14 = vadd.f32 %v3808_v11, %v15211_v59  ;;  %v3769_v15 = vpop.f32.mrb[33].mxu0  ;;  %v11613_v16 = vpop.f32.mrb[33].mxu1  ;;  %v12362_v9 = vld [vmem:[%s14711_s9 + $0x1b4] ss:$12 sps:$4 sm:$0xff]   ;;  %v12360_v11 = vld [vmem:[%s14711_s9 + $0x1b0] ss:$12 sps:$4 sm:$0xff]  }
 0x93d   : > { %v15256_v45 = vadd.f32 %v3769_v15, %v15213_v63  ;;  %v3771_v18 = vpop.f32.mrb[34].mxu0  ;;  %v3811_v21 = vpop.f32.mrb[34].mxu1  ;;  %v12366_v15 = vld [vmem:[%s14711_s9 + $0x1cc] ss:$12 sps:$4 sm:$0xff]   ;;  %v12364_v16 = vld [vmem:[%s14711_s9 + $0x1c8] ss:$12 sps:$4 sm:$0xff]  }
 0x93e   : > { %v3772_v22 = vpop.f32.mrb[35].mxu0  ;;  %v11614_v24 = vpop.f32.mrb[35].mxu1 }
 0x943   : > { %v3863_v28 = vpop.f32.mrb[36].mxu0 }
 0x944   : > { %v3864_v30 = vadd.f32 %v3863_v28, %v15132_v41  ;;  %v11619_v31 = vpop.f32.mrb[37].mxu0 }
 0x945   : > { %v3866_v32 = vpop.f32.mrb[38].mxu0 }
 0x946   : > { %v3869_v23 = vsel %vm3013_vm4, %v3864_v30, -inf  ;;  %v11620_v33 = vpop.f32.mrb[39].mxu0 }
 0x947   : > { %v3870_v34 = vrot.slane %v3869_v23, 4 }
 0x949   : > { %v3871_v59 = vmax.f32 %v3869_v23, %v3870_v34 }
 0x94b   : > { %v3872_v36 = vrot.slane %v3871_v59, 2 }
 0x94d   : > { %v3873_v3 = vmax.f32 %v3871_v59, %v3872_v36 }
 0x94f   : > { %v3874_v37 = vrot.slane %v3873_v3, 1 }
 0x951   : > { %v3875_v63 = vmax.f32 %v3873_v3, %v3874_v37 }
 0x953   : > { %v3876_v17 = vsub.f32 %v3864_v30, %v3875_v63 }
 0x955   : > { %v3877_v4 = vmul.f32 1.442695, %v3876_v17 }
 0x957   : > { %13215 = vpow2.f32 %v3877_v4 }
 0x961   : > { %v13216_v38 = vpop.eup %13215 }
 0x962   : > { %v3879_v39 = vsel %vm3013_vm4, %v13216_v38, 0.0 }
 0x963   : > { %v3880_v40 = vrot.slane %v3879_v39, 4 }
 0x965   : > { %v3881_v29 = vadd.f32 %v3880_v40, %v3879_v39 }
 0x967   : > { %v3882_v42 = vrot.slane %v3881_v29, 2 }
 0x969   : > { %v3883_v43 = vadd.f32 %v3882_v42, %v3881_v29 }
 0x96b   : > { %v3884_v5 = vrot.slane %v3883_v43, 1 }
 0x96d   : > { %v3885_v13 = vadd.f32 %v3884_v5, %v3883_v43 }
 0x96f   : > { %13217 = vrcp.f32 %v3885_v13 }
 0x979   : > { %v13218_v44 = vpop.eup %13217 }
 0x97a   : > { %v3887_v47 = vmul.f32 %v13218_v44, %v13216_v38 }
 0x97c   : > { %v3888_v49 = vpack.c.bf16 %v3887_v47, %v3887_v47 }
 0x97e   : > { %11624 = vmatmul.mubr.msk.bf16.vlgmr.msra.gmra.mrb[36].mxu1 %vm3013_vm4, %v3888_v49 }
 0x97f   : > { %11628 = vmatpush3.bf16.msra.mxu1 %v12343_v48  ;;  %11635 = vmatprep.mubr.msk.bf16.mxu1 %vm13918_vm0, %v13917_v10 }
 0x980   : > { %11629 = vmatprep.subr.bf16.mxu1 %v13917_v10 }
 0x983   : > { %11630 = vmatpush3.bf16.msra.mxu1 %v12347_v52 }
 0x984   : > { %11631 = vmatprep.subr.bf16.mxu1 %v13917_v10 }
 0x987   : > { %11632 = vmatpush3.bf16.msra.mxu1 %v12351_v54  ;;  %v12359_v54 = vld [vmem:[%s14711_s9 + $0x188] ss:$12 sps:$4 sm:$0xff]  }
 0x988   : > { %11633 = vmatprep.subr.bf16.mxu1 %v13917_v10 }
 0x98b   : > { %11634 = vmatpush3.bf16.msra.mxu1 %v12352_v55 }
 0x98c   : > { %11645 = vmatprep.subr.bf16.mxu1 %v13917_v10 }
 0xa51   : > { %v3932_v57 = vpop.f32.mrb[36].mxu1 }
 0xa52   : > { %v3938_v58 = vpack.c.bf16 %v3932_v57, %v3932_v57  ;;  %v11625_v60 = vpop.f32.mrb[37].mxu1  ;;  %v12363_v57 = vld [vmem:[%s14711_s9 + $0x1a0] ss:$12 sps:$4 sm:$0xff]  }
 0xa53   : > { %v3935_v61 = vpop.f32.mrb[38].mxu1  ;;  %v12368_v60 = vld [vmem:[%s14711_s9 + $0x1d0] ss:$12 sps:$4 sm:$0xff]  }
 0xa54   : > { %v11626_v2 = vpop.f32.mrb[39].mxu1  ;;  %10603 = vmatmul.mubr.msk.bf16.vlgmr.msra.gmra.mrb[40].mxu0 %vm2966_vm1, %v3938_v58  ;;  %11636 = vmatmul.mubr.msk.bf16.vlgmr.msra.gmra.mrb[40].mxu1 %vm2966_vm1, %v3938_v58  ;;  %v12367_v58 = vld [vmem:[%s14711_s9 + $0x1b8] ss:$12 sps:$4 sm:$0xff]   ;;  %v4396_v61 = vpop.permute.xlu1 %4395 }
 0xa55   : > { %11640 = vmatpush3.bf16.xpose.msra.mxu0 %v4114_v1  ;;  %11646 = vmatpush3.bf16.msra.mxu1 %v4180_v6 }
 0xa56   : > { %11641 = vmatprep.mubr.msk.bf16.mxu0 %vm13918_vm0, %v13917_v10  ;;  %11647 = vmatprep.mubr.msk.bf16.mxu1 %vm13918_vm0, %v13917_v10 }
 0xa57   : > { %11651 = vmatprep.subr.bf16.mxu1 %v13917_v10  ;;  %4307 = vmatprep.subr.bf16.mxu0 %v12355_v46 }
 0xa58   : > { %v4393_v1 = vpop.permute.xlu1 %4392 }
 0xa5c   : > { %11642 = vmatmul.mubr.msk.bf16.vlgmr.msra.gmra.mrb[44].mxu0 %vm2966_vm1, %v15118_v20  ;;  %v4465_v2 = vpop.permute.xlu1 %4464 }
 0xa5d   : > { %4339 = vmatprep.mubr.bf16.mxu0 %v13916_v53  ;;  %4308 = vmatpush1.bf16.msra.mxu0 %v12353_v19 }
 0xa5e   : > { %4309 = vmatprep.subr.bf16.mxu0 %v12358_v7 }
 0xa61   : > { %4310 = vmatpush1.bf16.msra.mxu0 %v12356_v8  ;;  %v4401_v8 = vsel %vm2966_vm1, %v4396_v61, 0  ;;  %v12372_v61 = vld [vmem:[%s14711_s9 + $0x1e8] ss:$12 sps:$4 sm:$0xff]  }
 0xa62   : > { %4311 = vmatprep.subr.bf16.mxu0 %v12362_v9  ;;  %v4470_v9 = vsel %vm3037_vm2, %v4465_v2, 0  ;;  %v12376_v2 = vld [vmem:[%s14711_s9 + $0x200] ss:$12 sps:$4 sm:$0xff]  }
 0xa65   : > { %4312 = vmatpush1.bf16.msra.mxu0 %v12360_v11 }
 0xa66   : > { %4313 = vmatprep.subr.bf16.mxu0 %v12366_v15  ;;  %v12369_v15 = vld [vmem:[%s14711_s9 + $0x1e0] ss:$12 sps:$4 sm:$0xff]  }
 0xa69   : > { %4314 = vmatpush1.bf16.msra.mxu0 %v12364_v16  ;;  %v12371_v16 = vld [vmem:[%s14711_s9 + $0x1e4] ss:$12 sps:$4 sm:$0xff]  }
 0xa6a   : > { %11663 = vmatprep.subr.bf16.mxu0 %v13917_v10 }
 0xb27   : > { %v4057_v20 = vpop.f32.mrb[40].mxu0  ;;  %v4098_v18 = vpop.f32.mrb[40].mxu1 }
 0xb28   : > { %v15296_v21 = vadd.f32 %v4057_v20, %v15250_v12  ;;  %v15299_v22 = vadd.f32 %v4098_v18, %v15253_v14  ;;  %v4059_v24 = vpop.f32.mrb[41].mxu0  ;;  %v11637_v28 = vpop.f32.mrb[41].mxu1  ;;  %v12375_v20 = vld [vmem:[%s14711_s9 + $0x1fc] ss:$12 sps:$4 sm:$0xff]   ;;  %v12373_v18 = vld [vmem:[%s14711_s9 + $0x1f8] ss:$12 sps:$4 sm:$0xff]  }
 0xb29   : > { %v15302_v30 = vadd.f32 %v4059_v24, %v15256_v45  ;;  %v4061_v31 = vpop.f32.mrb[42].mxu0  ;;  %v4101_v32 = vpop.f32.mrb[42].mxu1  ;;  %v12379_v24 = vld [vmem:[%s14711_s9 + $0x214] ss:$12 sps:$4 sm:$0xff]   ;;  %v12377_v28 = vld [vmem:[%s14711_s9 + $0x210] ss:$12 sps:$4 sm:$0xff]  }
 0xb2a   : > { %v4062_v23 = vpop.f32.mrb[43].mxu0  ;;  %v11638_v33 = vpop.f32.mrb[43].mxu1  ;;  %v12383_v31 = vld [vmem:[%s14711_s9 + $0x22c] ss:$12 sps:$4 sm:$0xff]   ;;  %v12381_v32 = vld [vmem:[%s14711_s9 + $0x228] ss:$12 sps:$4 sm:$0xff]  }
 0xb2f   : > { %v4150_v34 = vpop.f32.mrb[44].mxu0 }
 0xb30   : > { %v4151_v59 = vadd.f32 %v4150_v34, %v15132_v41  ;;  %v11643_v36 = vpop.f32.mrb[45].mxu0 }
 0xb31   : > { %v4153_v3 = vpop.f32.mrb[46].mxu0 }
 0xb32   : > { %v4156_v12 = vsel %vm3013_vm4, %v4151_v59, -inf  ;;  %v11644_v37 = vpop.f32.mrb[47].mxu0 }
 0xb33   : > { %v4157_v63 = vrot.slane %v4156_v12, 4 }
 0xb35   : > { %v4158_v14 = vmax.f32 %v4156_v12, %v4157_v63 }
 0xb37   : > { %v4159_v17 = vrot.slane %v4158_v14, 2 }
 0xb39   : > { %v4160_v4 = vmax.f32 %v4158_v14, %v4159_v17 }
 0xb3b   : > { %v4161_v38 = vrot.slane %v4160_v4, 1 }
 0xb3d   : > { %v4162_v45 = vmax.f32 %v4160_v4, %v4161_v38 }
 0xb3f   : > { %v4163_v39 = vsub.f32 %v4151_v59, %v4162_v45 }
 0xb41   : > { %v4164_v40 = vmul.f32 1.442695, %v4163_v39 }
 0xb43   : > { %13219 = vpow2.f32 %v4164_v40 }
 0xb4d   : > { %v13220_v29 = vpop.eup %13219 }
 0xb4e   : > { %v4166_v42 = vsel %vm3013_vm4, %v13220_v29, 0.0 }
 0xb4f   : > { %v4167_v43 = vrot.slane %v4166_v42, 4 }
 0xb51   : > { %v4168_v5 = vadd.f32 %v4167_v43, %v4166_v42 }
 0xb53   : > { %v4169_v13 = vrot.slane %v4168_v5, 2 }
 0xb55   : > { %v4170_v44 = vadd.f32 %v4169_v13, %v4168_v5 }
 0xb57   : > { %v4171_v47 = vrot.slane %v4170_v44, 1 }
 0xb59   : > { %v4172_v48 = vadd.f32 %v4171_v47, %v4170_v44 }
 0xb5b   : > { %13221 = vrcp.f32 %v4172_v48 }
 0xb65   : > { %v13222_v49 = vpop.eup %13221 }
 0xb66   : > { %v4174_v52 = vmul.f32 %v13222_v49, %v13220_v29 }
 0xb68   : > { %v4175_v55 = vpack.c.bf16 %v4174_v52, %v4174_v52 }
 0xb6a   : > { %11648 = vmatmul.mubr.msk.bf16.vlgmr.msra.gmra.mrb[44].mxu1 %vm3013_vm4, %v4175_v55 }
 0xb6b   : > { %11652 = vmatpush3.bf16.msra.mxu1 %v12359_v54  ;;  %11659 = vmatprep.mubr.msk.bf16.mxu1 %vm13918_vm0, %v13917_v10 }
 0xb6c   : > { %11653 = vmatprep.subr.bf16.mxu1 %v13917_v10 }
 0xb6f   : > { %11654 = vmatpush3.bf16.msra.mxu1 %v12363_v57 }
 0xb70   : > { %11655 = vmatprep.subr.bf16.mxu1 %v13917_v10 }
 0xb73   : > { %11656 = vmatpush3.bf16.msra.mxu1 %v12367_v58 }
 0xb74   : > { %11657 = vmatprep.subr.bf16.mxu1 %v13917_v10 }
 0xb77   : > { %11658 = vmatpush3.bf16.msra.mxu1 %v12368_v60 }
 0xb78   : > { %11669 = vmatprep.subr.bf16.mxu1 %v13917_v10 }
 0xc3d   : > { %v4216_v6 = vpop.f32.mrb[44].mxu1 }
 0xc3e   : > { %v4222_v19 = vpack.c.bf16 %v4216_v6, %v4216_v6  ;;  %v11649_v46 = vpop.f32.mrb[45].mxu1  ;;  %v12380_v6 = vld [vmem:[%s14711_s9 + $0x218] ss:$12 sps:$4 sm:$0xff]  }
 0xc3f   : > { %v4219_v7 = vpop.f32.mrb[46].mxu1 }
 0xc40   : > { %v11650_v11 = vpop.f32.mrb[47].mxu1  ;;  %10635 = vmatmul.mubr.msk.bf16.vlgmr.msra.gmra.mrb[48].mxu0 %vm2966_vm1, %v4222_v19  ;;  %11660 = vmatmul.mubr.msk.bf16.vlgmr.msra.gmra.mrb[48].mxu1 %vm2966_vm1, %v4222_v19  ;;  %v12384_v19 = vld [vmem:[%s14711_s9 + $0x230] ss:$12 sps:$4 sm:$0xff]  }
 0xc41   : > { %11664 = vmatpush3.bf16.xpose.msra.mxu0 %v4401_v8  ;;  %11670 = vmatpush3.bf16.msra.mxu1 %v4470_v9 }
 0xc42   : > { %11665 = vmatprep.mubr.msk.bf16.mxu0 %vm13918_vm0, %v13917_v10  ;;  %11671 = vmatprep.mubr.msk.bf16.mxu1 %vm13918_vm0, %v13917_v10 }
 0xc43   : > { %11675 = vmatprep.subr.bf16.mxu1 %v13917_v10  ;;  %4597 = vmatprep.subr.bf16.mxu0 %v12371_v16  ;;  %v12387_v16 = vld [vmem:[%s14727_s17 + $0x4] ss:$48 sps:$4 sm:$0xff]  }
 0xc48   : > { %11666 = vmatmul.mubr.msk.bf16.vlgmr.msra.gmra.mrb[52].mxu0 %vm2966_vm1, %v4393_v1 }
 0xc49   : > { %4629 = vmatprep.mubr.bf16.mxu0 %v13916_v53  ;;  %4598 = vmatpush1.bf16.msra.mxu0 %v12369_v15  ;;  %v12385_v15 = vld [vmem:[%s14727_s17] ss:$48 sps:$4 sm:$0xff]  }
 0xc4a   : > { %4599 = vmatprep.subr.bf16.mxu0 %v12375_v20  ;;  %v12390_v20 = vld [vmem:[%s14727_s17 + $0xc] ss:$48 sps:$4 sm:$0xff]  }
 0xc4d   : > { %4600 = vmatpush1.bf16.msra.mxu0 %v12373_v18  ;;  %v12393_v18 = vld [vmem:[%s14727_s17 + $0x64] ss:$48 sps:$4 sm:$0xff]  }
 0xc4e   : > { %4601 = vmatprep.subr.bf16.mxu0 %v12379_v24  ;;  %v12396_v24 = vld [vmem:[%s14727_s17 + $0x6c] ss:$48 sps:$4 sm:$0xff]  }
 0xc51   : > { %4602 = vmatpush1.bf16.msra.mxu0 %v12377_v28  ;;  %v12391_v28 = vld [vmem:[%s14727_s17 + $0x60] ss:$48 sps:$4 sm:$0xff]  }
 0xc52   : > { %4603 = vmatprep.subr.bf16.mxu0 %v12383_v31  ;;  %v12394_v31 = vld [vmem:[%s14727_s17 + $0x68] ss:$48 sps:$4 sm:$0xff]  }
 0xc55   : > { %4604 = vmatpush1.bf16.msra.mxu0 %v12381_v32  ;;  %v12399_v32 = vld [vmem:[%s14727_s17 + $0xc4] ss:$48 sps:$4 sm:$0xff]  }
 0xc56   : > { %6562 = vmatprep.subr.bf16.mxu0 %v12387_v16 }
 0xd13   : > { %v4341_v23 = vpop.f32.mrb[48].mxu0  ;;  %v4382_v33 = vpop.f32.mrb[48].mxu1 }
 0xd14   : > { %v15338_v34 = vadd.f32 %v4341_v23, %v15296_v21  ;;  %v15341_v59 = vadd.f32 %v4382_v33, %v15299_v22  ;;  %v4343_v36 = vpop.f32.mrb[49].mxu0  ;;  %v11661_v3 = vpop.f32.mrb[49].mxu1  ;;  %v12402_v23 = vld [vmem:[%s14727_s17 + $0xcc] ss:$48 sps:$4 sm:$0xff]   ;;  %v12397_v33 = vld [vmem:[%s14727_s17 + $0xc0] ss:$48 sps:$4 sm:$0xff]  }
 0xd15   : > { %v15344_v12 = vadd.f32 %v4343_v36, %v15302_v30  ;;  %v4345_v37 = vpop.f32.mrb[50].mxu0  ;;  %v4385_v63 = vpop.f32.mrb[50].mxu1  ;;  %v12400_v36 = vld [vmem:[%s14727_s17 + $0xc8] ss:$48 sps:$4 sm:$0xff]   ;;  %v12405_v3 = vld [vmem:[%s14727_s17 + $0x124] ss:$48 sps:$4 sm:$0xff]  }
 0xd16   : > { %v4346_v14 = vpop.f32.mrb[51].mxu0  ;;  %v11662_v17 = vpop.f32.mrb[51].mxu1  ;;  %v12408_v37 = vld [vmem:[%s14727_s17 + $0x12c] ss:$48 sps:$4 sm:$0xff]   ;;  %v12403_v63 = vld [vmem:[%s14727_s17 + $0x120] ss:$48 sps:$4 sm:$0xff]  }
 0xd17   : > { %v12406_v14 = vld [vmem:[%s14727_s17 + $0x128] ss:$48 sps:$4 sm:$0xff]   ;;  %v12411_v17 = vld [vmem:[%s14727_s17 + $0x184] ss:$48 sps:$4 sm:$0xff]  }
 0xd1b   : > { %v4437_v4 = vpop.f32.mrb[52].mxu0 }
 0xd1c   : > { %v4438_v38 = vadd.f32 %v4437_v4, %v15132_v41  ;;  %v11667_v45 = vpop.f32.mrb[53].mxu0  ;;  %v12414_v4 = vld [vmem:[%s14727_s17 + $0x18c] ss:$48 sps:$4 sm:$0xff]  }
 0xd1d   : > { %v4440_v39 = vpop.f32.mrb[54].mxu0  ;;  %v12412_v45 = vld [vmem:[%s14727_s17 + $0x188] ss:$48 sps:$4 sm:$0xff]  }
 0xd1e   : > { %v4443_v21 = vsel %vm3013_vm4, %v4438_v38, -inf  ;;  %v11668_v40 = vpop.f32.mrb[55].mxu0  ;;  %v12417_v39 = vld [vmem:[%s14727_s17 + $0x1e4] ss:$48 sps:$4 sm:$0xff]  }
 0xd1f   : > { %v4444_v29 = vrot.slane %v4443_v21, 4  ;;  %v12415_v40 = vld [vmem:[%s14727_s17 + $0x1e0] ss:$48 sps:$4 sm:$0xff]  }
 0xd21   : > { %v4445_v22 = vmax.f32 %v4443_v21, %v4444_v29  ;;  %v12420_v21 = vld [vmem:[%s14727_s17 + $0x1ec] ss:$48 sps:$4 sm:$0xff]   ;;  %v12418_v29 = vld [vmem:[%s14727_s17 + $0x1e8] ss:$48 sps:$4 sm:$0xff]  }
 0xd23   : > { %v4446_v42 = vrot.slane %v4445_v22, 2 }
 0xd25   : > { %v4447_v43 = vmax.f32 %v4445_v22, %v4446_v42  ;;  %v12423_v22 = vld [vmem:[%s14727_s17 + $0x244] ss:$48 sps:$4 sm:$0xff]   ;;  %v12426_v42 = vld [vmem:[%s14727_s17 + $0x24c] ss:$48 sps:$4 sm:$0xff]  }
 0xd27   : > { %v4448_v5 = vrot.slane %v4447_v43, 1 }
 0xd29   : > { %v4449_v30 = vmax.f32 %v4447_v43, %v4448_v5  ;;  %v12421_v43 = vld [vmem:[%s14727_s17 + $0x240] ss:$48 sps:$4 sm:$0xff]   ;;  %v12424_v5 = vld [vmem:[%s14727_s17 + $0x248] ss:$48 sps:$4 sm:$0xff]  }
 0xd2b   : > { %v4450_v13 = vsub.f32 %v4438_v38, %v4449_v30  ;;  %v12409_v38 = vld [vmem:[%s14727_s17 + $0x180] ss:$48 sps:$4 sm:$0xff]   ;;  %v12429_v30 = vld [vmem:[%s14727_s17 + $0x2a4] ss:$48 sps:$4 sm:$0xff]  }
 0xd2d   : > { %v4451_v44 = vmul.f32 1.442695, %v4450_v13  ;;  %v12432_v13 = vld [vmem:[%s14727_s17 + $0x2ac] ss:$48 sps:$4 sm:$0xff]  }
 0xd2f   : > { %13223 = vpow2.f32 %v4451_v44  ;;  %v12427_v44 = vld [vmem:[%s14727_s17 + $0x2a0] ss:$48 sps:$4 sm:$0xff]  }
 0xd39   : > { %v13224_v47 = vpop.eup %13223 }
 0xd3a   : > { %v4453_v48 = vsel %vm3013_vm4, %v13224_v47, 0.0 }
 0xd3b   : > { %v4454_v41 = vrot.slane %v4453_v48, 4 }
 0xd3d   : > { %v4455_v49 = vadd.f32 %v4454_v41, %v4453_v48  ;;  %v12435_v48 = vld [vmem:[%s14727_s17 + $0x304] ss:$48 sps:$4 sm:$0xff]   ;;  %v12438_v41 = vld [vmem:[%s14727_s17 + $0x30c] ss:$48 sps:$4 sm:$0xff]  }
 0xd3f   : > { %v4456_v52 = vrot.slane %v4455_v49, 2 }
 0xd41   : > { %v4457_v54 = vadd.f32 %v4456_v52, %v4455_v49  ;;  %v12433_v49 = vld [vmem:[%s14727_s17 + $0x300] ss:$48 sps:$4 sm:$0xff]   ;;  %v12436_v52 = vld [vmem:[%s14727_s17 + $0x308] ss:$48 sps:$4 sm:$0xff]  }
 0xd43   : > { %v4458_v55 = vrot.slane %v4457_v54, 1 }
 0xd45   : > { %v4459_v57 = vadd.f32 %v4458_v55, %v4457_v54  ;;  %v12441_v54 = vld [vmem:[%s14727_s17 + $0x364] ss:$48 sps:$4 sm:$0xff]   ;;  %v12444_v55 = vld [vmem:[%s14727_s17 + $0x36c] ss:$48 sps:$4 sm:$0xff]  }
 0xd47   : > { %13225 = vrcp.f32 %v4459_v57  ;;  %v12439_v57 = vld [vmem:[%s14727_s17 + $0x360] ss:$48 sps:$4 sm:$0xff]  }
 0xd51   : > { %v13226_v58 = vpop.eup %13225 }
 0xd52   : > { %v4461_v60 = vmul.f32 %v13226_v58, %v13224_v47  ;;  %v12430_v47 = vld [vmem:[%s14727_s17 + $0x2a8] ss:$48 sps:$4 sm:$0xff]  }
 0xd53   : > { %v12442_v58 = vld [vmem:[%s14727_s17 + $0x368] ss:$48 sps:$4 sm:$0xff]  }
 0xd54   : > { %v4462_v1 = vpack.c.bf16 %v4461_v60, %v4461_v60  ;;  %v4684_v60 = vld [vmem:[%s16366_s6] sm:$0x7] }
 0xd56   : > { %11672 = vmatmul.mubr.msk.bf16.vlgmr.msra.gmra.mrb[52].mxu1 %vm3013_vm4, %v4462_v1 }
 0xd57   : > { %11676 = vmatpush3.bf16.msra.mxu1 %v12372_v61  ;;  %11683 = vmatprep.mubr.msk.bf16.mxu1 %vm13918_vm0, %v13917_v10 }
 0xd58   : > { %11677 = vmatprep.subr.bf16.mxu1 %v13917_v10 }
 0xd5b   : > { %11678 = vmatpush3.bf16.msra.mxu1 %v12376_v2 }
 0xd5c   : > { %11679 = vmatprep.subr.bf16.mxu1 %v13917_v10 }
 0xd5f   : > { %11680 = vmatpush3.bf16.msra.mxu1 %v12380_v6  ;;  %v4689_v6 = vrot.slane %v4684_v60, %v14846_v27 }
 0xd60   : > { %11681 = vmatprep.subr.bf16.mxu1 %v13917_v10  ;;  %v12388_v10 = vld [vmem:[%s14727_s17 + $0x8] ss:$48 sps:$4 sm:$0xff]  }
 0xd63   : > { %11682 = vmatpush3.bf16.msra.mxu1 %v12384_v19 }
 0xd64   : > { %6644 = vmatprep.subr.bf16.mxu1 %v12390_v20 }
 0xe29   : > { %v4506_v46 = vpop.f32.mrb[52].mxu1 }
 0xe2a   : > { %v4512_v7 = vpack.c.bf16 %v4506_v46, %v4506_v46  ;;  %v11673_v8 = vpop.f32.mrb[53].mxu1 }
 0xe2b   : > { %v4509_v9 = vpop.f32.mrb[54].mxu1  ;;  %v4697_v8 = vrot.slane %v4684_v60, %v14903_v0 }
 0xe2c   : > { %v11674_v11 = vpop.f32.mrb[55].mxu1  ;;  %10667 = vmatmul.mubr.msk.bf16.vlgmr.msra.gmra.mrb[56].mxu0 %vm2966_vm1, %v4512_v7  ;;  %11684 = vmatmul.mubr.msk.bf16.vlgmr.msra.gmra.mrb[56].mxu1 %vm2966_vm1, %v4512_v7 }
 0xe2d   : > { %6563 = vmatpush1.bf16.msra.mxu0 %v12385_v15  ;;  %6645 = vmatpush1.bf16.msra.mxu1 %v12388_v10  ;;  %v4693_v11 = vrot.slane %v4684_v60, %v14843_v26  ;;  %v13230_v10 = vld [vmem:[#allocation2] sm:$0xff] }
 0xe2e   : > { %6564 = vmatprep.subr.bf16.mxu0 %v12393_v18  ;;  %6646 = vmatprep.subr.bf16.mxu1 %v12396_v24  ;;  %v13231_v18 = vld [vmem:[#allocation2 + $0x10] sm:$0xff] }
 0xe2f   : > { %v12478_v60 = vld [vmem:[%s14727_s17 + $0x5a8] ss:$48 sps:$4 sm:$0xff]  }
 0xe31   : > { %6565 = vmatpush1.bf16.msra.mxu0 %v12391_v28  ;;  %6647 = vmatpush1.bf16.msra.mxu1 %v12394_v31  ;;  %v13232_v31 = vld [vmem:[#allocation2 + $0x8] sm:$0xff] }
 0xe32   : > { %6566 = vmatprep.subr.bf16.mxu0 %v12399_v32  ;;  %6648 = vmatprep.subr.bf16.mxu1 %v12402_v23 }
 0xe35   : > { %6567 = vmatpush1.bf16.msra.mxu0 %v12397_v33  ;;  %6649 = vmatpush1.bf16.msra.mxu1 %v12400_v36 }
 0xe36   : > { %6568 = vmatprep.subr.bf16.mxu0 %v12405_v3  ;;  %6650 = vmatprep.subr.bf16.mxu1 %v12408_v37 }
 0xe39   : > { %6569 = vmatpush1.bf16.msra.mxu0 %v12403_v63  ;;  %6651 = vmatpush1.bf16.msra.mxu1 %v12406_v14 }
 0xe3a   : > { %6570 = vmatprep.subr.bf16.mxu0 %v12411_v17  ;;  %6652 = vmatprep.subr.bf16.mxu1 %v12414_v4  ;;  %v12447_v4 = vld [vmem:[%s14727_s17 + $0x3c4] ss:$48 sps:$4 sm:$0xff]  }
 0xe3d   : > { %6571 = vmatpush1.bf16.msra.mxu0 %v12409_v38  ;;  %6653 = vmatpush1.bf16.msra.mxu1 %v12412_v45  ;;  %v12450_v38 = vld [vmem:[%s14727_s17 + $0x3cc] ss:$48 sps:$4 sm:$0xff]   ;;  %v12445_v45 = vld [vmem:[%s14727_s17 + $0x3c0] ss:$48 sps:$4 sm:$0xff]  }
 0xe3e   : > { %6572 = vmatprep.subr.bf16.mxu0 %v12417_v39  ;;  %6654 = vmatprep.subr.bf16.mxu1 %v12420_v21  ;;  %v12448_v39 = vld [vmem:[%s14727_s17 + $0x3c8] ss:$48 sps:$4 sm:$0xff]   ;;  %v12453_v21 = vld [vmem:[%s14727_s17 + $0x424] ss:$48 sps:$4 sm:$0xff]  }
 0xe41   : > { %6573 = vmatpush1.bf16.msra.mxu0 %v12415_v40  ;;  %6655 = vmatpush1.bf16.msra.mxu1 %v12418_v29  ;;  %v12456_v40 = vld [vmem:[%s14727_s17 + $0x42c] ss:$48 sps:$4 sm:$0xff]   ;;  %v12451_v29 = vld [vmem:[%s14727_s17 + $0x420] ss:$48 sps:$4 sm:$0xff]  }
 0xe42   : > { %6574 = vmatprep.subr.bf16.mxu0 %v12423_v22  ;;  %6656 = vmatprep.subr.bf16.mxu1 %v12426_v42  ;;  %v12454_v22 = vld [vmem:[%s14727_s17 + $0x428] ss:$48 sps:$4 sm:$0xff]   ;;  %v12457_v42 = vld [vmem:[%s14727_s17 + $0x480] ss:$48 sps:$4 sm:$0xff]  }
 0xe45   : > { %6575 = vmatpush1.bf16.msra.mxu0 %v12421_v43  ;;  %6657 = vmatpush1.bf16.msra.mxu1 %v12424_v5  ;;  %v12459_v43 = vld [vmem:[%s14727_s17 + $0x484] ss:$48 sps:$4 sm:$0xff]   ;;  %v12460_v5 = vld [vmem:[%s14727_s17 + $0x488] ss:$48 sps:$4 sm:$0xff]  }
 0xe46   : > { %6576 = vmatprep.subr.bf16.mxu0 %v12429_v30  ;;  %6658 = vmatprep.subr.bf16.mxu1 %v12432_v13  ;;  %v12462_v30 = vld [vmem:[%s14727_s17 + $0x48c] ss:$48 sps:$4 sm:$0xff]   ;;  %v12465_v13 = vld [vmem:[%s14727_s17 + $0x4e4] ss:$48 sps:$4 sm:$0xff]  }
 0xe49   : > { %6577 = vmatpush1.bf16.msra.mxu0 %v12427_v44  ;;  %6659 = vmatpush1.bf16.msra.mxu1 %v12430_v47  ;;  %v12468_v44 = vld [vmem:[%s14727_s17 + $0x4ec] ss:$48 sps:$4 sm:$0xff]   ;;  %v12463_v47 = vld [vmem:[%s14727_s17 + $0x4e0] ss:$48 sps:$4 sm:$0xff]  }
 0xe4a   : > { %6578 = vmatprep.subr.bf16.mxu0 %v12435_v48  ;;  %6660 = vmatprep.subr.bf16.mxu1 %v12438_v41  ;;  %v12466_v48 = vld [vmem:[%s14727_s17 + $0x4e8] ss:$48 sps:$4 sm:$0xff]   ;;  %v12471_v41 = vld [vmem:[%s14727_s17 + $0x544] ss:$48 sps:$4 sm:$0xff]  }
 0xe4d   : > { %6579 = vmatpush1.bf16.msra.mxu0 %v12433_v49  ;;  %6661 = vmatpush1.bf16.msra.mxu1 %v12436_v52  ;;  %v12474_v49 = vld [vmem:[%s14727_s17 + $0x54c] ss:$48 sps:$4 sm:$0xff]   ;;  %v12469_v52 = vld [vmem:[%s14727_s17 + $0x540] ss:$48 sps:$4 sm:$0xff]  }
 0xe4e   : > { %6580 = vmatprep.subr.bf16.mxu0 %v12441_v54  ;;  %6662 = vmatprep.subr.bf16.mxu1 %v12444_v55  ;;  %v12472_v54 = vld [vmem:[%s14727_s17 + $0x548] ss:$48 sps:$4 sm:$0xff]   ;;  %v12477_v55 = vld [vmem:[%s14727_s17 + $0x5a4] ss:$48 sps:$4 sm:$0xff]  }
 0xe51   : > { %6581 = vmatpush1.bf16.msra.mxu0 %v12439_v57  ;;  %6663 = vmatpush1.bf16.msra.mxu1 %v12442_v58  ;;  %v12480_v57 = vld [vmem:[%s14727_s17 + $0x5ac] ss:$48 sps:$4 sm:$0xff]   ;;  %v12475_v58 = vld [vmem:[%s14727_s17 + $0x5a0] ss:$48 sps:$4 sm:$0xff]  }
 0xe52   : > { %6582 = vmatprep.subr.bf16.mxu0 %v12447_v4  ;;  %6664 = vmatprep.subr.bf16.mxu1 %v12450_v38  ;;  %v12489_v38 = vld [vmem:[%s14727_s17 + $0x664] ss:$48 sps:$4 sm:$0xff]  }
 0xe55   : > { %6583 = vmatpush1.bf16.msra.mxu0 %v12445_v45  ;;  %6665 = vmatpush1.bf16.msra.mxu1 %v12448_v39  ;;  %v12492_v45 = vld [vmem:[%s14727_s17 + $0x66c] ss:$48 sps:$4 sm:$0xff]   ;;  %v12487_v39 = vld [vmem:[%s14727_s17 + $0x660] ss:$48 sps:$4 sm:$0xff]  }
 0xe56   : > { %6584 = vmatprep.subr.bf16.mxu0 %v12453_v21  ;;  %6666 = vmatprep.subr.bf16.mxu1 %v12456_v40  ;;  %v12490_v21 = vld [vmem:[%s14727_s17 + $0x668] ss:$48 sps:$4 sm:$0xff]   ;;  %v12495_v40 = vld [vmem:[%s14727_s17 + $0x6c4] ss:$48 sps:$4 sm:$0xff]  }
 0xe59   : > { %6585 = vmatpush1.bf16.msra.mxu0 %v12451_v29  ;;  %6667 = vmatpush1.bf16.msra.mxu1 %v12454_v22  ;;  %v12498_v29 = vld [vmem:[%s14727_s17 + $0x6cc] ss:$48 sps:$4 sm:$0xff]   ;;  %v12493_v22 = vld [vmem:[%s14727_s17 + $0x6c0] ss:$48 sps:$4 sm:$0xff]  }
 0xe5a   : > { %6586 = vmatprep.subr.bf16.mxu0 %v12459_v43  ;;  %6668 = vmatprep.subr.bf16.mxu1 %v12462_v30  ;;  %v12501_v43 = vld [vmem:[%s14727_s17 + $0x724] ss:$48 sps:$4 sm:$0xff]   ;;  %v12499_v30 = vld [vmem:[%s14727_s17 + $0x720] ss:$48 sps:$4 sm:$0xff]  }
 0xe5d   : > { %6587 = vmatpush1.bf16.msra.mxu0 %v12457_v42  ;;  %6669 = vmatpush1.bf16.msra.mxu1 %v12460_v5  ;;  %v12496_v42 = vld [vmem:[%s14727_s17 + $0x6c8] ss:$48 sps:$4 sm:$0xff]   ;;  %v12504_v5 = vld [vmem:[%s14727_s17 + $0x72c] ss:$48 sps:$4 sm:$0xff]  }
 0xe5e   : > { %6588 = vmatprep.subr.bf16.mxu0 %v12465_v13  ;;  %6670 = vmatprep.subr.bf16.mxu1 %v12468_v44  ;;  %v12502_v13 = vld [vmem:[%s14727_s17 + $0x728] ss:$48 sps:$4 sm:$0xff]   ;;  %v12507_v44 = vld [vmem:[%s14727_s17 + $0x784] ss:$48 sps:$4 sm:$0xff]  }
 0xe61   : > { %6589 = vmatpush1.bf16.msra.mxu0 %v12463_v47  ;;  %6671 = vmatpush1.bf16.msra.mxu1 %v12466_v48  ;;  %v12510_v47 = vld [vmem:[%s14727_s17 + $0x78c] ss:$48 sps:$4 sm:$0xff]   ;;  %v12505_v48 = vld [vmem:[%s14727_s17 + $0x780] ss:$48 sps:$4 sm:$0xff]  }
 0xe62   : > { %6590 = vmatprep.subr.bf16.mxu0 %v12471_v41  ;;  %6672 = vmatprep.subr.bf16.mxu1 %v12474_v49  ;;  %v12508_v41 = vld [vmem:[%s14727_s17 + $0x788] ss:$48 sps:$4 sm:$0xff]   ;;  %v12513_v49 = vld [vmem:[%s14727_s17 + $0x7e4] ss:$48 sps:$4 sm:$0xff]  }
 0xe65   : > { %6591 = vmatpush1.bf16.msra.mxu0 %v12469_v52  ;;  %6673 = vmatpush1.bf16.msra.mxu1 %v12472_v54  ;;  %v12516_v52 = vld [vmem:[%s14727_s17 + $0x7ec] ss:$48 sps:$4 sm:$0xff]  }
 0xe66   : > { %6592 = vmatprep.subr.bf16.mxu0 %v12477_v55  ;;  %6674 = vmatprep.subr.bf16.mxu1 %v12480_v57  ;;  %v12511_v55 = vld [vmem:[%s14727_s17 + $0x7e0] ss:$48 sps:$4 sm:$0xff]   ;;  %v12514_v57 = vld [vmem:[%s14727_s17 + $0x7e8] ss:$48 sps:$4 sm:$0xff]  }
 0xe69   : > { %6593 = vmatpush1.bf16.msra.mxu0 %v12475_v58  ;;  %6675 = vmatpush1.bf16.msra.mxu1 %v12478_v60  ;;  %v12519_v58 = vld [vmem:[%s14727_s17 + $0x844] ss:$48 sps:$4 sm:$0xff]   ;;  %v12522_v60 = vld [vmem:[%s14727_s17 + $0x84c] ss:$48 sps:$4 sm:$0xff]  }
 0xeff   : > { %v4631_v61 = vpop.f32.mrb[56].mxu0  ;;  %v4672_v1 = vpop.f32.mrb[56].mxu1 }
 0xf00   : > { %v4678_v2 = vadd.f32 %v4631_v61, %v15338_v34  ;;  %v4680_v19 = vadd.f32 %v4672_v1, %v15341_v59  ;;  %v4633_v46 = vpop.f32.mrb[57].mxu0  ;;  %v11685_v7 = vpop.f32.mrb[57].mxu1  ;;  %v12483_v61 = vld [vmem:[%s14727_s17 + $0x604] ss:$48 sps:$4 sm:$0xff]   ;;  %v12486_v1 = vld [vmem:[%s14727_s17 + $0x60c] ss:$48 sps:$4 sm:$0xff]  }
 0xf01   : > { %v4679_v9 = vadd.f32 %v4633_v46, %v15344_v12  ;;  %v4635_v15 = vpop.f32.mrb[58].mxu0  ;;  %v4675_v16 = vpop.f32.mrb[58].mxu1  ;;  %6603 = vmatprep.subr.bf16.mxu0 %v12483_v61  ;;  %6685 = vmatprep.subr.bf16.mxu1 %v12486_v1 }
 0xf02   : > { %v4681_v20 = vadd.f32 %v13230_v10, %v4678_v2  ;;  %v4683_v24 = vadd.f32 %v13231_v18, %v4680_v19  ;;  %v4636_v28 = vpop.f32.mrb[59].mxu0  ;;  %v11686_v34 = vpop.f32.mrb[59].mxu1  ;;  %v15460_v15 = vld [vmem:[%s16368_s3] sm:$0x7] }
 0xf03   : > { %v4682_v59 = vadd.f32 %v13232_v31, %v4679_v9  ;;  %v4756_v34 = vrot.slane %v15460_v15, %v14843_v26 }
 0xf04   : > { %v15409_v32 = vadd.f32 %v4689_v6, %v4681_v20  ;;  %v15411_v23 = vadd.f32 %v4697_v8, %v4683_v24 }
 0xf05   : > { %v15413_v12 = vadd.f32 %v4693_v11, %v4682_v59  ;;  %v15456_v11 = vld [vmem:[%s16367_s25] sm:$0x7]  ;;  %v4752_v59 = vrot.slane %v15460_v15, %v14846_v27 }
 0xf06   : > { %v4711_v33 = vmul.f32 %v15409_v32, %v15409_v32  ;;  %v4713_v63 = vmul.f32 %v15411_v23, %v15411_v23  ;;  %v4737_v20 = vrot.slane %v15456_v11, %v14843_v26  ;;  %v4733_v18 = vrot.slane %v15456_v11, %v14846_v27 }
 0xf07   : > { %v4706_v36 = vadd.f32 %v15413_v12, %v15409_v32  ;;  %v4712_v3 = vmul.f32 %v15413_v12, %v15413_v12  ;;  %v4741_v1 = vrot.slane %v15456_v11, %v14903_v0  ;;  %v12526_v11 = vld [vmem:[%s14727_s17 + $0x8a8] ss:$48 sps:$4 sm:$0xff]  }
 0xf09   : > { %v4707_v37 = vadd.f32 %v4706_v36, %v15411_v23  ;;  %v4714_v14 = vadd.f32 %v4712_v3, %v4711_v33 }
 0xf0b   : > { %4708 = vadd.xlane.f32.xlu0 %v4707_v37  ;;  %v4715_v17 = vadd.f32 %v4714_v14, %v4713_v63  ;;  %v12481_v14 = vld [vmem:[%s14727_s17 + $0x600] ss:$48 sps:$4 sm:$0xff]  }
 0xf0d   : > { %4716 = vadd.xlane.f32.xlu1 %v4715_v17  ;;  %v12484_v17 = vld [vmem:[%s14727_s17 + $0x608] ss:$48 sps:$4 sm:$0xff]  }
 0xf98   : > { %v4709_v2 = vpop.xlane.xlu0 %4708 }
 0xf99   : > { %v15450_v6 = vmul.f32 0.0026041667, %v4709_v2  ;;  %v12517_v2 = vld [vmem:[%s14727_s17 + $0x840] ss:$48 sps:$4 sm:$0xff]  }
 0xf9a   : > { %v4717_v19 = vpop.xlane.xlu1 %4716 }
 0xf9b   : > { %v4718_v46 = vmul.f32 0.0026041667, %v4717_v19  ;;  %v4719_v7 = vmul.f32 %v15450_v6, %v15450_v6  ;;  %v4721_v16 = vsub.f32 %v15409_v32, %v15450_v6  ;;  %v4722_v10 = vsub.f32 %v15413_v12, %v15450_v6  ;;  %v12525_v19 = vld [vmem:[%s14727_s17 + $0x8a4] ss:$48 sps:$4 sm:$0xff]  }
 0xf9c   : > { %v4723_v54 = vsub.f32 %v15411_v23, %v15450_v6  ;;  %v12520_v6 = vld [vmem:[%s14727_s17 + $0x848] ss:$48 sps:$4 sm:$0xff]  }
 0xf9d   : > { %v4720_v8 = vsub.f32 %v4718_v46, %v4719_v7  ;;  %v12528_v46 = vld [vmem:[%s14727_s17 + $0x8ac] ss:$48 sps:$4 sm:$0xff]  }
 0xf9f   : > { %v4724_v9 = vadd.f32 1e-05, %v4720_v8  ;;  %v4760_v8 = vrot.slane %v15460_v15, %v14903_v0  ;;  %v12532_v15 = vld [vmem:[%s14727_s17 + $0x18] ss:$48 sps:$4 sm:$0xff]  }
 0xfa1   : > { %13227 = vrsqrt.f32 %v4724_v9  ;;  %v12523_v9 = vld [vmem:[%s14727_s17 + $0x8a0] ss:$48 sps:$4 sm:$0xff]  }
 0xfab   : > { %v13228_v24 = vpop.eup %13227 }
 0xfac   : > { %v4727_v28 = vmul.f32 %v13228_v24, %v4722_v10  ;;  %v4726_v31 = vmul.f32 %v13228_v24, %v4721_v16  ;;  %v4728_v61 = vmul.f32 %v13228_v24, %v4723_v54  ;;  %v12531_v10 = vld [vmem:[%s14727_s17 + $0x14] ss:$48 sps:$4 sm:$0xff]  }
 0xfad   : > { %v12579_v54 = vld [vmem:[%s14727_s17 + $0x314] ss:$48 sps:$4 sm:$0xff]  }
 0xfae   : > { %v4746_v33 = vmul.f32 %v4737_v20, %v4727_v28  ;;  %v4745_v36 = vmul.f32 %v4733_v18, %v4726_v31  ;;  %v4747_v7 = vmul.f32 %v4741_v1, %v4728_v61  ;;  %v12534_v20 = vld [vmem:[%s14727_s17 + $0x1c] ss:$48 sps:$4 sm:$0xff]   ;;  %v12529_v18 = vld [vmem:[%s14727_s17 + $0x10] ss:$48 sps:$4 sm:$0xff]   ;;  %v12537_v28 = vld [vmem:[%s14727_s17 + $0x74] ss:$48 sps:$4 sm:$0xff]  }
 0xfaf   : > { %v12535_v31 = vld [vmem:[%s14727_s17 + $0x70] ss:$48 sps:$4 sm:$0xff]   ;;  %v12588_v61 = vld [vmem:[%s14727_s17 + $0x37c] ss:$48 sps:$4 sm:$0xff]  }
 0xfb0   : > { %v4765_v3 = vadd.f32 %v4756_v34, %v4746_v33  ;;  %v4764_v37 = vadd.f32 %v4752_v59, %v4745_v36  ;;  %v4766_v16 = vadd.f32 %v4760_v8, %v4747_v7  ;;  %v12540_v34 = vld [vmem:[%s14727_s17 + $0x7c] ss:$48 sps:$4 sm:$0xff]   ;;  %v12538_v59 = vld [vmem:[%s14727_s17 + $0x78] ss:$48 sps:$4 sm:$0xff]   ;;  %v12543_v33 = vld [vmem:[%s14727_s17 + $0xd4] ss:$48 sps:$4 sm:$0xff]  }
 0xfb1   : > { %v12546_v36 = vld [vmem:[%s14727_s17 + $0xdc] ss:$48 sps:$4 sm:$0xff]   ;;  %v12583_v1 = vld [vmem:[%s14727_s17 + $0x370] ss:$48 sps:$4 sm:$0xff]   ;;  %v12592_v7 = vld [vmem:[%s14727_s17 + $0x3d8] ss:$48 sps:$4 sm:$0xff]  }
 0xfb2   : > { %v15474_v63 = vpack.c.bf16 %v4765_v3, %v4765_v3  ;;  %v15478_v4 = vpack.c.bf16 %v4764_v37, %v4764_v37  ;;  %v15523_v24 = vpack.c.bf16 %v4766_v16, %v4766_v16  ;;  %v12541_v3 = vld [vmem:[%s14727_s17 + $0xd0] ss:$48 sps:$4 sm:$0xff]   ;;  %v12544_v37 = vld [vmem:[%s14727_s17 + $0xd8] ss:$48 sps:$4 sm:$0xff]   ;;  %v12597_v8 = vld [vmem:[%s14727_s17 + $0x434] ss:$48 sps:$4 sm:$0xff]  }
 0xfb3   : > { %v12598_v16 = vld [vmem:[%s14727_s17 + $0x438] ss:$48 sps:$4 sm:$0xff]  }
 0xfb4   : > { %6594 = vmatprep.mubr.bf16.mxu0 %v15474_v63  ;;  %6676 = vmatprep.mubr.bf16.mxu1 %v15474_v63 }
 0xfb5   : > { %6595 = vmatmul.mubr.bf16.vlgmr.msra.gmra.mrb[60].mxu0 %v15478_v4  ;;  %6677 = vmatmul.mubr.bf16.vlgmr.msra.gmra.mrb[60].mxu1 %v15478_v4 }
 0xfb6   : > { %6604 = vmatpush1.bf16.msra.mxu0 %v12481_v14  ;;  %6686 = vmatpush1.bf16.msra.mxu1 %v12484_v17  ;;  %v12549_v14 = vld [vmem:[%s14727_s17 + $0x134] ss:$48 sps:$4 sm:$0xff]   ;;  %v12552_v17 = vld [vmem:[%s14727_s17 + $0x13c] ss:$48 sps:$4 sm:$0xff]  }
 0xfb7   : > { %6605 = vmatprep.subr.bf16.mxu0 %v12489_v38  ;;  %6687 = vmatprep.subr.bf16.mxu1 %v12492_v45  ;;  %v12547_v38 = vld [vmem:[%s14727_s17 + $0x130] ss:$48 sps:$4 sm:$0xff]   ;;  %v12550_v45 = vld [vmem:[%s14727_s17 + $0x138] ss:$48 sps:$4 sm:$0xff]  }
 0xfb8   : > { %6635 = vmatprep.mubr.bf16.mxu0 %v13916_v53  ;;  %6717 = vmatprep.mubr.bf16.mxu1 %v13916_v53 }
 0xfba   : > { %6606 = vmatpush1.bf16.msra.mxu0 %v12487_v39  ;;  %6688 = vmatpush1.bf16.msra.mxu1 %v12490_v21  ;;  %v12555_v39 = vld [vmem:[%s14727_s17 + $0x194] ss:$48 sps:$4 sm:$0xff]   ;;  %v12558_v21 = vld [vmem:[%s14727_s17 + $0x19c] ss:$48 sps:$4 sm:$0xff]  }
 0xfbb   : > { %6607 = vmatprep.subr.bf16.mxu0 %v12495_v40  ;;  %6689 = vmatprep.subr.bf16.mxu1 %v12498_v29  ;;  %v12553_v40 = vld [vmem:[%s14727_s17 + $0x190] ss:$48 sps:$4 sm:$0xff]   ;;  %v12556_v29 = vld [vmem:[%s14727_s17 + $0x198] ss:$48 sps:$4 sm:$0xff]  }
 0xfbe   : > { %6608 = vmatpush1.bf16.msra.mxu0 %v12493_v22  ;;  %6690 = vmatpush1.bf16.msra.mxu1 %v12496_v42  ;;  %v12561_v22 = vld [vmem:[%s14727_s17 + $0x1f4] ss:$48 sps:$4 sm:$0xff]   ;;  %v12564_v42 = vld [vmem:[%s14727_s17 + $0x1fc] ss:$48 sps:$4 sm:$0xff]  }
 0xfbf   : > { %6609 = vmatprep.subr.bf16.mxu0 %v12501_v43  ;;  %6691 = vmatprep.subr.bf16.mxu1 %v12504_v5  ;;  %v12559_v43 = vld [vmem:[%s14727_s17 + $0x1f0] ss:$48 sps:$4 sm:$0xff]   ;;  %v12562_v5 = vld [vmem:[%s14727_s17 + $0x1f8] ss:$48 sps:$4 sm:$0xff]  }
 0xfc2   : > { %6610 = vmatpush1.bf16.msra.mxu0 %v12499_v30  ;;  %6692 = vmatpush1.bf16.msra.mxu1 %v12502_v13  ;;  %v12567_v30 = vld [vmem:[%s14727_s17 + $0x254] ss:$48 sps:$4 sm:$0xff]   ;;  %v12570_v13 = vld [vmem:[%s14727_s17 + $0x25c] ss:$48 sps:$4 sm:$0xff]  }
 0xfc3   : > { %6611 = vmatprep.subr.bf16.mxu0 %v12507_v44  ;;  %6693 = vmatprep.subr.bf16.mxu1 %v12510_v47  ;;  %v12565_v44 = vld [vmem:[%s14727_s17 + $0x250] ss:$48 sps:$4 sm:$0xff]   ;;  %v12568_v47 = vld [vmem:[%s14727_s17 + $0x258] ss:$48 sps:$4 sm:$0xff]  }
 0xfc6   : > { %6612 = vmatpush1.bf16.msra.mxu0 %v12505_v48  ;;  %6694 = vmatpush1.bf16.msra.mxu1 %v12508_v41  ;;  %v12573_v48 = vld [vmem:[%s14727_s17 + $0x2b4] ss:$48 sps:$4 sm:$0xff]   ;;  %v12576_v41 = vld [vmem:[%s14727_s17 + $0x2bc] ss:$48 sps:$4 sm:$0xff]  }
 0xfc7   : > { %6613 = vmatprep.subr.bf16.mxu0 %v12513_v49  ;;  %6695 = vmatprep.subr.bf16.mxu1 %v12516_v52  ;;  %v12571_v49 = vld [vmem:[%s14727_s17 + $0x2b0] ss:$48 sps:$4 sm:$0xff]   ;;  %v12574_v52 = vld [vmem:[%s14727_s17 + $0x2b8] ss:$48 sps:$4 sm:$0xff]  }
 0xfca   : > { %6614 = vmatpush1.bf16.msra.mxu0 %v12511_v55  ;;  %6696 = vmatpush1.bf16.msra.mxu1 %v12514_v57  ;;  %v12582_v55 = vld [vmem:[%s14727_s17 + $0x31c] ss:$48 sps:$4 sm:$0xff]   ;;  %v12577_v57 = vld [vmem:[%s14727_s17 + $0x310] ss:$48 sps:$4 sm:$0xff]  }
 0xfcb   : > { %6615 = vmatprep.subr.bf16.mxu0 %v12519_v58  ;;  %6697 = vmatprep.subr.bf16.mxu1 %v12522_v60  ;;  %v12580_v58 = vld [vmem:[%s14727_s17 + $0x318] ss:$48 sps:$4 sm:$0xff]   ;;  %v12585_v60 = vld [vmem:[%s14727_s17 + $0x374] ss:$48 sps:$4 sm:$0xff]  }
 0xfce   : > { %6616 = vmatpush1.bf16.msra.mxu0 %v12517_v2  ;;  %6698 = vmatpush1.bf16.msra.mxu1 %v12520_v6  ;;  %v12586_v2 = vld [vmem:[%s14727_s17 + $0x378] ss:$48 sps:$4 sm:$0xff]   ;;  %v12591_v6 = vld [vmem:[%s14727_s17 + $0x3d4] ss:$48 sps:$4 sm:$0xff]  }
 0xfcf   : > { %6617 = vmatprep.subr.bf16.mxu0 %v12525_v19  ;;  %6699 = vmatprep.subr.bf16.mxu1 %v12528_v46  ;;  %v12594_v19 = vld [vmem:[%s14727_s17 + $0x3dc] ss:$48 sps:$4 sm:$0xff]   ;;  %v12589_v46 = vld [vmem:[%s14727_s17 + $0x3d0] ss:$48 sps:$4 sm:$0xff]  }
 0xfd2   : > { %6618 = vmatpush1.bf16.msra.mxu0 %v12523_v9  ;;  %6700 = vmatpush1.bf16.msra.mxu1 %v12526_v11  ;;  %v12600_v9 = vld [vmem:[%s14727_s17 + $0x43c] ss:$48 sps:$4 sm:$0xff]   ;;  %v12595_v11 = vld [vmem:[%s14727_s17 + $0x430] ss:$48 sps:$4 sm:$0xff]  }
 0xfd3   : > { %6726 = vmatprep.subr.bf16.mxu0 %v12531_v10  ;;  %6808 = vmatprep.subr.bf16.mxu1 %v12534_v20  ;;  %v12603_v10 = vld [vmem:[%s14727_s17 + $0x494] ss:$48 sps:$4 sm:$0xff]   ;;  %v12606_v20 = vld [vmem:[%s14727_s17 + $0x49c] ss:$48 sps:$4 sm:$0xff]  }
 0xfd5   : > { %6636 = vmatmul.mubr.bf16.vlgmr.msra.gmra.mrb[60].mxu0 %v15523_v24  ;;  %6718 = vmatmul.mubr.bf16.vlgmr.msra.gmra.mrb[60].mxu1 %v15523_v24 }
 0xfd6   : > { %6727 = vmatpush1.bf16.msra.mxu0 %v12529_v18  ;;  %6758 = vmatprep.mubr.bf16.mxu0 %v15474_v63  ;;  %v12601_v18 = vld [vmem:[%s14727_s17 + $0x490] ss:$48 sps:$4 sm:$0xff]  }
 0xfd7   : > { %6809 = vmatpush1.bf16.msra.mxu1 %v12532_v15  ;;  %6840 = vmatprep.mubr.bf16.mxu1 %v15474_v63  ;;  %v12604_v15 = vld [vmem:[%s14727_s17 + $0x498] ss:$48 sps:$4 sm:$0xff]  }
 0xfd8   : > { %6728 = vmatprep.subr.bf16.mxu0 %v12537_v28  ;;  %6810 = vmatprep.subr.bf16.mxu1 %v12540_v34  ;;  %v12609_v28 = vld [vmem:[%s14727_s17 + $0x4f4] ss:$48 sps:$4 sm:$0xff]   ;;  %v12612_v34 = vld [vmem:[%s14727_s17 + $0x4fc] ss:$48 sps:$4 sm:$0xff]  }
 0xfda   : > { %6729 = vmatpush1.bf16.msra.mxu0 %v12535_v31  ;;  %v12607_v31 = vld [vmem:[%s14727_s17 + $0x4f0] ss:$48 sps:$4 sm:$0xff]  }
 0xfdb   : > { %6811 = vmatpush1.bf16.msra.mxu1 %v12538_v59  ;;  %6730 = vmatprep.subr.bf16.mxu0 %v12543_v33  ;;  %v12610_v59 = vld [vmem:[%s14727_s17 + $0x4f8] ss:$48 sps:$4 sm:$0xff]   ;;  %v12615_v33 = vld [vmem:[%s14727_s17 + $0x554] ss:$48 sps:$4 sm:$0xff]  }
 0xfdc   : > { %6812 = vmatprep.subr.bf16.mxu1 %v12546_v36  ;;  %v12618_v36 = vld [vmem:[%s14727_s17 + $0x55c] ss:$48 sps:$4 sm:$0xff]  }
 0xfde   : > { %6731 = vmatpush1.bf16.msra.mxu0 %v12541_v3  ;;  %v12613_v3 = vld [vmem:[%s14727_s17 + $0x550] ss:$48 sps:$4 sm:$0xff]  }
 0xfdf   : > { %6813 = vmatpush1.bf16.msra.mxu1 %v12544_v37  ;;  %6732 = vmatprep.subr.bf16.mxu0 %v12549_v14  ;;  %v12616_v37 = vld [vmem:[%s14727_s17 + $0x558] ss:$48 sps:$4 sm:$0xff]   ;;  %v12621_v14 = vld [vmem:[%s14727_s17 + $0x5b4] ss:$48 sps:$4 sm:$0xff]  }
 0xfe0   : > { %6814 = vmatprep.subr.bf16.mxu1 %v12552_v17  ;;  %v12624_v17 = vld [vmem:[%s14727_s17 + $0x5bc] ss:$48 sps:$4 sm:$0xff]  }
 0xfe2   : > { %6733 = vmatpush1.bf16.msra.mxu0 %v12547_v38  ;;  %v12619_v38 = vld [vmem:[%s14727_s17 + $0x5b0] ss:$48 sps:$4 sm:$0xff]  }
 0xfe3   : > { %6815 = vmatpush1.bf16.msra.mxu1 %v12550_v45  ;;  %6734 = vmatprep.subr.bf16.mxu0 %v12555_v39  ;;  %v12622_v45 = vld [vmem:[%s14727_s17 + $0x5b8] ss:$48 sps:$4 sm:$0xff]   ;;  %v12627_v39 = vld [vmem:[%s14727_s17 + $0x614] ss:$48 sps:$4 sm:$0xff]  }
 0xfe4   : > { %6816 = vmatprep.subr.bf16.mxu1 %v12558_v21  ;;  %v12630_v21 = vld [vmem:[%s14727_s17 + $0x61c] ss:$48 sps:$4 sm:$0xff]  }
 0xfe6   : > { %6735 = vmatpush1.bf16.msra.mxu0 %v12553_v40  ;;  %v12625_v40 = vld [vmem:[%s14727_s17 + $0x610] ss:$48 sps:$4 sm:$0xff]  }
 0xfe7   : > { %6817 = vmatpush1.bf16.msra.mxu1 %v12556_v29  ;;  %6736 = vmatprep.subr.bf16.mxu0 %v12561_v22  ;;  %v12628_v29 = vld [vmem:[%s14727_s17 + $0x618] ss:$48 sps:$4 sm:$0xff]   ;;  %v12633_v22 = vld [vmem:[%s14727_s17 + $0x674] ss:$48 sps:$4 sm:$0xff]  }
 0xfe8   : > { %6818 = vmatprep.subr.bf16.mxu1 %v12564_v42  ;;  %v12636_v42 = vld [vmem:[%s14727_s17 + $0x67c] ss:$48 sps:$4 sm:$0xff]  }
 0xfea   : > { %6737 = vmatpush1.bf16.msra.mxu0 %v12559_v43  ;;  %v12631_v43 = vld [vmem:[%s14727_s17 + $0x670] ss:$48 sps:$4 sm:$0xff]  }
 0xfeb   : > { %6819 = vmatpush1.bf16.msra.mxu1 %v12562_v5  ;;  %6738 = vmatprep.subr.bf16.mxu0 %v12567_v30  ;;  %v12634_v5 = vld [vmem:[%s14727_s17 + $0x678] ss:$48 sps:$4 sm:$0xff]   ;;  %v12639_v30 = vld [vmem:[%s14727_s17 + $0x6d4] ss:$48 sps:$4 sm:$0xff]  }
 0xfec   : > { %6820 = vmatprep.subr.bf16.mxu1 %v12570_v13  ;;  %v12642_v13 = vld [vmem:[%s14727_s17 + $0x6dc] ss:$48 sps:$4 sm:$0xff]  }
 0xfee   : > { %6739 = vmatpush1.bf16.msra.mxu0 %v12565_v44  ;;  %v12637_v44 = vld [vmem:[%s14727_s17 + $0x6d0] ss:$48 sps:$4 sm:$0xff]  }
 0xfef   : > { %6821 = vmatpush1.bf16.msra.mxu1 %v12568_v47  ;;  %6740 = vmatprep.subr.bf16.mxu0 %v12573_v48  ;;  %v12640_v47 = vld [vmem:[%s14727_s17 + $0x6d8] ss:$48 sps:$4 sm:$0xff]   ;;  %v12645_v48 = vld [vmem:[%s14727_s17 + $0x734] ss:$48 sps:$4 sm:$0xff]  }
 0xff0   : > { %6822 = vmatprep.subr.bf16.mxu1 %v12576_v41  ;;  %v12648_v41 = vld [vmem:[%s14727_s17 + $0x73c] ss:$48 sps:$4 sm:$0xff]  }
 0xff2   : > { %6741 = vmatpush1.bf16.msra.mxu0 %v12571_v49  ;;  %v12643_v49 = vld [vmem:[%s14727_s17 + $0x730] ss:$48 sps:$4 sm:$0xff]  }
 0xff3   : > { %6823 = vmatpush1.bf16.msra.mxu1 %v12574_v52  ;;  %6742 = vmatprep.subr.bf16.mxu0 %v12579_v54  ;;  %v12646_v52 = vld [vmem:[%s14727_s17 + $0x738] ss:$48 sps:$4 sm:$0xff]   ;;  %v12651_v54 = vld [vmem:[%s14727_s17 + $0x794] ss:$48 sps:$4 sm:$0xff]  }
 0xff4   : > { %6824 = vmatprep.subr.bf16.mxu1 %v12582_v55  ;;  %v12654_v55 = vld [vmem:[%s14727_s17 + $0x79c] ss:$48 sps:$4 sm:$0xff]  }
 0xff6   : > { %6743 = vmatpush1.bf16.msra.mxu0 %v12577_v57  ;;  %v12649_v57 = vld [vmem:[%s14727_s17 + $0x790] ss:$48 sps:$4 sm:$0xff]  }
 0xff7   : > { %6825 = vmatpush1.bf16.msra.mxu1 %v12580_v58  ;;  %6744 = vmatprep.subr.bf16.mxu0 %v12585_v60  ;;  %v12652_v58 = vld [vmem:[%s14727_s17 + $0x798] ss:$48 sps:$4 sm:$0xff]   ;;  %v12657_v60 = vld [vmem:[%s14727_s17 + $0x7f4] ss:$48 sps:$4 sm:$0xff]  }
 0xff8   : > { %6826 = vmatprep.subr.bf16.mxu1 %v12588_v61  ;;  %v12660_v61 = vld [vmem:[%s14727_s17 + $0x7fc] ss:$48 sps:$4 sm:$0xff]  }
 0xffa   : > { %6745 = vmatpush1.bf16.msra.mxu0 %v12583_v1  ;;  %v12655_v1 = vld [vmem:[%s14727_s17 + $0x7f0] ss:$48 sps:$4 sm:$0xff]  }
 0xffb   : > { %6827 = vmatpush1.bf16.msra.mxu1 %v12586_v2  ;;  %6746 = vmatprep.subr.bf16.mxu0 %v12591_v6  ;;  %v12658_v2 = vld [vmem:[%s14727_s17 + $0x7f8] ss:$48 sps:$4 sm:$0xff]   ;;  %v12663_v6 = vld [vmem:[%s14727_s17 + $0x854] ss:$48 sps:$4 sm:$0xff]  }
 0xffc   : > { %6828 = vmatprep.subr.bf16.mxu1 %v12594_v19  ;;  %v12666_v19 = vld [vmem:[%s14727_s17 + $0x85c] ss:$48 sps:$4 sm:$0xff]  }
 0xffe   : > { %6747 = vmatpush1.bf16.msra.mxu0 %v12589_v46  ;;  %v12661_v46 = vld [vmem:[%s14727_s17 + $0x850] ss:$48 sps:$4 sm:$0xff]  }
 0xfff   : > { %6829 = vmatpush1.bf16.msra.mxu1 %v12592_v7  ;;  %6748 = vmatprep.subr.bf16.mxu0 %v12597_v8  ;;  %v12664_v7 = vld [vmem:[%s14727_s17 + $0x858] ss:$48 sps:$4 sm:$0xff]   ;;  %v12669_v8 = vld [vmem:[%s14727_s17 + $0x8b4] ss:$48 sps:$4 sm:$0xff]  }
0x1000   : > { %6830 = vmatprep.subr.bf16.mxu1 %v12600_v9  ;;  %v12672_v9 = vld [vmem:[%s14727_s17 + $0x8bc] ss:$48 sps:$4 sm:$0xff]  }
0x1002   : > { %6749 = vmatpush1.bf16.msra.mxu0 %v12595_v11  ;;  %v12667_v11 = vld [vmem:[%s14727_s17 + $0x8b0] ss:$48 sps:$4 sm:$0xff]  }
0x1003   : > { %6831 = vmatpush1.bf16.msra.mxu1 %v12598_v16  ;;  %6750 = vmatprep.subr.bf16.mxu0 %v12603_v10  ;;  %v12670_v16 = vld [vmem:[%s14727_s17 + $0x8b8] ss:$48 sps:$4 sm:$0xff]   ;;  %v12675_v10 = vld [vmem:[%s14727_s17 + $0x24] ss:$48 sps:$4 sm:$0xff]  }
0x1004   : > { %6832 = vmatprep.subr.bf16.mxu1 %v12606_v20  ;;  %v12678_v20 = vld [vmem:[%s14727_s17 + $0x2c] ss:$48 sps:$4 sm:$0xff]  }
0x1006   : > { %6751 = vmatpush1.bf16.msra.mxu0 %v12601_v18  ;;  %v12673_v18 = vld [vmem:[%s14727_s17 + $0x20] ss:$48 sps:$4 sm:$0xff]  }
0x1007   : > { %6833 = vmatpush1.bf16.msra.mxu1 %v12604_v15  ;;  %6752 = vmatprep.subr.bf16.mxu0 %v12609_v28  ;;  %v12676_v15 = vld [vmem:[%s14727_s17 + $0x28] ss:$48 sps:$4 sm:$0xff]   ;;  %v12681_v28 = vld [vmem:[%s14727_s17 + $0x84] ss:$48 sps:$4 sm:$0xff]  }
0x1008   : > { %6834 = vmatprep.subr.bf16.mxu1 %v12612_v34  ;;  %v12684_v34 = vld [vmem:[%s14727_s17 + $0x8c] ss:$48 sps:$4 sm:$0xff]  }
0x100a   : > { %6753 = vmatpush1.bf16.msra.mxu0 %v12607_v31  ;;  %v12679_v31 = vld [vmem:[%s14727_s17 + $0x80] ss:$48 sps:$4 sm:$0xff]  }
0x100b   : > { %6835 = vmatpush1.bf16.msra.mxu1 %v12610_v59  ;;  %6754 = vmatprep.subr.bf16.mxu0 %v12615_v33  ;;  %v12682_v59 = vld [vmem:[%s14727_s17 + $0x88] ss:$48 sps:$4 sm:$0xff]   ;;  %v12687_v33 = vld [vmem:[%s14727_s17 + $0xe4] ss:$48 sps:$4 sm:$0xff]  }
0x100c   : > { %6836 = vmatprep.subr.bf16.mxu1 %v12618_v36  ;;  %v12690_v36 = vld [vmem:[%s14727_s17 + $0xec] ss:$48 sps:$4 sm:$0xff]  }
0x100e   : > { %6755 = vmatpush1.bf16.msra.mxu0 %v12613_v3  ;;  %v12685_v3 = vld [vmem:[%s14727_s17 + $0xe0] ss:$48 sps:$4 sm:$0xff]  }
0x100f   : > { %6837 = vmatpush1.bf16.msra.mxu1 %v12616_v37  ;;  %6756 = vmatprep.subr.bf16.mxu0 %v12621_v14  ;;  %v12688_v37 = vld [vmem:[%s14727_s17 + $0xe8] ss:$48 sps:$4 sm:$0xff]   ;;  %v12693_v14 = vld [vmem:[%s14727_s17 + $0x144] ss:$48 sps:$4 sm:$0xff]  }
0x1010   : > { %6838 = vmatprep.subr.bf16.mxu1 %v12624_v17  ;;  %v12696_v17 = vld [vmem:[%s14727_s17 + $0x14c] ss:$48 sps:$4 sm:$0xff]  }
0x1012   : > { %6757 = vmatpush1.bf16.msra.mxu0 %v12619_v38  ;;  %v12694_v38 = vld [vmem:[%s14727_s17 + $0x148] ss:$48 sps:$4 sm:$0xff]  }
0x1013   : > { %6839 = vmatpush1.bf16.msra.mxu1 %v12622_v45  ;;  %6767 = vmatprep.subr.bf16.mxu0 %v12627_v39  ;;  %v12699_v45 = vld [vmem:[%s14727_s17 + $0x1a4] ss:$48 sps:$4 sm:$0xff]   ;;  %v12702_v39 = vld [vmem:[%s14727_s17 + $0x1ac] ss:$48 sps:$4 sm:$0xff]  }
0x1014   : > { %6849 = vmatprep.subr.bf16.mxu1 %v12630_v21  ;;  %v12697_v21 = vld [vmem:[%s14727_s17 + $0x1a0] ss:$48 sps:$4 sm:$0xff]  }
0x1015   : > { %6759 = vmatmul.mubr.bf16.vlgmr.msra.gmra.mrb[64].mxu0 %v15478_v4 }
0x1016   : > { %6841 = vmatmul.mubr.bf16.vlgmr.msra.gmra.mrb[64].mxu1 %v15478_v4  ;;  %6768 = vmatpush1.bf16.msra.mxu0 %v12625_v40  ;;  %v12700_v40 = vld [vmem:[%s14727_s17 + $0x1a8] ss:$48 sps:$4 sm:$0xff]  }
0x1017   : > { %6850 = vmatpush1.bf16.msra.mxu1 %v12628_v29  ;;  %6769 = vmatprep.subr.bf16.mxu0 %v12633_v22  ;;  %v12705_v29 = vld [vmem:[%s14727_s17 + $0x204] ss:$48 sps:$4 sm:$0xff]   ;;  %v12708_v22 = vld [vmem:[%s14727_s17 + $0x20c] ss:$48 sps:$4 sm:$0xff]  }
0x1018   : > { %6851 = vmatprep.subr.bf16.mxu1 %v12636_v42  ;;  %6799 = vmatprep.mubr.bf16.mxu0 %v13916_v53  ;;  %v12703_v42 = vld [vmem:[%s14727_s17 + $0x200] ss:$48 sps:$4 sm:$0xff]  }
0x1019   : > { %6881 = vmatprep.mubr.bf16.mxu1 %v13916_v53 }
0x101a   : > { %6770 = vmatpush1.bf16.msra.mxu0 %v12631_v43  ;;  %v12706_v43 = vld [vmem:[%s14727_s17 + $0x208] ss:$48 sps:$4 sm:$0xff]  }
0x101b   : > { %6852 = vmatpush1.bf16.msra.mxu1 %v12634_v5  ;;  %6771 = vmatprep.subr.bf16.mxu0 %v12639_v30  ;;  %v12711_v5 = vld [vmem:[%s14727_s17 + $0x264] ss:$48 sps:$4 sm:$0xff]   ;;  %v12714_v30 = vld [vmem:[%s14727_s17 + $0x26c] ss:$48 sps:$4 sm:$0xff]  }
0x101c   : > { %6853 = vmatprep.subr.bf16.mxu1 %v12642_v13  ;;  %v12709_v13 = vld [vmem:[%s14727_s17 + $0x260] ss:$48 sps:$4 sm:$0xff]  }
0x101e   : > { %6772 = vmatpush1.bf16.msra.mxu0 %v12637_v44  ;;  %v12712_v44 = vld [vmem:[%s14727_s17 + $0x268] ss:$48 sps:$4 sm:$0xff]  }
0x101f   : > { %6854 = vmatpush1.bf16.msra.mxu1 %v12640_v47  ;;  %6773 = vmatprep.subr.bf16.mxu0 %v12645_v48  ;;  %v12717_v47 = vld [vmem:[%s14727_s17 + $0x2c4] ss:$48 sps:$4 sm:$0xff]   ;;  %v12720_v48 = vld [vmem:[%s14727_s17 + $0x2cc] ss:$48 sps:$4 sm:$0xff]  }
0x1020   : > { %6855 = vmatprep.subr.bf16.mxu1 %v12648_v41  ;;  %v12715_v41 = vld [vmem:[%s14727_s17 + $0x2c0] ss:$48 sps:$4 sm:$0xff]  }
0x1022   : > { %6774 = vmatpush1.bf16.msra.mxu0 %v12643_v49  ;;  %v12718_v49 = vld [vmem:[%s14727_s17 + $0x2c8] ss:$48 sps:$4 sm:$0xff]  }
0x1023   : > { %6856 = vmatpush1.bf16.msra.mxu1 %v12646_v52  ;;  %6775 = vmatprep.subr.bf16.mxu0 %v12651_v54  ;;  %v12723_v52 = vld [vmem:[%s14727_s17 + $0x324] ss:$48 sps:$4 sm:$0xff]   ;;  %v12726_v54 = vld [vmem:[%s14727_s17 + $0x32c] ss:$48 sps:$4 sm:$0xff]  }
0x1024   : > { %6857 = vmatprep.subr.bf16.mxu1 %v12654_v55  ;;  %v12721_v55 = vld [vmem:[%s14727_s17 + $0x320] ss:$48 sps:$4 sm:$0xff]  }
0x1026   : > { %6776 = vmatpush1.bf16.msra.mxu0 %v12649_v57  ;;  %v12724_v57 = vld [vmem:[%s14727_s17 + $0x328] ss:$48 sps:$4 sm:$0xff]  }
0x1027   : > { %6858 = vmatpush1.bf16.msra.mxu1 %v12652_v58  ;;  %6777 = vmatprep.subr.bf16.mxu0 %v12657_v60  ;;  %v12729_v58 = vld [vmem:[%s14727_s17 + $0x384] ss:$48 sps:$4 sm:$0xff]   ;;  %v12732_v60 = vld [vmem:[%s14727_s17 + $0x38c] ss:$48 sps:$4 sm:$0xff]  }
0x1028   : > { %6859 = vmatprep.subr.bf16.mxu1 %v12660_v61  ;;  %v12727_v61 = vld [vmem:[%s14727_s17 + $0x380] ss:$48 sps:$4 sm:$0xff]  }
0x102a   : > { %6778 = vmatpush1.bf16.msra.mxu0 %v12655_v1  ;;  %v12730_v1 = vld [vmem:[%s14727_s17 + $0x388] ss:$48 sps:$4 sm:$0xff]  }
0x102b   : > { %6860 = vmatpush1.bf16.msra.mxu1 %v12658_v2  ;;  %6779 = vmatprep.subr.bf16.mxu0 %v12663_v6  ;;  %v12735_v2 = vld [vmem:[%s14727_s17 + $0x3e4] ss:$48 sps:$4 sm:$0xff]   ;;  %v12738_v6 = vld [vmem:[%s14727_s17 + $0x3ec] ss:$48 sps:$4 sm:$0xff]  }
0x102c   : > { %6861 = vmatprep.subr.bf16.mxu1 %v12666_v19  ;;  %v12733_v19 = vld [vmem:[%s14727_s17 + $0x3e0] ss:$48 sps:$4 sm:$0xff]  }
0x102e   : > { %6780 = vmatpush1.bf16.msra.mxu0 %v12661_v46  ;;  %v12736_v46 = vld [vmem:[%s14727_s17 + $0x3e8] ss:$48 sps:$4 sm:$0xff]  }
0x102f   : > { %6862 = vmatpush1.bf16.msra.mxu1 %v12664_v7  ;;  %6781 = vmatprep.subr.bf16.mxu0 %v12669_v8  ;;  %v12741_v7 = vld [vmem:[%s14727_s17 + $0x444] ss:$48 sps:$4 sm:$0xff]   ;;  %v12744_v8 = vld [vmem:[%s14727_s17 + $0x44c] ss:$48 sps:$4 sm:$0xff]  }
0x1030   : > { %6863 = vmatprep.subr.bf16.mxu1 %v12672_v9  ;;  %v12739_v9 = vld [vmem:[%s14727_s17 + $0x440] ss:$48 sps:$4 sm:$0xff]  }
0x1032   : > { %6782 = vmatpush1.bf16.msra.mxu0 %v12667_v11  ;;  %v12742_v11 = vld [vmem:[%s14727_s17 + $0x448] ss:$48 sps:$4 sm:$0xff]  }
0x1033   : > { %6864 = vmatpush1.bf16.msra.mxu1 %v12670_v16  ;;  %6890 = vmatprep.subr.bf16.mxu0 %v12675_v10  ;;  %v12747_v16 = vld [vmem:[%s14727_s17 + $0x4a4] ss:$48 sps:$4 sm:$0xff]   ;;  %v12750_v10 = vld [vmem:[%s14727_s17 + $0x4ac] ss:$48 sps:$4 sm:$0xff]  }
0x1034   : > { %6972 = vmatprep.subr.bf16.mxu1 %v12678_v20  ;;  %v12745_v20 = vld [vmem:[%s14727_s17 + $0x4a0] ss:$48 sps:$4 sm:$0xff]  }
0x1035   : > { %6800 = vmatmul.mubr.bf16.vlgmr.msra.gmra.mrb[64].mxu0 %v15523_v24 }
0x1036   : > { %6882 = vmatmul.mubr.bf16.vlgmr.msra.gmra.mrb[64].mxu1 %v15523_v24  ;;  %6891 = vmatpush1.bf16.msra.mxu0 %v12673_v18  ;;  %v12748_v18 = vld [vmem:[%s14727_s17 + $0x4a8] ss:$48 sps:$4 sm:$0xff]  }
0x1037   : > { %6922 = vmatprep.mubr.bf16.mxu0 %v15474_v63  ;;  %6973 = vmatpush1.bf16.msra.mxu1 %v12676_v15  ;;  %v12753_v15 = vld [vmem:[%s14727_s17 + $0x504] ss:$48 sps:$4 sm:$0xff]  }
0x1038   : > { %7004 = vmatprep.mubr.bf16.mxu1 %v15474_v63  ;;  %6892 = vmatprep.subr.bf16.mxu0 %v12681_v28  ;;  %v12691_v63 = vld [vmem:[%s14727_s17 + $0x140] ss:$48 sps:$4 sm:$0xff]   ;;  %v12756_v28 = vld [vmem:[%s14727_s17 + $0x50c] ss:$48 sps:$4 sm:$0xff]  }
0x1039   : > { %6974 = vmatprep.subr.bf16.mxu1 %v12684_v34  ;;  %v12751_v34 = vld [vmem:[%s14727_s17 + $0x500] ss:$48 sps:$4 sm:$0xff]  }
0x103a   : > { %6893 = vmatpush1.bf16.msra.mxu0 %v12679_v31  ;;  %v12754_v31 = vld [vmem:[%s14727_s17 + $0x508] ss:$48 sps:$4 sm:$0xff]  }
0x103b   : > { %6975 = vmatpush1.bf16.msra.mxu1 %v12682_v59  ;;  %6894 = vmatprep.subr.bf16.mxu0 %v12687_v33  ;;  %v12759_v59 = vld [vmem:[%s14727_s17 + $0x564] ss:$48 sps:$4 sm:$0xff]   ;;  %v12762_v33 = vld [vmem:[%s14727_s17 + $0x56c] ss:$48 sps:$4 sm:$0xff]  }
0x103c   : > { %6976 = vmatprep.subr.bf16.mxu1 %v12690_v36  ;;  %v12757_v36 = vld [vmem:[%s14727_s17 + $0x560] ss:$48 sps:$4 sm:$0xff]  }
0x103e   : > { %6895 = vmatpush1.bf16.msra.mxu0 %v12685_v3  ;;  %v12760_v3 = vld [vmem:[%s14727_s17 + $0x568] ss:$48 sps:$4 sm:$0xff]  }
0x103f   : > { %6977 = vmatpush1.bf16.msra.mxu1 %v12688_v37  ;;  %6896 = vmatprep.subr.bf16.mxu0 %v12693_v14  ;;  %v12765_v37 = vld [vmem:[%s14727_s17 + $0x5c4] ss:$48 sps:$4 sm:$0xff]   ;;  %v12768_v14 = vld [vmem:[%s14727_s17 + $0x5cc] ss:$48 sps:$4 sm:$0xff]  }
0x1040   : > { %6978 = vmatprep.subr.bf16.mxu1 %v12696_v17  ;;  %v12763_v17 = vld [vmem:[%s14727_s17 + $0x5c0] ss:$48 sps:$4 sm:$0xff]  }
0x1042   : > { %6897 = vmatpush1.bf16.msra.mxu0 %v12691_v63  ;;  %v12766_v63 = vld [vmem:[%s14727_s17 + $0x5c8] ss:$48 sps:$4 sm:$0xff]  }
0x1043   : > { %6979 = vmatpush1.bf16.msra.mxu1 %v12694_v38  ;;  %6898 = vmatprep.subr.bf16.mxu0 %v12699_v45  ;;  %v12771_v38 = vld [vmem:[%s14727_s17 + $0x624] ss:$48 sps:$4 sm:$0xff]   ;;  %v12774_v45 = vld [vmem:[%s14727_s17 + $0x62c] ss:$48 sps:$4 sm:$0xff]  }
0x1044   : > { %6980 = vmatprep.subr.bf16.mxu1 %v12702_v39  ;;  %v12769_v39 = vld [vmem:[%s14727_s17 + $0x620] ss:$48 sps:$4 sm:$0xff]  }
0x1046   : > { %6899 = vmatpush1.bf16.msra.mxu0 %v12697_v21  ;;  %v12772_v21 = vld [vmem:[%s14727_s17 + $0x628] ss:$48 sps:$4 sm:$0xff]  }
0x1047   : > { %6981 = vmatpush1.bf16.msra.mxu1 %v12700_v40  ;;  %6900 = vmatprep.subr.bf16.mxu0 %v12705_v29  ;;  %v12777_v40 = vld [vmem:[%s14727_s17 + $0x684] ss:$48 sps:$4 sm:$0xff]   ;;  %v12780_v29 = vld [vmem:[%s14727_s17 + $0x68c] ss:$48 sps:$4 sm:$0xff]  }
0x1048   : > { %6982 = vmatprep.subr.bf16.mxu1 %v12708_v22  ;;  %v12775_v22 = vld [vmem:[%s14727_s17 + $0x680] ss:$48 sps:$4 sm:$0xff]  }
0x104a   : > { %6901 = vmatpush1.bf16.msra.mxu0 %v12703_v42  ;;  %v12778_v42 = vld [vmem:[%s14727_s17 + $0x688] ss:$48 sps:$4 sm:$0xff]  }
0x104b   : > { %6983 = vmatpush1.bf16.msra.mxu1 %v12706_v43  ;;  %6902 = vmatprep.subr.bf16.mxu0 %v12711_v5  ;;  %v12783_v43 = vld [vmem:[%s14727_s17 + $0x6e4] ss:$48 sps:$4 sm:$0xff]   ;;  %v12786_v5 = vld [vmem:[%s14727_s17 + $0x6ec] ss:$48 sps:$4 sm:$0xff]  }
0x104c   : > { %6984 = vmatprep.subr.bf16.mxu1 %v12714_v30  ;;  %v12784_v30 = vld [vmem:[%s14727_s17 + $0x6e8] ss:$48 sps:$4 sm:$0xff]  }
0x104e   : > { %6903 = vmatpush1.bf16.msra.mxu0 %v12709_v13  ;;  %v12789_v13 = vld [vmem:[%s14727_s17 + $0x744] ss:$48 sps:$4 sm:$0xff]  }
0x104f   : > { %6985 = vmatpush1.bf16.msra.mxu1 %v12712_v44  ;;  %6904 = vmatprep.subr.bf16.mxu0 %v12717_v47  ;;  %v12792_v44 = vld [vmem:[%s14727_s17 + $0x74c] ss:$48 sps:$4 sm:$0xff]   ;;  %v12787_v47 = vld [vmem:[%s14727_s17 + $0x740] ss:$48 sps:$4 sm:$0xff]  }
0x1050   : > { %6986 = vmatprep.subr.bf16.mxu1 %v12720_v48  ;;  %v12790_v48 = vld [vmem:[%s14727_s17 + $0x748] ss:$48 sps:$4 sm:$0xff]  }
0x1052   : > { %6905 = vmatpush1.bf16.msra.mxu0 %v12715_v41  ;;  %v12798_v41 = vld [vmem:[%s14727_s17 + $0x7ac] ss:$48 sps:$4 sm:$0xff]  }
0x1053   : > { %6987 = vmatpush1.bf16.msra.mxu1 %v12718_v49  ;;  %6906 = vmatprep.subr.bf16.mxu0 %v12723_v52  ;;  %v12793_v49 = vld [vmem:[%s14727_s17 + $0x7a0] ss:$48 sps:$4 sm:$0xff]   ;;  %v12796_v52 = vld [vmem:[%s14727_s17 + $0x7a8] ss:$48 sps:$4 sm:$0xff]  }
0x1054   : > { %6988 = vmatprep.subr.bf16.mxu1 %v12726_v54  ;;  %v12801_v54 = vld [vmem:[%s14727_s17 + $0x804] ss:$48 sps:$4 sm:$0xff]  }
0x1056   : > { %6907 = vmatpush1.bf16.msra.mxu0 %v12721_v55  ;;  %v12804_v55 = vld [vmem:[%s14727_s17 + $0x80c] ss:$48 sps:$4 sm:$0xff]  }
0x1057   : > { %6989 = vmatpush1.bf16.msra.mxu1 %v12724_v57  ;;  %6908 = vmatprep.subr.bf16.mxu0 %v12729_v58  ;;  %v12799_v57 = vld [vmem:[%s14727_s17 + $0x800] ss:$48 sps:$4 sm:$0xff]   ;;  %v12802_v58 = vld [vmem:[%s14727_s17 + $0x808] ss:$48 sps:$4 sm:$0xff]  }
0x1058   : > { %6990 = vmatprep.subr.bf16.mxu1 %v12732_v60  ;;  %v12807_v60 = vld [vmem:[%s14727_s17 + $0x864] ss:$48 sps:$4 sm:$0xff]  }
0x105a   : > { %6909 = vmatpush1.bf16.msra.mxu0 %v12727_v61  ;;  %v12810_v61 = vld [vmem:[%s14727_s17 + $0x86c] ss:$48 sps:$4 sm:$0xff]  }
0x105b   : > { %6991 = vmatpush1.bf16.msra.mxu1 %v12730_v1  ;;  %6910 = vmatprep.subr.bf16.mxu0 %v12735_v2  ;;  %v12805_v1 = vld [vmem:[%s14727_s17 + $0x860] ss:$48 sps:$4 sm:$0xff]   ;;  %v12808_v2 = vld [vmem:[%s14727_s17 + $0x868] ss:$48 sps:$4 sm:$0xff]  }
0x105c   : > { %6992 = vmatprep.subr.bf16.mxu1 %v12738_v6  ;;  %v12813_v6 = vld [vmem:[%s14727_s17 + $0x8c4] ss:$48 sps:$4 sm:$0xff]  }
0x105e   : > { %6911 = vmatpush1.bf16.msra.mxu0 %v12733_v19  ;;  %v12816_v19 = vld [vmem:[%s14727_s17 + $0x8cc] ss:$48 sps:$4 sm:$0xff]  }
0x105f   : > { %6993 = vmatpush1.bf16.msra.mxu1 %v12736_v46  ;;  %6912 = vmatprep.subr.bf16.mxu0 %v12741_v7  ;;  %v12811_v46 = vld [vmem:[%s14727_s17 + $0x8c0] ss:$48 sps:$4 sm:$0xff]   ;;  %v12814_v7 = vld [vmem:[%s14727_s17 + $0x8c8] ss:$48 sps:$4 sm:$0xff]  }
0x1060   : > { %6994 = vmatprep.subr.bf16.mxu1 %v12744_v8  ;;  %v12819_v8 = vld [vmem:[%s14737_s12 + $0x4] ss:$12 sps:$4 sm:$0xff]  }
0x1062   : > { %6913 = vmatpush1.bf16.msra.mxu0 %v12739_v9  ;;  %v12822_v9 = vld [vmem:[%s14737_s12 + $0x184] ss:$12 sps:$4 sm:$0xff]  }
0x1063   : > { %6995 = vmatpush1.bf16.msra.mxu1 %v12742_v11  ;;  %6914 = vmatprep.subr.bf16.mxu0 %v12747_v16  ;;  %v12817_v11 = vld [vmem:[%s14737_s12] ss:$12 sps:$4 sm:$0xff]  }
0x1064   : > { %6996 = vmatprep.subr.bf16.mxu1 %v12750_v10  ;;  %v12820_v16 = vld [vmem:[%s14737_s12 + $0x180] ss:$12 sps:$4 sm:$0xff]   ;;  %v12825_v10 = vld [vmem:[%s14737_s12 + $0x1c] ss:$12 sps:$4 sm:$0xff]  }
0x1066   : > { %6915 = vmatpush1.bf16.msra.mxu0 %v12745_v20  ;;  %v12828_v20 = vld [vmem:[%s14737_s12 + $0x19c] ss:$12 sps:$4 sm:$0xff]  }
0x1067   : > { %6997 = vmatpush1.bf16.msra.mxu1 %v12748_v18  ;;  %6916 = vmatprep.subr.bf16.mxu0 %v12753_v15  ;;  %v12823_v18 = vld [vmem:[%s14737_s12 + $0x18] ss:$12 sps:$4 sm:$0xff]  }
0x1068   : > { %6998 = vmatprep.subr.bf16.mxu1 %v12756_v28  ;;  %v12826_v15 = vld [vmem:[%s14737_s12 + $0x198] ss:$12 sps:$4 sm:$0xff]   ;;  %v12831_v28 = vld [vmem:[%s14737_s12 + $0x34] ss:$12 sps:$4 sm:$0xff]  }
0x106a   : > { %6917 = vmatpush1.bf16.msra.mxu0 %v12751_v34  ;;  %v12834_v34 = vld [vmem:[%s14737_s12 + $0x1b4] ss:$12 sps:$4 sm:$0xff]  }
0x106b   : > { %6999 = vmatpush1.bf16.msra.mxu1 %v12754_v31  ;;  %6918 = vmatprep.subr.bf16.mxu0 %v12759_v59  ;;  %v12829_v31 = vld [vmem:[%s14737_s12 + $0x30] ss:$12 sps:$4 sm:$0xff]  }
0x106c   : > { %7000 = vmatprep.subr.bf16.mxu1 %v12762_v33  ;;  %v12832_v59 = vld [vmem:[%s14737_s12 + $0x1b0] ss:$12 sps:$4 sm:$0xff]   ;;  %v12840_v33 = vld [vmem:[%s14737_s12 + $0x1cc] ss:$12 sps:$4 sm:$0xff]  }
0x106e   : > { %6919 = vmatpush1.bf16.msra.mxu0 %v12757_v36  ;;  %v12835_v36 = vld [vmem:[%s14737_s12 + $0x48] ss:$12 sps:$4 sm:$0xff]  }
0x106f   : > { %7001 = vmatpush1.bf16.msra.mxu1 %v12760_v3  ;;  %6920 = vmatprep.subr.bf16.mxu0 %v12765_v37  ;;  %v12838_v3 = vld [vmem:[%s14737_s12 + $0x1c8] ss:$12 sps:$4 sm:$0xff]   ;;  %v12843_v37 = vld [vmem:[%s14737_s12 + $0x64] ss:$12 sps:$4 sm:$0xff]  }
0x1070   : > { %7002 = vmatprep.subr.bf16.mxu1 %v12768_v14  ;;  %v12846_v14 = vld [vmem:[%s14737_s12 + $0x1e4] ss:$12 sps:$4 sm:$0xff]  }
0x1072   : > { %6921 = vmatpush1.bf16.msra.mxu0 %v12763_v17  ;;  %v12841_v17 = vld [vmem:[%s14737_s12 + $0x60] ss:$12 sps:$4 sm:$0xff]  }
0x1073   : > { %7003 = vmatpush1.bf16.msra.mxu1 %v12766_v63  ;;  %6931 = vmatprep.subr.bf16.mxu0 %v12771_v38  ;;  %v12844_v63 = vld [vmem:[%s14737_s12 + $0x1e0] ss:$12 sps:$4 sm:$0xff]  }
0x1074   : > { %7013 = vmatprep.subr.bf16.mxu1 %v12774_v45  ;;  %v15753_v38 = vld [vmem:[%s14734_s23] sm:$0xff] }
0x1075   : > { %6923 = vmatmul.mubr.bf16.vlgmr.msra.gmra.mrb[68].mxu0 %v15478_v4  ;;  %v12849_v45 = vld [vmem:[%s14737_s12 + $0x7c] ss:$12 sps:$4 sm:$0xff]  }
0x1076   : > { %7005 = vmatmul.mubr.bf16.vlgmr.msra.gmra.mrb[68].mxu1 %v15478_v4  ;;  %6932 = vmatpush1.bf16.msra.mxu0 %v12769_v39  ;;  %v12781_v4 = vld [vmem:[%s14727_s17 + $0x6e0] ss:$48 sps:$4 sm:$0xff]  }
0x1077   : > { %7014 = vmatpush1.bf16.msra.mxu1 %v12772_v21  ;;  %6933 = vmatprep.subr.bf16.mxu0 %v12777_v40  ;;  %v12852_v39 = vld [vmem:[%s14737_s12 + $0x1fc] ss:$12 sps:$4 sm:$0xff]   ;;  %v5069_v21 = vrot.slane %v15753_v38, %v14843_v26  ;;  %v5077_v40 = vrot.slane %v15753_v38, %v15073_v35 }
0x1078   : > { %7015 = vmatprep.subr.bf16.mxu1 %v12780_v29  ;;  %6963 = vmatprep.mubr.bf16.mxu0 %v13916_v53  ;;  %v12847_v29 = vld [vmem:[%s14737_s12 + $0x78] ss:$12 sps:$4 sm:$0xff]  }
0x1079   : > { %7045 = vmatprep.mubr.bf16.mxu1 %v13916_v53  ;;  %v12795_v53 = vld [vmem:[%s14727_s17 + $0x7a4] ss:$48 sps:$4 sm:$0xff]  }
0x107a   : > { %6934 = vmatpush1.bf16.msra.mxu0 %v12775_v22  ;;  %v12850_v22 = vld [vmem:[%s14737_s12 + $0x1f8] ss:$12 sps:$4 sm:$0xff]  }
0x107b   : > { %7016 = vmatpush1.bf16.msra.mxu1 %v12778_v42  ;;  %6935 = vmatprep.subr.bf16.mxu0 %v12783_v43  ;;  %v12855_v42 = vld [vmem:[%s14737_s12 + $0x94] ss:$12 sps:$4 sm:$0xff]  }
0x107c   : > { %7017 = vmatprep.subr.bf16.mxu1 %v12786_v5 }
0x107e   : > { %6936 = vmatpush1.bf16.msra.mxu0 %v12781_v4  ;;  %v12858_v4 = vld [vmem:[%s14737_s12 + $0x214] ss:$12 sps:$4 sm:$0xff]  }
0x107f   : > { %7018 = vmatpush1.bf16.msra.mxu1 %v12784_v30  ;;  %6937 = vmatprep.subr.bf16.mxu0 %v12789_v13 }
0x1080   : > { %7019 = vmatprep.subr.bf16.mxu1 %v12792_v44 }
0x1082   : > { %6938 = vmatpush1.bf16.msra.mxu0 %v12787_v47 }
0x1083   : > { %7020 = vmatpush1.bf16.msra.mxu1 %v12790_v48  ;;  %6939 = vmatprep.subr.bf16.mxu0 %v12795_v53 }
0x1084   : > { %7021 = vmatprep.subr.bf16.mxu1 %v12798_v41  ;;  %v12853_v41 = vld [vmem:[%s14737_s12 + $0x90] ss:$12 sps:$4 sm:$0xff]  }
0x1086   : > { %6940 = vmatpush1.bf16.msra.mxu0 %v12793_v49 }
0x1087   : > { %7022 = vmatpush1.bf16.msra.mxu1 %v12796_v52  ;;  %6941 = vmatprep.subr.bf16.mxu0 %v12801_v54  ;;  %v12856_v54 = vld [vmem:[%s14737_s12 + $0x210] ss:$12 sps:$4 sm:$0xff]  }
0x1088   : > { %7023 = vmatprep.subr.bf16.mxu1 %v12804_v55  ;;  %v12861_v55 = vld [vmem:[%s14737_s12 + $0xac] ss:$12 sps:$4 sm:$0xff]  }
0x108a   : > { %6942 = vmatpush1.bf16.msra.mxu0 %v12799_v57 }
0x108b   : > { %7024 = vmatpush1.bf16.msra.mxu1 %v12802_v58  ;;  %6943 = vmatprep.subr.bf16.mxu0 %v12807_v60  ;;  %v12864_v60 = vld [vmem:[%s14737_s12 + $0x22c] ss:$12 sps:$4 sm:$0xff]  }
0x108c   : > { %7025 = vmatprep.subr.bf16.mxu1 %v12810_v61 }
0x108e   : > { %6944 = vmatpush1.bf16.msra.mxu0 %v12805_v1 }
0x108f   : > { %7026 = vmatpush1.bf16.msra.mxu1 %v12808_v2  ;;  %6945 = vmatprep.subr.bf16.mxu0 %v12813_v6  ;;  %v12859_v2 = vld [vmem:[%s14737_s12 + $0xa8] ss:$12 sps:$4 sm:$0xff]  }
0x1090   : > { %7027 = vmatprep.subr.bf16.mxu1 %v12816_v19  ;;  %v12862_v6 = vld [vmem:[%s14737_s12 + $0x228] ss:$12 sps:$4 sm:$0xff]   ;;  %v12867_v19 = vld [vmem:[%s14737_s12 + $0xc4] ss:$12 sps:$4 sm:$0xff]  }
0x1092   : > { %6946 = vmatpush1.bf16.msra.mxu0 %v12811_v46  ;;  %v12870_v46 = vld [vmem:[%s14737_s12 + $0x244] ss:$12 sps:$4 sm:$0xff]  }
0x1093   : > { %7028 = vmatpush1.bf16.msra.mxu1 %v12814_v7  ;;  %9015 = vmatprep.subr.bf16.mxu0 %v12819_v8  ;;  %v12865_v7 = vld [vmem:[%s14737_s12 + $0xc0] ss:$12 sps:$4 sm:$0xff]  }
0x1094   : > { %9056 = vmatprep.subr.bf16.mxu1 %v12822_v9  ;;  %v12868_v8 = vld [vmem:[%s14737_s12 + $0x240] ss:$12 sps:$4 sm:$0xff]   ;;  %v12873_v9 = vld [vmem:[%s14737_s12 + $0xdc] ss:$12 sps:$4 sm:$0xff]  }
0x1095   : > { %6964 = vmatmul.mubr.bf16.vlgmr.msra.gmra.mrb[68].mxu0 %v15523_v24 }
0x1096   : > { %7046 = vmatmul.mubr.bf16.vlgmr.msra.gmra.mrb[68].mxu1 %v15523_v24  ;;  %9016 = vmatpush1.bf16.msra.mxu0 %v12817_v11  ;;  %v12837_v24 = vld [vmem:[%s14737_s12 + $0x4c] ss:$12 sps:$4 sm:$0xff]   ;;  %v12876_v11 = vld [vmem:[%s14737_s12 + $0x25c] ss:$12 sps:$4 sm:$0xff]  }
0x1097   : > { %9057 = vmatpush1.bf16.msra.mxu1 %v12820_v16  ;;  %9017 = vmatprep.subr.bf16.mxu0 %v12825_v10  ;;  %v12871_v16 = vld [vmem:[%s14737_s12 + $0xd8] ss:$12 sps:$4 sm:$0xff]  }
0x1098   : > { %9058 = vmatprep.subr.bf16.mxu1 %v12828_v20  ;;  %v12874_v10 = vld [vmem:[%s14737_s12 + $0x258] ss:$12 sps:$4 sm:$0xff]   ;;  %v12879_v20 = vld [vmem:[%s14737_s12 + $0xf4] ss:$12 sps:$4 sm:$0xff]  }
0x109a   : > { %9018 = vmatpush1.bf16.msra.mxu0 %v12823_v18  ;;  %v12882_v18 = vld [vmem:[%s14737_s12 + $0x274] ss:$12 sps:$4 sm:$0xff]  }
0x109b   : > { %9059 = vmatpush1.bf16.msra.mxu1 %v12826_v15  ;;  %9019 = vmatprep.subr.bf16.mxu0 %v12831_v28  ;;  %v12877_v15 = vld [vmem:[%s14737_s12 + $0xf0] ss:$12 sps:$4 sm:$0xff]  }
0x109c   : > { %9060 = vmatprep.subr.bf16.mxu1 %v12834_v34  ;;  %v12880_v28 = vld [vmem:[%s14737_s12 + $0x270] ss:$12 sps:$4 sm:$0xff]   ;;  %v12885_v34 = vld [vmem:[%s14737_s12 + $0x10c] ss:$12 sps:$4 sm:$0xff]  }
0x109e   : > { %9020 = vmatpush1.bf16.msra.mxu0 %v12829_v31  ;;  %v12888_v31 = vld [vmem:[%s14737_s12 + $0x28c] ss:$12 sps:$4 sm:$0xff]  }
0x109f   : > { %9061 = vmatpush1.bf16.msra.mxu1 %v12832_v59  ;;  %9021 = vmatprep.subr.bf16.mxu0 %v12837_v24  ;;  %v12883_v59 = vld [vmem:[%s14737_s12 + $0x108] ss:$12 sps:$4 sm:$0xff]  }
0x10a0   : > { %9062 = vmatprep.subr.bf16.mxu1 %v12840_v33  ;;  %v12886_v24 = vld [vmem:[%s14737_s12 + $0x288] ss:$12 sps:$4 sm:$0xff]   ;;  %v12891_v33 = vld [vmem:[%s14737_s12 + $0x124] ss:$12 sps:$4 sm:$0xff]  }
0x10a2   : > { %9022 = vmatpush1.bf16.msra.mxu0 %v12835_v36  ;;  %v12894_v36 = vld [vmem:[%s14737_s12 + $0x2a4] ss:$12 sps:$4 sm:$0xff]  }
0x10a3   : > { %9063 = vmatpush1.bf16.msra.mxu1 %v12838_v3  ;;  %9023 = vmatprep.subr.bf16.mxu0 %v12843_v37  ;;  %v12889_v3 = vld [vmem:[%s14737_s12 + $0x120] ss:$12 sps:$4 sm:$0xff]  }
0x10a4   : > { %9064 = vmatprep.subr.bf16.mxu1 %v12846_v14  ;;  %v12892_v37 = vld [vmem:[%s14737_s12 + $0x2a0] ss:$12 sps:$4 sm:$0xff]   ;;  %v12897_v14 = vld [vmem:[%s14737_s12 + $0x13c] ss:$12 sps:$4 sm:$0xff]  }
0x10a6   : > { %9024 = vmatpush1.bf16.msra.mxu0 %v12841_v17  ;;  %v12900_v17 = vld [vmem:[%s14737_s12 + $0x2bc] ss:$12 sps:$4 sm:$0xff]  }
0x10a7   : > { %9065 = vmatpush1.bf16.msra.mxu1 %v12844_v63  ;;  %9025 = vmatprep.subr.bf16.mxu0 %v12849_v45  ;;  %v12895_v63 = vld [vmem:[%s14737_s12 + $0x138] ss:$12 sps:$4 sm:$0xff]   ;;  %v5065_v45 = vrot.slane %v15753_v38, %v14846_v27 }
0x10a8   : > { %v15764_v43 = vpop.f32.mrb[60].mxu0  ;;  %v15766_v5 = vpop.f32.mrb[60].mxu1  ;;  %9066 = vmatprep.subr.bf16.mxu1 %v12852_v39  ;;  %v12898_v39 = vld [vmem:[%s14737_s12 + $0x2b8] ss:$12 sps:$4 sm:$0xff]  }
0x10a9   : > { %v6639_v30 = vpop.f32.mrb[61].mxu0  ;;  %v6721_v13 = vpop.f32.mrb[61].mxu1 }
0x10aa   : > { %v11716_v44 = vadd.f32 %v6639_v30, %v5069_v21  ;;  %v11718_v47 = vadd.f32 %v6721_v13, %v5077_v40  ;;  %v6641_v48 = vpop.f32.mrb[62].mxu0  ;;  %v6723_v53 = vpop.f32.mrb[62].mxu1  ;;  %9026 = vmatpush1.bf16.msra.mxu0 %v12847_v29  ;;  %v12903_v21 = vld [vmem:[%s14737_s12 + $0x154] ss:$12 sps:$4 sm:$0xff]   ;;  %v5073_v40 = vrot.slane %v15753_v38, %v14903_v0  ;;  %v12909_v30 = vld [vmem:[%s14737_s12 + $0x16c] ss:$12 sps:$4 sm:$0xff]  }
0x10ab   : > { %9067 = vmatpush1.bf16.msra.mxu1 %v12850_v22  ;;  %v6642_v49 = vpop.f32.mrb[63].mxu0  ;;  %v6724_v52 = vpop.f32.mrb[63].mxu1  ;;  %9027 = vmatprep.subr.bf16.mxu0 %v12855_v42  ;;  %v12906_v29 = vld [vmem:[%s14737_s12 + $0x2d4] ss:$12 sps:$4 sm:$0xff]   ;;  %v12901_v22 = vld [vmem:[%s14737_s12 + $0x150] ss:$12 sps:$4 sm:$0xff]   ;;  %v11715_v42 = vadd.f32 %v15764_v43, %v5065_v45 }
0x10ac   : > { %v7055_v57 = vmax.f32 %v11716_v44, 0.0  ;;  %v7057_v58 = vmax.f32 %v11718_v47, 0.0  ;;  %9068 = vmatprep.subr.bf16.mxu1 %v12858_v4  ;;  %v12904_v4 = vld [vmem:[%s14737_s12 + $0x2d0] ss:$12 sps:$4 sm:$0xff]   ;;  %v11717_v13 = vadd.f32 %v15766_v5, %v5073_v40  ;;  %v12912_v44 = vld [vmem:[%s14737_s12 + $0x2ec] ss:$12 sps:$4 sm:$0xff]  }
0x10ad   : > { %v12907_v47 = vld [vmem:[%s14737_s12 + $0x168] ss:$12 sps:$4 sm:$0xff]   ;;  %v7054_v48 = vmax.f32 %v11715_v42, 0.0  ;;  %v12915_v43 = vld [vmem:[%s14737_s12 + $0x304] ss:$12 sps:$4 sm:$0xff]  }
0x10ae   : > { %v15773_v61 = vpack.c.bf16 %v7055_v57, %v7055_v57  ;;  %v15775_v1 = vpack.c.bf16 %v7057_v58, %v7057_v58  ;;  %9028 = vmatpush1.bf16.msra.mxu0 %v12853_v41  ;;  %v12910_v53 = vld [vmem:[%s14737_s12 + $0x2e8] ss:$12 sps:$4 sm:$0xff]   ;;  %v7056_v41 = vmax.f32 %v11717_v13, 0.0  ;;  %v12918_v49 = vld [vmem:[%s14737_s12 + $0x484] ss:$12 sps:$4 sm:$0xff]  }
0x10af   : > { %9069 = vmatpush1.bf16.msra.mxu1 %v12856_v54  ;;  %9029 = vmatprep.subr.bf16.mxu0 %v12861_v55  ;;  %v12913_v52 = vld [vmem:[%s14737_s12 + $0x300] ss:$12 sps:$4 sm:$0xff]   ;;  %v15822_v5 = vpack.c.bf16 %v7054_v48, %v7054_v48  ;;  %v12921_v55 = vld [vmem:[%s14737_s12 + $0x31c] ss:$12 sps:$4 sm:$0xff]   ;;  %v12963_v45 = vld [vmem:[%s14737_s12 + $0x3c4] ss:$12 sps:$4 sm:$0xff]  }
0x10b0   : > { %9047 = vmatprep.mubr.bf16.mxu0 %v15773_v61  ;;  %9088 = vmatprep.mubr.bf16.mxu1 %v15775_v1  ;;  %v12916_v54 = vld [vmem:[%s14737_s12 + $0x480] ss:$12 sps:$4 sm:$0xff]   ;;  %v15826_v57 = vpack.c.bf16 %v7056_v41, %v7056_v41  ;;  %v12924_v58 = vld [vmem:[%s14737_s12 + $0x49c] ss:$12 sps:$4 sm:$0xff]   ;;  %v12967_v42 = vld [vmem:[%s14737_s12 + $0x3d8] ss:$12 sps:$4 sm:$0xff]  }
0x10b1   : > { %9070 = vmatprep.subr.bf16.mxu1 %v12864_v60  ;;  %v12919_v60 = vld [vmem:[%s14737_s12 + $0x318] ss:$12 sps:$4 sm:$0xff]   ;;  %v12964_v40 = vld [vmem:[%s14737_s12 + $0x540] ss:$12 sps:$4 sm:$0xff]   ;;  %v12982_v41 = vld [vmem:[%s14737_s12 + $0x588] ss:$12 sps:$4 sm:$0xff]  }
0x10b2   : > { %9030 = vmatpush1.bf16.msra.mxu0 %v12859_v2  ;;  %v12922_v2 = vld [vmem:[%s14737_s12 + $0x498] ss:$12 sps:$4 sm:$0xff]   ;;  %v12978_v13 = vld [vmem:[%s14737_s12 + $0x574] ss:$12 sps:$4 sm:$0xff]  }
0x10b3   : > { %9071 = vmatpush1.bf16.msra.mxu1 %v12862_v6  ;;  %9031 = vmatprep.subr.bf16.mxu0 %v12867_v19  ;;  %v12927_v6 = vld [vmem:[%s14737_s12 + $0x334] ss:$12 sps:$4 sm:$0xff]   ;;  %v12981_v48 = vld [vmem:[%s14737_s12 + $0x40c] ss:$12 sps:$4 sm:$0xff]  }
0x10b4   : > { %9072 = vmatprep.subr.bf16.mxu1 %v12870_v46  ;;  %v12930_v19 = vld [vmem:[%s14737_s12 + $0x4b4] ss:$12 sps:$4 sm:$0xff]   ;;  %v12925_v46 = vld [vmem:[%s14737_s12 + $0x330] ss:$12 sps:$4 sm:$0xff]  }
0x10b6   : > { %9032 = vmatpush1.bf16.msra.mxu0 %v12865_v7  ;;  %v12928_v7 = vld [vmem:[%s14737_s12 + $0x4b0] ss:$12 sps:$4 sm:$0xff]  }
0x10b7   : > { %9073 = vmatpush1.bf16.msra.mxu1 %v12868_v8  ;;  %9033 = vmatprep.subr.bf16.mxu0 %v12873_v9  ;;  %v12933_v8 = vld [vmem:[%s14737_s12 + $0x34c] ss:$12 sps:$4 sm:$0xff]  }
0x10b8   : > { %9074 = vmatprep.subr.bf16.mxu1 %v12876_v11  ;;  %v12936_v9 = vld [vmem:[%s14737_s12 + $0x4cc] ss:$12 sps:$4 sm:$0xff]   ;;  %v12931_v11 = vld [vmem:[%s14737_s12 + $0x348] ss:$12 sps:$4 sm:$0xff]  }
0x10ba   : > { %9034 = vmatpush1.bf16.msra.mxu0 %v12871_v16  ;;  %v12934_v16 = vld [vmem:[%s14737_s12 + $0x4c8] ss:$12 sps:$4 sm:$0xff]  }
0x10bb   : > { %9075 = vmatpush1.bf16.msra.mxu1 %v12874_v10  ;;  %9035 = vmatprep.subr.bf16.mxu0 %v12879_v20  ;;  %v12939_v10 = vld [vmem:[%s14737_s12 + $0x364] ss:$12 sps:$4 sm:$0xff]  }
0x10bc   : > { %9076 = vmatprep.subr.bf16.mxu1 %v12882_v18  ;;  %v12942_v20 = vld [vmem:[%s14737_s12 + $0x4e4] ss:$12 sps:$4 sm:$0xff]   ;;  %v12937_v18 = vld [vmem:[%s14737_s12 + $0x360] ss:$12 sps:$4 sm:$0xff]  }
0x10be   : > { %9036 = vmatpush1.bf16.msra.mxu0 %v12877_v15  ;;  %v12940_v15 = vld [vmem:[%s14737_s12 + $0x4e0] ss:$12 sps:$4 sm:$0xff]  }
0x10bf   : > { %9077 = vmatpush1.bf16.msra.mxu1 %v12880_v28  ;;  %9037 = vmatprep.subr.bf16.mxu0 %v12885_v34  ;;  %v12945_v28 = vld [vmem:[%s14737_s12 + $0x37c] ss:$12 sps:$4 sm:$0xff]  }
0x10c0   : > { %9078 = vmatprep.subr.bf16.mxu1 %v12888_v31  ;;  %v12948_v34 = vld [vmem:[%s14737_s12 + $0x4fc] ss:$12 sps:$4 sm:$0xff]   ;;  %v12943_v31 = vld [vmem:[%s14737_s12 + $0x378] ss:$12 sps:$4 sm:$0xff]  }
0x10c2   : > { %9038 = vmatpush1.bf16.msra.mxu0 %v12883_v59  ;;  %v12946_v59 = vld [vmem:[%s14737_s12 + $0x4f8] ss:$12 sps:$4 sm:$0xff]  }
0x10c3   : > { %9079 = vmatpush1.bf16.msra.mxu1 %v12886_v24  ;;  %9039 = vmatprep.subr.bf16.mxu0 %v12891_v33  ;;  %v12951_v24 = vld [vmem:[%s14737_s12 + $0x394] ss:$12 sps:$4 sm:$0xff]  }
0x10c4   : > { %9080 = vmatprep.subr.bf16.mxu1 %v12894_v36  ;;  %v12954_v33 = vld [vmem:[%s14737_s12 + $0x514] ss:$12 sps:$4 sm:$0xff]   ;;  %v12949_v36 = vld [vmem:[%s14737_s12 + $0x390] ss:$12 sps:$4 sm:$0xff]  }
0x10c6   : > { %9040 = vmatpush1.bf16.msra.mxu0 %v12889_v3  ;;  %v12952_v3 = vld [vmem:[%s14737_s12 + $0x510] ss:$12 sps:$4 sm:$0xff]  }
0x10c7   : > { %9081 = vmatpush1.bf16.msra.mxu1 %v12892_v37  ;;  %9041 = vmatprep.subr.bf16.mxu0 %v12897_v14  ;;  %v12957_v37 = vld [vmem:[%s14737_s12 + $0x3ac] ss:$12 sps:$4 sm:$0xff]  }
0x10c8   : > { %9082 = vmatprep.subr.bf16.mxu1 %v12900_v17  ;;  %v12960_v14 = vld [vmem:[%s14737_s12 + $0x52c] ss:$12 sps:$4 sm:$0xff]   ;;  %v12955_v17 = vld [vmem:[%s14737_s12 + $0x3a8] ss:$12 sps:$4 sm:$0xff]  }
0x10ca   : > { %9042 = vmatpush1.bf16.msra.mxu0 %v12895_v63  ;;  %v12958_v63 = vld [vmem:[%s14737_s12 + $0x528] ss:$12 sps:$4 sm:$0xff]  }
0x10cb   : > { %9083 = vmatpush1.bf16.msra.mxu1 %v12898_v39  ;;  %9043 = vmatprep.subr.bf16.mxu0 %v12903_v21  ;;  %v12966_v39 = vld [vmem:[%s14737_s12 + $0x544] ss:$12 sps:$4 sm:$0xff]   ;;  %v12961_v21 = vld [vmem:[%s14737_s12 + $0x3c0] ss:$12 sps:$4 sm:$0xff]  }
0x10cc   : > { %9084 = vmatprep.subr.bf16.mxu1 %v12906_v29  ;;  %v12969_v29 = vld [vmem:[%s14737_s12 + $0x3dc] ss:$12 sps:$4 sm:$0xff]  }
0x10ce   : > { %9044 = vmatpush1.bf16.msra.mxu0 %v12901_v22  ;;  %v12972_v22 = vld [vmem:[%s14737_s12 + $0x55c] ss:$12 sps:$4 sm:$0xff]  }
0x10cf   : > { %9085 = vmatpush1.bf16.msra.mxu1 %v12904_v4  ;;  %9045 = vmatprep.subr.bf16.mxu0 %v12909_v30  ;;  %v12970_v4 = vld [vmem:[%s14737_s12 + $0x558] ss:$12 sps:$4 sm:$0xff]   ;;  %v12975_v30 = vld [vmem:[%s14737_s12 + $0x3f4] ss:$12 sps:$4 sm:$0xff]  }
0x10d0   : > { %9086 = vmatprep.subr.bf16.mxu1 %v12912_v44  ;;  %v12973_v44 = vld [vmem:[%s14737_s12 + $0x3f0] ss:$12 sps:$4 sm:$0xff]  }
0x10d2   : > { %9046 = vmatpush1.bf16.msra.mxu0 %v12907_v47  ;;  %v12976_v47 = vld [vmem:[%s14737_s12 + $0x570] ss:$12 sps:$4 sm:$0xff]  }
0x10d3   : > { %9087 = vmatpush1.bf16.msra.mxu1 %v12910_v53  ;;  %9097 = vmatprep.subr.bf16.mxu0 %v12915_v43  ;;  %v12984_v53 = vld [vmem:[%s14737_s12 + $0x58c] ss:$12 sps:$4 sm:$0xff]   ;;  %v12979_v43 = vld [vmem:[%s14737_s12 + $0x408] ss:$12 sps:$4 sm:$0xff]  }
0x10d4   : > { %9138 = vmatprep.subr.bf16.mxu1 %v12918_v49  ;;  %v12987_v49 = vld [vmem:[%s14737_s12 + $0x424] ss:$12 sps:$4 sm:$0xff]  }
0x10d5   : > { %9048 = vmatmul.mubr.bf16.vlgmr.msra.gmra.mrb[72].mxu0 %v15822_v5 }
0x10d6   : > { %9089 = vmatmul.mubr.bf16.vlgmr.msra.gmra.mrb[72].mxu1 %v15826_v57  ;;  %9098 = vmatpush1.bf16.msra.mxu0 %v12913_v52  ;;  %v12990_v52 = vld [vmem:[%s14737_s12 + $0x5a4] ss:$12 sps:$4 sm:$0xff]  }
0x10d7   : > { %9139 = vmatpush1.bf16.msra.mxu1 %v12916_v54  ;;  %9099 = vmatprep.subr.bf16.mxu0 %v12921_v55  ;;  %v12985_v54 = vld [vmem:[%s14737_s12 + $0x420] ss:$12 sps:$4 sm:$0xff]  }
0x10d8   : > { %9140 = vmatprep.subr.bf16.mxu1 %v12924_v58  ;;  %v12988_v55 = vld [vmem:[%s14737_s12 + $0x5a0] ss:$12 sps:$4 sm:$0xff]   ;;  %v12993_v58 = vld [vmem:[%s14737_s12 + $0x43c] ss:$12 sps:$4 sm:$0xff]  }
0x10da   : > { %9100 = vmatpush1.bf16.msra.mxu0 %v12919_v60  ;;  %v12996_v60 = vld [vmem:[%s14737_s12 + $0x5bc] ss:$12 sps:$4 sm:$0xff]  }
0x10db   : > { %9141 = vmatpush1.bf16.msra.mxu1 %v12922_v2  ;;  %9101 = vmatprep.subr.bf16.mxu0 %v12927_v6  ;;  %v5085_v2 = vrot.slane %v15753_v38, %v1422_v62  ;;  %v12991_v6 = vld [vmem:[%s14737_s12 + $0x438] ss:$12 sps:$4 sm:$0xff]   ;;  %v13002_v62 = vld [vmem:[%s14737_s12 + $0x5d4] ss:$12 sps:$4 sm:$0xff]  }
0x10dc   : > { %9142 = vmatprep.subr.bf16.mxu1 %v12930_v19  ;;  %v5081_v19 = vrot.slane %v15753_v38, %v1418_v50 }
0x10de   : > { %9102 = vmatpush1.bf16.msra.mxu0 %v12925_v46  ;;  %v5093_v46 = vrot.slane %v15753_v38, %v1430_v56  ;;  %v12997_v56 = vld [vmem:[%s14737_s12 + $0x450] ss:$12 sps:$4 sm:$0xff]  }
0x10df   : > { %9143 = vmatpush1.bf16.msra.mxu1 %v12928_v7  ;;  %9103 = vmatprep.subr.bf16.mxu0 %v12933_v8  ;;  %v12994_v7 = vld [vmem:[%s14737_s12 + $0x5b8] ss:$12 sps:$4 sm:$0xff]   ;;  %v12999_v8 = vld [vmem:[%s14737_s12 + $0x454] ss:$12 sps:$4 sm:$0xff]  }
0x10e0   : > { %9144 = vmatprep.subr.bf16.mxu1 %v12936_v9 }
0x10e2   : > { %9104 = vmatpush1.bf16.msra.mxu0 %v12931_v11  ;;  %v5089_v11 = vrot.slane %v15753_v38, %v1426_v51  ;;  %v13000_v51 = vld [vmem:[%s14737_s12 + $0x5d0] ss:$12 sps:$4 sm:$0xff]   ;;  %v13005_v38 = vld [vmem:[%s14737_s12 + $0x46c] ss:$12 sps:$4 sm:$0xff]  }
0x10e3   : > { %9145 = vmatpush1.bf16.msra.mxu1 %v12934_v16  ;;  %9105 = vmatprep.subr.bf16.mxu0 %v12939_v10 }
0x10e4   : > { %9146 = vmatprep.subr.bf16.mxu1 %v12942_v20 }
0x10e6   : > { %9106 = vmatpush1.bf16.msra.mxu0 %v12937_v18 }
0x10e7   : > { %9147 = vmatpush1.bf16.msra.mxu1 %v12940_v15  ;;  %9107 = vmatprep.subr.bf16.mxu0 %v12945_v28 }
0x10e8   : > { %9148 = vmatprep.subr.bf16.mxu1 %v12948_v34 }
0x10ea   : > { %9108 = vmatpush1.bf16.msra.mxu0 %v12943_v31 }
0x10eb   : > { %9149 = vmatpush1.bf16.msra.mxu1 %v12946_v59  ;;  %9109 = vmatprep.subr.bf16.mxu0 %v12951_v24 }
0x10ec   : > { %9150 = vmatprep.subr.bf16.mxu1 %v12954_v33  ;;  %v13008_v33 = vld [vmem:[%s14737_s12 + $0x5ec] ss:$12 sps:$4 sm:$0xff]  }
0x10ee   : > { %9110 = vmatpush1.bf16.msra.mxu0 %v12949_v36 }
0x10ef   : > { %9151 = vmatpush1.bf16.msra.mxu1 %v12952_v3  ;;  %9111 = vmatprep.subr.bf16.mxu0 %v12957_v37  ;;  %v13003_v37 = vld [vmem:[%s14737_s12 + $0x468] ss:$12 sps:$4 sm:$0xff]  }
0x10f0   : > { %9152 = vmatprep.subr.bf16.mxu1 %v12960_v14 }
0x10f2   : > { %9112 = vmatpush1.bf16.msra.mxu0 %v12955_v17 }
0x10f3   : > { %9153 = vmatpush1.bf16.msra.mxu1 %v12958_v63  ;;  %9113 = vmatprep.subr.bf16.mxu0 %v12963_v45  ;;  %v13006_v63 = vld [vmem:[%s14737_s12 + $0x5e8] ss:$12 sps:$4 sm:$0xff]   ;;  %v13011_v45 = vld [vmem:[%s14737_s12 + $0x604] ss:$12 sps:$4 sm:$0xff]  }
0x10f4   : > { %9154 = vmatprep.subr.bf16.mxu1 %v12966_v39 }
0x10f6   : > { %9114 = vmatpush1.bf16.msra.mxu0 %v12961_v21  ;;  %v13014_v21 = vld [vmem:[%s14737_s12 + $0x784] ss:$12 sps:$4 sm:$0xff]  }
0x10f7   : > { %9155 = vmatpush1.bf16.msra.mxu1 %v12964_v40  ;;  %9115 = vmatprep.subr.bf16.mxu0 %v12969_v29  ;;  %v13009_v40 = vld [vmem:[%s14737_s12 + $0x600] ss:$12 sps:$4 sm:$0xff]  }
0x10f8   : > { %9156 = vmatprep.subr.bf16.mxu1 %v12972_v22  ;;  %v13012_v22 = vld [vmem:[%s14737_s12 + $0x780] ss:$12 sps:$4 sm:$0xff]  }
0x10fa   : > { %9116 = vmatpush1.bf16.msra.mxu0 %v12967_v42  ;;  %v13017_v42 = vld [vmem:[%s14737_s12 + $0x61c] ss:$12 sps:$4 sm:$0xff]  }
0x10fb   : > { %9157 = vmatpush1.bf16.msra.mxu1 %v12970_v4  ;;  %9117 = vmatprep.subr.bf16.mxu0 %v12975_v30  ;;  %v13020_v30 = vld [vmem:[%s14737_s12 + $0x79c] ss:$12 sps:$4 sm:$0xff]  }
0x10fc   : > { %9158 = vmatprep.subr.bf16.mxu1 %v12978_v13  ;;  %v13015_v13 = vld [vmem:[%s14737_s12 + $0x618] ss:$12 sps:$4 sm:$0xff]  }
0x10fe   : > { %9118 = vmatpush1.bf16.msra.mxu0 %v12973_v44  ;;  %v13018_v44 = vld [vmem:[%s14737_s12 + $0x798] ss:$12 sps:$4 sm:$0xff]  }
0x10ff   : > { %9159 = vmatpush1.bf16.msra.mxu1 %v12976_v47  ;;  %9119 = vmatprep.subr.bf16.mxu0 %v12981_v48  ;;  %v13023_v47 = vld [vmem:[%s14737_s12 + $0x634] ss:$12 sps:$4 sm:$0xff]  }
0x1100   : > { %9160 = vmatprep.subr.bf16.mxu1 %v12984_v53  ;;  %v13026_v48 = vld [vmem:[%s14737_s12 + $0x7b4] ss:$12 sps:$4 sm:$0xff]   ;;  %v13021_v53 = vld [vmem:[%s14737_s12 + $0x630] ss:$12 sps:$4 sm:$0xff]  }
0x1102   : > { %9120 = vmatpush1.bf16.msra.mxu0 %v12979_v43  ;;  %v13024_v43 = vld [vmem:[%s14737_s12 + $0x7b0] ss:$12 sps:$4 sm:$0xff]  }
0x1103   : > { %9161 = vmatpush1.bf16.msra.mxu1 %v12982_v41  ;;  %9121 = vmatprep.subr.bf16.mxu0 %v12987_v49  ;;  %v13029_v41 = vld [vmem:[%s14737_s12 + $0x64c] ss:$12 sps:$4 sm:$0xff]  }
0x1104   : > { %9162 = vmatprep.subr.bf16.mxu1 %v12990_v52  ;;  %v13032_v49 = vld [vmem:[%s14737_s12 + $0x7cc] ss:$12 sps:$4 sm:$0xff]   ;;  %v13027_v52 = vld [vmem:[%s14737_s12 + $0x648] ss:$12 sps:$4 sm:$0xff]  }
0x1106   : > { %9122 = vmatpush1.bf16.msra.mxu0 %v12985_v54  ;;  %v13030_v54 = vld [vmem:[%s14737_s12 + $0x7c8] ss:$12 sps:$4 sm:$0xff]  }
0x1107   : > { %9163 = vmatpush1.bf16.msra.mxu1 %v12988_v55  ;;  %9123 = vmatprep.subr.bf16.mxu0 %v12993_v58  ;;  %v13035_v55 = vld [vmem:[%s14737_s12 + $0x664] ss:$12 sps:$4 sm:$0xff]  }
0x1108   : > { %v6801_v9 = vpop.f32.mrb[64].mxu0  ;;  %9164 = vmatprep.subr.bf16.mxu1 %v12996_v60  ;;  %v13038_v58 = vld [vmem:[%s14737_s12 + $0x7e4] ss:$12 sps:$4 sm:$0xff]   ;;  %v13033_v60 = vld [vmem:[%s14737_s12 + $0x660] ss:$12 sps:$4 sm:$0xff]  }
0x1109   : > { %v6883_v16 = vpop.f32.mrb[64].mxu1  ;;  %v6803_v10 = vpop.f32.mrb[65].mxu0  ;;  %v11719_v15 = vadd.f32 %v6801_v9, %v5081_v19  ;;  %v13044_v19 = vld [vmem:[%s14737_s12 + $0x7fc] ss:$12 sps:$4 sm:$0xff]   ;;  %v13050_v9 = vld [vmem:[%s14737_s12 + $0x814] ss:$12 sps:$4 sm:$0xff]  }
0x110a   : > { %v11720_v20 = vadd.f32 %v6803_v10, %v5085_v2  ;;  %v6885_v50 = vpop.f32.mrb[65].mxu1  ;;  %v6805_v18 = vpop.f32.mrb[66].mxu0  ;;  %9124 = vmatpush1.bf16.msra.mxu0 %v12991_v6  ;;  %v11721_v31 = vadd.f32 %v6883_v16, %v5089_v11  ;;  %v13036_v2 = vld [vmem:[%s14737_s12 + $0x7e0] ss:$12 sps:$4 sm:$0xff]   ;;  %v13041_v6 = vld [vmem:[%s14737_s12 + $0x67c] ss:$12 sps:$4 sm:$0xff]  }
0x110b   : > { %v11722_v28 = vadd.f32 %v6885_v50, %v5093_v46  ;;  %v6887_v34 = vpop.f32.mrb[66].mxu1  ;;  %9165 = vmatpush1.bf16.msra.mxu1 %v12994_v7  ;;  %v6806_v25 = vpop.f32.mrb[67].mxu0  ;;  %9125 = vmatprep.subr.bf16.mxu0 %v12999_v8  ;;  %v7058_v14 = vmax.f32 %v11719_v15, 0.0  ;;  %v13039_v46 = vld [vmem:[%s14737_s12 + $0x678] ss:$12 sps:$4 sm:$0xff]  }
0x110c   : > { %v7059_v59 = vmax.f32 %v11720_v20, 0.0  ;;  %v6888_v24 = vpop.f32.mrb[67].mxu1  ;;  %9166 = vmatprep.subr.bf16.mxu1 %v13002_v62  ;;  %v7060_v39 = vmax.f32 %v11721_v31, 0.0  ;;  %v13042_v7 = vld [vmem:[%s14737_s12 + $0x7f8] ss:$12 sps:$4 sm:$0xff]  }
0x110d   : > { %v7061_v36 = vmax.f32 %v11722_v28, 0.0  ;;  %v15910_v29 = vpack.c.bf16 %v7058_v14, %v7058_v14  ;;  %v13047_v8 = vld [vmem:[%s14737_s12 + $0x694] ss:$12 sps:$4 sm:$0xff]   ;;  %v13045_v11 = vld [vmem:[%s14737_s12 + $0x690] ss:$12 sps:$4 sm:$0xff]  }
0x110e   : > { %v15899_v3 = vpack.c.bf16 %v7059_v59, %v7059_v59  ;;  %9126 = vmatpush1.bf16.msra.mxu0 %v12997_v56  ;;  %v15914_v4 = vpack.c.bf16 %v7060_v39, %v7060_v39  ;;  %v13048_v62 = vld [vmem:[%s14737_s12 + $0x810] ss:$12 sps:$4 sm:$0xff]   ;;  %v13053_v16 = vld [vmem:[%s14737_s12 + $0x6ac] ss:$12 sps:$4 sm:$0xff]   ;;  %v13051_v20 = vld [vmem:[%s14737_s12 + $0x6a8] ss:$12 sps:$4 sm:$0xff]  }
0x110f   : > { %v15902_v17 = vpack.c.bf16 %v7061_v36, %v7061_v36  ;;  %9167 = vmatpush1.bf16.msra.mxu1 %v13000_v51  ;;  %9127 = vmatprep.subr.bf16.mxu0 %v13005_v38  ;;  %v13056_v10 = vld [vmem:[%s14737_s12 + $0x82c] ss:$12 sps:$4 sm:$0xff]   ;;  %v13054_v50 = vld [vmem:[%s14737_s12 + $0x828] ss:$12 sps:$4 sm:$0xff]   ;;  %v13059_v18 = vld [vmem:[%s14737_s12 + $0x6c4] ss:$12 sps:$4 sm:$0xff]  }
0x1110   : > { %9129 = vmatprep.mubr.bf16.mxu0 %v15899_v3  ;;  %9168 = vmatprep.subr.bf16.mxu1 %v13008_v33  ;;  %v13062_v56 = vld [vmem:[%s14737_s12 + $0x844] ss:$12 sps:$4 sm:$0xff]   ;;  %v13057_v15 = vld [vmem:[%s14737_s12 + $0x6c0] ss:$12 sps:$4 sm:$0xff]   ;;  %v13065_v34 = vld [vmem:[%s14737_s12 + $0x6dc] ss:$12 sps:$4 sm:$0xff]  }
0x1111   : > { %9170 = vmatprep.mubr.bf16.mxu1 %v15902_v17  ;;  %v13060_v28 = vld [vmem:[%s14737_s12 + $0x840] ss:$12 sps:$4 sm:$0xff]   ;;  %v13068_v25 = vld [vmem:[%s14737_s12 + $0x85c] ss:$12 sps:$4 sm:$0xff]   ;;  %v13063_v51 = vld [vmem:[%s14737_s12 + $0x6d8] ss:$12 sps:$4 sm:$0xff]  }
0x1112   : > { %9128 = vmatpush1.bf16.msra.mxu0 %v13003_v37  ;;  %v13066_v38 = vld [vmem:[%s14737_s12 + $0x858] ss:$12 sps:$4 sm:$0xff]   ;;  %v13071_v31 = vld [vmem:[%s14737_s12 + $0x6f4] ss:$12 sps:$4 sm:$0xff]   ;;  %v13069_v24 = vld [vmem:[%s14737_s12 + $0x6f0] ss:$12 sps:$4 sm:$0xff]  }
0x1113   : > { %9169 = vmatpush1.bf16.msra.mxu1 %v13006_v63  ;;  %9179 = vmatprep.subr.bf16.mxu0 %v13011_v45  ;;  %v13074_v59 = vld [vmem:[%s14737_s12 + $0x874] ss:$12 sps:$4 sm:$0xff]   ;;  %v13072_v33 = vld [vmem:[%s14737_s12 + $0x870] ss:$12 sps:$4 sm:$0xff]   ;;  %v13077_v36 = vld [vmem:[%s14737_s12 + $0x70c] ss:$12 sps:$4 sm:$0xff]  }
0x1114   : > { %9220 = vmatprep.subr.bf16.mxu1 %v13014_v21  ;;  %v13080_v37 = vld [vmem:[%s14737_s12 + $0x88c] ss:$12 sps:$4 sm:$0xff]   ;;  %v13075_v14 = vld [vmem:[%s14737_s12 + $0x708] ss:$12 sps:$4 sm:$0xff]   ;;  %v13083_v45 = vld [vmem:[%s14737_s12 + $0x724] ss:$12 sps:$4 sm:$0xff]  }
0x1115   : > { %9130 = vmatmul.mubr.bf16.vlgmr.msra.gmra.mrb[76].mxu0 %v15910_v29  ;;  %v13078_v63 = vld [vmem:[%s14737_s12 + $0x888] ss:$12 sps:$4 sm:$0xff]   ;;  %v13086_v39 = vld [vmem:[%s14737_s12 + $0x8a4] ss:$12 sps:$4 sm:$0xff]   ;;  %v13081_v21 = vld [vmem:[%s14737_s12 + $0x720] ss:$12 sps:$4 sm:$0xff]  }
0x1116   : > { %9171 = vmatmul.mubr.bf16.vlgmr.msra.gmra.mrb[76].mxu1 %v15914_v4  ;;  %9180 = vmatpush1.bf16.msra.mxu0 %v13009_v40  ;;  %v13084_v40 = vld [vmem:[%s14737_s12 + $0x8a0] ss:$12 sps:$4 sm:$0xff]  }
0x1117   : > { %9221 = vmatpush1.bf16.msra.mxu1 %v13012_v22  ;;  %9181 = vmatprep.subr.bf16.mxu0 %v13017_v42  ;;  %v13089_v22 = vld [vmem:[%s14737_s12 + $0x73c] ss:$12 sps:$4 sm:$0xff]  }
0x1118   : > { %9222 = vmatprep.subr.bf16.mxu1 %v13020_v30  ;;  %v13092_v42 = vld [vmem:[%s14737_s12 + $0x8bc] ss:$12 sps:$4 sm:$0xff]   ;;  %v13087_v30 = vld [vmem:[%s14737_s12 + $0x738] ss:$12 sps:$4 sm:$0xff]  }
0x111a   : > { %9182 = vmatpush1.bf16.msra.mxu0 %v13015_v13  ;;  %v13090_v13 = vld [vmem:[%s14737_s12 + $0x8b8] ss:$12 sps:$4 sm:$0xff]  }
0x111b   : > { %9223 = vmatpush1.bf16.msra.mxu1 %v13018_v44  ;;  %9183 = vmatprep.subr.bf16.mxu0 %v13023_v47  ;;  %v13095_v44 = vld [vmem:[%s14737_s12 + $0x754] ss:$12 sps:$4 sm:$0xff]  }
0x111c   : > { %9224 = vmatprep.subr.bf16.mxu1 %v13026_v48  ;;  %v13098_v47 = vld [vmem:[%s14737_s12 + $0x8d4] ss:$12 sps:$4 sm:$0xff]   ;;  %v13093_v48 = vld [vmem:[%s14737_s12 + $0x750] ss:$12 sps:$4 sm:$0xff]  }
0x111e   : > { %9184 = vmatpush1.bf16.msra.mxu0 %v13021_v53  ;;  %v13096_v53 = vld [vmem:[%s14737_s12 + $0x8d0] ss:$12 sps:$4 sm:$0xff]  }
0x111f   : > { %9225 = vmatpush1.bf16.msra.mxu1 %v13024_v43  ;;  %9185 = vmatprep.subr.bf16.mxu0 %v13029_v41  ;;  %v13101_v43 = vld [vmem:[%s14737_s12 + $0x76c] ss:$12 sps:$4 sm:$0xff]  }
0x1120   : > { %9226 = vmatprep.subr.bf16.mxu1 %v13032_v49  ;;  %v13104_v41 = vld [vmem:[%s14737_s12 + $0x8ec] ss:$12 sps:$4 sm:$0xff]   ;;  %v13099_v49 = vld [vmem:[%s14737_s12 + $0x768] ss:$12 sps:$4 sm:$0xff]  }
0x1122   : > { %9186 = vmatpush1.bf16.msra.mxu0 %v13027_v52  ;;  %v13102_v52 = vld [vmem:[%s14737_s12 + $0x8e8] ss:$12 sps:$4 sm:$0xff]  }
0x1123   : > { %9227 = vmatpush1.bf16.msra.mxu1 %v13030_v54  ;;  %9187 = vmatprep.subr.bf16.mxu0 %v13035_v55  ;;  %v13105_v54 = vld [vmem:[%s14737_s12 + $0xc8] ss:$12 sps:$4 sm:$0xff]  }
0x1124   : > { %9228 = vmatprep.subr.bf16.mxu1 %v13038_v58  ;;  %v13106_v55 = vld [vmem:[%s14737_s12 + $0x248] ss:$12 sps:$4 sm:$0xff]   ;;  %v5059_v58 = vld [vmem:[%s14734_s23 + $0x8] sm:$0xf] }
0x1126   : > { %9188 = vmatpush1.bf16.msra.mxu0 %v13033_v60  ;;  %v5097_v60 = vrot.slane %v5059_v58, %v14846_v27 }
0x1127   : > { %9229 = vmatpush1.bf16.msra.mxu1 %v13036_v2  ;;  %9189 = vmatprep.subr.bf16.mxu0 %v13041_v6  ;;  %v5105_v2 = vrot.slane %v5059_v58, %v14903_v0  ;;  %v5101_v6 = vrot.slane %v5059_v58, %v14843_v26 }
0x1128   : > { %9230 = vmatprep.subr.bf16.mxu1 %v13044_v19  ;;  %v5109_v19 = vrot.slane %v5059_v58, %v15073_v35  ;;  %v13134_v58 = vld [vmem:[%s14737_s12 + $0x2f0] ss:$12 sps:$4 sm:$0xff]  }
0x112a   : > { %9190 = vmatpush1.bf16.msra.mxu0 %v13039_v46 }
0x112b   : > { %9231 = vmatpush1.bf16.msra.mxu1 %v13042_v7  ;;  %9191 = vmatprep.subr.bf16.mxu0 %v13047_v8 }
0x112c   : > { %9232 = vmatprep.subr.bf16.mxu1 %v13050_v9 }
0x112e   : > { %9192 = vmatpush1.bf16.msra.mxu0 %v13045_v11 }
0x112f   : > { %9233 = vmatpush1.bf16.msra.mxu1 %v13048_v62  ;;  %9193 = vmatprep.subr.bf16.mxu0 %v13053_v16 }
0x1130   : > { %9234 = vmatprep.subr.bf16.mxu1 %v13056_v10 }
0x1132   : > { %9194 = vmatpush1.bf16.msra.mxu0 %v13051_v20 }
0x1133   : > { %9235 = vmatpush1.bf16.msra.mxu1 %v13054_v50  ;;  %9195 = vmatprep.subr.bf16.mxu0 %v13059_v18 }
0x1134   : > { %9236 = vmatprep.subr.bf16.mxu1 %v13062_v56 }
0x1136   : > { %9196 = vmatpush1.bf16.msra.mxu0 %v13057_v15 }
0x1137   : > { %9237 = vmatpush1.bf16.msra.mxu1 %v13060_v28  ;;  %9197 = vmatprep.subr.bf16.mxu0 %v13065_v34 }
0x1138   : > { %9238 = vmatprep.subr.bf16.mxu1 %v13068_v25 }
0x113a   : > { %9198 = vmatpush1.bf16.msra.mxu0 %v13063_v51  ;;  %v13107_v51 = vld [vmem:[%s14737_s12 + $0x8] ss:$12 sps:$4 sm:$0xff]  }
0x113b   : > { %9239 = vmatpush1.bf16.msra.mxu1 %v13066_v38  ;;  %9199 = vmatprep.subr.bf16.mxu0 %v13071_v31 }
0x113c   : > { %9240 = vmatprep.subr.bf16.mxu1 %v13074_v59  ;;  %v13108_v59 = vld [vmem:[%s14737_s12 + $0x188] ss:$12 sps:$4 sm:$0xff]  }
0x113e   : > { %9200 = vmatpush1.bf16.msra.mxu0 %v13069_v24 }
0x113f   : > { %9241 = vmatpush1.bf16.msra.mxu1 %v13072_v33  ;;  %9201 = vmatprep.subr.bf16.mxu0 %v13077_v36  ;;  %v13109_v33 = vld [vmem:[%s14737_s12 + $0xe0] ss:$12 sps:$4 sm:$0xff]  }
0x1140   : > { %9242 = vmatprep.subr.bf16.mxu1 %v13080_v37  ;;  %v13110_v36 = vld [vmem:[%s14737_s12 + $0x260] ss:$12 sps:$4 sm:$0xff]  }
0x1141   : > { %v13111_v37 = vld [vmem:[%s14737_s12 + $0x20] ss:$12 sps:$4 sm:$0xff]  }
0x1142   : > { %9202 = vmatpush1.bf16.msra.mxu0 %v13075_v14  ;;  %v13112_v14 = vld [vmem:[%s14737_s12 + $0x1a0] ss:$12 sps:$4 sm:$0xff]  }
0x1143   : > { %9243 = vmatpush1.bf16.msra.mxu1 %v13078_v63  ;;  %9203 = vmatprep.subr.bf16.mxu0 %v13083_v45  ;;  %v13113_v63 = vld [vmem:[%s14737_s12 + $0xf8] ss:$12 sps:$4 sm:$0xff]  }
0x1144   : > { %9244 = vmatprep.subr.bf16.mxu1 %v13086_v39  ;;  %v13114_v45 = vld [vmem:[%s14737_s12 + $0x278] ss:$12 sps:$4 sm:$0xff]  }
0x1145   : > { %v13115_v39 = vld [vmem:[%s14737_s12 + $0x38] ss:$12 sps:$4 sm:$0xff]  }
0x1146   : > { %9204 = vmatpush1.bf16.msra.mxu0 %v13081_v21  ;;  %v13116_v21 = vld [vmem:[%s14737_s12 + $0x1b8] ss:$12 sps:$4 sm:$0xff]  }
0x1147   : > { %9245 = vmatpush1.bf16.msra.mxu1 %v13084_v40  ;;  %9205 = vmatprep.subr.bf16.mxu0 %v13089_v22  ;;  %v13117_v40 = vld [vmem:[%s14737_s12 + $0x110] ss:$12 sps:$4 sm:$0xff]  }
0x1148   : > { %9246 = vmatprep.subr.bf16.mxu1 %v13092_v42  ;;  %v13120_v22 = vld [vmem:[%s14737_s12 + $0x1d0] ss:$12 sps:$4 sm:$0xff]   ;;  %v13121_v42 = vld [vmem:[%s14737_s12 + $0x128] ss:$12 sps:$4 sm:$0xff]  }
0x114a   : > { %9206 = vmatpush1.bf16.msra.mxu0 %v13087_v30  ;;  %v13122_v30 = vld [vmem:[%s14737_s12 + $0x2a8] ss:$12 sps:$4 sm:$0xff]  }
0x114b   : > { %9247 = vmatpush1.bf16.msra.mxu1 %v13090_v13  ;;  %9207 = vmatprep.subr.bf16.mxu0 %v13095_v44  ;;  %v13123_v13 = vld [vmem:[%s14737_s12 + $0x68] ss:$12 sps:$4 sm:$0xff]  }
0x114c   : > { %9248 = vmatprep.subr.bf16.mxu1 %v13098_v47  ;;  %v13124_v44 = vld [vmem:[%s14737_s12 + $0x1e8] ss:$12 sps:$4 sm:$0xff]   ;;  %v13125_v47 = vld [vmem:[%s14737_s12 + $0x140] ss:$12 sps:$4 sm:$0xff]  }
0x114e   : > { %9208 = vmatpush1.bf16.msra.mxu0 %v13093_v48  ;;  %v13126_v48 = vld [vmem:[%s14737_s12 + $0x2c0] ss:$12 sps:$4 sm:$0xff]  }
0x114f   : > { %9249 = vmatpush1.bf16.msra.mxu1 %v13096_v53  ;;  %9209 = vmatprep.subr.bf16.mxu0 %v13101_v43  ;;  %v13127_v53 = vld [vmem:[%s14737_s12 + $0x80] ss:$12 sps:$4 sm:$0xff]  }
0x1150   : > { %9250 = vmatprep.subr.bf16.mxu1 %v13104_v41  ;;  %v13128_v43 = vld [vmem:[%s14737_s12 + $0x200] ss:$12 sps:$4 sm:$0xff]   ;;  %v13129_v41 = vld [vmem:[%s14737_s12 + $0x158] ss:$12 sps:$4 sm:$0xff]  }
0x1152   : > { %9210 = vmatpush1.bf16.msra.mxu0 %v13099_v49  ;;  %v13130_v49 = vld [vmem:[%s14737_s12 + $0x2d8] ss:$12 sps:$4 sm:$0xff]  }
0x1153   : > { %9251 = vmatpush1.bf16.msra.mxu1 %v13102_v52  ;;  %11360 = vmatprep.subr.bf16.mxu0 %v13105_v54  ;;  %v13131_v52 = vld [vmem:[%s14737_s12 + $0x98] ss:$12 sps:$4 sm:$0xff]  }
0x1154   : > { %11382 = vmatprep.subr.bf16.mxu1 %v13106_v55  ;;  %v13132_v54 = vld [vmem:[%s14737_s12 + $0x218] ss:$12 sps:$4 sm:$0xff]   ;;  %v13133_v55 = vld [vmem:[%s14737_s12 + $0x170] ss:$12 sps:$4 sm:$0xff]  }
0x1168   : > { %v6965_v46 = vpop.f32.mrb[68].mxu0 }
0x1169   : > { %v11723_v7 = vadd.f32 %v6965_v46, %v5097_v60  ;;  %v7047_v8 = vpop.f32.mrb[68].mxu1  ;;  %v6967_v9 = vpop.f32.mrb[69].mxu0  ;;  %v13135_v60 = vld [vmem:[%s14737_s12 + $0xb0] ss:$12 sps:$4 sm:$0xff]   ;;  %v13139_v46 = vld [vmem:[%s14737_s12 + $0x308] ss:$12 sps:$4 sm:$0xff]  }
0x116a   : > { %v11725_v11 = vadd.f32 %v7047_v8, %v5105_v2  ;;  %v11724_v62 = vadd.f32 %v6967_v9, %v5101_v6  ;;  %v7049_v16 = vpop.f32.mrb[69].mxu1  ;;  %v6969_v10 = vpop.f32.mrb[70].mxu0  ;;  %v13136_v2 = vld [vmem:[%s14737_s12 + $0x230] ss:$12 sps:$4 sm:$0xff]   ;;  %v13137_v6 = vld [vmem:[%s14737_s12 + $0x3c8] ss:$12 sps:$4 sm:$0xff]  }
0x116b   : > { %v7062_v20 = vmax.f32 %v11723_v7, 0.0  ;;  %v11726_v50 = vadd.f32 %v7049_v16, %v5109_v19  ;;  %v7051_v18 = vpop.f32.mrb[70].mxu1  ;;  %v6970_v56 = vpop.f32.mrb[71].mxu0  ;;  %v13138_v19 = vld [vmem:[%s14737_s12 + $0x548] ss:$12 sps:$4 sm:$0xff]  }
0x116c   : > { %v7064_v15 = vmax.f32 %v11725_v11, 0.0  ;;  %v7063_v28 = vmax.f32 %v11724_v62, 0.0  ;;  %v7052_v35 = vpop.f32.mrb[71].mxu1  ;;  %v13140_v7 = vld [vmem:[%s14737_s12 + $0x488] ss:$12 sps:$4 sm:$0xff]  }
0x116d   : > { %v7065_v34 = vmax.f32 %v11726_v50, 0.0  ;;  %v15987_v38 = vpack.c.bf16 %v7062_v20, %v7062_v20  ;;  %v13141_v8 = vld [vmem:[%s14737_s12 + $0x3e0] ss:$12 sps:$4 sm:$0xff]   ;;  %v13145_v16 = vld [vmem:[%s14737_s12 + $0x3f8] ss:$12 sps:$4 sm:$0xff]  }
0x116e   : > { %v15984_v25 = vpack.c.bf16 %v7063_v28, %v7063_v28  ;;  %v15992_v24 = vpack.c.bf16 %v7064_v15, %v7064_v15  ;;  %v13142_v9 = vld [vmem:[%s14737_s12 + $0x560] ss:$12 sps:$4 sm:$0xff]   ;;  %v13148_v10 = vld [vmem:[%s14737_s12 + $0x4b8] ss:$12 sps:$4 sm:$0xff]   ;;  %v13150_v20 = vld [vmem:[%s14737_s12 + $0x590] ss:$12 sps:$4 sm:$0xff]  }
0x116f   : > { %v15989_v31 = vpack.c.bf16 %v7065_v34, %v7065_v34  ;;  %v13143_v11 = vld [vmem:[%s14737_s12 + $0x320] ss:$12 sps:$4 sm:$0xff]   ;;  %v13152_v50 = vld [vmem:[%s14737_s12 + $0x4d0] ss:$12 sps:$4 sm:$0xff]   ;;  %v13153_v18 = vld [vmem:[%s14737_s12 + $0x428] ss:$12 sps:$4 sm:$0xff]  }
0x1170   : > { %9211 = vmatprep.mubr.bf16.mxu0 %v15984_v25  ;;  %v13144_v62 = vld [vmem:[%s14737_s12 + $0x4a0] ss:$12 sps:$4 sm:$0xff]   ;;  %v13154_v56 = vld [vmem:[%s14737_s12 + $0x5a8] ss:$12 sps:$4 sm:$0xff]  }
0x1171   : > { %9252 = vmatprep.mubr.bf16.mxu1 %v15989_v31  ;;  %9212 = vmatmul.mubr.bf16.vlgmr.msra.gmra.mrb[80].mxu0 %v15987_v38  ;;  %v13155_v15 = vld [vmem:[%s14737_s12 + $0x368] ss:$12 sps:$4 sm:$0xff]   ;;  %v13157_v35 = vld [vmem:[%s14737_s12 + $0x440] ss:$12 sps:$4 sm:$0xff]  }
0x1172   : > { %9253 = vmatmul.mubr.bf16.vlgmr.msra.gmra.mrb[80].mxu1 %v15992_v24  ;;  %11361 = vmatpush3.bf16.msra.mxu0 %v13107_v51  ;;  %v13156_v28 = vld [vmem:[%s14737_s12 + $0x4e8] ss:$12 sps:$4 sm:$0xff]   ;;  %v13158_v34 = vld [vmem:[%s14737_s12 + $0x5c0] ss:$12 sps:$4 sm:$0xff]  }
0x1173   : > { %11383 = vmatpush3.bf16.msra.mxu1 %v13108_v59  ;;  %9293 = vmatprep.mubr.bf16.mxu0 %v15773_v61  ;;  %v13118_v61 = vld [vmem:[%s14737_s12 + $0x290] ss:$12 sps:$4 sm:$0xff]   ;;  %v13159_v51 = vld [vmem:[%s14737_s12 + $0x380] ss:$12 sps:$4 sm:$0xff]  }
0x1174   : > { %9333 = vmatprep.mubr.bf16.mxu1 %v15775_v1  ;;  %11362 = vmatprep.subr.bf16.mxu0 %v13109_v33  ;;  %v13119_v1 = vld [vmem:[%s14737_s12 + $0x50] ss:$12 sps:$4 sm:$0xff]   ;;  %v16057_v59 = vld [vmem:[%s948_s8] sm:$0x7] }
0x1175   : > { %11384 = vmatprep.subr.bf16.mxu1 %v13110_v36  ;;  %v13160_v33 = vld [vmem:[%s14737_s12 + $0x500] ss:$12 sps:$4 sm:$0xff]   ;;  %v13161_v36 = vld [vmem:[%s14737_s12 + $0x458] ss:$12 sps:$4 sm:$0xff]  }
0x1176   : > { %11363 = vmatpush3.bf16.msra.mxu0 %v13111_v37  ;;  %v13162_v37 = vld [vmem:[%s14737_s12 + $0x5d8] ss:$12 sps:$4 sm:$0xff]  }
0x1177   : > { %11385 = vmatpush3.bf16.msra.mxu1 %v13112_v14  ;;  %11364 = vmatprep.subr.bf16.mxu0 %v13113_v63  ;;  %v7467_v14 = vrot.slane %v16057_v59, %v14846_v27  ;;  %v7471_v63 = vrot.slane %v16057_v59, %v14843_v26 }
0x1178   : > { %11386 = vmatprep.subr.bf16.mxu1 %v13114_v45  ;;  %v13163_v45 = vld [vmem:[%s14737_s12 + $0x398] ss:$12 sps:$4 sm:$0xff]  }
0x117a   : > { %11365 = vmatpush3.bf16.msra.mxu0 %v13115_v39  ;;  %v13164_v39 = vld [vmem:[%s14737_s12 + $0x518] ss:$12 sps:$4 sm:$0xff]  }
0x117b   : > { %11387 = vmatpush3.bf16.msra.mxu1 %v13116_v21  ;;  %11366 = vmatprep.subr.bf16.mxu0 %v13117_v40  ;;  %v13165_v21 = vld [vmem:[%s14737_s12 + $0x470] ss:$12 sps:$4 sm:$0xff]  }
0x117c   : > { %11388 = vmatprep.subr.bf16.mxu1 %v13118_v61  ;;  %v13166_v61 = vld [vmem:[%s14737_s12 + $0x5f0] ss:$12 sps:$4 sm:$0xff]  }
0x117e   : > { %11367 = vmatpush3.bf16.msra.mxu0 %v13119_v1 }
0x117f   : > { %11389 = vmatpush3.bf16.msra.mxu1 %v13120_v22  ;;  %11368 = vmatprep.subr.bf16.mxu0 %v13121_v42 }
0x1180   : > { %11390 = vmatprep.subr.bf16.mxu1 %v13122_v30 }
0x1182   : > { %11369 = vmatpush3.bf16.msra.mxu0 %v13123_v13 }
0x1183   : > { %11391 = vmatpush3.bf16.msra.mxu1 %v13124_v44  ;;  %11370 = vmatprep.subr.bf16.mxu0 %v13125_v47  ;;  %v13167_v47 = vld [vmem:[%s14737_s12 + $0x3b0] ss:$12 sps:$4 sm:$0xff]  }
0x1184   : > { %11392 = vmatprep.subr.bf16.mxu1 %v13126_v48 }
0x1186   : > { %11371 = vmatpush3.bf16.msra.mxu0 %v13127_v53 }
0x1187   : > { %11393 = vmatpush3.bf16.msra.mxu1 %v13128_v43  ;;  %11372 = vmatprep.subr.bf16.mxu0 %v13129_v41  ;;  %v13168_v41 = vld [vmem:[%s14737_s12 + $0x530] ss:$12 sps:$4 sm:$0xff]  }
0x1188   : > { %11394 = vmatprep.subr.bf16.mxu1 %v13130_v49  ;;  %v13169_v49 = vld [vmem:[%s14737_s12 + $0x6c8] ss:$12 sps:$4 sm:$0xff]  }
0x118a   : > { %11373 = vmatpush3.bf16.msra.mxu0 %v13131_v52 }
0x118b   : > { %11395 = vmatpush3.bf16.msra.mxu1 %v13132_v54  ;;  %11374 = vmatprep.subr.bf16.mxu0 %v13133_v55  ;;  %v13170_v55 = vld [vmem:[%s14737_s12 + $0x848] ss:$12 sps:$4 sm:$0xff]  }
0x118c   : > { %11396 = vmatprep.subr.bf16.mxu1 %v13134_v58  ;;  %v13171_v58 = vld [vmem:[%s14737_s12 + $0x608] ss:$12 sps:$4 sm:$0xff]  }
0x118e   : > { %11375 = vmatpush3.bf16.msra.mxu0 %v13135_v60  ;;  %v13172_v60 = vld [vmem:[%s14737_s12 + $0x788] ss:$12 sps:$4 sm:$0xff]  }
0x118f   : > { %11397 = vmatpush3.bf16.msra.mxu1 %v13136_v2  ;;  %11404 = vmatprep.subr.bf16.mxu0 %v13137_v6  ;;  %v13173_v2 = vld [vmem:[%s14737_s12 + $0x6e0] ss:$12 sps:$4 sm:$0xff]  }
0x1190   : > { %11426 = vmatprep.subr.bf16.mxu1 %v13138_v19  ;;  %v13174_v6 = vld [vmem:[%s14737_s12 + $0x860] ss:$12 sps:$4 sm:$0xff]  }
0x1191   : > { %9294 = vmatmul.mubr.bf16.vlgmr.msra.gmra.mrb[84].mxu0 %v15822_v5  ;;  %v13146_v5 = vld [vmem:[%s14737_s12 + $0x578] ss:$12 sps:$4 sm:$0xff]   ;;  %v13175_v19 = vld [vmem:[%s14737_s12 + $0x620] ss:$12 sps:$4 sm:$0xff]  }
0x1192   : > { %9334 = vmatmul.mubr.bf16.vlgmr.msra.gmra.mrb[84].mxu1 %v15826_v57  ;;  %11405 = vmatpush3.bf16.msra.mxu0 %v13139_v46  ;;  %v13147_v57 = vld [vmem:[%s14737_s12 + $0x338] ss:$12 sps:$4 sm:$0xff]   ;;  %v13176_v46 = vld [vmem:[%s14737_s12 + $0x7a0] ss:$12 sps:$4 sm:$0xff]  }
0x1193   : > { %9373 = vmatprep.mubr.bf16.mxu0 %v15899_v3  ;;  %11427 = vmatpush3.bf16.msra.mxu1 %v13140_v7  ;;  %v13149_v3 = vld [vmem:[%s14737_s12 + $0x410] ss:$12 sps:$4 sm:$0xff]   ;;  %v13177_v7 = vld [vmem:[%s14737_s12 + $0x6f8] ss:$12 sps:$4 sm:$0xff]  }
0x1194   : > { %9413 = vmatprep.mubr.bf16.mxu1 %v15902_v17  ;;  %11406 = vmatprep.subr.bf16.mxu0 %v13141_v8  ;;  %v13151_v17 = vld [vmem:[%s14737_s12 + $0x350] ss:$12 sps:$4 sm:$0xff]   ;;  %v13180_v8 = vld [vmem:[%s14737_s12 + $0x7b8] ss:$12 sps:$4 sm:$0xff]  }
0x1195   : > { %11428 = vmatprep.subr.bf16.mxu1 %v13142_v9  ;;  %v13182_v9 = vld [vmem:[%s14737_s12 + $0x890] ss:$12 sps:$4 sm:$0xff]  }
0x1196   : > { %11407 = vmatpush3.bf16.msra.mxu0 %v13143_v11  ;;  %v13184_v11 = vld [vmem:[%s14737_s12 + $0x7d0] ss:$12 sps:$4 sm:$0xff]  }
0x1197   : > { %11429 = vmatpush3.bf16.msra.mxu1 %v13144_v62  ;;  %11408 = vmatprep.subr.bf16.mxu0 %v13145_v16  ;;  %v13185_v62 = vld [vmem:[%s14737_s12 + $0x728] ss:$12 sps:$4 sm:$0xff]  }
0x1198   : > { %11430 = vmatprep.subr.bf16.mxu1 %v13146_v5  ;;  %v13186_v16 = vld [vmem:[%s14737_s12 + $0x8a8] ss:$12 sps:$4 sm:$0xff]  }
0x1199   : > { %v13187_v5 = vld [vmem:[%s14737_s12 + $0x668] ss:$12 sps:$4 sm:$0xff]  }
0x119a   : > { %11409 = vmatpush3.bf16.msra.mxu0 %v13147_v57  ;;  %v13188_v57 = vld [vmem:[%s14737_s12 + $0x7e8] ss:$12 sps:$4 sm:$0xff]  }
0x119b   : > { %11431 = vmatpush3.bf16.msra.mxu1 %v13148_v10  ;;  %11410 = vmatprep.subr.bf16.mxu0 %v13149_v3  ;;  %v13189_v10 = vld [vmem:[%s14737_s12 + $0x740] ss:$12 sps:$4 sm:$0xff]  }
0x119c   : > { %11432 = vmatprep.subr.bf16.mxu1 %v13150_v20  ;;  %v13190_v3 = vld [vmem:[%s14737_s12 + $0x8c0] ss:$12 sps:$4 sm:$0xff]  }
0x119d   : > { %v13191_v20 = vld [vmem:[%s14737_s12 + $0x680] ss:$12 sps:$4 sm:$0xff]  }
0x119e   : > { %11411 = vmatpush3.bf16.msra.mxu0 %v13151_v17  ;;  %v13192_v17 = vld [vmem:[%s14737_s12 + $0x800] ss:$12 sps:$4 sm:$0xff]  }
0x119f   : > { %11433 = vmatpush3.bf16.msra.mxu1 %v13152_v50  ;;  %11412 = vmatprep.subr.bf16.mxu0 %v13153_v18  ;;  %v13193_v50 = vld [vmem:[%s14737_s12 + $0x758] ss:$12 sps:$4 sm:$0xff]  }
0x11a0   : > { %11434 = vmatprep.subr.bf16.mxu1 %v13154_v56  ;;  %v13194_v18 = vld [vmem:[%s14737_s12 + $0x8d8] ss:$12 sps:$4 sm:$0xff]  }
0x11a1   : > { %v13195_v56 = vld [vmem:[%s14737_s12 + $0x698] ss:$12 sps:$4 sm:$0xff]  }
0x11a2   : > { %11413 = vmatpush3.bf16.msra.mxu0 %v13155_v15  ;;  %v13196_v15 = vld [vmem:[%s14737_s12 + $0x818] ss:$12 sps:$4 sm:$0xff]  }
0x11a3   : > { %11435 = vmatpush3.bf16.msra.mxu1 %v13156_v28  ;;  %11414 = vmatprep.subr.bf16.mxu0 %v13157_v35  ;;  %v13197_v28 = vld [vmem:[%s14737_s12 + $0x770] ss:$12 sps:$4 sm:$0xff]  }
0x11a4   : > { %11436 = vmatprep.subr.bf16.mxu1 %v13158_v34  ;;  %v13198_v35 = vld [vmem:[%s14737_s12 + $0x8f0] ss:$12 sps:$4 sm:$0xff]  }
0x11a5   : > { %v13199_v34 = vld [vmem:[%s14737_s12 + $0x6b0] ss:$12 sps:$4 sm:$0xff]  }
0x11a6   : > { %11415 = vmatpush3.bf16.msra.mxu0 %v13159_v51  ;;  %v13200_v51 = vld [vmem:[%s14737_s12 + $0x830] ss:$12 sps:$4 sm:$0xff]  }
0x11a7   : > { %11437 = vmatpush3.bf16.msra.mxu1 %v13160_v33  ;;  %11416 = vmatprep.subr.bf16.mxu0 %v13161_v36 }
0x11a8   : > { %v9049_v40 = vpop.f32.mrb[72].mxu0  ;;  %11438 = vmatprep.subr.bf16.mxu1 %v13162_v37 }
0x11a9   : > { %v9050_v1 = vadd.f32 %v9049_v40, %v7467_v14  ;;  %v9090_v22 = vpop.f32.mrb[72].mxu1  ;;  %v9051_v42 = vpop.f32.mrb[73].mxu0 }
0x11aa   : > { %v9052_v30 = vadd.f32 %v9051_v42, %v7471_v63  ;;  %v9092_v13 = vpop.f32.mrb[73].mxu1  ;;  %11417 = vmatpush3.bf16.msra.mxu0 %v13163_v45  ;;  %v9053_v44 = vpop.f32.mrb[74].mxu0 }
0x11ab   : > { %v16071_v48 = vadd.f32 %v9090_v22, %v9050_v1  ;;  %11439 = vmatpush3.bf16.msra.mxu1 %v13164_v39  ;;  %v9094_v53 = vpop.f32.mrb[74].mxu1  ;;  %v9054_v43 = vpop.f32.mrb[75].mxu0  ;;  %11418 = vmatprep.subr.bf16.mxu0 %v13165_v21 }
0x11ac   : > { %v16075_v52 = vadd.f32 %v9092_v13, %v9052_v30  ;;  %v9095_v54 = vpop.f32.mrb[75].mxu1  ;;  %11440 = vmatprep.subr.bf16.mxu1 %v13166_v61 }
0x11ae   : > { %11419 = vmatpush3.bf16.msra.mxu0 %v13167_v47 }
0x11af   : > { %11441 = vmatpush3.bf16.msra.mxu1 %v13168_v41  ;;  %11448 = vmatprep.subr.bf16.mxu0 %v13169_v49 }
0x11b0   : > { %11470 = vmatprep.subr.bf16.mxu1 %v13170_v55 }
0x11b1   : > { %9374 = vmatmul.mubr.bf16.vlgmr.msra.gmra.mrb[88].mxu0 %v15910_v29  ;;  %v13178_v29 = vld [vmem:[%s14737_s12 + $0x878] ss:$12 sps:$4 sm:$0xff]  }
0x11b2   : > { %9414 = vmatmul.mubr.bf16.vlgmr.msra.gmra.mrb[88].mxu1 %v15914_v4  ;;  %11449 = vmatpush3.bf16.msra.mxu0 %v13171_v58  ;;  %v13179_v4 = vld [vmem:[%s14737_s12 + $0x638] ss:$12 sps:$4 sm:$0xff]   ;;  %v7475_v58 = vrot.slane %v16057_v59, %v14903_v0 }
0x11b3   : > { %9453 = vmatprep.mubr.bf16.mxu0 %v15984_v25  ;;  %11471 = vmatpush3.bf16.msra.mxu1 %v13172_v60  ;;  %v13181_v25 = vld [vmem:[%s14737_s12 + $0x710] ss:$12 sps:$4 sm:$0xff]  }
0x11b4   : > { %9493 = vmatprep.mubr.bf16.mxu1 %v15989_v31  ;;  %11450 = vmatprep.subr.bf16.mxu0 %v13173_v2  ;;  %v13183_v31 = vld [vmem:[%s14737_s12 + $0x650] ss:$12 sps:$4 sm:$0xff]  }
0x11b5   : > { %11472 = vmatprep.subr.bf16.mxu1 %v13174_v6 }
0x11b6   : > { %11451 = vmatpush3.bf16.msra.mxu0 %v13175_v19 }
0x11b7   : > { %11473 = vmatpush3.bf16.msra.mxu1 %v13176_v46  ;;  %11452 = vmatprep.subr.bf16.mxu0 %v13177_v7 }
0x11b8   : > { %11474 = vmatprep.subr.bf16.mxu1 %v13178_v29 }
0x11ba   : > { %11453 = vmatpush3.bf16.msra.mxu0 %v13179_v4 }
0x11bb   : > { %11475 = vmatpush3.bf16.msra.mxu1 %v13180_v8  ;;  %11454 = vmatprep.subr.bf16.mxu0 %v13181_v25 }
0x11bc   : > { %11476 = vmatprep.subr.bf16.mxu1 %v13182_v9 }
0x11be   : > { %11455 = vmatpush3.bf16.msra.mxu0 %v13183_v31 }
0x11bf   : > { %11477 = vmatpush3.bf16.msra.mxu1 %v13184_v11  ;;  %11456 = vmatprep.subr.bf16.mxu0 %v13185_v62 }
0x11c0   : > { %11478 = vmatprep.subr.bf16.mxu1 %v13186_v16 }
0x11c2   : > { %11457 = vmatpush3.bf16.msra.mxu0 %v13187_v5 }
0x11c3   : > { %11479 = vmatpush3.bf16.msra.mxu1 %v13188_v57  ;;  %11458 = vmatprep.subr.bf16.mxu0 %v13189_v10 }
0x11c4   : > { %11480 = vmatprep.subr.bf16.mxu1 %v13190_v3 }
0x11c6   : > { %11459 = vmatpush3.bf16.msra.mxu0 %v13191_v20 }
0x11c7   : > { %11481 = vmatpush3.bf16.msra.mxu1 %v13192_v17  ;;  %11460 = vmatprep.subr.bf16.mxu0 %v13193_v50 }
0x11c8   : > { %11482 = vmatprep.subr.bf16.mxu1 %v13194_v18 }
0x11ca   : > { %11461 = vmatpush3.bf16.msra.mxu0 %v13195_v56 }
0x11cb   : > { %11483 = vmatpush3.bf16.msra.mxu1 %v13196_v15  ;;  %11462 = vmatprep.subr.bf16.mxu0 %v13197_v28 }
0x11cc   : > { %11484 = vmatprep.subr.bf16.mxu1 %v13198_v35 }
0x11ce   : > { %11463 = vmatpush3.bf16.msra.mxu0 %v13199_v34 }
0x11cf   : > { %11485 = vmatpush3.bf16.msra.mxu1 %v13200_v51 }
0x11d1   : > { %9454 = vmatmul.mubr.bf16.vlgmr.msra.gmra.mrb[92].mxu0 %v15987_v38 }
0x11d2   : > { %9494 = vmatmul.mubr.bf16.vlgmr.msra.gmra.mrb[92].mxu1 %v15992_v24 }
0x11e8   : > { %v9131_v33 = vpop.f32.mrb[76].mxu0 }
0x11e9   : > { %v9132_v36 = vadd.f32 %v9131_v33, %v16071_v48  ;;  %v9172_v37 = vpop.f32.mrb[76].mxu1  ;;  %v9133_v14 = vpop.f32.mrb[77].mxu0 }
0x11ea   : > { %v9134_v63 = vadd.f32 %v9133_v14, %v16075_v52  ;;  %v9174_v45 = vpop.f32.mrb[77].mxu1  ;;  %v9135_v39 = vpop.f32.mrb[78].mxu0 }
0x11eb   : > { %v9173_v21 = vadd.f32 %v9172_v37, %v9132_v36  ;;  %v9176_v40 = vpop.f32.mrb[78].mxu1  ;;  %v9136_v61 = vpop.f32.mrb[79].mxu0 }
0x11ec   : > { %v9175_v1 = vadd.f32 %v9174_v45, %v9134_v63  ;;  %v9177_v22 = vpop.f32.mrb[79].mxu1  ;;  %v13233_v40 = vld [vmem:[#allocation27 + $0x40] sm:$0xff] (!%p11245_p0)  }
0x11ed   : > { %v13921_v22 = vmov (!%p11245_p0), 0.0   ;;  %11492 = vmatprep.subr.bf16.mxu0 (!%p11245_p0), %v13233_v40 }
0x11ee   : > { %11687 = vmatprep.subr.bf16.mxu1 (!%p11245_p0), %v13921_v22  ;;  %11703 = vmatprep.mubr.msk.bf16.mxu1 (!%p11245_p0), %vm13922_vm5, %v13921_v22 }
0x1244   : > { %v9213_v42 = vpop.f32.mrb[80].mxu0 }
0x1245   : > { %v9214_v30 = vadd.f32 %v9213_v42, %v9173_v21  ;;  %v9254_v13 = vpop.f32.mrb[80].mxu1  ;;  %v9215_v38 = vpop.f32.mrb[81].mxu0  ;;  %v13235_v42 = vld [vmem:[#allocation27] sm:$0xff] (!%p11245_p0)  }
0x1246   : > { %v9216_v44 = vadd.f32 %v9215_v38, %v9175_v1  ;;  %v9256_v24 = vpop.f32.mrb[81].mxu1  ;;  %v9217_v47 = vpop.f32.mrb[82].mxu0  ;;  %11493 = vmatpush3.bf16.msra.mxu0 (!%p11245_p0), %v13235_v42  ;;  %v13237_v38 = vld [vmem:[#allocation27 + $0x88] sm:$0xff] (!%p11245_p0)  }
0x1247   : > { %v9255_v53 = vadd.f32 %v9254_v13, %v9214_v30  ;;  %v9258_v48 = vpop.f32.mrb[82].mxu1  ;;  %v9218_v43 = vpop.f32.mrb[83].mxu0  ;;  %v13236_v13 = vld [vmem:[#allocation27 + $0x48] sm:$0xff] (!%p11245_p0)   ;;  %v13240_v47 = vld [vmem:[#allocation27 + $0x90] sm:$0xff] (!%p11245_p0)  }
0x1248   : > { %v9257_v41 = vadd.f32 %v9256_v24, %v9216_v44  ;;  %v9259_v49 = vpop.f32.mrb[83].mxu1  ;;  %v13238_v44 = vld [vmem:[#allocation27 + $0x8] sm:$0xff] (!%p11245_p0)   ;;  %11494 = vmatprep.subr.bf16.mxu0 (!%p11245_p0), %v13236_v13  ;;  %v13239_v24 = vld [vmem:[#allocation27 + $0x50] sm:$0xff] (!%p11245_p0)   ;;  %v13242_v48 = vld [vmem:[#allocation27 + $0x58] sm:$0xff] (!%p11245_p0)  }
0x1249   : > { %v16117_v52 = vadd.f32 %v9255_v53, %v15409_v32  ;;  %v13241_v53 = vld [vmem:[#allocation27 + $0x10] sm:$0xff] (!%p11245_p0)   ;;  %v13243_v43 = vld [vmem:[#allocation27 + $0x98] sm:$0xff] (!%p11245_p0)   ;;  %v13245_v49 = vld [vmem:[#allocation27 + $0x60] sm:$0xff] (!%p11245_p0)  }
0x124a   : > { %v16120_v54 = vadd.f32 %v9257_v41, %v15413_v12  ;;  %11495 = vmatpush3.bf16.msra.mxu0 (!%p11245_p0), %v13238_v44  ;;  %v13244_v41 = vld [vmem:[#allocation27 + $0x18] sm:$0xff] (!%p11245_p0)  }
0x124b   : > { %9504 = vst [vmem:[#allocation2] sm:$0xff] %v16117_v52  ;;  %v9518_v45 = vmul.f32 (!%p11245_p0), %v16117_v52, %v16117_v52  ;;  %11496 = vmatprep.subr.bf16.mxu0 (!%p11245_p0), %v13239_v24 }
0x124c   : > { %9505 = vst [vmem:[#allocation2 + $0x8] sm:$0xff] %v16120_v54  ;;  %v9513_v63 = vadd.f32 (!%p11245_p0), %v16120_v54, %v16117_v52  ;;  %v9519_v39 = vmul.f32 (!%p11245_p0), %v16120_v54, %v16120_v54 }
0x124e   : > { %v9521_v1 = vadd.f32 (!%p11245_p0), %v9519_v39, %v9518_v45  ;;  %11497 = vmatpush3.bf16.msra.mxu0 (!%p11245_p0), %v13241_v53 }
0x124f   : > { %11498 = vmatprep.subr.bf16.mxu0 (!%p11245_p0), %v13242_v48 }
0x1252   : > { %11499 = vmatpush3.bf16.msra.mxu0 (!%p11245_p0), %v13244_v41 }
0x1253   : > { %11500 = vmatprep.subr.bf16.mxu0 (!%p11245_p0), %v13245_v49 }
0x1264   : > { %v11376_v55 = vpop.f32.mrb[84].mxu0 }
0x1265   : > { %v11398_v60 = vpop.f32.mrb[84].mxu1  ;;  %v11377_v2 = vpop.f32.mrb[85].mxu0 }
0x1266   : > { %v11378_v6 = vadd.f32 %v11377_v2, %v11376_v55  ;;  %v11399_v19 = vpop.f32.mrb[85].mxu1  ;;  %v11379_v46 = vpop.f32.mrb[86].mxu0  ;;  %v13246_v55 = vld [vmem:[#allocation27 + $0xa0] sm:$0xff] (!%p11245_p0)   ;;  %v13249_v2 = vld [vmem:[#allocation27 + $0xa8] sm:$0xff] (!%p11245_p0)  }
0x1267   : > { %v11400_v7 = vadd.f32 %v11399_v19, %v11398_v60  ;;  %v11401_v29 = vpop.f32.mrb[86].mxu1  ;;  %v11380_v32 = vpop.f32.mrb[87].mxu0  ;;  %v13248_v60 = vld [vmem:[#allocation27 + $0x68] sm:$0xff] (!%p11245_p0)   ;;  %v13251_v19 = vld [vmem:[#allocation27 + $0x70] sm:$0xff] (!%p11245_p0)  }
0x1268   : > { %v9296_v4 = vadd.f32 %v11378_v6, %v7475_v58  ;;  %v11402_v8 = vpop.f32.mrb[87].mxu1  ;;  %v13247_v58 = vld [vmem:[#allocation27 + $0x20] sm:$0xff] (!%p11245_p0)   ;;  %v13250_v6 = vld [vmem:[#allocation27 + $0x28] sm:$0xff] (!%p11245_p0)   ;;  %v13252_v46 = vld [vmem:[#allocation27 + $0xb0] sm:$0xff] (!%p11245_p0)  }
0x1269   : > { %11501 = vmatpush3.bf16.msra.mxu0 (!%p11245_p0), %v13247_v58  ;;  %v13254_v29 = vld [vmem:[#allocation27 + $0x78] sm:$0xff] (!%p11245_p0)  }
0x126a   : > { %v9336_v12 = vadd.f32 %v11400_v7, %v9296_v4  ;;  %11502 = vmatprep.subr.bf16.mxu0 (!%p11245_p0), %v13248_v60  ;;  %v13253_v7 = vld [vmem:[#allocation27 + $0x30] sm:$0xff] (!%p11245_p0)   ;;  %v13255_v32 = vld [vmem:[#allocation27 + $0xb8] sm:$0xff] (!%p11245_p0)  }
0x126b   : > { %v13256_v4 = vld [vmem:[#allocation27 + $0x38] sm:$0xff] (!%p11245_p0)  }
0x126d   : > { %11503 = vmatpush3.bf16.msra.mxu0 (!%p11245_p0), %v13250_v6 }
0x126e   : > { %11504 = vmatprep.subr.bf16.mxu0 (!%p11245_p0), %v13251_v19 }
0x1271   : > { %11505 = vmatpush3.bf16.msra.mxu0 (!%p11245_p0), %v13253_v7 }
0x1272   : > { %11506 = vmatprep.subr.bf16.mxu0 (!%p11245_p0), %v13254_v29 }
0x1275   : > { %11507 = vmatpush3.bf16.msra.mxu0 (!%p11245_p0), %v13256_v4 }
0x1284   : > { %v11420_v25 = vpop.f32.mrb[88].mxu0 }
0x1285   : > { %v11442_v9 = vpop.f32.mrb[88].mxu1  ;;  %v11421_v31 = vpop.f32.mrb[89].mxu0 }
0x1286   : > { %v11422_v11 = vadd.f32 %v11421_v31, %v11420_v25  ;;  %v11443_v62 = vpop.f32.mrb[89].mxu1  ;;  %v11423_v16 = vpop.f32.mrb[90].mxu0 }
0x1287   : > { %v11444_v5 = vadd.f32 %v11443_v62, %v11442_v9  ;;  %v11445_v57 = vpop.f32.mrb[90].mxu1  ;;  %v11424_v59 = vpop.f32.mrb[91].mxu0  ;;  %v9511_v16 = vld [vmem:[#allocation24] sm:$0x7] (!%p11245_p0) }
0x1288   : > { %v9376_v10 = vadd.f32 %v11422_v11, %v9336_v12  ;;  %v11446_v3 = vpop.f32.mrb[91].mxu1  ;;  %v9544_v57 = vrot.slane (!%p11245_p0), %v9511_v16, %v14843_v26  ;;  %v9548_v59 = vrot.slane (!%p11245_p0), %v9511_v16, %v14903_v0 }
0x128a   : > { %v9416_v20 = vadd.f32 %v11444_v5, %v9376_v10  ;;  %v9512_v5 = vld [vmem:[#allocation26] sm:$0x7] (!%p11245_p0) }
0x12a4   : > { %v11464_v17 = vpop.f32.mrb[92].mxu0 }
0x12a5   : > { %v11486_v50 = vpop.f32.mrb[92].mxu1  ;;  %v11465_v18 = vpop.f32.mrb[93].mxu0 }
0x12a6   : > { %v11466_v56 = vadd.f32 %v11465_v18, %v11464_v17  ;;  %v11487_v15 = vpop.f32.mrb[93].mxu1  ;;  %v11467_v28 = vpop.f32.mrb[94].mxu0  ;;  %v9540_v17 = vrot.slane (!%p11245_p0), %v9511_v16, %v14846_v27  ;;  %v9563_v18 = vrot.slane (!%p11245_p0), %v9512_v5, %v14843_v26 }
0x12a7   : > { %v11488_v35 = vadd.f32 %v11487_v15, %v11486_v50  ;;  %v11489_v34 = vpop.f32.mrb[94].mxu1  ;;  %v11468_v51 = vpop.f32.mrb[95].mxu0 }
0x12a8   : > { %v9456_v33 = vadd.f32 %v11466_v56, %v9416_v20  ;;  %v11490_v36 = vpop.f32.mrb[95].mxu1  ;;  %9510 = sbr.rel (%p11245_p0) target bundleno = 5176 (0x1438), region = 164  ;;  %v9567_v56 = vrot.slane (!%p11245_p0), %v9512_v5, %v14903_v0  ;;  %v9559_v34 = vrot.slane (!%p11245_p0), %v9512_v5, %v14846_v27 }
0x12aa   : > { %v9496_v37 = vadd.f32 %v11488_v35, %v9456_v33 }
0x12ac   : > { %v16127_v14 = vadd.f32 %v9496_v37, %v15411_v23  ;;  %v13234_v23 = vld [vmem:[#allocation27 + $0x80] sm:$0xff] (!%p11245_p0)  }
0x12ad   : > { %11688 = vmatpush3.bf16.msra.mxu1 (!%p11245_p0), %v13234_v23 }
0x12ae   : > { %9506 = vst [vmem:[#allocation2 + $0x10] sm:$0xff] %v16127_v14  ;;  %v9520_v21 = vmul.f32 (!%p11245_p0), %v16127_v14, %v16127_v14  ;;  %v9514_v61 = vadd.f32 (!%p11245_p0), %v9513_v63, %v16127_v14  ;;  %11689 = vmatprep.subr.bf16.mxu1 (!%p11245_p0), %v13921_v22 }
0x12b0   : > { %9515 = vadd.xlane.f32.xlu0 %v9514_v61  ;;  %v9522_v30 = vadd.f32 %v9521_v1, %v9520_v21  ;;  %v11246_v21 = vld [vmem:[#allocation29] ss:$0 sm:$0xff] }
0x12b1   : > { %11690 = vmatpush3.bf16.msra.mxu1 %v13237_v38 }
0x12b2   : > { %11691 = vmatprep.subr.bf16.mxu1 %v13921_v22 }
0x12b4   : > { %9523 = vadd.xlane.f32.xlu0 %v9522_v30 }
0x12b5   : > { %11692 = vmatpush3.bf16.msra.mxu1 %v13240_v47 }
0x12b6   : > { %11693 = vmatprep.subr.bf16.mxu1 %v13921_v22 }
0x12b9   : > { %11694 = vmatpush3.bf16.msra.mxu1 %v13243_v43 }
0x12ba   : > { %11695 = vmatprep.subr.bf16.mxu1 %v13921_v22 }
0x12bd   : > { %11696 = vmatpush3.bf16.msra.mxu1 %v13246_v55 }
0x12be   : > { %11697 = vmatprep.subr.bf16.mxu1 %v13921_v22 }
0x12c1   : > { %11698 = vmatpush3.bf16.msra.mxu1 %v13249_v2 }
0x12c2   : > { %11699 = vmatprep.subr.bf16.mxu1 %v13921_v22 }
0x12c5   : > { %11700 = vmatpush3.bf16.msra.mxu1 %v13252_v46 }
0x12c6   : > { %11701 = vmatprep.subr.bf16.mxu1 %v13921_v22 }
0x12c9   : > { %11702 = vmatpush3.bf16.msra.mxu1 %v13255_v32 }
0x133d   : > { %v9516_v8 = vpop.xlane.xlu0 %9515 }
0x133e   : > { %v9517_v12 = vmul.f32 0.0026041667, %v9516_v8 }
0x1340   : > { %v9526_v9 = vmul.f32 %v9517_v12, %v9517_v12  ;;  %v9528_v10 = vsub.f32 %v16117_v52, %v9517_v12  ;;  %v9530_v3 = vsub.f32 %v16127_v14, %v9517_v12  ;;  %v9529_v20 = vsub.f32 %v16120_v54, %v9517_v12 }
0x1341   : > { %v9524_v25 = vpop.xlane.xlu0 %9523 }
0x1342   : > { %v9525_v31 = vmul.f32 0.0026041667, %v9524_v25 }
0x1344   : > { %v9527_v11 = vsub.f32 %v9525_v31, %v9526_v9 }
0x1346   : > { %v9531_v62 = vadd.f32 1e-05, %v9527_v11 }
0x1348   : > { %13257 = vrsqrt.f32 %v9531_v62 }
0x1352   : > { %v13258_v50 = vpop.eup %13257 }
0x1353   : > { %v9534_v15 = vmul.f32 %v13258_v50, %v9529_v20  ;;  %v9535_v28 = vmul.f32 %v13258_v50, %v9530_v3  ;;  %v9533_v35 = vmul.f32 %v13258_v50, %v9528_v10 }
0x1355   : > { %v9553_v51 = vmul.f32 %v9544_v57, %v9534_v15  ;;  %v9554_v33 = vmul.f32 %v9548_v59, %v9535_v28  ;;  %v9552_v36 = vmul.f32 %v9540_v17, %v9533_v35 }
0x1357   : > { %v9572_v52 = vadd.f32 %v9563_v18, %v9553_v51  ;;  %v9573_v37 = vadd.f32 %v9567_v56, %v9554_v33  ;;  %v9571_v14 = vadd.f32 %v9559_v34, %v9552_v36 }
0x1359   : > { %v9575_v63 = vpack.c.bf16 %v9572_v52, %v9572_v52  ;;  %v9576_v54 = vpack.c.bf16 %v9573_v37, %v9573_v37  ;;  %v9574_v45 = vpack.c.bf16 %v9571_v14, %v9571_v14 }
0x135b   : > { %9808 = vmatprep.mubr.bf16.mxu0 %v9575_v63  ;;  %11704 = vmatmul.mubr.bf16.vlgmr.msra.gmra.mrb[0].mxu1 %v9576_v54 }
0x135c   : > { %9809 = vmatmul.mubr.bf16.vlgmr.msra.gmra.mrb[0].mxu0 %v9574_v45 }
0x142e   : > { %v9850_v26 = vpop.f32.mrb[0].mxu1 }
0x142f   : > { %v11508_v0 = vpop.f32.mrb[0].mxu0  ;;  %v11705_v39 = vpop.f32.mrb[1].mxu1 }
0x1430   : > { %v11509_v40 = vpop.f32.mrb[1].mxu0  ;;  %v9853_v23 = vpop.f32.mrb[2].mxu1 }
0x1431   : > { %v11510_v27 = vadd.f32 %v11509_v40, %v11508_v0  ;;  %v11511_v61 = vpop.f32.mrb[2].mxu0  ;;  %v11706_v1 = vpop.f32.mrb[3].mxu1 }
0x1432   : > { %v11512_v22 = vpop.f32.mrb[3].mxu0 }
0x1433   : > { %v9811_v42 = vadd.f32 %v11510_v27, %v11246_v21 }
0x1435   : > { %v9851_v30 = vadd.f32 %v9850_v26, %v9811_v42 }
0x1437   : > { %9856 = vst [vmem:[%s14753_s5] sm:$0xff] %v9851_v30 }
0x1438 PF: > { %s16370_s0 = sld [smem:[#allocation45_spill]]  ;;  %s16371_s19 = sld [smem:[#allocation55_spill]] }
0x1439   : > { %s16372_s10 = sld [smem:[#allocation73_spill]]  ;;  %s9871_s4 = sshll.u32 %s14753_s5, 4  ;;  %s9872_s4 = int_to_ptr.vmem [resolvable:$true] %s9871_s4 }
0x143a   : > { %s9858_s17 = scalar_lea.sflag [#allocation5], %s14672_s13  ;;  %s13735_s11 = scalar_lea.vmem %s9872_s4, 128 }
0x143b   : > { %p13736_p10 = scmp.ne.s32.totalorder %s9872_s4, %s13735_s11  ;;  %s13923_s24 = smov [#allocation30]  }
0x143c   : > { %s13739_s30 = sshll.u32 %s13923_s24, 4  ;;  %s13740_s30 = int_to_ptr.vmem [resolvable:$false] %s13739_s30 }
0x143d   : > { %s13741_s2 = scalar_lea.vmem %s13740_s30, 256  ;;  %p13742_p1 = scmp.lt.s32.totalorder %s9872_s4, %s13740_s30 }
0x143e   : > { %s11272_s9 = sshll.u32 %s16370_s0, 7  ;;  %p16373_p7 = scmp.ne.s32.totalorder %s16371_s19, 0 }
0x143f   : > { %s16154_s8 = scalar_lea.hbm %s16372_s10, %s11272_s9  ;;  %p13743_p3 = scmp.lt.s32.totalorder %s13741_s2, %s13735_s11 }
0x1440   : > { %p13737_p6 = pnand %p13736_p10, %p16373_p7 }
0x1441   : > { %p13744_p2 = por %p13743_p3, %p13742_p1 }
0x1442   : > { %p13738_p9 = pneg %p13737_p6 }
0x1444   : > { %p13745_p4 = pnand %p13744_p2, %p13738_p9 }
0x1446   : > { %13748 = shalt.err (!%p13745_p4)
}
0x1447   : > { %s13749_s13 = scalar_lea.hbm %s16154_s8, 128  ;;  %s13753_s6 = scalar_lea.hbm %s16372_s10, 256 }
0x1448   : > { %p13750_p13 = scmp.ne.s32.totalorder %s16154_s8, %s13749_s13  ;;  %p13754_p11 = scmp.lt.u32.totalorder %s16154_s8, %s16372_s10 }
0x1449   : > { %p13755_p5 = scmp.lt.u32.totalorder %s13753_s6, %s13749_s13  ;;  %p13757_p10 = scmp.lt.u32.totalorder %s13749_s13, %s16154_s8 }
0x144a   : > { %p13751_p8 = pnand %p13750_p13, %p16373_p7 }
0x144b   : > { %p13756_p0 = por %p13755_p5, %p13754_p11 }
0x144c   : > { %p13752_p12 = pneg %p13751_p8 }
0x144d   : > { %p13758_p6 = por %p13757_p10, %p13756_p0 }
0x144f   : > { %p13759_p9 = pnand %p13758_p6, %p13752_p12 }
0x1451   : > { %13762 = shalt.err (!%p13759_p9)
}
0x1452   : > { %11842 = dma.vmem_to_hbm [thread:$0]  (%p16373_p7), %s9872_s4, 128, %s16154_s8, %s9858_s17  }
0x1453 PF: > { %s16374_s21 = sld [smem:[#allocation42_spill]]  ;;  %p11869_p1 = scmp.ge.s32.totalorder %s13889_s1, 2 }
0x1454   : > { %s16375_s0 = sld [smem:[#allocation56_spill]] }
0x1459   : > { %s9883_s9 = sand.u32 1, %s16374_s21  }
0x145a   : > { %p16376_p3 = scmp.ne.s32.totalorder %s16375_s0, 0  ;;  %s9884_s12 = scalar_lea.sflag [#allocation5], %s9883_s9 }
0x145c   : > { %p11858_p2 = pnand %p11869_p1, %p16376_p3 }
0x145e   : > { %13844 = dma.done.wait (!%p11858_p2), %s9884_s12, 128  }
0x145f   : > { %13846 = vsyncadd (!%p11858_p2), %s9884_s12, 4294967168  ;;  %s53_s1 = sadd.s32 1, %s13889_s1   ;;  %s16377_s24 = sld [smem:[#allocation41_spill]] }
0x1460   : > { %p50_p4 = scmp.ge.s32.totalorder %s53_s1, 14   ;;  %s16378_s23 = sld [smem:[#allocation52_spill]] }
0x1461   : > { %s16379_s19 = sld [smem:[#allocation43_spill]]  ;;  %s16380_s8 = sld [smem:[#allocation53_spill]] }
0x1462   : > { %s16381_s30 = sld [smem:[#allocation46_spill]]  ;;  %s16382_s4 = sld [smem:[#allocation48_spill]] }
0x1463   : > { %s16383_s17 = sld [smem:[#allocation50_spill]]  ;;  %s16384_s25 = smov %s13857_s26 }
0x1464   : > { %s16387_s28 = smov %s13869_s29  ;;  %s16389_s0 = smov %s13881_s18 }
0x1465   :  { %52 = sbr.rel (!%p50_p4) target bundleno = 40 (0x28), region = 306 }
0x1466   : > { %s16385_s26 = smov %s16378_s23 }
0x1467   : > { %16386 = sst [smem:[#allocation41_spill]] %s16379_s19  ;;  %s16388_s29 = smov %s16380_s8 }
0x1468   : > { %s16390_s18 = smov %s16382_s4 }
0x1469   : > { %s16391_s19 = smov %s16383_s17 }
0x146c   :  { %9889 = vsyncpa [#allocation4], 1 }
0x146d   :  { %9891 = vsyncpa [#allocation4 + $0x1], 1 }
0x146e   :  { %9892 = vsyncpa [#allocation7], 1 }
0x146f   :  { %9894 = vsyncpa [#allocation7 + $0x1], 1 }
0x1470   :  { %9895 = vsyncpa [#allocation10], 1 }
0x1471   :  { %9897 = vsyncpa [#allocation10 + $0x1], 1 }
0x1472   :  { %9898 = vsyncpa [#allocation13], 1 }
0x1473   :  { %9900 = vsyncpa [#allocation13 + $0x1], 1 }
0x1474   :  { %9901 = vsyncpa [#allocation16], 1 }
0x1475   :  { %9903 = vsyncpa [#allocation16 + $0x1], 1 }
0x1476   :  { %9904 = vsyncpa [#allocation19], 1 }
0x1477   :  { %9906 = vsyncpa [#allocation19 + $0x1], 1 }
0x1478   :  { %9907 = vsyncpa [#allocation22], 1 }
0x1479   :  { %9909 = vsyncpa [#allocation22 + $0x1], 1 }
0x147a   :  { %9910 = vsyncpa [#allocation25], 1 }
0x147b   :  { %9911 = vsyncpa [#allocation28], 1 }
0x147c   :  { %9912 = vsyncpa [#allocation5], 1 }
0x147d   :  { %9914 = vsyncpa [#allocation5 + $0x1], 1 }

</bundles_post_ra>
